<compile_context>
chip_gen: v7x
topology: tpu7x:2x2x1
jax: 0.10.0
libtpu: 0.0.40
codegen_flags: <defaults>
</compile_context>

<pallas_src>
import jax
import jax.numpy as jnp
from jax import lax
from jax.experimental import pallas as pl
from jax.experimental.pallas import tpu as pltpu


# ----------------------------------------------------------------------------
# In-kernel epilogue: Mish (1 exp + 1 approx EUP reciprocal) -> BN affine
# ----------------------------------------------------------------------------
def _mish_bn(y, scale, shift):
    # mish(x) = x * tanh(softplus(x));  with u = exp(-|x|):
    #   x >= 0: (1 + 2u) / (1 + 2u + 2u^2)
    #   x <  0: (u^2 + 2u) / (u^2 + 2u + 2)
    u = jnp.exp(-jnp.abs(y))
    pos = y >= 0.0
    num = jnp.where(pos, 1.0 + 2.0 * u, u * (u + 2.0))
    den = num + jnp.where(pos, 2.0 * u * u, 2.0)
    t = num * pl.reciprocal(den, approx=True)
    return y * t * scale + shift


# ----------------------------------------------------------------------------
# Pallas kernels
# ----------------------------------------------------------------------------
def _make_conv_kernel(has_residual: bool, m_on_lanes: bool):
    """Fused matmul -> Mish -> BN affine (-> + residual) -> bf16 store."""

    def kernel(w_ref, p_ref, scale_ref, shift_ref, *rest):
        if has_residual:
            r_ref, o_ref = rest
        else:
            (o_ref,) = rest

        if m_on_lanes:
            # W[Cout,Kd] @ P[Kd,tm] -> [Cout, tm]  (spatial on the lane axis)
            y = jnp.dot(w_ref[...], p_ref[...], preferred_element_type=jnp.float32)
        else:
            # P[M,Kd] @ W^T[Kd,Cout] -> [M, Cout]  (channels on the lane axis)
            y = jnp.dot(p_ref[...], w_ref[...], preferred_element_type=jnp.float32)

        y = _mish_bn(y, scale_ref[...], shift_ref[...])
        if has_residual:
            y = y + r_ref[...].astype(jnp.float32)
        o_ref[...] = y.astype(o_ref.dtype)

    return kernel


def _make_conv_pool_kernel(pool: str):
    """Conv -> Mish -> BN for each 2x2 pool quadrant, reduced before the store.

    p_ref is [4, Kd, tm] with the leading axis enumerating pool quadrants, so
    the pooled output tile [Cout, tm] is produced lane-dense in one pass.
    """

    def kernel(w_ref, p_ref, scale_ref, shift_ref, o_ref):
        def quad(q):
            y = jnp.dot(w_ref[...], p_ref[q], preferred_element_type=jnp.float32)
            return _mish_bn(y, scale_ref[...], shift_ref[...])

        o = quad(0)
        for q in (1, 2, 3):
            z = quad(q)
            o = jnp.maximum(o, z) if pool == "max" else o + z
        if pool == "avg":
            o = o * 0.25
        o_ref[...] = o.astype(o_ref.dtype)

    return kernel


def _fc_l2_kernel(x_ref, w_ref, b_ref, o_ref):
    y = jnp.dot(x_ref[...], w_ref[...], preferred_element_type=jnp.float32) + b_ref[...]
    inv = lax.rsqrt(jnp.maximum(jnp.sum(y * y, axis=-1, keepdims=True), 1e-24))
    o_ref[...] = y * inv


# ----------------------------------------------------------------------------
# Tiling / cost helpers
# ----------------------------------------------------------------------------
def _pick_tm(M):
    # Single grid step everywhere except the largest layers: those get exactly
    # 2 "parallel" steps (one per v7x TensorCore); single-TC v5e/v6e only pay
    # ~0.35us.  All tiles are KB-scale, so VMEM capacity is never a concern.
    if M >= 2048 and (M // 2) % 128 == 0:
        return M // 2
    return M


def _conv_cost(cout, kd, m):
    return pl.CostEstimate(
        flops=2 * cout * kd * m,
        transcendentals=cout * m,
        bytes_accessed=2 * (cout * kd + kd * m + cout * m) + 8 * cout,
    )


# ----------------------------------------------------------------------------
# XLA-side im2col glue (channel-first "CNHW" layout, bf16 activations)
# ----------------------------------------------------------------------------
def _im2col_cols(x, k, stride, pad):
    """x: [C,N,H,W] -> [C, k*k, N, Ho, Wo]; tap order (kh, kw) matches weight flatten."""
    C, N, H, W = x.shape
    xp = jnp.pad(x, ((0, 0), (0, 0), (pad, pad), (pad, pad)))
    Ho = (H + 2 * pad - k) // stride + 1
    Wo = (W + 2 * pad - k) // stride + 1
    cols = [xp[:, :, i:i + stride * Ho:stride, j:j + stride * Wo:stride]
            for i in range(k) for j in range(k)]
    return jnp.stack(cols, axis=1), (N, Ho, Wo)


# ----------------------------------------------------------------------------
# Layer wrappers
# ----------------------------------------------------------------------------
def conv_mish_bn_pool(x, w, scale, shift, pool):
    """Conv3x3(s1,p1) -> Mish -> BN -> 2x2 pool, fused.  x: [Cin,N,H,W] bf16."""
    Cout, Cin, k, _ = w.shape
    C, N, H, W = x.shape
    pt, _ = _im2col_cols(x, k, 1, 1)                         # [C, kk, N, H, W]
    Hq, Wq = H // 2, W // 2
    Kd, Mq = Cin * k * k, N * Hq * Wq
    # quadrant-major columns: [2(a), 2(b), C, kk, N, Hq, Wq] -> [4, Kd, Mq]
    pt = pt.reshape(C, k * k, N, Hq, 2, Wq, 2)
    pt = jnp.transpose(pt, (4, 6, 0, 1, 2, 3, 5)).reshape(4, Kd, Mq)
    wmat = w.reshape(Cout, Kd).astype(jnp.bfloat16)
    tm = _pick_tm(Mq)

    out = pl.pallas_call(
        _make_conv_pool_kernel(pool),
        out_shape=jax.ShapeDtypeStruct((Cout, Mq), jnp.bfloat16),
        grid=(Mq // tm,),
        in_specs=[pl.BlockSpec((Cout, Kd), lambda i: (0, 0)),
                  pl.BlockSpec((4, Kd, tm), lambda i: (0, 0, i)),
                  pl.BlockSpec((Cout, 1), lambda i: (0, 0)),
                  pl.BlockSpec((Cout, 1), lambda i: (0, 0))],
        out_specs=pl.BlockSpec((Cout, tm), lambda i: (0, i)),
        compiler_params=pltpu.CompilerParams(dimension_semantics=("parallel",)),
        cost_estimate=_conv_cost(Cout, Kd, 4 * Mq),
    )(wmat, pt, scale.reshape(Cout, 1), shift.reshape(Cout, 1))
    return out.reshape(Cout, N, Hq, Wq)


def conv_mish_bn(x, w, scale, shift, residual=None):
    """Conv3x3(s1,p1) -> Mish -> BN (-> +residual).  Lane-dense [Cout, M] output."""
    Cout, Cin, k, _ = w.shape
    C, N, H, W = x.shape
    pt, _ = _im2col_cols(x, k, 1, 1)
    Kd, M = Cin * k * k, N * H * W
    pt = pt.reshape(Kd, M)
    wmat = w.reshape(Cout, Kd).astype(jnp.bfloat16)
    tm = _pick_tm(M)

    in_specs = [pl.BlockSpec((Cout, Kd), lambda i: (0, 0)),
                pl.BlockSpec((Kd, tm), lambda i: (0, i)),
                pl.BlockSpec((Cout, 1), lambda i: (0, 0)),
                pl.BlockSpec((Cout, 1), lambda i: (0, 0))]
    args = [wmat, pt, scale.reshape(Cout, 1), shift.reshape(Cout, 1)]
    if residual is not None:
        in_specs.append(pl.BlockSpec((Cout, tm), lambda i: (0, i)))
        args.append(residual.reshape(Cout, M).astype(jnp.bfloat16))

    out = pl.pallas_call(
        _make_conv_kernel(residual is not None, m_on_lanes=True),
        out_shape=jax.ShapeDtypeStruct((Cout, M), jnp.bfloat16),
        grid=(M // tm,),
        in_specs=in_specs,
        out_specs=pl.BlockSpec((Cout, tm), lambda i: (0, i)),
        compiler_params=pltpu.CompilerParams(dimension_semantics=("parallel",)),
        cost_estimate=_conv_cost(Cout, Kd, M),
    )(*args)
    return out.reshape(Cout, N, H, W)


def tail_conv(x, w, scale, shift, stride=1, pad=1, residual=None):
    """Tiny-M conv (tail): patches[M,Kd] @ W^T[Kd,Cout] so Cout sits on lanes.

    Returns ([M, Cout] bf16 with rows ordered (n, ho, wo), (N, Ho, Wo)).
    """
    Cout, Cin, k, _ = w.shape
    pt, (N, Ho, Wo) = _im2col_cols(x, k, stride, pad)        # [C, kk, N, Ho, Wo]
    Kd, M = Cin * k * k, N * Ho * Wo
    pt = jnp.transpose(pt, (2, 3, 4, 0, 1)).reshape(M, Kd)
    wmat = w.reshape(Cout, Kd).T.astype(jnp.bfloat16)        # [Kd, Cout]

    in_specs = [pl.BlockSpec((Kd, Cout), lambda i: (0, 0)),
                pl.BlockSpec((M, Kd), lambda i: (0, 0)),
                pl.BlockSpec((1, Cout), lambda i: (0, 0)),
                pl.BlockSpec((1, Cout), lambda i: (0, 0))]
    args = [wmat, pt, scale.reshape(1, Cout), shift.reshape(1, Cout)]
    if residual is not None:
        in_specs.append(pl.BlockSpec((M, Cout), lambda i: (0, 0)))
        args.append(residual)

    out = pl.pallas_call(
        _make_conv_kernel(residual is not None, m_on_lanes=False),
        out_shape=jax.ShapeDtypeStruct((M, Cout), jnp.bfloat16),
        grid=(1,),
        in_specs=in_specs,
        out_specs=pl.BlockSpec((M, Cout), lambda i: (0, 0)),
        cost_estimate=_conv_cost(Cout, Kd, M),
    )(*args)
    return out, (N, Ho, Wo)


def _rows_to_cnhw(y, N, Ho, Wo):
    """[M, C] with rows (n, ho, wo) -> [C, N, Ho, Wo]."""
    C = y.shape[1]
    return jnp.transpose(y.reshape(N, Ho, Wo, C), (3, 0, 1, 2))


def fc_l2(flat, w_fc, b_fc):
    """flat: [N, F], w_fc: [Out, F] (PyTorch layout), b_fc: [Out]; fused L2 norm."""
    N, F = flat.shape
    Out = w_fc.shape[0]
    return pl.pallas_call(
        _fc_l2_kernel,
        out_shape=jax.ShapeDtypeStruct((N, Out), jnp.float32),
        grid=(1,),
        in_specs=[pl.BlockSpec((N, F), lambda i: (0, 0)),
                  pl.BlockSpec((F, Out), lambda i: (0, 0)),
                  pl.BlockSpec((1, Out), lambda i: (0, 0))],
        out_specs=pl.BlockSpec((N, Out), lambda i: (0, 0)),
    )(flat.astype(jnp.bfloat16), w_fc.T.astype(jnp.bfloat16),
      b_fc.reshape(1, Out).astype(jnp.float32))


# ----------------------------------------------------------------------------
# Parameters (deterministic, synthetic; BN folded to inference scale/shift)
# ----------------------------------------------------------------------------
def make_conv_params(key, cin, cout, k):
    kw_, k1, k2, k3, k4 = jax.random.split(key, 5)
    w = jax.random.normal(kw_, (cout, cin, k, k), jnp.float32) / jnp.sqrt(cin * k * k)
    gamma = 1.0 + 0.1 * jax.random.normal(k1, (cout,), jnp.float32)
    beta = 0.1 * jax.random.normal(k2, (cout,), jnp.float32)
    mean = 0.1 * jax.random.normal(k3, (cout,), jnp.float32)
    var = 1.0 + 0.1 * jax.random.uniform(k4, (cout,), jnp.float32)
    eps = 1e-5
    scale = gamma / jnp.sqrt(var + eps)
    shift = beta - mean * scale
    return w, scale, shift


# ----------------------------------------------------------------------------
# Full forward pass (matches VisualEncoderTinyModel.forward)
# ----------------------------------------------------------------------------
@jax.jit
def forward(x_nchw, params):
    x = jnp.transpose(x_nchw, (1, 0, 2, 3)).astype(jnp.bfloat16)   # NCHW -> CNHW bf16

    # block1 (conv+Mish+BN+maxpool fused) + skipblock
    x = conv_mish_bn_pool(x, *params["b1"], pool="max")
    h = conv_mish_bn(x, *params["s1a"])
    x = conv_mish_bn(h, *params["s1b"], residual=x)

    # block2 + skipblock2
    x = conv_mish_bn_pool(x, *params["b2"], pool="max")
    h = conv_mish_bn(x, *params["s2a"])
    x = conv_mish_bn(h, *params["s2b"], residual=x)

    # block3 (avg pool) + skipblock3
    x = conv_mish_bn_pool(x, *params["b3"], pool="avg")
    h = conv_mish_bn(x, *params["s3a"])
    x = conv_mish_bn(h, *params["s3b"], residual=x)

    # block4 (k5, s3, p1) + skipblock4 — M = N*2*2 = 8, Cout=64 on the lane axis
    y4, (N, Ho, Wo) = tail_conv(x, *params["b4"], stride=3, pad=1)
    h, _ = tail_conv(_rows_to_cnhw(y4, N, Ho, Wo), *params["s4a"])
    y, _ = tail_conv(_rows_to_cnhw(h, N, Ho, Wo), *params["s4b"], residual=y4)

    # flatten in PyTorch NCHW order: [N, C*Ho*Wo] = [N, 256]
    C = y.shape[1]
    flat = jnp.transpose(y.reshape(N, Ho * Wo, C), (0, 2, 1)).reshape(N, C * Ho * Wo)

    w_fc, b_fc = params["fc"]
    return fc_l2(flat, w_fc, b_fc)


if __name__ == "__main__":
    key = jax.random.PRNGKey(0)
    keys = jax.random.split(key, 16)
    params = {
        "b1":  make_conv_params(keys[0], 3, 8, 3),
        "s1a": make_conv_params(keys[1], 8, 8, 3),
        "s1b": make_conv_params(keys[2], 8, 8, 3),
        "b2":  make_conv_params(keys[3], 8, 16, 3),
        "s2a": make_conv_params(keys[4], 16, 16, 3),
        "s2b": make_conv_params(keys[5], 16, 16, 3),
        "b3":  make_conv_params(keys[6], 16, 32, 3),
        "s3a": make_conv_params(keys[7], 32, 32, 3),
        "s3b": make_conv_params(keys[8], 32, 32, 3),
        "b4":  make_conv_params(keys[9], 32, 64, 5),
        "s4a": make_conv_params(keys[10], 64, 64, 3),
        "s4b": make_conv_params(keys[11], 64, 64, 3),
        "fc": (jax.random.normal(keys[12], (64, 256), jnp.float32) / 16.0,
               0.1 * jax.random.normal(keys[13], (64,), jnp.float32)),
    }

    # 64x64 input so block4 output is 64ch x 2x2 = 256 features for fc(256, 64).
    x = jax.random.normal(keys[14], (2, 3, 64, 64), jnp.float32)

    out = forward(x, params)
    jax.block_until_ready(out)
    assert out.shape == (2, 64), out.shape
    assert bool(jnp.all(jnp.isfinite(out)))
    print("KERNEL_OK")
</pallas_src>

<mosaic_0001>
module attributes {stable_mosaic.version = 11 : i64} {
  func.func @kernel(%arg0: i32, %arg1: memref<8x27xbf16, #tpu.memory_space<vmem>>, %arg2: memref<4x27x1024xbf16, #tpu.memory_space<vmem>>, %arg3: memref<8x1xf32, #tpu.memory_space<vmem>>, %arg4: memref<8x1xf32, #tpu.memory_space<vmem>>, %arg5: memref<8x1024xbf16, #tpu.memory_space<vmem>>) attributes {dimension_semantics = [#tpu.dimension_semantics<parallel>], iteration_bounds = array<i64: 2>, scalar_prefetch = 0 : i64, scratch_operands = 0 : i64, tpu.core_type = #tpu.core_type<tc>, window_params = [{pipeline_mode = #tpu.pipeline_mode<synchronous>, transform_indices = @transform_0, window_bounds = array<i64: 8, 27>}, {transform_indices = @transform_1, window_bounds = array<i64: 4, 27, 1024>}, {pipeline_mode = #tpu.pipeline_mode<synchronous>, transform_indices = @transform_2, window_bounds = array<i64: 8, 1>}, {pipeline_mode = #tpu.pipeline_mode<synchronous>, transform_indices = @transform_3, window_bounds = array<i64: 8, 1>}, {transform_indices = @transform_4, window_bounds = array<i64: 8, 1024>}]} {
    %c0 = arith.constant 0 : index
    %c0_0 = arith.constant 0 : index
    %0 = vector.load %arg1[%c0, %c0_0] : memref<8x27xbf16, #tpu.memory_space<vmem>>, vector<8x27xbf16>
    %c0_1 = arith.constant 0 : index
    %c0_2 = arith.constant 0 : index
    %c0_3 = arith.constant 0 : index
    %1 = vector.load %arg2[%c0_1, %c0_2, %c0_3] : memref<4x27x1024xbf16, #tpu.memory_space<vmem>>, vector<1x27x1024xbf16>
    %2 = vector.shape_cast %1 : vector<1x27x1024xbf16> to vector<27x1024xbf16>
    %cst = arith.constant dense<0.000000e+00> : vector<8x1024xf32>
    %3 = tpu.matmul %0, %2, %cst {dimension_numbers = #tpu.dot_dimension_numbers<[1], [0], [0], [1], [0, 0, 1, 1], [], []>} : vector<8x27xbf16>, vector<27x1024xbf16>, vector<8x1024xf32> -> vector<8x1024xf32>
    %c0_4 = arith.constant 0 : index
    %c0_5 = arith.constant 0 : index
    %4 = vector.load %arg3[%c0_4, %c0_5] : memref<8x1xf32, #tpu.memory_space<vmem>>, vector<8x1xf32>
    %c0_6 = arith.constant 0 : index
    %c0_7 = arith.constant 0 : index
    %5 = vector.load %arg4[%c0_6, %c0_7] : memref<8x1xf32, #tpu.memory_space<vmem>>, vector<8x1xf32>
    %6 = math.absf %3 : vector<8x1024xf32>
    %cst_8 = arith.constant 0.000000e+00 : f32
    %7 = vector.broadcast %cst_8 : f32 to vector<8x1024xf32>
    %8 = arith.subf %7, %6 : vector<8x1024xf32>
    %9 = math.exp %8 : vector<8x1024xf32>
    %cst_9 = arith.constant 0.000000e+00 : f32
    %10 = vector.broadcast %cst_9 : f32 to vector<8x1024xf32>
    %11 = arith.cmpf oge, %3, %10 : vector<8x1024xf32>
    %cst_10 = arith.constant 2.000000e+00 : f32
    %12 = vector.broadcast %cst_10 : f32 to vector<8x1024xf32>
    %13 = arith.mulf %12, %9 : vector<8x1024xf32>
    %cst_11 = arith.constant 1.000000e+00 : f32
    %14 = vector.broadcast %cst_11 : f32 to vector<8x1024xf32>
    %15 = arith.addf %14, %13 : vector<8x1024xf32>
    %cst_12 = arith.constant 2.000000e+00 : f32
    %16 = vector.broadcast %cst_12 : f32 to vector<8x1024xf32>
    %17 = arith.addf %9, %16 : vector<8x1024xf32>
    %18 = arith.mulf %9, %17 : vector<8x1024xf32>
    %19 = arith.select %11, %15, %18 : vector<8x1024xi1>, vector<8x1024xf32>
    %cst_13 = arith.constant 2.000000e+00 : f32
    %20 = vector.broadcast %cst_13 : f32 to vector<8x1024xf32>
    %21 = arith.mulf %20, %9 : vector<8x1024xf32>
    %22 = arith.mulf %21, %9 : vector<8x1024xf32>
    %cst_14 = arith.constant 2.000000e+00 : f32
    %23 = vector.broadcast %cst_14 : f32 to vector<8x1024xf32>
    %24 = arith.select %11, %22, %23 : vector<8x1024xi1>, vector<8x1024xf32>
    %25 = arith.addf %19, %24 : vector<8x1024xf32>
    %26 = tpu.reciprocal %25 {approx = true} : vector<8x1024xf32> -> vector<8x1024xf32>
    %27 = arith.mulf %19, %26 : vector<8x1024xf32>
    %28 = arith.mulf %3, %27 : vector<8x1024xf32>
    %29 = vector.broadcast %4 : vector<8x1xf32> to vector<8x1024xf32>
    %30 = arith.mulf %28, %29 : vector<8x1024xf32>
    %31 = vector.broadcast %5 : vector<8x1xf32> to vector<8x1024xf32>
    %32 = arith.addf %30, %31 : vector<8x1024xf32>
    %c0_15 = arith.constant 0 : index
    %c0_16 = arith.constant 0 : index
    %33 = vector.load %arg1[%c0_15, %c0_16] : memref<8x27xbf16, #tpu.memory_space<vmem>>, vector<8x27xbf16>
    %c1 = arith.constant 1 : index
    %c0_17 = arith.constant 0 : index
    %c0_18 = arith.constant 0 : index
    %34 = vector.load %arg2[%c1, %c0_17, %c0_18] : memref<4x27x1024xbf16, #tpu.memory_space<vmem>>, vector<1x27x1024xbf16>
    %35 = vector.shape_cast %34 : vector<1x27x1024xbf16> to vector<27x1024xbf16>
    %cst_19 = arith.constant dense<0.000000e+00> : vector<8x1024xf32>
    %36 = tpu.matmul %33, %35, %cst_19 {dimension_numbers = #tpu.dot_dimension_numbers<[1], [0], [0], [1], [0, 0, 1, 1], [], []>} : vector<8x27xbf16>, vector<27x1024xbf16>, vector<8x1024xf32> -> vector<8x1024xf32>
    %c0_20 = arith.constant 0 : index
    %c0_21 = arith.constant 0 : index
    %37 = vector.load %arg3[%c0_20, %c0_21] : memref<8x1xf32, #tpu.memory_space<vmem>>, vector<8x1xf32>
    %c0_22 = arith.constant 0 : index
    %c0_23 = arith.constant 0 : index
    %38 = vector.load %arg4[%c0_22, %c0_23] : memref<8x1xf32, #tpu.memory_space<vmem>>, vector<8x1xf32>
    %39 = math.absf %36 : vector<8x1024xf32>
    %cst_24 = arith.constant 0.000000e+00 : f32
    %40 = vector.broadcast %cst_24 : f32 to vector<8x1024xf32>
    %41 = arith.subf %40, %39 : vector<8x1024xf32>
    %42 = math.exp %41 : vector<8x1024xf32>
    %cst_25 = arith.constant 0.000000e+00 : f32
    %43 = vector.broadcast %cst_25 : f32 to vector<8x1024xf32>
    %44 = arith.cmpf oge, %36, %43 : vector<8x1024xf32>
    %cst_26 = arith.constant 2.000000e+00 : f32
    %45 = vector.broadcast %cst_26 : f32 to vector<8x1024xf32>
    %46 = arith.mulf %45, %42 : vector<8x1024xf32>
    %cst_27 = arith.constant 1.000000e+00 : f32
    %47 = vector.broadcast %cst_27 : f32 to vector<8x1024xf32>
    %48 = arith.addf %47, %46 : vector<8x1024xf32>
    %cst_28 = arith.constant 2.000000e+00 : f32
    %49 = vector.broadcast %cst_28 : f32 to vector<8x1024xf32>
    %50 = arith.addf %42, %49 : vector<8x1024xf32>
    %51 = arith.mulf %42, %50 : vector<8x1024xf32>
    %52 = arith.select %44, %48, %51 : vector<8x1024xi1>, vector<8x1024xf32>
    %cst_29 = arith.constant 2.000000e+00 : f32
    %53 = vector.broadcast %cst_29 : f32 to vector<8x1024xf32>
    %54 = arith.mulf %53, %42 : vector<8x1024xf32>
    %55 = arith.mulf %54, %42 : vector<8x1024xf32>
    %cst_30 = arith.constant 2.000000e+00 : f32
    %56 = vector.broadcast %cst_30 : f32 to vector<8x1024xf32>
    %57 = arith.select %44, %55, %56 : vector<8x1024xi1>, vector<8x1024xf32>
    %58 = arith.addf %52, %57 : vector<8x1024xf32>
    %59 = tpu.reciprocal %58 {approx = true} : vector<8x1024xf32> -> vector<8x1024xf32>
    %60 = arith.mulf %52, %59 : vector<8x1024xf32>
    %61 = arith.mulf %36, %60 : vector<8x1024xf32>
    %62 = vector.broadcast %37 : vector<8x1xf32> to vector<8x1024xf32>
    %63 = arith.mulf %61, %62 : vector<8x1024xf32>
    %64 = vector.broadcast %38 : vector<8x1xf32> to vector<8x1024xf32>
    %65 = arith.addf %63, %64 : vector<8x1024xf32>
    %66 = arith.maximumf %32, %65 : vector<8x1024xf32>
    %c0_31 = arith.constant 0 : index
    %c0_32 = arith.constant 0 : index
    %67 = vector.load %arg1[%c0_31, %c0_32] : memref<8x27xbf16, #tpu.memory_space<vmem>>, vector<8x27xbf16>
    %c2 = arith.constant 2 : index
    %c0_33 = arith.constant 0 : index
    %c0_34 = arith.constant 0 : index
    %68 = vector.load %arg2[%c2, %c0_33, %c0_34] : memref<4x27x1024xbf16, #tpu.memory_space<vmem>>, vector<1x27x1024xbf16>
    %69 = vector.shape_cast %68 : vector<1x27x1024xbf16> to vector<27x1024xbf16>
    %cst_35 = arith.constant dense<0.000000e+00> : vector<8x1024xf32>
    %70 = tpu.matmul %67, %69, %cst_35 {dimension_numbers = #tpu.dot_dimension_numbers<[1], [0], [0], [1], [0, 0, 1, 1], [], []>} : vector<8x27xbf16>, vector<27x1024xbf16>, vector<8x1024xf32> -> vector<8x1024xf32>
    %c0_36 = arith.constant 0 : index
    %c0_37 = arith.constant 0 : index
    %71 = vector.load %arg3[%c0_36, %c0_37] : memref<8x1xf32, #tpu.memory_space<vmem>>, vector<8x1xf32>
    %c0_38 = arith.constant 0 : index
    %c0_39 = arith.constant 0 : index
    %72 = vector.load %arg4[%c0_38, %c0_39] : memref<8x1xf32, #tpu.memory_space<vmem>>, vector<8x1xf32>
    %73 = math.absf %70 : vector<8x1024xf32>
    %cst_40 = arith.constant 0.000000e+00 : f32
    %74 = vector.broadcast %cst_40 : f32 to vector<8x1024xf32>
    %75 = arith.subf %74, %73 : vector<8x1024xf32>
    %76 = math.exp %75 : vector<8x1024xf32>
    %cst_41 = arith.constant 0.000000e+00 : f32
    %77 = vector.broadcast %cst_41 : f32 to vector<8x1024xf32>
    %78 = arith.cmpf oge, %70, %77 : vector<8x1024xf32>
    %cst_42 = arith.constant 2.000000e+00 : f32
    %79 = vector.broadcast %cst_42 : f32 to vector<8x1024xf32>
    %80 = arith.mulf %79, %76 : vector<8x1024xf32>
    %cst_43 = arith.constant 1.000000e+00 : f32
    %81 = vector.broadcast %cst_43 : f32 to vector<8x1024xf32>
    %82 = arith.addf %81, %80 : vector<8x1024xf32>
    %cst_44 = arith.constant 2.000000e+00 : f32
    %83 = vector.broadcast %cst_44 : f32 to vector<8x1024xf32>
    %84 = arith.addf %76, %83 : vector<8x1024xf32>
    %85 = arith.mulf %76, %84 : vector<8x1024xf32>
    %86 = arith.select %78, %82, %85 : vector<8x1024xi1>, vector<8x1024xf32>
    %cst_45 = arith.constant 2.000000e+00 : f32
    %87 = vector.broadcast %cst_45 : f32 to vector<8x1024xf32>
    %88 = arith.mulf %87, %76 : vector<8x1024xf32>
    %89 = arith.mulf %88, %76 : vector<8x1024xf32>
    %cst_46 = arith.constant 2.000000e+00 : f32
    %90 = vector.broadcast %cst_46 : f32 to vector<8x1024xf32>
    %91 = arith.select %78, %89, %90 : vector<8x1024xi1>, vector<8x1024xf32>
    %92 = arith.addf %86, %91 : vector<8x1024xf32>
    %93 = tpu.reciprocal %92 {approx = true} : vector<8x1024xf32> -> vector<8x1024xf32>
    %94 = arith.mulf %86, %93 : vector<8x1024xf32>
    %95 = arith.mulf %70, %94 : vector<8x1024xf32>
    %96 = vector.broadcast %71 : vector<8x1xf32> to vector<8x1024xf32>
    %97 = arith.mulf %95, %96 : vector<8x1024xf32>
    %98 = vector.broadcast %72 : vector<8x1xf32> to vector<8x1024xf32>
    %99 = arith.addf %97, %98 : vector<8x1024xf32>
    %100 = arith.maximumf %66, %99 : vector<8x1024xf32>
    %c0_47 = arith.constant 0 : index
    %c0_48 = arith.constant 0 : index
    %101 = vector.load %arg1[%c0_47, %c0_48] : memref<8x27xbf16, #tpu.memory_space<vmem>>, vector<8x27xbf16>
    %c3 = arith.constant 3 : index
    %c0_49 = arith.constant 0 : index
    %c0_50 = arith.constant 0 : index
    %102 = vector.load %arg2[%c3, %c0_49, %c0_50] : memref<4x27x1024xbf16, #tpu.memory_space<vmem>>, vector<1x27x1024xbf16>
    %103 = vector.shape_cast %102 : vector<1x27x1024xbf16> to vector<27x1024xbf16>
    %cst_51 = arith.constant dense<0.000000e+00> : vector<8x1024xf32>
    %104 = tpu.matmul %101, %103, %cst_51 {dimension_numbers = #tpu.dot_dimension_numbers<[1], [0], [0], [1], [0, 0, 1, 1], [], []>} : vector<8x27xbf16>, vector<27x1024xbf16>, vector<8x1024xf32> -> vector<8x1024xf32>
    %c0_52 = arith.constant 0 : index
    %c0_53 = arith.constant 0 : index
    %105 = vector.load %arg3[%c0_52, %c0_53] : memref<8x1xf32, #tpu.memory_space<vmem>>, vector<8x1xf32>
    %c0_54 = arith.constant 0 : index
    %c0_55 = arith.constant 0 : index
    %106 = vector.load %arg4[%c0_54, %c0_55] : memref<8x1xf32, #tpu.memory_space<vmem>>, vector<8x1xf32>
    %107 = math.absf %104 : vector<8x1024xf32>
    %cst_56 = arith.constant 0.000000e+00 : f32
    %108 = vector.broadcast %cst_56 : f32 to vector<8x1024xf32>
    %109 = arith.subf %108, %107 : vector<8x1024xf32>
    %110 = math.exp %109 : vector<8x1024xf32>
    %cst_57 = arith.constant 0.000000e+00 : f32
    %111 = vector.broadcast %cst_57 : f32 to vector<8x1024xf32>
    %112 = arith.cmpf oge, %104, %111 : vector<8x1024xf32>
    %cst_58 = arith.constant 2.000000e+00 : f32
    %113 = vector.broadcast %cst_58 : f32 to vector<8x1024xf32>
    %114 = arith.mulf %113, %110 : vector<8x1024xf32>
    %cst_59 = arith.constant 1.000000e+00 : f32
    %115 = vector.broadcast %cst_59 : f32 to vector<8x1024xf32>
    %116 = arith.addf %115, %114 : vector<8x1024xf32>
    %cst_60 = arith.constant 2.000000e+00 : f32
    %117 = vector.broadcast %cst_60 : f32 to vector<8x1024xf32>
    %118 = arith.addf %110, %117 : vector<8x1024xf32>
    %119 = arith.mulf %110, %118 : vector<8x1024xf32>
    %120 = arith.select %112, %116, %119 : vector<8x1024xi1>, vector<8x1024xf32>
    %cst_61 = arith.constant 2.000000e+00 : f32
    %121 = vector.broadcast %cst_61 : f32 to vector<8x1024xf32>
    %122 = arith.mulf %121, %110 : vector<8x1024xf32>
    %123 = arith.mulf %122, %110 : vector<8x1024xf32>
    %cst_62 = arith.constant 2.000000e+00 : f32
    %124 = vector.broadcast %cst_62 : f32 to vector<8x1024xf32>
    %125 = arith.select %112, %123, %124 : vector<8x1024xi1>, vector<8x1024xf32>
    %126 = arith.addf %120, %125 : vector<8x1024xf32>
    %127 = tpu.reciprocal %126 {approx = true} : vector<8x1024xf32> -> vector<8x1024xf32>
    %128 = arith.mulf %120, %127 : vector<8x1024xf32>
    %129 = arith.mulf %104, %128 : vector<8x1024xf32>
    %130 = vector.broadcast %105 : vector<8x1xf32> to vector<8x1024xf32>
    %131 = arith.mulf %129, %130 : vector<8x1024xf32>
    %132 = vector.broadcast %106 : vector<8x1xf32> to vector<8x1024xf32>
    %133 = arith.addf %131, %132 : vector<8x1024xf32>
    %134 = arith.maximumf %100, %133 : vector<8x1024xf32>
    %135 = arith.truncf %134 : vector<8x1024xf32> to vector<8x1024xbf16>
    %c0_63 = arith.constant 0 : index
    %c0_64 = arith.constant 0 : index
    %136 = vector.load %arg5[%c0_63, %c0_64] : memref<8x1024xbf16, #tpu.memory_space<vmem>>, vector<8x1024xbf16>
    tpu.vector_store %arg5[%c0_63, %c0_64], %135 {strides = array<i32>} : memref<8x1024xbf16, #tpu.memory_space<vmem>>, vector<8x1024xbf16>,
    return
  }
  func.func @transform_0(%arg0: i32) -> (i32, i32) {
    %c0_i32 = arith.constant 0 : i32
    %c0_i32_0 = arith.constant 0 : i32
    %c0_i32_1 = arith.constant 0 : i32
    return %c0_i32, %c0_i32_0 : i32, i32
  }
  func.func @transform_1(%arg0: i32) -> (i32, i32, i32) {
    %c0_i32 = arith.constant 0 : i32
    %c0_i32_0 = arith.constant 0 : i32
    %c0_i32_1 = arith.constant 0 : i32
    return %c0_i32, %c0_i32_0, %arg0 : i32, i32, i32
  }
  func.func @transform_2(%arg0: i32) -> (i32, i32) {
    %c0_i32 = arith.constant 0 : i32
    %c0_i32_0 = arith.constant 0 : i32
    %c0_i32_1 = arith.constant 0 : i32
    return %c0_i32, %c0_i32_0 : i32, i32
  }
  func.func @transform_3(%arg0: i32) -> (i32, i32) {
    %c0_i32 = arith.constant 0 : i32
    %c0_i32_0 = arith.constant 0 : i32
    %c0_i32_1 = arith.constant 0 : i32
    return %c0_i32, %c0_i32_0 : i32, i32
  }
  func.func @transform_4(%arg0: i32) -> (i32, i32) {
    %c0_i32 = arith.constant 0 : i32
    %c0_i32_0 = arith.constant 0 : i32
    return %c0_i32, %arg0 : i32, i32
  }
}

module attributes {stable_mosaic.version = 11 : i64} {
  func.func @kernel(%arg0: i32, %arg1: memref<8x72xbf16, #tpu.memory_space<vmem>>, %arg2: memref<72x1024xbf16, #tpu.memory_space<vmem>>, %arg3: memref<8x1xf32, #tpu.memory_space<vmem>>, %arg4: memref<8x1xf32, #tpu.memory_space<vmem>>, %arg5: memref<8x1024xbf16, #tpu.memory_space<vmem>>) attributes {dimension_semantics = [#tpu.dimension_semantics<parallel>], iteration_bounds = array<i64: 2>, scalar_prefetch = 0 : i64, scratch_operands = 0 : i64, tpu.core_type = #tpu.core_type<tc>, window_params = [{pipeline_mode = #tpu.pipeline_mode<synchronous>, transform_indices = @transform_0, window_bounds = array<i64: 8, 72>}, {transform_indices = @transform_1, window_bounds = array<i64: 72, 1024>}, {pipeline_mode = #tpu.pipeline_mode<synchronous>, transform_indices = @transform_2, window_bounds = array<i64: 8, 1>}, {pipeline_mode = #tpu.pipeline_mode<synchronous>, transform_indices = @transform_3, window_bounds = array<i64: 8, 1>}, {transform_indices = @transform_4, window_bounds = array<i64: 8, 1024>}]} {
    %c0 = arith.constant 0 : index
    %c0_0 = arith.constant 0 : index
    %0 = vector.load %arg1[%c0, %c0_0] : memref<8x72xbf16, #tpu.memory_space<vmem>>, vector<8x72xbf16>
    %c0_1 = arith.constant 0 : index
    %c0_2 = arith.constant 0 : index
    %1 = vector.load %arg2[%c0_1, %c0_2] : memref<72x1024xbf16, #tpu.memory_space<vmem>>, vector<72x1024xbf16>
    %cst = arith.constant dense<0.000000e+00> : vector<8x1024xf32>
    %2 = tpu.matmul %0, %1, %cst {dimension_numbers = #tpu.dot_dimension_numbers<[1], [0], [0], [1], [0, 0, 1, 1], [], []>} : vector<8x72xbf16>, vector<72x1024xbf16>, vector<8x1024xf32> -> vector<8x1024xf32>
    %c0_3 = arith.constant 0 : index
    %c0_4 = arith.constant 0 : index
    %3 = vector.load %arg3[%c0_3, %c0_4] : memref<8x1xf32, #tpu.memory_space<vmem>>, vector<8x1xf32>
    %c0_5 = arith.constant 0 : index
    %c0_6 = arith.constant 0 : index
    %4 = vector.load %arg4[%c0_5, %c0_6] : memref<8x1xf32, #tpu.memory_space<vmem>>, vector<8x1xf32>
    %5 = math.absf %2 : vector<8x1024xf32>
    %cst_7 = arith.constant 0.000000e+00 : f32
    %6 = vector.broadcast %cst_7 : f32 to vector<8x1024xf32>
    %7 = arith.subf %6, %5 : vector<8x1024xf32>
    %8 = math.exp %7 : vector<8x1024xf32>
    %cst_8 = arith.constant 0.000000e+00 : f32
    %9 = vector.broadcast %cst_8 : f32 to vector<8x1024xf32>
    %10 = arith.cmpf oge, %2, %9 : vector<8x1024xf32>
    %cst_9 = arith.constant 2.000000e+00 : f32
    %11 = vector.broadcast %cst_9 : f32 to vector<8x1024xf32>
    %12 = arith.mulf %11, %8 : vector<8x1024xf32>
    %cst_10 = arith.constant 1.000000e+00 : f32
    %13 = vector.broadcast %cst_10 : f32 to vector<8x1024xf32>
    %14 = arith.addf %13, %12 : vector<8x1024xf32>
    %cst_11 = arith.constant 2.000000e+00 : f32
    %15 = vector.broadcast %cst_11 : f32 to vector<8x1024xf32>
    %16 = arith.addf %8, %15 : vector<8x1024xf32>
    %17 = arith.mulf %8, %16 : vector<8x1024xf32>
    %18 = arith.select %10, %14, %17 : vector<8x1024xi1>, vector<8x1024xf32>
    %cst_12 = arith.constant 2.000000e+00 : f32
    %19 = vector.broadcast %cst_12 : f32 to vector<8x1024xf32>
    %20 = arith.mulf %19, %8 : vector<8x1024xf32>
    %21 = arith.mulf %20, %8 : vector<8x1024xf32>
    %cst_13 = arith.constant 2.000000e+00 : f32
    %22 = vector.broadcast %cst_13 : f32 to vector<8x1024xf32>
    %23 = arith.select %10, %21, %22 : vector<8x1024xi1>, vector<8x1024xf32>
    %24 = arith.addf %18, %23 : vector<8x1024xf32>
    %25 = tpu.reciprocal %24 {approx = true} : vector<8x1024xf32> -> vector<8x1024xf32>
    %26 = arith.mulf %18, %25 : vector<8x1024xf32>
    %27 = arith.mulf %2, %26 : vector<8x1024xf32>
    %28 = vector.broadcast %3 : vector<8x1xf32> to vector<8x1024xf32>
    %29 = arith.mulf %27, %28 : vector<8x1024xf32>
    %30 = vector.broadcast %4 : vector<8x1xf32> to vector<8x1024xf32>
    %31 = arith.addf %29, %30 : vector<8x1024xf32>
    %32 = arith.truncf %31 : vector<8x1024xf32> to vector<8x1024xbf16>
    %c0_14 = arith.constant 0 : index
    %c0_15 = arith.constant 0 : index
    %33 = vector.load %arg5[%c0_14, %c0_15] : memref<8x1024xbf16, #tpu.memory_space<vmem>>, vector<8x1024xbf16>
    tpu.vector_store %arg5[%c0_14, %c0_15], %32 {strides = array<i32>} : memref<8x1024xbf16, #tpu.memory_space<vmem>>, vector<8x1024xbf16>,
    return
  }
  func.func @transform_0(%arg0: i32) -> (i32, i32) {
    %c0_i32 = arith.constant 0 : i32
    %c0_i32_0 = arith.constant 0 : i32
    %c0_i32_1 = arith.constant 0 : i32
    return %c0_i32, %c0_i32_0 : i32, i32
  }
  func.func @transform_1(%arg0: i32) -> (i32, i32) {
    %c0_i32 = arith.constant 0 : i32
    %c0_i32_0 = arith.constant 0 : i32
    return %c0_i32, %arg0 : i32, i32
  }
  func.func @transform_2(%arg0: i32) -> (i32, i32) {
    %c0_i32 = arith.constant 0 : i32
    %c0_i32_0 = arith.constant 0 : i32
    %c0_i32_1 = arith.constant 0 : i32
    return %c0_i32, %c0_i32_0 : i32, i32
  }
  func.func @transform_3(%arg0: i32) -> (i32, i32) {
    %c0_i32 = arith.constant 0 : i32
    %c0_i32_0 = arith.constant 0 : i32
    %c0_i32_1 = arith.constant 0 : i32
    return %c0_i32, %c0_i32_0 : i32, i32
  }
  func.func @transform_4(%arg0: i32) -> (i32, i32) {
    %c0_i32 = arith.constant 0 : i32
    %c0_i32_0 = arith.constant 0 : i32
    return %c0_i32, %arg0 : i32, i32
  }
}

module attributes {stable_mosaic.version = 11 : i64} {
  func.func @kernel(%arg0: i32, %arg1: memref<8x72xbf16, #tpu.memory_space<vmem>>, %arg2: memref<72x1024xbf16, #tpu.memory_space<vmem>>, %arg3: memref<8x1xf32, #tpu.memory_space<vmem>>, %arg4: memref<8x1xf32, #tpu.memory_space<vmem>>, %arg5: memref<8x1024xbf16, #tpu.memory_space<vmem>>, %arg6: memref<8x1024xbf16, #tpu.memory_space<vmem>>) attributes {dimension_semantics = [#tpu.dimension_semantics<parallel>], iteration_bounds = array<i64: 2>, scalar_prefetch = 0 : i64, scratch_operands = 0 : i64, tpu.core_type = #tpu.core_type<tc>, window_params = [{pipeline_mode = #tpu.pipeline_mode<synchronous>, transform_indices = @transform_0, window_bounds = array<i64: 8, 72>}, {transform_indices = @transform_1, window_bounds = array<i64: 72, 1024>}, {pipeline_mode = #tpu.pipeline_mode<synchronous>, transform_indices = @transform_2, window_bounds = array<i64: 8, 1>}, {pipeline_mode = #tpu.pipeline_mode<synchronous>, transform_indices = @transform_3, window_bounds = array<i64: 8, 1>}, {transform_indices = @transform_4, window_bounds = array<i64: 8, 1024>}, {transform_indices = @transform_5, window_bounds = array<i64: 8, 1024>}]} {
    %c0 = arith.constant 0 : index
    %c0_0 = arith.constant 0 : index
    %0 = vector.load %arg1[%c0, %c0_0] : memref<8x72xbf16, #tpu.memory_space<vmem>>, vector<8x72xbf16>
    %c0_1 = arith.constant 0 : index
    %c0_2 = arith.constant 0 : index
    %1 = vector.load %arg2[%c0_1, %c0_2] : memref<72x1024xbf16, #tpu.memory_space<vmem>>, vector<72x1024xbf16>
    %cst = arith.constant dense<0.000000e+00> : vector<8x1024xf32>
    %2 = tpu.matmul %0, %1, %cst {dimension_numbers = #tpu.dot_dimension_numbers<[1], [0], [0], [1], [0, 0, 1, 1], [], []>} : vector<8x72xbf16>, vector<72x1024xbf16>, vector<8x1024xf32> -> vector<8x1024xf32>
    %c0_3 = arith.constant 0 : index
    %c0_4 = arith.constant 0 : index
    %3 = vector.load %arg3[%c0_3, %c0_4] : memref<8x1xf32, #tpu.memory_space<vmem>>, vector<8x1xf32>
    %c0_5 = arith.constant 0 : index
    %c0_6 = arith.constant 0 : index
    %4 = vector.load %arg4[%c0_5, %c0_6] : memref<8x1xf32, #tpu.memory_space<vmem>>, vector<8x1xf32>
    %5 = math.absf %2 : vector<8x1024xf32>
    %cst_7 = arith.constant 0.000000e+00 : f32
    %6 = vector.broadcast %cst_7 : f32 to vector<8x1024xf32>
    %7 = arith.subf %6, %5 : vector<8x1024xf32>
    %8 = math.exp %7 : vector<8x1024xf32>
    %cst_8 = arith.constant 0.000000e+00 : f32
    %9 = vector.broadcast %cst_8 : f32 to vector<8x1024xf32>
    %10 = arith.cmpf oge, %2, %9 : vector<8x1024xf32>
    %cst_9 = arith.constant 2.000000e+00 : f32
    %11 = vector.broadcast %cst_9 : f32 to vector<8x1024xf32>
    %12 = arith.mulf %11, %8 : vector<8x1024xf32>
    %cst_10 = arith.constant 1.000000e+00 : f32
    %13 = vector.broadcast %cst_10 : f32 to vector<8x1024xf32>
    %14 = arith.addf %13, %12 : vector<8x1024xf32>
    %cst_11 = arith.constant 2.000000e+00 : f32
    %15 = vector.broadcast %cst_11 : f32 to vector<8x1024xf32>
    %16 = arith.addf %8, %15 : vector<8x1024xf32>
    %17 = arith.mulf %8, %16 : vector<8x1024xf32>
    %18 = arith.select %10, %14, %17 : vector<8x1024xi1>, vector<8x1024xf32>
    %cst_12 = arith.constant 2.000000e+00 : f32
    %19 = vector.broadcast %cst_12 : f32 to vector<8x1024xf32>
    %20 = arith.mulf %19, %8 : vector<8x1024xf32>
    %21 = arith.mulf %20, %8 : vector<8x1024xf32>
    %cst_13 = arith.constant 2.000000e+00 : f32
    %22 = vector.broadcast %cst_13 : f32 to vector<8x1024xf32>
    %23 = arith.select %10, %21, %22 : vector<8x1024xi1>, vector<8x1024xf32>
    %24 = arith.addf %18, %23 : vector<8x1024xf32>
    %25 = tpu.reciprocal %24 {approx = true} : vector<8x1024xf32> -> vector<8x1024xf32>
    %26 = arith.mulf %18, %25 : vector<8x1024xf32>
    %27 = arith.mulf %2, %26 : vector<8x1024xf32>
    %28 = vector.broadcast %3 : vector<8x1xf32> to vector<8x1024xf32>
    %29 = arith.mulf %27, %28 : vector<8x1024xf32>
    %30 = vector.broadcast %4 : vector<8x1xf32> to vector<8x1024xf32>
    %31 = arith.addf %29, %30 : vector<8x1024xf32>
    %c0_14 = arith.constant 0 : index
    %c0_15 = arith.constant 0 : index
    %32 = vector.load %arg5[%c0_14, %c0_15] : memref<8x1024xbf16, #tpu.memory_space<vmem>>, vector<8x1024xbf16>
    %33 = arith.extf %32 : vector<8x1024xbf16> to vector<8x1024xf32>
    %34 = arith.addf %31, %33 : vector<8x1024xf32>
    %35 = arith.truncf %34 : vector<8x1024xf32> to vector<8x1024xbf16>
    %c0_16 = arith.constant 0 : index
    %c0_17 = arith.constant 0 : index
    %36 = vector.load %arg6[%c0_16, %c0_17] : memref<8x1024xbf16, #tpu.memory_space<vmem>>, vector<8x1024xbf16>
    tpu.vector_store %arg6[%c0_16, %c0_17], %35 {strides = array<i32>} : memref<8x1024xbf16, #tpu.memory_space<vmem>>, vector<8x1024xbf16>,
    return
  }
  func.func @transform_0(%arg0: i32) -> (i32, i32) {
    %c0_i32 = arith.constant 0 : i32
    %c0_i32_0 = arith.constant 0 : i32
    %c0_i32_1 = arith.constant 0 : i32
    return %c0_i32, %c0_i32_0 : i32, i32
  }
  func.func @transform_1(%arg0: i32) -> (i32, i32) {
    %c0_i32 = arith.constant 0 : i32
    %c0_i32_0 = arith.constant 0 : i32
    return %c0_i32, %arg0 : i32, i32
  }
  func.func @transform_2(%arg0: i32) -> (i32, i32) {
    %c0_i32 = arith.constant 0 : i32
    %c0_i32_0 = arith.constant 0 : i32
    %c0_i32_1 = arith.constant 0 : i32
    return %c0_i32, %c0_i32_0 : i32, i32
  }
  func.func @transform_3(%arg0: i32) -> (i32, i32) {
    %c0_i32 = arith.constant 0 : i32
    %c0_i32_0 = arith.constant 0 : i32
    %c0_i32_1 = arith.constant 0 : i32
    return %c0_i32, %c0_i32_0 : i32, i32
  }
  func.func @transform_4(%arg0: i32) -> (i32, i32) {
    %c0_i32 = arith.constant 0 : i32
    %c0_i32_0 = arith.constant 0 : i32
    return %c0_i32, %arg0 : i32, i32
  }
  func.func @transform_5(%arg0: i32) -> (i32, i32) {
    %c0_i32 = arith.constant 0 : i32
    %c0_i32_0 = arith.constant 0 : i32
    return %c0_i32, %arg0 : i32, i32
  }
}

module attributes {stable_mosaic.version = 11 : i64} {
  func.func @kernel(%arg0: i32, %arg1: memref<16x72xbf16, #tpu.memory_space<vmem>>, %arg2: memref<4x72x512xbf16, #tpu.memory_space<vmem>>, %arg3: memref<16x1xf32, #tpu.memory_space<vmem>>, %arg4: memref<16x1xf32, #tpu.memory_space<vmem>>, %arg5: memref<16x512xbf16, #tpu.memory_space<vmem>>) attributes {dimension_semantics = [#tpu.dimension_semantics<parallel>], iteration_bounds = array<i64: 1>, scalar_prefetch = 0 : i64, scratch_operands = 0 : i64, tpu.core_type = #tpu.core_type<tc>, window_params = [{pipeline_mode = #tpu.pipeline_mode<synchronous>, transform_indices = @transform_0, window_bounds = array<i64: 16, 72>}, {transform_indices = @transform_1, window_bounds = array<i64: 4, 72, 512>}, {pipeline_mode = #tpu.pipeline_mode<synchronous>, transform_indices = @transform_2, window_bounds = array<i64: 16, 1>}, {pipeline_mode = #tpu.pipeline_mode<synchronous>, transform_indices = @transform_3, window_bounds = array<i64: 16, 1>}, {transform_indices = @transform_4, window_bounds = array<i64: 16, 512>}]} {
    %c0 = arith.constant 0 : index
    %c0_0 = arith.constant 0 : index
    %0 = vector.load %arg1[%c0, %c0_0] : memref<16x72xbf16, #tpu.memory_space<vmem>>, vector<16x72xbf16>
    %c0_1 = arith.constant 0 : index
    %c0_2 = arith.constant 0 : index
    %c0_3 = arith.constant 0 : index
    %1 = vector.load %arg2[%c0_1, %c0_2, %c0_3] : memref<4x72x512xbf16, #tpu.memory_space<vmem>>, vector<1x72x512xbf16>
    %2 = vector.shape_cast %1 : vector<1x72x512xbf16> to vector<72x512xbf16>
    %cst = arith.constant dense<0.000000e+00> : vector<16x512xf32>
    %3 = tpu.matmul %0, %2, %cst {dimension_numbers = #tpu.dot_dimension_numbers<[1], [0], [0], [1], [0, 0, 1, 1], [], []>} : vector<16x72xbf16>, vector<72x512xbf16>, vector<16x512xf32> -> vector<16x512xf32>
    %c0_4 = arith.constant 0 : index
    %c0_5 = arith.constant 0 : index
    %4 = vector.load %arg3[%c0_4, %c0_5] : memref<16x1xf32, #tpu.memory_space<vmem>>, vector<16x1xf32>
    %c0_6 = arith.constant 0 : index
    %c0_7 = arith.constant 0 : index
    %5 = vector.load %arg4[%c0_6, %c0_7] : memref<16x1xf32, #tpu.memory_space<vmem>>, vector<16x1xf32>
    %6 = math.absf %3 : vector<16x512xf32>
    %cst_8 = arith.constant 0.000000e+00 : f32
    %7 = vector.broadcast %cst_8 : f32 to vector<16x512xf32>
    %8 = arith.subf %7, %6 : vector<16x512xf32>
    %9 = math.exp %8 : vector<16x512xf32>
    %cst_9 = arith.constant 0.000000e+00 : f32
    %10 = vector.broadcast %cst_9 : f32 to vector<16x512xf32>
    %11 = arith.cmpf oge, %3, %10 : vector<16x512xf32>
    %cst_10 = arith.constant 2.000000e+00 : f32
    %12 = vector.broadcast %cst_10 : f32 to vector<16x512xf32>
    %13 = arith.mulf %12, %9 : vector<16x512xf32>
    %cst_11 = arith.constant 1.000000e+00 : f32
    %14 = vector.broadcast %cst_11 : f32 to vector<16x512xf32>
    %15 = arith.addf %14, %13 : vector<16x512xf32>
    %cst_12 = arith.constant 2.000000e+00 : f32
    %16 = vector.broadcast %cst_12 : f32 to vector<16x512xf32>
    %17 = arith.addf %9, %16 : vector<16x512xf32>
    %18 = arith.mulf %9, %17 : vector<16x512xf32>
    %19 = arith.select %11, %15, %18 : vector<16x512xi1>, vector<16x512xf32>
    %cst_13 = arith.constant 2.000000e+00 : f32
    %20 = vector.broadcast %cst_13 : f32 to vector<16x512xf32>
    %21 = arith.mulf %20, %9 : vector<16x512xf32>
    %22 = arith.mulf %21, %9 : vector<16x512xf32>
    %cst_14 = arith.constant 2.000000e+00 : f32
    %23 = vector.broadcast %cst_14 : f32 to vector<16x512xf32>
    %24 = arith.select %11, %22, %23 : vector<16x512xi1>, vector<16x512xf32>
    %25 = arith.addf %19, %24 : vector<16x512xf32>
    %26 = tpu.reciprocal %25 {approx = true} : vector<16x512xf32> -> vector<16x512xf32>
    %27 = arith.mulf %19, %26 : vector<16x512xf32>
    %28 = arith.mulf %3, %27 : vector<16x512xf32>
    %29 = vector.broadcast %4 : vector<16x1xf32> to vector<16x512xf32>
    %30 = arith.mulf %28, %29 : vector<16x512xf32>
    %31 = vector.broadcast %5 : vector<16x1xf32> to vector<16x512xf32>
    %32 = arith.addf %30, %31 : vector<16x512xf32>
    %c0_15 = arith.constant 0 : index
    %c0_16 = arith.constant 0 : index
    %33 = vector.load %arg1[%c0_15, %c0_16] : memref<16x72xbf16, #tpu.memory_space<vmem>>, vector<16x72xbf16>
    %c1 = arith.constant 1 : index
    %c0_17 = arith.constant 0 : index
    %c0_18 = arith.constant 0 : index
    %34 = vector.load %arg2[%c1, %c0_17, %c0_18] : memref<4x72x512xbf16, #tpu.memory_space<vmem>>, vector<1x72x512xbf16>
    %35 = vector.shape_cast %34 : vector<1x72x512xbf16> to vector<72x512xbf16>
    %cst_19 = arith.constant dense<0.000000e+00> : vector<16x512xf32>
    %36 = tpu.matmul %33, %35, %cst_19 {dimension_numbers = #tpu.dot_dimension_numbers<[1], [0], [0], [1], [0, 0, 1, 1], [], []>} : vector<16x72xbf16>, vector<72x512xbf16>, vector<16x512xf32> -> vector<16x512xf32>
    %c0_20 = arith.constant 0 : index
    %c0_21 = arith.constant 0 : index
    %37 = vector.load %arg3[%c0_20, %c0_21] : memref<16x1xf32, #tpu.memory_space<vmem>>, vector<16x1xf32>
    %c0_22 = arith.constant 0 : index
    %c0_23 = arith.constant 0 : index
    %38 = vector.load %arg4[%c0_22, %c0_23] : memref<16x1xf32, #tpu.memory_space<vmem>>, vector<16x1xf32>
    %39 = math.absf %36 : vector<16x512xf32>
    %cst_24 = arith.constant 0.000000e+00 : f32
    %40 = vector.broadcast %cst_24 : f32 to vector<16x512xf32>
    %41 = arith.subf %40, %39 : vector<16x512xf32>
    %42 = math.exp %41 : vector<16x512xf32>
    %cst_25 = arith.constant 0.000000e+00 : f32
    %43 = vector.broadcast %cst_25 : f32 to vector<16x512xf32>
    %44 = arith.cmpf oge, %36, %43 : vector<16x512xf32>
    %cst_26 = arith.constant 2.000000e+00 : f32
    %45 = vector.broadcast %cst_26 : f32 to vector<16x512xf32>
    %46 = arith.mulf %45, %42 : vector<16x512xf32>
    %cst_27 = arith.constant 1.000000e+00 : f32
    %47 = vector.broadcast %cst_27 : f32 to vector<16x512xf32>
    %48 = arith.addf %47, %46 : vector<16x512xf32>
    %cst_28 = arith.constant 2.000000e+00 : f32
    %49 = vector.broadcast %cst_28 : f32 to vector<16x512xf32>
    %50 = arith.addf %42, %49 : vector<16x512xf32>
    %51 = arith.mulf %42, %50 : vector<16x512xf32>
    %52 = arith.select %44, %48, %51 : vector<16x512xi1>, vector<16x512xf32>
    %cst_29 = arith.constant 2.000000e+00 : f32
    %53 = vector.broadcast %cst_29 : f32 to vector<16x512xf32>
    %54 = arith.mulf %53, %42 : vector<16x512xf32>
    %55 = arith.mulf %54, %42 : vector<16x512xf32>
    %cst_30 = arith.constant 2.000000e+00 : f32
    %56 = vector.broadcast %cst_30 : f32 to vector<16x512xf32>
    %57 = arith.select %44, %55, %56 : vector<16x512xi1>, vector<16x512xf32>
    %58 = arith.addf %52, %57 : vector<16x512xf32>
    %59 = tpu.reciprocal %58 {approx = true} : vector<16x512xf32> -> vector<16x512xf32>
    %60 = arith.mulf %52, %59 : vector<16x512xf32>
    %61 = arith.mulf %36, %60 : vector<16x512xf32>
    %62 = vector.broadcast %37 : vector<16x1xf32> to vector<16x512xf32>
    %63 = arith.mulf %61, %62 : vector<16x512xf32>
    %64 = vector.broadcast %38 : vector<16x1xf32> to vector<16x512xf32>
    %65 = arith.addf %63, %64 : vector<16x512xf32>
    %66 = arith.maximumf %32, %65 : vector<16x512xf32>
    %c0_31 = arith.constant 0 : index
    %c0_32 = arith.constant 0 : index
    %67 = vector.load %arg1[%c0_31, %c0_32] : memref<16x72xbf16, #tpu.memory_space<vmem>>, vector<16x72xbf16>
    %c2 = arith.constant 2 : index
    %c0_33 = arith.constant 0 : index
    %c0_34 = arith.constant 0 : index
    %68 = vector.load %arg2[%c2, %c0_33, %c0_34] : memref<4x72x512xbf16, #tpu.memory_space<vmem>>, vector<1x72x512xbf16>
    %69 = vector.shape_cast %68 : vector<1x72x512xbf16> to vector<72x512xbf16>
    %cst_35 = arith.constant dense<0.000000e+00> : vector<16x512xf32>
    %70 = tpu.matmul %67, %69, %cst_35 {dimension_numbers = #tpu.dot_dimension_numbers<[1], [0], [0], [1], [0, 0, 1, 1], [], []>} : vector<16x72xbf16>, vector<72x512xbf16>, vector<16x512xf32> -> vector<16x512xf32>
    %c0_36 = arith.constant 0 : index
    %c0_37 = arith.constant 0 : index
    %71 = vector.load %arg3[%c0_36, %c0_37] : memref<16x1xf32, #tpu.memory_space<vmem>>, vector<16x1xf32>
    %c0_38 = arith.constant 0 : index
    %c0_39 = arith.constant 0 : index
    %72 = vector.load %arg4[%c0_38, %c0_39] : memref<16x1xf32, #tpu.memory_space<vmem>>, vector<16x1xf32>
    %73 = math.absf %70 : vector<16x512xf32>
    %cst_40 = arith.constant 0.000000e+00 : f32
    %74 = vector.broadcast %cst_40 : f32 to vector<16x512xf32>
    %75 = arith.subf %74, %73 : vector<16x512xf32>
    %76 = math.exp %75 : vector<16x512xf32>
    %cst_41 = arith.constant 0.000000e+00 : f32
    %77 = vector.broadcast %cst_41 : f32 to vector<16x512xf32>
    %78 = arith.cmpf oge, %70, %77 : vector<16x512xf32>
    %cst_42 = arith.constant 2.000000e+00 : f32
    %79 = vector.broadcast %cst_42 : f32 to vector<16x512xf32>
    %80 = arith.mulf %79, %76 : vector<16x512xf32>
    %cst_43 = arith.constant 1.000000e+00 : f32
    %81 = vector.broadcast %cst_43 : f32 to vector<16x512xf32>
    %82 = arith.addf %81, %80 : vector<16x512xf32>
    %cst_44 = arith.constant 2.000000e+00 : f32
    %83 = vector.broadcast %cst_44 : f32 to vector<16x512xf32>
    %84 = arith.addf %76, %83 : vector<16x512xf32>
    %85 = arith.mulf %76, %84 : vector<16x512xf32>
    %86 = arith.select %78, %82, %85 : vector<16x512xi1>, vector<16x512xf32>
    %cst_45 = arith.constant 2.000000e+00 : f32
    %87 = vector.broadcast %cst_45 : f32 to vector<16x512xf32>
    %88 = arith.mulf %87, %76 : vector<16x512xf32>
    %89 = arith.mulf %88, %76 : vector<16x512xf32>
    %cst_46 = arith.constant 2.000000e+00 : f32
    %90 = vector.broadcast %cst_46 : f32 to vector<16x512xf32>
    %91 = arith.select %78, %89, %90 : vector<16x512xi1>, vector<16x512xf32>
    %92 = arith.addf %86, %91 : vector<16x512xf32>
    %93 = tpu.reciprocal %92 {approx = true} : vector<16x512xf32> -> vector<16x512xf32>
    %94 = arith.mulf %86, %93 : vector<16x512xf32>
    %95 = arith.mulf %70, %94 : vector<16x512xf32>
    %96 = vector.broadcast %71 : vector<16x1xf32> to vector<16x512xf32>
    %97 = arith.mulf %95, %96 : vector<16x512xf32>
    %98 = vector.broadcast %72 : vector<16x1xf32> to vector<16x512xf32>
    %99 = arith.addf %97, %98 : vector<16x512xf32>
    %100 = arith.maximumf %66, %99 : vector<16x512xf32>
    %c0_47 = arith.constant 0 : index
    %c0_48 = arith.constant 0 : index
    %101 = vector.load %arg1[%c0_47, %c0_48] : memref<16x72xbf16, #tpu.memory_space<vmem>>, vector<16x72xbf16>
    %c3 = arith.constant 3 : index
    %c0_49 = arith.constant 0 : index
    %c0_50 = arith.constant 0 : index
    %102 = vector.load %arg2[%c3, %c0_49, %c0_50] : memref<4x72x512xbf16, #tpu.memory_space<vmem>>, vector<1x72x512xbf16>
    %103 = vector.shape_cast %102 : vector<1x72x512xbf16> to vector<72x512xbf16>
    %cst_51 = arith.constant dense<0.000000e+00> : vector<16x512xf32>
    %104 = tpu.matmul %101, %103, %cst_51 {dimension_numbers = #tpu.dot_dimension_numbers<[1], [0], [0], [1], [0, 0, 1, 1], [], []>} : vector<16x72xbf16>, vector<72x512xbf16>, vector<16x512xf32> -> vector<16x512xf32>
    %c0_52 = arith.constant 0 : index
    %c0_53 = arith.constant 0 : index
    %105 = vector.load %arg3[%c0_52, %c0_53] : memref<16x1xf32, #tpu.memory_space<vmem>>, vector<16x1xf32>
    %c0_54 = arith.constant 0 : index
    %c0_55 = arith.constant 0 : index
    %106 = vector.load %arg4[%c0_54, %c0_55] : memref<16x1xf32, #tpu.memory_space<vmem>>, vector<16x1xf32>
    %107 = math.absf %104 : vector<16x512xf32>
    %cst_56 = arith.constant 0.000000e+00 : f32
    %108 = vector.broadcast %cst_56 : f32 to vector<16x512xf32>
    %109 = arith.subf %108, %107 : vector<16x512xf32>
    %110 = math.exp %109 : vector<16x512xf32>
    %cst_57 = arith.constant 0.000000e+00 : f32
    %111 = vector.broadcast %cst_57 : f32 to vector<16x512xf32>
    %112 = arith.cmpf oge, %104, %111 : vector<16x512xf32>
    %cst_58 = arith.constant 2.000000e+00 : f32
    %113 = vector.broadcast %cst_58 : f32 to vector<16x512xf32>
    %114 = arith.mulf %113, %110 : vector<16x512xf32>
    %cst_59 = arith.constant 1.000000e+00 : f32
    %115 = vector.broadcast %cst_59 : f32 to vector<16x512xf32>
    %116 = arith.addf %115, %114 : vector<16x512xf32>
    %cst_60 = arith.constant 2.000000e+00 : f32
    %117 = vector.broadcast %cst_60 : f32 to vector<16x512xf32>
    %118 = arith.addf %110, %117 : vector<16x512xf32>
    %119 = arith.mulf %110, %118 : vector<16x512xf32>
    %120 = arith.select %112, %116, %119 : vector<16x512xi1>, vector<16x512xf32>
    %cst_61 = arith.constant 2.000000e+00 : f32
    %121 = vector.broadcast %cst_61 : f32 to vector<16x512xf32>
    %122 = arith.mulf %121, %110 : vector<16x512xf32>
    %123 = arith.mulf %122, %110 : vector<16x512xf32>
    %cst_62 = arith.constant 2.000000e+00 : f32
    %124 = vector.broadcast %cst_62 : f32 to vector<16x512xf32>
    %125 = arith.select %112, %123, %124 : vector<16x512xi1>, vector<16x512xf32>
    %126 = arith.addf %120, %125 : vector<16x512xf32>
    %127 = tpu.reciprocal %126 {approx = true} : vector<16x512xf32> -> vector<16x512xf32>
    %128 = arith.mulf %120, %127 : vector<16x512xf32>
    %129 = arith.mulf %104, %128 : vector<16x512xf32>
    %130 = vector.broadcast %105 : vector<16x1xf32> to vector<16x512xf32>
    %131 = arith.mulf %129, %130 : vector<16x512xf32>
    %132 = vector.broadcast %106 : vector<16x1xf32> to vector<16x512xf32>
    %133 = arith.addf %131, %132 : vector<16x512xf32>
    %134 = arith.maximumf %100, %133 : vector<16x512xf32>
    %135 = arith.truncf %134 : vector<16x512xf32> to vector<16x512xbf16>
    %c0_63 = arith.constant 0 : index
    %c0_64 = arith.constant 0 : index
    %136 = vector.load %arg5[%c0_63, %c0_64] : memref<16x512xbf16, #tpu.memory_space<vmem>>, vector<16x512xbf16>
    tpu.vector_store %arg5[%c0_63, %c0_64], %135 {strides = array<i32>} : memref<16x512xbf16, #tpu.memory_space<vmem>>, vector<16x512xbf16>,
    return
  }
  func.func @transform_0(%arg0: i32) -> (i32, i32) {
    %c0_i32 = arith.constant 0 : i32
    %c0_i32_0 = arith.constant 0 : i32
    %c0_i32_1 = arith.constant 0 : i32
    return %c0_i32, %c0_i32_0 : i32, i32
  }
  func.func @transform_1(%arg0: i32) -> (i32, i32, i32) {
    %c0_i32 = arith.constant 0 : i32
    %c0_i32_0 = arith.constant 0 : i32
    %c0_i32_1 = arith.constant 0 : i32
    return %c0_i32, %c0_i32_0, %arg0 : i32, i32, i32
  }
  func.func @transform_2(%arg0: i32) -> (i32, i32) {
    %c0_i32 = arith.constant 0 : i32
    %c0_i32_0 = arith.constant 0 : i32
    %c0_i32_1 = arith.constant 0 : i32
    return %c0_i32, %c0_i32_0 : i32, i32
  }
  func.func @transform_3(%arg0: i32) -> (i32, i32) {
    %c0_i32 = arith.constant 0 : i32
    %c0_i32_0 = arith.constant 0 : i32
    %c0_i32_1 = arith.constant 0 : i32
    return %c0_i32, %c0_i32_0 : i32, i32
  }
  func.func @transform_4(%arg0: i32) -> (i32, i32) {
    %c0_i32 = arith.constant 0 : i32
    %c0_i32_0 = arith.constant 0 : i32
    return %c0_i32, %arg0 : i32, i32
  }
}

module attributes {stable_mosaic.version = 11 : i64} {
  func.func @kernel(%arg0: i32, %arg1: memref<16x144xbf16, #tpu.memory_space<vmem>>, %arg2: memref<144x512xbf16, #tpu.memory_space<vmem>>, %arg3: memref<16x1xf32, #tpu.memory_space<vmem>>, %arg4: memref<16x1xf32, #tpu.memory_space<vmem>>, %arg5: memref<16x512xbf16, #tpu.memory_space<vmem>>, %arg6: memref<16x512xbf16, #tpu.memory_space<vmem>>) attributes {dimension_semantics = [#tpu.dimension_semantics<parallel>], iteration_bounds = array<i64: 1>, scalar_prefetch = 0 : i64, scratch_operands = 0 : i64, tpu.core_type = #tpu.core_type<tc>, window_params = [{pipeline_mode = #tpu.pipeline_mode<synchronous>, transform_indices = @transform_0, window_bounds = array<i64: 16, 144>}, {transform_indices = @transform_1, window_bounds = array<i64: 144, 512>}, {pipeline_mode = #tpu.pipeline_mode<synchronous>, transform_indices = @transform_2, window_bounds = array<i64: 16, 1>}, {pipeline_mode = #tpu.pipeline_mode<synchronous>, transform_indices = @transform_3, window_bounds = array<i64: 16, 1>}, {transform_indices = @transform_4, window_bounds = array<i64: 16, 512>}, {transform_indices = @transform_5, window_bounds = array<i64: 16, 512>}]} {
    %c0 = arith.constant 0 : index
    %c0_0 = arith.constant 0 : index
    %0 = vector.load %arg1[%c0, %c0_0] : memref<16x144xbf16, #tpu.memory_space<vmem>>, vector<16x144xbf16>
    %c0_1 = arith.constant 0 : index
    %c0_2 = arith.constant 0 : index
    %1 = vector.load %arg2[%c0_1, %c0_2] : memref<144x512xbf16, #tpu.memory_space<vmem>>, vector<144x512xbf16>
    %cst = arith.constant dense<0.000000e+00> : vector<16x512xf32>
    %2 = tpu.matmul %0, %1, %cst {dimension_numbers = #tpu.dot_dimension_numbers<[1], [0], [0], [1], [0, 0, 1, 1], [], []>} : vector<16x144xbf16>, vector<144x512xbf16>, vector<16x512xf32> -> vector<16x512xf32>
    %c0_3 = arith.constant 0 : index
    %c0_4 = arith.constant 0 : index
    %3 = vector.load %arg3[%c0_3, %c0_4] : memref<16x1xf32, #tpu.memory_space<vmem>>, vector<16x1xf32>
    %c0_5 = arith.constant 0 : index
    %c0_6 = arith.constant 0 : index
    %4 = vector.load %arg4[%c0_5, %c0_6] : memref<16x1xf32, #tpu.memory_space<vmem>>, vector<16x1xf32>
    %5 = math.absf %2 : vector<16x512xf32>
    %cst_7 = arith.constant 0.000000e+00 : f32
    %6 = vector.broadcast %cst_7 : f32 to vector<16x512xf32>
    %7 = arith.subf %6, %5 : vector<16x512xf32>
    %8 = math.exp %7 : vector<16x512xf32>
    %cst_8 = arith.constant 0.000000e+00 : f32
    %9 = vector.broadcast %cst_8 : f32 to vector<16x512xf32>
    %10 = arith.cmpf oge, %2, %9 : vector<16x512xf32>
    %cst_9 = arith.constant 2.000000e+00 : f32
    %11 = vector.broadcast %cst_9 : f32 to vector<16x512xf32>
    %12 = arith.mulf %11, %8 : vector<16x512xf32>
    %cst_10 = arith.constant 1.000000e+00 : f32
    %13 = vector.broadcast %cst_10 : f32 to vector<16x512xf32>
    %14 = arith.addf %13, %12 : vector<16x512xf32>
    %cst_11 = arith.constant 2.000000e+00 : f32
    %15 = vector.broadcast %cst_11 : f32 to vector<16x512xf32>
    %16 = arith.addf %8, %15 : vector<16x512xf32>
    %17 = arith.mulf %8, %16 : vector<16x512xf32>
    %18 = arith.select %10, %14, %17 : vector<16x512xi1>, vector<16x512xf32>
    %cst_12 = arith.constant 2.000000e+00 : f32
    %19 = vector.broadcast %cst_12 : f32 to vector<16x512xf32>
    %20 = arith.mulf %19, %8 : vector<16x512xf32>
    %21 = arith.mulf %20, %8 : vector<16x512xf32>
    %cst_13 = arith.constant 2.000000e+00 : f32
    %22 = vector.broadcast %cst_13 : f32 to vector<16x512xf32>
    %23 = arith.select %10, %21, %22 : vector<16x512xi1>, vector<16x512xf32>
    %24 = arith.addf %18, %23 : vector<16x512xf32>
    %25 = tpu.reciprocal %24 {approx = true} : vector<16x512xf32> -> vector<16x512xf32>
    %26 = arith.mulf %18, %25 : vector<16x512xf32>
    %27 = arith.mulf %2, %26 : vector<16x512xf32>
    %28 = vector.broadcast %3 : vector<16x1xf32> to vector<16x512xf32>
    %29 = arith.mulf %27, %28 : vector<16x512xf32>
    %30 = vector.broadcast %4 : vector<16x1xf32> to vector<16x512xf32>
    %31 = arith.addf %29, %30 : vector<16x512xf32>
    %c0_14 = arith.constant 0 : index
    %c0_15 = arith.constant 0 : index
    %32 = vector.load %arg5[%c0_14, %c0_15] : memref<16x512xbf16, #tpu.memory_space<vmem>>, vector<16x512xbf16>
    %33 = arith.extf %32 : vector<16x512xbf16> to vector<16x512xf32>
    %34 = arith.addf %31, %33 : vector<16x512xf32>
    %35 = arith.truncf %34 : vector<16x512xf32> to vector<16x512xbf16>
    %c0_16 = arith.constant 0 : index
    %c0_17 = arith.constant 0 : index
    %36 = vector.load %arg6[%c0_16, %c0_17] : memref<16x512xbf16, #tpu.memory_space<vmem>>, vector<16x512xbf16>
    tpu.vector_store %arg6[%c0_16, %c0_17], %35 {strides = array<i32>} : memref<16x512xbf16, #tpu.memory_space<vmem>>, vector<16x512xbf16>,
    return
  }
  func.func @transform_0(%arg0: i32) -> (i32, i32) {
    %c0_i32 = arith.constant 0 : i32
    %c0_i32_0 = arith.constant 0 : i32
    %c0_i32_1 = arith.constant 0 : i32
    return %c0_i32, %c0_i32_0 : i32, i32
  }
  func.func @transform_1(%arg0: i32) -> (i32, i32) {
    %c0_i32 = arith.constant 0 : i32
    %c0_i32_0 = arith.constant 0 : i32
    return %c0_i32, %arg0 : i32, i32
  }
  func.func @transform_2(%arg0: i32) -> (i32, i32) {
    %c0_i32 = arith.constant 0 : i32
    %c0_i32_0 = arith.constant 0 : i32
    %c0_i32_1 = arith.constant 0 : i32
    return %c0_i32, %c0_i32_0 : i32, i32
  }
  func.func @transform_3(%arg0: i32) -> (i32, i32) {
    %c0_i32 = arith.constant 0 : i32
    %c0_i32_0 = arith.constant 0 : i32
    %c0_i32_1 = arith.constant 0 : i32
    return %c0_i32, %c0_i32_0 : i32, i32
  }
  func.func @transform_4(%arg0: i32) -> (i32, i32) {
    %c0_i32 = arith.constant 0 : i32
    %c0_i32_0 = arith.constant 0 : i32
    return %c0_i32, %arg0 : i32, i32
  }
  func.func @transform_5(%arg0: i32) -> (i32, i32) {
    %c0_i32 = arith.constant 0 : i32
    %c0_i32_0 = arith.constant 0 : i32
    return %c0_i32, %arg0 : i32, i32
  }
}

module attributes {stable_mosaic.version = 11 : i64} {
  func.func @kernel(%arg0: i32, %arg1: memref<16x144xbf16, #tpu.memory_space<vmem>>, %arg2: memref<144x512xbf16, #tpu.memory_space<vmem>>, %arg3: memref<16x1xf32, #tpu.memory_space<vmem>>, %arg4: memref<16x1xf32, #tpu.memory_space<vmem>>, %arg5: memref<16x512xbf16, #tpu.memory_space<vmem>>) attributes {dimension_semantics = [#tpu.dimension_semantics<parallel>], iteration_bounds = array<i64: 1>, scalar_prefetch = 0 : i64, scratch_operands = 0 : i64, tpu.core_type = #tpu.core_type<tc>, window_params = [{pipeline_mode = #tpu.pipeline_mode<synchronous>, transform_indices = @transform_0, window_bounds = array<i64: 16, 144>}, {transform_indices = @transform_1, window_bounds = array<i64: 144, 512>}, {pipeline_mode = #tpu.pipeline_mode<synchronous>, transform_indices = @transform_2, window_bounds = array<i64: 16, 1>}, {pipeline_mode = #tpu.pipeline_mode<synchronous>, transform_indices = @transform_3, window_bounds = array<i64: 16, 1>}, {transform_indices = @transform_4, window_bounds = array<i64: 16, 512>}]} {
    %c0 = arith.constant 0 : index
    %c0_0 = arith.constant 0 : index
    %0 = vector.load %arg1[%c0, %c0_0] : memref<16x144xbf16, #tpu.memory_space<vmem>>, vector<16x144xbf16>
    %c0_1 = arith.constant 0 : index
    %c0_2 = arith.constant 0 : index
    %1 = vector.load %arg2[%c0_1, %c0_2] : memref<144x512xbf16, #tpu.memory_space<vmem>>, vector<144x512xbf16>
    %cst = arith.constant dense<0.000000e+00> : vector<16x512xf32>
    %2 = tpu.matmul %0, %1, %cst {dimension_numbers = #tpu.dot_dimension_numbers<[1], [0], [0], [1], [0, 0, 1, 1], [], []>} : vector<16x144xbf16>, vector<144x512xbf16>, vector<16x512xf32> -> vector<16x512xf32>
    %c0_3 = arith.constant 0 : index
    %c0_4 = arith.constant 0 : index
    %3 = vector.load %arg3[%c0_3, %c0_4] : memref<16x1xf32, #tpu.memory_space<vmem>>, vector<16x1xf32>
    %c0_5 = arith.constant 0 : index
    %c0_6 = arith.constant 0 : index
    %4 = vector.load %arg4[%c0_5, %c0_6] : memref<16x1xf32, #tpu.memory_space<vmem>>, vector<16x1xf32>
    %5 = math.absf %2 : vector<16x512xf32>
    %cst_7 = arith.constant 0.000000e+00 : f32
    %6 = vector.broadcast %cst_7 : f32 to vector<16x512xf32>
    %7 = arith.subf %6, %5 : vector<16x512xf32>
    %8 = math.exp %7 : vector<16x512xf32>
    %cst_8 = arith.constant 0.000000e+00 : f32
    %9 = vector.broadcast %cst_8 : f32 to vector<16x512xf32>
    %10 = arith.cmpf oge, %2, %9 : vector<16x512xf32>
    %cst_9 = arith.constant 2.000000e+00 : f32
    %11 = vector.broadcast %cst_9 : f32 to vector<16x512xf32>
    %12 = arith.mulf %11, %8 : vector<16x512xf32>
    %cst_10 = arith.constant 1.000000e+00 : f32
    %13 = vector.broadcast %cst_10 : f32 to vector<16x512xf32>
    %14 = arith.addf %13, %12 : vector<16x512xf32>
    %cst_11 = arith.constant 2.000000e+00 : f32
    %15 = vector.broadcast %cst_11 : f32 to vector<16x512xf32>
    %16 = arith.addf %8, %15 : vector<16x512xf32>
    %17 = arith.mulf %8, %16 : vector<16x512xf32>
    %18 = arith.select %10, %14, %17 : vector<16x512xi1>, vector<16x512xf32>
    %cst_12 = arith.constant 2.000000e+00 : f32
    %19 = vector.broadcast %cst_12 : f32 to vector<16x512xf32>
    %20 = arith.mulf %19, %8 : vector<16x512xf32>
    %21 = arith.mulf %20, %8 : vector<16x512xf32>
    %cst_13 = arith.constant 2.000000e+00 : f32
    %22 = vector.broadcast %cst_13 : f32 to vector<16x512xf32>
    %23 = arith.select %10, %21, %22 : vector<16x512xi1>, vector<16x512xf32>
    %24 = arith.addf %18, %23 : vector<16x512xf32>
    %25 = tpu.reciprocal %24 {approx = true} : vector<16x512xf32> -> vector<16x512xf32>
    %26 = arith.mulf %18, %25 : vector<16x512xf32>
    %27 = arith.mulf %2, %26 : vector<16x512xf32>
    %28 = vector.broadcast %3 : vector<16x1xf32> to vector<16x512xf32>
    %29 = arith.mulf %27, %28 : vector<16x512xf32>
    %30 = vector.broadcast %4 : vector<16x1xf32> to vector<16x512xf32>
    %31 = arith.addf %29, %30 : vector<16x512xf32>
    %32 = arith.truncf %31 : vector<16x512xf32> to vector<16x512xbf16>
    %c0_14 = arith.constant 0 : index
    %c0_15 = arith.constant 0 : index
    %33 = vector.load %arg5[%c0_14, %c0_15] : memref<16x512xbf16, #tpu.memory_space<vmem>>, vector<16x512xbf16>
    tpu.vector_store %arg5[%c0_14, %c0_15], %32 {strides = array<i32>} : memref<16x512xbf16, #tpu.memory_space<vmem>>, vector<16x512xbf16>,
    return
  }
  func.func @transform_0(%arg0: i32) -> (i32, i32) {
    %c0_i32 = arith.constant 0 : i32
    %c0_i32_0 = arith.constant 0 : i32
    %c0_i32_1 = arith.constant 0 : i32
    return %c0_i32, %c0_i32_0 : i32, i32
  }
  func.func @transform_1(%arg0: i32) -> (i32, i32) {
    %c0_i32 = arith.constant 0 : i32
    %c0_i32_0 = arith.constant 0 : i32
    return %c0_i32, %arg0 : i32, i32
  }
  func.func @transform_2(%arg0: i32) -> (i32, i32) {
    %c0_i32 = arith.constant 0 : i32
    %c0_i32_0 = arith.constant 0 : i32
    %c0_i32_1 = arith.constant 0 : i32
    return %c0_i32, %c0_i32_0 : i32, i32
  }
  func.func @transform_3(%arg0: i32) -> (i32, i32) {
    %c0_i32 = arith.constant 0 : i32
    %c0_i32_0 = arith.constant 0 : i32
    %c0_i32_1 = arith.constant 0 : i32
    return %c0_i32, %c0_i32_0 : i32, i32
  }
  func.func @transform_4(%arg0: i32) -> (i32, i32) {
    %c0_i32 = arith.constant 0 : i32
    %c0_i32_0 = arith.constant 0 : i32
    return %c0_i32, %arg0 : i32, i32
  }
}

module attributes {stable_mosaic.version = 11 : i64} {
  func.func @kernel(%arg0: i32, %arg1: memref<32x144xbf16, #tpu.memory_space<vmem>>, %arg2: memref<4x144x128xbf16, #tpu.memory_space<vmem>>, %arg3: memref<32x1xf32, #tpu.memory_space<vmem>>, %arg4: memref<32x1xf32, #tpu.memory_space<vmem>>, %arg5: memref<32x128xbf16, #tpu.memory_space<vmem>>) attributes {dimension_semantics = [#tpu.dimension_semantics<parallel>], iteration_bounds = array<i64: 1>, scalar_prefetch = 0 : i64, scratch_operands = 0 : i64, tpu.core_type = #tpu.core_type<tc>, window_params = [{pipeline_mode = #tpu.pipeline_mode<synchronous>, transform_indices = @transform_0, window_bounds = array<i64: 32, 144>}, {transform_indices = @transform_1, window_bounds = array<i64: 4, 144, 128>}, {pipeline_mode = #tpu.pipeline_mode<synchronous>, transform_indices = @transform_2, window_bounds = array<i64: 32, 1>}, {pipeline_mode = #tpu.pipeline_mode<synchronous>, transform_indices = @transform_3, window_bounds = array<i64: 32, 1>}, {transform_indices = @transform_4, window_bounds = array<i64: 32, 128>}]} {
    %c0 = arith.constant 0 : index
    %c0_0 = arith.constant 0 : index
    %0 = vector.load %arg1[%c0, %c0_0] : memref<32x144xbf16, #tpu.memory_space<vmem>>, vector<32x144xbf16>
    %c0_1 = arith.constant 0 : index
    %c0_2 = arith.constant 0 : index
    %c0_3 = arith.constant 0 : index
    %1 = vector.load %arg2[%c0_1, %c0_2, %c0_3] : memref<4x144x128xbf16, #tpu.memory_space<vmem>>, vector<1x144x128xbf16>
    %2 = vector.shape_cast %1 : vector<1x144x128xbf16> to vector<144x128xbf16>
    %cst = arith.constant dense<0.000000e+00> : vector<32x128xf32>
    %3 = tpu.matmul %0, %2, %cst {dimension_numbers = #tpu.dot_dimension_numbers<[1], [0], [0], [1], [0, 0, 1, 1], [], []>} : vector<32x144xbf16>, vector<144x128xbf16>, vector<32x128xf32> -> vector<32x128xf32>
    %c0_4 = arith.constant 0 : index
    %c0_5 = arith.constant 0 : index
    %4 = vector.load %arg3[%c0_4, %c0_5] : memref<32x1xf32, #tpu.memory_space<vmem>>, vector<32x1xf32>
    %c0_6 = arith.constant 0 : index
    %c0_7 = arith.constant 0 : index
    %5 = vector.load %arg4[%c0_6, %c0_7] : memref<32x1xf32, #tpu.memory_space<vmem>>, vector<32x1xf32>
    %6 = math.absf %3 : vector<32x128xf32>
    %cst_8 = arith.constant 0.000000e+00 : f32
    %7 = vector.broadcast %cst_8 : f32 to vector<32x128xf32>
    %8 = arith.subf %7, %6 : vector<32x128xf32>
    %9 = math.exp %8 : vector<32x128xf32>
    %cst_9 = arith.constant 0.000000e+00 : f32
    %10 = vector.broadcast %cst_9 : f32 to vector<32x128xf32>
    %11 = arith.cmpf oge, %3, %10 : vector<32x128xf32>
    %cst_10 = arith.constant 2.000000e+00 : f32
    %12 = vector.broadcast %cst_10 : f32 to vector<32x128xf32>
    %13 = arith.mulf %12, %9 : vector<32x128xf32>
    %cst_11 = arith.constant 1.000000e+00 : f32
    %14 = vector.broadcast %cst_11 : f32 to vector<32x128xf32>
    %15 = arith.addf %14, %13 : vector<32x128xf32>
    %cst_12 = arith.constant 2.000000e+00 : f32
    %16 = vector.broadcast %cst_12 : f32 to vector<32x128xf32>
    %17 = arith.addf %9, %16 : vector<32x128xf32>
    %18 = arith.mulf %9, %17 : vector<32x128xf32>
    %19 = arith.select %11, %15, %18 : vector<32x128xi1>, vector<32x128xf32>
    %cst_13 = arith.constant 2.000000e+00 : f32
    %20 = vector.broadcast %cst_13 : f32 to vector<32x128xf32>
    %21 = arith.mulf %20, %9 : vector<32x128xf32>
    %22 = arith.mulf %21, %9 : vector<32x128xf32>
    %cst_14 = arith.constant 2.000000e+00 : f32
    %23 = vector.broadcast %cst_14 : f32 to vector<32x128xf32>
    %24 = arith.select %11, %22, %23 : vector<32x128xi1>, vector<32x128xf32>
    %25 = arith.addf %19, %24 : vector<32x128xf32>
    %26 = tpu.reciprocal %25 {approx = true} : vector<32x128xf32> -> vector<32x128xf32>
    %27 = arith.mulf %19, %26 : vector<32x128xf32>
    %28 = arith.mulf %3, %27 : vector<32x128xf32>
    %29 = vector.broadcast %4 : vector<32x1xf32> to vector<32x128xf32>
    %30 = arith.mulf %28, %29 : vector<32x128xf32>
    %31 = vector.broadcast %5 : vector<32x1xf32> to vector<32x128xf32>
    %32 = arith.addf %30, %31 : vector<32x128xf32>
    %c0_15 = arith.constant 0 : index
    %c0_16 = arith.constant 0 : index
    %33 = vector.load %arg1[%c0_15, %c0_16] : memref<32x144xbf16, #tpu.memory_space<vmem>>, vector<32x144xbf16>
    %c1 = arith.constant 1 : index
    %c0_17 = arith.constant 0 : index
    %c0_18 = arith.constant 0 : index
    %34 = vector.load %arg2[%c1, %c0_17, %c0_18] : memref<4x144x128xbf16, #tpu.memory_space<vmem>>, vector<1x144x128xbf16>
    %35 = vector.shape_cast %34 : vector<1x144x128xbf16> to vector<144x128xbf16>
    %cst_19 = arith.constant dense<0.000000e+00> : vector<32x128xf32>
    %36 = tpu.matmul %33, %35, %cst_19 {dimension_numbers = #tpu.dot_dimension_numbers<[1], [0], [0], [1], [0, 0, 1, 1], [], []>} : vector<32x144xbf16>, vector<144x128xbf16>, vector<32x128xf32> -> vector<32x128xf32>
    %c0_20 = arith.constant 0 : index
    %c0_21 = arith.constant 0 : index
    %37 = vector.load %arg3[%c0_20, %c0_21] : memref<32x1xf32, #tpu.memory_space<vmem>>, vector<32x1xf32>
    %c0_22 = arith.constant 0 : index
    %c0_23 = arith.constant 0 : index
    %38 = vector.load %arg4[%c0_22, %c0_23] : memref<32x1xf32, #tpu.memory_space<vmem>>, vector<32x1xf32>
    %39 = math.absf %36 : vector<32x128xf32>
    %cst_24 = arith.constant 0.000000e+00 : f32
    %40 = vector.broadcast %cst_24 : f32 to vector<32x128xf32>
    %41 = arith.subf %40, %39 : vector<32x128xf32>
    %42 = math.exp %41 : vector<32x128xf32>
    %cst_25 = arith.constant 0.000000e+00 : f32
    %43 = vector.broadcast %cst_25 : f32 to vector<32x128xf32>
    %44 = arith.cmpf oge, %36, %43 : vector<32x128xf32>
    %cst_26 = arith.constant 2.000000e+00 : f32
    %45 = vector.broadcast %cst_26 : f32 to vector<32x128xf32>
    %46 = arith.mulf %45, %42 : vector<32x128xf32>
    %cst_27 = arith.constant 1.000000e+00 : f32
    %47 = vector.broadcast %cst_27 : f32 to vector<32x128xf32>
    %48 = arith.addf %47, %46 : vector<32x128xf32>
    %cst_28 = arith.constant 2.000000e+00 : f32
    %49 = vector.broadcast %cst_28 : f32 to vector<32x128xf32>
    %50 = arith.addf %42, %49 : vector<32x128xf32>
    %51 = arith.mulf %42, %50 : vector<32x128xf32>
    %52 = arith.select %44, %48, %51 : vector<32x128xi1>, vector<32x128xf32>
    %cst_29 = arith.constant 2.000000e+00 : f32
    %53 = vector.broadcast %cst_29 : f32 to vector<32x128xf32>
    %54 = arith.mulf %53, %42 : vector<32x128xf32>
    %55 = arith.mulf %54, %42 : vector<32x128xf32>
    %cst_30 = arith.constant 2.000000e+00 : f32
    %56 = vector.broadcast %cst_30 : f32 to vector<32x128xf32>
    %57 = arith.select %44, %55, %56 : vector<32x128xi1>, vector<32x128xf32>
    %58 = arith.addf %52, %57 : vector<32x128xf32>
    %59 = tpu.reciprocal %58 {approx = true} : vector<32x128xf32> -> vector<32x128xf32>
    %60 = arith.mulf %52, %59 : vector<32x128xf32>
    %61 = arith.mulf %36, %60 : vector<32x128xf32>
    %62 = vector.broadcast %37 : vector<32x1xf32> to vector<32x128xf32>
    %63 = arith.mulf %61, %62 : vector<32x128xf32>
    %64 = vector.broadcast %38 : vector<32x1xf32> to vector<32x128xf32>
    %65 = arith.addf %63, %64 : vector<32x128xf32>
    %66 = arith.addf %32, %65 : vector<32x128xf32>
    %c0_31 = arith.constant 0 : index
    %c0_32 = arith.constant 0 : index
    %67 = vector.load %arg1[%c0_31, %c0_32] : memref<32x144xbf16, #tpu.memory_space<vmem>>, vector<32x144xbf16>
    %c2 = arith.constant 2 : index
    %c0_33 = arith.constant 0 : index
    %c0_34 = arith.constant 0 : index
    %68 = vector.load %arg2[%c2, %c0_33, %c0_34] : memref<4x144x128xbf16, #tpu.memory_space<vmem>>, vector<1x144x128xbf16>
    %69 = vector.shape_cast %68 : vector<1x144x128xbf16> to vector<144x128xbf16>
    %cst_35 = arith.constant dense<0.000000e+00> : vector<32x128xf32>
    %70 = tpu.matmul %67, %69, %cst_35 {dimension_numbers = #tpu.dot_dimension_numbers<[1], [0], [0], [1], [0, 0, 1, 1], [], []>} : vector<32x144xbf16>, vector<144x128xbf16>, vector<32x128xf32> -> vector<32x128xf32>
    %c0_36 = arith.constant 0 : index
    %c0_37 = arith.constant 0 : index
    %71 = vector.load %arg3[%c0_36, %c0_37] : memref<32x1xf32, #tpu.memory_space<vmem>>, vector<32x1xf32>
    %c0_38 = arith.constant 0 : index
    %c0_39 = arith.constant 0 : index
    %72 = vector.load %arg4[%c0_38, %c0_39] : memref<32x1xf32, #tpu.memory_space<vmem>>, vector<32x1xf32>
    %73 = math.absf %70 : vector<32x128xf32>
    %cst_40 = arith.constant 0.000000e+00 : f32
    %74 = vector.broadcast %cst_40 : f32 to vector<32x128xf32>
    %75 = arith.subf %74, %73 : vector<32x128xf32>
    %76 = math.exp %75 : vector<32x128xf32>
    %cst_41 = arith.constant 0.000000e+00 : f32
    %77 = vector.broadcast %cst_41 : f32 to vector<32x128xf32>
    %78 = arith.cmpf oge, %70, %77 : vector<32x128xf32>
    %cst_42 = arith.constant 2.000000e+00 : f32
    %79 = vector.broadcast %cst_42 : f32 to vector<32x128xf32>
    %80 = arith.mulf %79, %76 : vector<32x128xf32>
    %cst_43 = arith.constant 1.000000e+00 : f32
    %81 = vector.broadcast %cst_43 : f32 to vector<32x128xf32>
    %82 = arith.addf %81, %80 : vector<32x128xf32>
    %cst_44 = arith.constant 2.000000e+00 : f32
    %83 = vector.broadcast %cst_44 : f32 to vector<32x128xf32>
    %84 = arith.addf %76, %83 : vector<32x128xf32>
    %85 = arith.mulf %76, %84 : vector<32x128xf32>
    %86 = arith.select %78, %82, %85 : vector<32x128xi1>, vector<32x128xf32>
    %cst_45 = arith.constant 2.000000e+00 : f32
    %87 = vector.broadcast %cst_45 : f32 to vector<32x128xf32>
    %88 = arith.mulf %87, %76 : vector<32x128xf32>
    %89 = arith.mulf %88, %76 : vector<32x128xf32>
    %cst_46 = arith.constant 2.000000e+00 : f32
    %90 = vector.broadcast %cst_46 : f32 to vector<32x128xf32>
    %91 = arith.select %78, %89, %90 : vector<32x128xi1>, vector<32x128xf32>
    %92 = arith.addf %86, %91 : vector<32x128xf32>
    %93 = tpu.reciprocal %92 {approx = true} : vector<32x128xf32> -> vector<32x128xf32>
    %94 = arith.mulf %86, %93 : vector<32x128xf32>
    %95 = arith.mulf %70, %94 : vector<32x128xf32>
    %96 = vector.broadcast %71 : vector<32x1xf32> to vector<32x128xf32>
    %97 = arith.mulf %95, %96 : vector<32x128xf32>
    %98 = vector.broadcast %72 : vector<32x1xf32> to vector<32x128xf32>
    %99 = arith.addf %97, %98 : vector<32x128xf32>
    %100 = arith.addf %66, %99 : vector<32x128xf32>
    %c0_47 = arith.constant 0 : index
    %c0_48 = arith.constant 0 : index
    %101 = vector.load %arg1[%c0_47, %c0_48] : memref<32x144xbf16, #tpu.memory_space<vmem>>, vector<32x144xbf16>
    %c3 = arith.constant 3 : index
    %c0_49 = arith.constant 0 : index
    %c0_50 = arith.constant 0 : index
    %102 = vector.load %arg2[%c3, %c0_49, %c0_50] : memref<4x144x128xbf16, #tpu.memory_space<vmem>>, vector<1x144x128xbf16>
    %103 = vector.shape_cast %102 : vector<1x144x128xbf16> to vector<144x128xbf16>
    %cst_51 = arith.constant dense<0.000000e+00> : vector<32x128xf32>
    %104 = tpu.matmul %101, %103, %cst_51 {dimension_numbers = #tpu.dot_dimension_numbers<[1], [0], [0], [1], [0, 0, 1, 1], [], []>} : vector<32x144xbf16>, vector<144x128xbf16>, vector<32x128xf32> -> vector<32x128xf32>
    %c0_52 = arith.constant 0 : index
    %c0_53 = arith.constant 0 : index
    %105 = vector.load %arg3[%c0_52, %c0_53] : memref<32x1xf32, #tpu.memory_space<vmem>>, vector<32x1xf32>
    %c0_54 = arith.constant 0 : index
    %c0_55 = arith.constant 0 : index
    %106 = vector.load %arg4[%c0_54, %c0_55] : memref<32x1xf32, #tpu.memory_space<vmem>>, vector<32x1xf32>
    %107 = math.absf %104 : vector<32x128xf32>
    %cst_56 = arith.constant 0.000000e+00 : f32
    %108 = vector.broadcast %cst_56 : f32 to vector<32x128xf32>
    %109 = arith.subf %108, %107 : vector<32x128xf32>
    %110 = math.exp %109 : vector<32x128xf32>
    %cst_57 = arith.constant 0.000000e+00 : f32
    %111 = vector.broadcast %cst_57 : f32 to vector<32x128xf32>
    %112 = arith.cmpf oge, %104, %111 : vector<32x128xf32>
    %cst_58 = arith.constant 2.000000e+00 : f32
    %113 = vector.broadcast %cst_58 : f32 to vector<32x128xf32>
    %114 = arith.mulf %113, %110 : vector<32x128xf32>
    %cst_59 = arith.constant 1.000000e+00 : f32
    %115 = vector.broadcast %cst_59 : f32 to vector<32x128xf32>
    %116 = arith.addf %115, %114 : vector<32x128xf32>
    %cst_60 = arith.constant 2.000000e+00 : f32
    %117 = vector.broadcast %cst_60 : f32 to vector<32x128xf32>
    %118 = arith.addf %110, %117 : vector<32x128xf32>
    %119 = arith.mulf %110, %118 : vector<32x128xf32>
    %120 = arith.select %112, %116, %119 : vector<32x128xi1>, vector<32x128xf32>
    %cst_61 = arith.constant 2.000000e+00 : f32
    %121 = vector.broadcast %cst_61 : f32 to vector<32x128xf32>
    %122 = arith.mulf %121, %110 : vector<32x128xf32>
    %123 = arith.mulf %122, %110 : vector<32x128xf32>
    %cst_62 = arith.constant 2.000000e+00 : f32
    %124 = vector.broadcast %cst_62 : f32 to vector<32x128xf32>
    %125 = arith.select %112, %123, %124 : vector<32x128xi1>, vector<32x128xf32>
    %126 = arith.addf %120, %125 : vector<32x128xf32>
    %127 = tpu.reciprocal %126 {approx = true} : vector<32x128xf32> -> vector<32x128xf32>
    %128 = arith.mulf %120, %127 : vector<32x128xf32>
    %129 = arith.mulf %104, %128 : vector<32x128xf32>
    %130 = vector.broadcast %105 : vector<32x1xf32> to vector<32x128xf32>
    %131 = arith.mulf %129, %130 : vector<32x128xf32>
    %132 = vector.broadcast %106 : vector<32x1xf32> to vector<32x128xf32>
    %133 = arith.addf %131, %132 : vector<32x128xf32>
    %134 = arith.addf %100, %133 : vector<32x128xf32>
    %cst_63 = arith.constant 2.500000e-01 : f32
    %135 = vector.broadcast %cst_63 : f32 to vector<32x128xf32>
    %136 = arith.mulf %134, %135 : vector<32x128xf32>
    %137 = arith.truncf %136 : vector<32x128xf32> to vector<32x128xbf16>
    %c0_64 = arith.constant 0 : index
    %c0_65 = arith.constant 0 : index
    %138 = vector.load %arg5[%c0_64, %c0_65] : memref<32x128xbf16, #tpu.memory_space<vmem>>, vector<32x128xbf16>
    tpu.vector_store %arg5[%c0_64, %c0_65], %137 {strides = array<i32>} : memref<32x128xbf16, #tpu.memory_space<vmem>>, vector<32x128xbf16>,
    return
  }
  func.func @transform_0(%arg0: i32) -> (i32, i32) {
    %c0_i32 = arith.constant 0 : i32
    %c0_i32_0 = arith.constant 0 : i32
    %c0_i32_1 = arith.constant 0 : i32
    return %c0_i32, %c0_i32_0 : i32, i32
  }
  func.func @transform_1(%arg0: i32) -> (i32, i32, i32) {
    %c0_i32 = arith.constant 0 : i32
    %c0_i32_0 = arith.constant 0 : i32
    %c0_i32_1 = arith.constant 0 : i32
    return %c0_i32, %c0_i32_0, %arg0 : i32, i32, i32
  }
  func.func @transform_2(%arg0: i32) -> (i32, i32) {
    %c0_i32 = arith.constant 0 : i32
    %c0_i32_0 = arith.constant 0 : i32
    %c0_i32_1 = arith.constant 0 : i32
    return %c0_i32, %c0_i32_0 : i32, i32
  }
  func.func @transform_3(%arg0: i32) -> (i32, i32) {
    %c0_i32 = arith.constant 0 : i32
    %c0_i32_0 = arith.constant 0 : i32
    %c0_i32_1 = arith.constant 0 : i32
    return %c0_i32, %c0_i32_0 : i32, i32
  }
  func.func @transform_4(%arg0: i32) -> (i32, i32) {
    %c0_i32 = arith.constant 0 : i32
    %c0_i32_0 = arith.constant 0 : i32
    return %c0_i32, %arg0 : i32, i32
  }
}

module attributes {stable_mosaic.version = 11 : i64} {
  func.func @kernel(%arg0: i32, %arg1: memref<32x288xbf16, #tpu.memory_space<vmem>>, %arg2: memref<288x128xbf16, #tpu.memory_space<vmem>>, %arg3: memref<32x1xf32, #tpu.memory_space<vmem>>, %arg4: memref<32x1xf32, #tpu.memory_space<vmem>>, %arg5: memref<32x128xbf16, #tpu.memory_space<vmem>>) attributes {dimension_semantics = [#tpu.dimension_semantics<parallel>], iteration_bounds = array<i64: 1>, scalar_prefetch = 0 : i64, scratch_operands = 0 : i64, tpu.core_type = #tpu.core_type<tc>, window_params = [{pipeline_mode = #tpu.pipeline_mode<synchronous>, transform_indices = @transform_0, window_bounds = array<i64: 32, 288>}, {transform_indices = @transform_1, window_bounds = array<i64: 288, 128>}, {pipeline_mode = #tpu.pipeline_mode<synchronous>, transform_indices = @transform_2, window_bounds = array<i64: 32, 1>}, {pipeline_mode = #tpu.pipeline_mode<synchronous>, transform_indices = @transform_3, window_bounds = array<i64: 32, 1>}, {transform_indices = @transform_4, window_bounds = array<i64: 32, 128>}]} {
    %c0 = arith.constant 0 : index
    %c0_0 = arith.constant 0 : index
    %0 = vector.load %arg1[%c0, %c0_0] : memref<32x288xbf16, #tpu.memory_space<vmem>>, vector<32x288xbf16>
    %c0_1 = arith.constant 0 : index
    %c0_2 = arith.constant 0 : index
    %1 = vector.load %arg2[%c0_1, %c0_2] : memref<288x128xbf16, #tpu.memory_space<vmem>>, vector<288x128xbf16>
    %cst = arith.constant dense<0.000000e+00> : vector<32x128xf32>
    %2 = tpu.matmul %0, %1, %cst {dimension_numbers = #tpu.dot_dimension_numbers<[1], [0], [0], [1], [0, 0, 1, 1], [], []>} : vector<32x288xbf16>, vector<288x128xbf16>, vector<32x128xf32> -> vector<32x128xf32>
    %c0_3 = arith.constant 0 : index
    %c0_4 = arith.constant 0 : index
    %3 = vector.load %arg3[%c0_3, %c0_4] : memref<32x1xf32, #tpu.memory_space<vmem>>, vector<32x1xf32>
    %c0_5 = arith.constant 0 : index
    %c0_6 = arith.constant 0 : index
    %4 = vector.load %arg4[%c0_5, %c0_6] : memref<32x1xf32, #tpu.memory_space<vmem>>, vector<32x1xf32>
    %5 = math.absf %2 : vector<32x128xf32>
    %cst_7 = arith.constant 0.000000e+00 : f32
    %6 = vector.broadcast %cst_7 : f32 to vector<32x128xf32>
    %7 = arith.subf %6, %5 : vector<32x128xf32>
    %8 = math.exp %7 : vector<32x128xf32>
    %cst_8 = arith.constant 0.000000e+00 : f32
    %9 = vector.broadcast %cst_8 : f32 to vector<32x128xf32>
    %10 = arith.cmpf oge, %2, %9 : vector<32x128xf32>
    %cst_9 = arith.constant 2.000000e+00 : f32
    %11 = vector.broadcast %cst_9 : f32 to vector<32x128xf32>
    %12 = arith.mulf %11, %8 : vector<32x128xf32>
    %cst_10 = arith.constant 1.000000e+00 : f32
    %13 = vector.broadcast %cst_10 : f32 to vector<32x128xf32>
    %14 = arith.addf %13, %12 : vector<32x128xf32>
    %cst_11 = arith.constant 2.000000e+00 : f32
    %15 = vector.broadcast %cst_11 : f32 to vector<32x128xf32>
    %16 = arith.addf %8, %15 : vector<32x128xf32>
    %17 = arith.mulf %8, %16 : vector<32x128xf32>
    %18 = arith.select %10, %14, %17 : vector<32x128xi1>, vector<32x128xf32>
    %cst_12 = arith.constant 2.000000e+00 : f32
    %19 = vector.broadcast %cst_12 : f32 to vector<32x128xf32>
    %20 = arith.mulf %19, %8 : vector<32x128xf32>
    %21 = arith.mulf %20, %8 : vector<32x128xf32>
    %cst_13 = arith.constant 2.000000e+00 : f32
    %22 = vector.broadcast %cst_13 : f32 to vector<32x128xf32>
    %23 = arith.select %10, %21, %22 : vector<32x128xi1>, vector<32x128xf32>
    %24 = arith.addf %18, %23 : vector<32x128xf32>
    %25 = tpu.reciprocal %24 {approx = true} : vector<32x128xf32> -> vector<32x128xf32>
    %26 = arith.mulf %18, %25 : vector<32x128xf32>
    %27 = arith.mulf %2, %26 : vector<32x128xf32>
    %28 = vector.broadcast %3 : vector<32x1xf32> to vector<32x128xf32>
    %29 = arith.mulf %27, %28 : vector<32x128xf32>
    %30 = vector.broadcast %4 : vector<32x1xf32> to vector<32x128xf32>
    %31 = arith.addf %29, %30 : vector<32x128xf32>
    %32 = arith.truncf %31 : vector<32x128xf32> to vector<32x128xbf16>
    %c0_14 = arith.constant 0 : index
    %c0_15 = arith.constant 0 : index
    %33 = vector.load %arg5[%c0_14, %c0_15] : memref<32x128xbf16, #tpu.memory_space<vmem>>, vector<32x128xbf16>
    tpu.vector_store %arg5[%c0_14, %c0_15], %32 {strides = array<i32>} : memref<32x128xbf16, #tpu.memory_space<vmem>>, vector<32x128xbf16>,
    return
  }
  func.func @transform_0(%arg0: i32) -> (i32, i32) {
    %c0_i32 = arith.constant 0 : i32
    %c0_i32_0 = arith.constant 0 : i32
    %c0_i32_1 = arith.constant 0 : i32
    return %c0_i32, %c0_i32_0 : i32, i32
  }
  func.func @transform_1(%arg0: i32) -> (i32, i32) {
    %c0_i32 = arith.constant 0 : i32
    %c0_i32_0 = arith.constant 0 : i32
    return %c0_i32, %arg0 : i32, i32
  }
  func.func @transform_2(%arg0: i32) -> (i32, i32) {
    %c0_i32 = arith.constant 0 : i32
    %c0_i32_0 = arith.constant 0 : i32
    %c0_i32_1 = arith.constant 0 : i32
    return %c0_i32, %c0_i32_0 : i32, i32
  }
  func.func @transform_3(%arg0: i32) -> (i32, i32) {
    %c0_i32 = arith.constant 0 : i32
    %c0_i32_0 = arith.constant 0 : i32
    %c0_i32_1 = arith.constant 0 : i32
    return %c0_i32, %c0_i32_0 : i32, i32
  }
  func.func @transform_4(%arg0: i32) -> (i32, i32) {
    %c0_i32 = arith.constant 0 : i32
    %c0_i32_0 = arith.constant 0 : i32
    return %c0_i32, %arg0 : i32, i32
  }
}

module attributes {stable_mosaic.version = 11 : i64} {
  func.func @kernel(%arg0: i32, %arg1: memref<32x288xbf16, #tpu.memory_space<vmem>>, %arg2: memref<288x128xbf16, #tpu.memory_space<vmem>>, %arg3: memref<32x1xf32, #tpu.memory_space<vmem>>, %arg4: memref<32x1xf32, #tpu.memory_space<vmem>>, %arg5: memref<32x128xbf16, #tpu.memory_space<vmem>>, %arg6: memref<32x128xbf16, #tpu.memory_space<vmem>>) attributes {dimension_semantics = [#tpu.dimension_semantics<parallel>], iteration_bounds = array<i64: 1>, scalar_prefetch = 0 : i64, scratch_operands = 0 : i64, tpu.core_type = #tpu.core_type<tc>, window_params = [{pipeline_mode = #tpu.pipeline_mode<synchronous>, transform_indices = @transform_0, window_bounds = array<i64: 32, 288>}, {transform_indices = @transform_1, window_bounds = array<i64: 288, 128>}, {pipeline_mode = #tpu.pipeline_mode<synchronous>, transform_indices = @transform_2, window_bounds = array<i64: 32, 1>}, {pipeline_mode = #tpu.pipeline_mode<synchronous>, transform_indices = @transform_3, window_bounds = array<i64: 32, 1>}, {transform_indices = @transform_4, window_bounds = array<i64: 32, 128>}, {transform_indices = @transform_5, window_bounds = array<i64: 32, 128>}]} {
    %c0 = arith.constant 0 : index
    %c0_0 = arith.constant 0 : index
    %0 = vector.load %arg1[%c0, %c0_0] : memref<32x288xbf16, #tpu.memory_space<vmem>>, vector<32x288xbf16>
    %c0_1 = arith.constant 0 : index
    %c0_2 = arith.constant 0 : index
    %1 = vector.load %arg2[%c0_1, %c0_2] : memref<288x128xbf16, #tpu.memory_space<vmem>>, vector<288x128xbf16>
    %cst = arith.constant dense<0.000000e+00> : vector<32x128xf32>
    %2 = tpu.matmul %0, %1, %cst {dimension_numbers = #tpu.dot_dimension_numbers<[1], [0], [0], [1], [0, 0, 1, 1], [], []>} : vector<32x288xbf16>, vector<288x128xbf16>, vector<32x128xf32> -> vector<32x128xf32>
    %c0_3 = arith.constant 0 : index
    %c0_4 = arith.constant 0 : index
    %3 = vector.load %arg3[%c0_3, %c0_4] : memref<32x1xf32, #tpu.memory_space<vmem>>, vector<32x1xf32>
    %c0_5 = arith.constant 0 : index
    %c0_6 = arith.constant 0 : index
    %4 = vector.load %arg4[%c0_5, %c0_6] : memref<32x1xf32, #tpu.memory_space<vmem>>, vector<32x1xf32>
    %5 = math.absf %2 : vector<32x128xf32>
    %cst_7 = arith.constant 0.000000e+00 : f32
    %6 = vector.broadcast %cst_7 : f32 to vector<32x128xf32>
    %7 = arith.subf %6, %5 : vector<32x128xf32>
    %8 = math.exp %7 : vector<32x128xf32>
    %cst_8 = arith.constant 0.000000e+00 : f32
    %9 = vector.broadcast %cst_8 : f32 to vector<32x128xf32>
    %10 = arith.cmpf oge, %2, %9 : vector<32x128xf32>
    %cst_9 = arith.constant 2.000000e+00 : f32
    %11 = vector.broadcast %cst_9 : f32 to vector<32x128xf32>
    %12 = arith.mulf %11, %8 : vector<32x128xf32>
    %cst_10 = arith.constant 1.000000e+00 : f32
    %13 = vector.broadcast %cst_10 : f32 to vector<32x128xf32>
    %14 = arith.addf %13, %12 : vector<32x128xf32>
    %cst_11 = arith.constant 2.000000e+00 : f32
    %15 = vector.broadcast %cst_11 : f32 to vector<32x128xf32>
    %16 = arith.addf %8, %15 : vector<32x128xf32>
    %17 = arith.mulf %8, %16 : vector<32x128xf32>
    %18 = arith.select %10, %14, %17 : vector<32x128xi1>, vector<32x128xf32>
    %cst_12 = arith.constant 2.000000e+00 : f32
    %19 = vector.broadcast %cst_12 : f32 to vector<32x128xf32>
    %20 = arith.mulf %19, %8 : vector<32x128xf32>
    %21 = arith.mulf %20, %8 : vector<32x128xf32>
    %cst_13 = arith.constant 2.000000e+00 : f32
    %22 = vector.broadcast %cst_13 : f32 to vector<32x128xf32>
    %23 = arith.select %10, %21, %22 : vector<32x128xi1>, vector<32x128xf32>
    %24 = arith.addf %18, %23 : vector<32x128xf32>
    %25 = tpu.reciprocal %24 {approx = true} : vector<32x128xf32> -> vector<32x128xf32>
    %26 = arith.mulf %18, %25 : vector<32x128xf32>
    %27 = arith.mulf %2, %26 : vector<32x128xf32>
    %28 = vector.broadcast %3 : vector<32x1xf32> to vector<32x128xf32>
    %29 = arith.mulf %27, %28 : vector<32x128xf32>
    %30 = vector.broadcast %4 : vector<32x1xf32> to vector<32x128xf32>
    %31 = arith.addf %29, %30 : vector<32x128xf32>
    %c0_14 = arith.constant 0 : index
    %c0_15 = arith.constant 0 : index
    %32 = vector.load %arg5[%c0_14, %c0_15] : memref<32x128xbf16, #tpu.memory_space<vmem>>, vector<32x128xbf16>
    %33 = arith.extf %32 : vector<32x128xbf16> to vector<32x128xf32>
    %34 = arith.addf %31, %33 : vector<32x128xf32>
    %35 = arith.truncf %34 : vector<32x128xf32> to vector<32x128xbf16>
    %c0_16 = arith.constant 0 : index
    %c0_17 = arith.constant 0 : index
    %36 = vector.load %arg6[%c0_16, %c0_17] : memref<32x128xbf16, #tpu.memory_space<vmem>>, vector<32x128xbf16>
    tpu.vector_store %arg6[%c0_16, %c0_17], %35 {strides = array<i32>} : memref<32x128xbf16, #tpu.memory_space<vmem>>, vector<32x128xbf16>,
    return
  }
  func.func @transform_0(%arg0: i32) -> (i32, i32) {
    %c0_i32 = arith.constant 0 : i32
    %c0_i32_0 = arith.constant 0 : i32
    %c0_i32_1 = arith.constant 0 : i32
    return %c0_i32, %c0_i32_0 : i32, i32
  }
  func.func @transform_1(%arg0: i32) -> (i32, i32) {
    %c0_i32 = arith.constant 0 : i32
    %c0_i32_0 = arith.constant 0 : i32
    return %c0_i32, %arg0 : i32, i32
  }
  func.func @transform_2(%arg0: i32) -> (i32, i32) {
    %c0_i32 = arith.constant 0 : i32
    %c0_i32_0 = arith.constant 0 : i32
    %c0_i32_1 = arith.constant 0 : i32
    return %c0_i32, %c0_i32_0 : i32, i32
  }
  func.func @transform_3(%arg0: i32) -> (i32, i32) {
    %c0_i32 = arith.constant 0 : i32
    %c0_i32_0 = arith.constant 0 : i32
    %c0_i32_1 = arith.constant 0 : i32
    return %c0_i32, %c0_i32_0 : i32, i32
  }
  func.func @transform_4(%arg0: i32) -> (i32, i32) {
    %c0_i32 = arith.constant 0 : i32
    %c0_i32_0 = arith.constant 0 : i32
    return %c0_i32, %arg0 : i32, i32
  }
  func.func @transform_5(%arg0: i32) -> (i32, i32) {
    %c0_i32 = arith.constant 0 : i32
    %c0_i32_0 = arith.constant 0 : i32
    return %c0_i32, %arg0 : i32, i32
  }
}

module attributes {stable_mosaic.version = 11 : i64} {
  func.func @kernel(%arg0: i32, %arg1: memref<800x64xbf16, #tpu.memory_space<vmem>>, %arg2: memref<8x800xbf16, #tpu.memory_space<vmem>>, %arg3: memref<1x64xf32, #tpu.memory_space<vmem>>, %arg4: memref<1x64xf32, #tpu.memory_space<vmem>>, %arg5: memref<8x64xbf16, #tpu.memory_space<vmem>>) attributes {dimension_semantics = [#tpu.dimension_semantics<arbitrary>], iteration_bounds = array<i64: 1>, scalar_prefetch = 0 : i64, scratch_operands = 0 : i64, tpu.core_type = #tpu.core_type<tc>, window_params = [{pipeline_mode = #tpu.pipeline_mode<synchronous>, transform_indices = @transform_0, window_bounds = array<i64: 800, 64>}, {pipeline_mode = #tpu.pipeline_mode<synchronous>, transform_indices = @transform_1, window_bounds = array<i64: 8, 800>}, {pipeline_mode = #tpu.pipeline_mode<synchronous>, transform_indices = @transform_2, window_bounds = array<i64: 1, 64>}, {pipeline_mode = #tpu.pipeline_mode<synchronous>, transform_indices = @transform_3, window_bounds = array<i64: 1, 64>}, {pipeline_mode = #tpu.pipeline_mode<synchronous>, transform_indices = @transform_4, window_bounds = array<i64: 8, 64>}]} {
    %c0 = arith.constant 0 : index
    %c0_0 = arith.constant 0 : index
    %0 = vector.load %arg2[%c0, %c0_0] : memref<8x800xbf16, #tpu.memory_space<vmem>>, vector<8x800xbf16>
    %c0_1 = arith.constant 0 : index
    %c0_2 = arith.constant 0 : index
    %1 = vector.load %arg1[%c0_1, %c0_2] : memref<800x64xbf16, #tpu.memory_space<vmem>>, vector<800x64xbf16>
    %cst = arith.constant dense<0.000000e+00> : vector<8x64xf32>
    %2 = tpu.matmul %0, %1, %cst {dimension_numbers = #tpu.dot_dimension_numbers<[1], [0], [0], [1], [0, 0, 1, 1], [], []>} : vector<8x800xbf16>, vector<800x64xbf16>, vector<8x64xf32> -> vector<8x64xf32>
    %c0_3 = arith.constant 0 : index
    %c0_4 = arith.constant 0 : index
    %3 = vector.load %arg3[%c0_3, %c0_4] : memref<1x64xf32, #tpu.memory_space<vmem>>, vector<1x64xf32>
    %c0_5 = arith.constant 0 : index
    %c0_6 = arith.constant 0 : index
    %4 = vector.load %arg4[%c0_5, %c0_6] : memref<1x64xf32, #tpu.memory_space<vmem>>, vector<1x64xf32>
    %5 = math.absf %2 : vector<8x64xf32>
    %cst_7 = arith.constant 0.000000e+00 : f32
    %6 = vector.broadcast %cst_7 : f32 to vector<8x64xf32>
    %7 = arith.subf %6, %5 : vector<8x64xf32>
    %8 = math.exp %7 : vector<8x64xf32>
    %cst_8 = arith.constant 0.000000e+00 : f32
    %9 = vector.broadcast %cst_8 : f32 to vector<8x64xf32>
    %10 = arith.cmpf oge, %2, %9 : vector<8x64xf32>
    %cst_9 = arith.constant 2.000000e+00 : f32
    %11 = vector.broadcast %cst_9 : f32 to vector<8x64xf32>
    %12 = arith.mulf %11, %8 : vector<8x64xf32>
    %cst_10 = arith.constant 1.000000e+00 : f32
    %13 = vector.broadcast %cst_10 : f32 to vector<8x64xf32>
    %14 = arith.addf %13, %12 : vector<8x64xf32>
    %cst_11 = arith.constant 2.000000e+00 : f32
    %15 = vector.broadcast %cst_11 : f32 to vector<8x64xf32>
    %16 = arith.addf %8, %15 : vector<8x64xf32>
    %17 = arith.mulf %8, %16 : vector<8x64xf32>
    %18 = arith.select %10, %14, %17 : vector<8x64xi1>, vector<8x64xf32>
    %cst_12 = arith.constant 2.000000e+00 : f32
    %19 = vector.broadcast %cst_12 : f32 to vector<8x64xf32>
    %20 = arith.mulf %19, %8 : vector<8x64xf32>
    %21 = arith.mulf %20, %8 : vector<8x64xf32>
    %cst_13 = arith.constant 2.000000e+00 : f32
    %22 = vector.broadcast %cst_13 : f32 to vector<8x64xf32>
    %23 = arith.select %10, %21, %22 : vector<8x64xi1>, vector<8x64xf32>
    %24 = arith.addf %18, %23 : vector<8x64xf32>
    %25 = tpu.reciprocal %24 {approx = true} : vector<8x64xf32> -> vector<8x64xf32>
    %26 = arith.mulf %18, %25 : vector<8x64xf32>
    %27 = arith.mulf %2, %26 : vector<8x64xf32>
    %28 = vector.broadcast %3 : vector<1x64xf32> to vector<8x64xf32>
    %29 = arith.mulf %27, %28 : vector<8x64xf32>
    %30 = vector.broadcast %4 : vector<1x64xf32> to vector<8x64xf32>
    %31 = arith.addf %29, %30 : vector<8x64xf32>
    %32 = arith.truncf %31 : vector<8x64xf32> to vector<8x64xbf16>
    %c0_14 = arith.constant 0 : index
    %c0_15 = arith.constant 0 : index
    %33 = vector.load %arg5[%c0_14, %c0_15] : memref<8x64xbf16, #tpu.memory_space<vmem>>, vector<8x64xbf16>
    tpu.vector_store %arg5[%c0_14, %c0_15], %32 {strides = array<i32>} : memref<8x64xbf16, #tpu.memory_space<vmem>>, vector<8x64xbf16>,
    return
  }
  func.func @transform_0(%arg0: i32) -> (i32, i32) {
    %c0_i32 = arith.constant 0 : i32
    %c0_i32_0 = arith.constant 0 : i32
    %c0_i32_1 = arith.constant 0 : i32
    return %c0_i32, %c0_i32_0 : i32, i32
  }
  func.func @transform_1(%arg0: i32) -> (i32, i32) {
    %c0_i32 = arith.constant 0 : i32
    %c0_i32_0 = arith.constant 0 : i32
    %c0_i32_1 = arith.constant 0 : i32
    return %c0_i32, %c0_i32_0 : i32, i32
  }
  func.func @transform_2(%arg0: i32) -> (i32, i32) {
    %c0_i32 = arith.constant 0 : i32
    %c0_i32_0 = arith.constant 0 : i32
    %c0_i32_1 = arith.constant 0 : i32
    return %c0_i32, %c0_i32_0 : i32, i32
  }
  func.func @transform_3(%arg0: i32) -> (i32, i32) {
    %c0_i32 = arith.constant 0 : i32
    %c0_i32_0 = arith.constant 0 : i32
    %c0_i32_1 = arith.constant 0 : i32
    return %c0_i32, %c0_i32_0 : i32, i32
  }
  func.func @transform_4(%arg0: i32) -> (i32, i32) {
    %c0_i32 = arith.constant 0 : i32
    %c0_i32_0 = arith.constant 0 : i32
    %c0_i32_1 = arith.constant 0 : i32
    return %c0_i32, %c0_i32_0 : i32, i32
  }
}

module attributes {stable_mosaic.version = 11 : i64} {
  func.func @kernel(%arg0: i32, %arg1: memref<576x64xbf16, #tpu.memory_space<vmem>>, %arg2: memref<8x576xbf16, #tpu.memory_space<vmem>>, %arg3: memref<1x64xf32, #tpu.memory_space<vmem>>, %arg4: memref<1x64xf32, #tpu.memory_space<vmem>>, %arg5: memref<8x64xbf16, #tpu.memory_space<vmem>>) attributes {dimension_semantics = [#tpu.dimension_semantics<arbitrary>], iteration_bounds = array<i64: 1>, scalar_prefetch = 0 : i64, scratch_operands = 0 : i64, tpu.core_type = #tpu.core_type<tc>, window_params = [{pipeline_mode = #tpu.pipeline_mode<synchronous>, transform_indices = @transform_0, window_bounds = array<i64: 576, 64>}, {pipeline_mode = #tpu.pipeline_mode<synchronous>, transform_indices = @transform_1, window_bounds = array<i64: 8, 576>}, {pipeline_mode = #tpu.pipeline_mode<synchronous>, transform_indices = @transform_2, window_bounds = array<i64: 1, 64>}, {pipeline_mode = #tpu.pipeline_mode<synchronous>, transform_indices = @transform_3, window_bounds = array<i64: 1, 64>}, {pipeline_mode = #tpu.pipeline_mode<synchronous>, transform_indices = @transform_4, window_bounds = array<i64: 8, 64>}]} {
    %c0 = arith.constant 0 : index
    %c0_0 = arith.constant 0 : index
    %0 = vector.load %arg2[%c0, %c0_0] : memref<8x576xbf16, #tpu.memory_space<vmem>>, vector<8x576xbf16>
    %c0_1 = arith.constant 0 : index
    %c0_2 = arith.constant 0 : index
    %1 = vector.load %arg1[%c0_1, %c0_2] : memref<576x64xbf16, #tpu.memory_space<vmem>>, vector<576x64xbf16>
    %cst = arith.constant dense<0.000000e+00> : vector<8x64xf32>
    %2 = tpu.matmul %0, %1, %cst {dimension_numbers = #tpu.dot_dimension_numbers<[1], [0], [0], [1], [0, 0, 1, 1], [], []>} : vector<8x576xbf16>, vector<576x64xbf16>, vector<8x64xf32> -> vector<8x64xf32>
    %c0_3 = arith.constant 0 : index
    %c0_4 = arith.constant 0 : index
    %3 = vector.load %arg3[%c0_3, %c0_4] : memref<1x64xf32, #tpu.memory_space<vmem>>, vector<1x64xf32>
    %c0_5 = arith.constant 0 : index
    %c0_6 = arith.constant 0 : index
    %4 = vector.load %arg4[%c0_5, %c0_6] : memref<1x64xf32, #tpu.memory_space<vmem>>, vector<1x64xf32>
    %5 = math.absf %2 : vector<8x64xf32>
    %cst_7 = arith.constant 0.000000e+00 : f32
    %6 = vector.broadcast %cst_7 : f32 to vector<8x64xf32>
    %7 = arith.subf %6, %5 : vector<8x64xf32>
    %8 = math.exp %7 : vector<8x64xf32>
    %cst_8 = arith.constant 0.000000e+00 : f32
    %9 = vector.broadcast %cst_8 : f32 to vector<8x64xf32>
    %10 = arith.cmpf oge, %2, %9 : vector<8x64xf32>
    %cst_9 = arith.constant 2.000000e+00 : f32
    %11 = vector.broadcast %cst_9 : f32 to vector<8x64xf32>
    %12 = arith.mulf %11, %8 : vector<8x64xf32>
    %cst_10 = arith.constant 1.000000e+00 : f32
    %13 = vector.broadcast %cst_10 : f32 to vector<8x64xf32>
    %14 = arith.addf %13, %12 : vector<8x64xf32>
    %cst_11 = arith.constant 2.000000e+00 : f32
    %15 = vector.broadcast %cst_11 : f32 to vector<8x64xf32>
    %16 = arith.addf %8, %15 : vector<8x64xf32>
    %17 = arith.mulf %8, %16 : vector<8x64xf32>
    %18 = arith.select %10, %14, %17 : vector<8x64xi1>, vector<8x64xf32>
    %cst_12 = arith.constant 2.000000e+00 : f32
    %19 = vector.broadcast %cst_12 : f32 to vector<8x64xf32>
    %20 = arith.mulf %19, %8 : vector<8x64xf32>
    %21 = arith.mulf %20, %8 : vector<8x64xf32>
    %cst_13 = arith.constant 2.000000e+00 : f32
    %22 = vector.broadcast %cst_13 : f32 to vector<8x64xf32>
    %23 = arith.select %10, %21, %22 : vector<8x64xi1>, vector<8x64xf32>
    %24 = arith.addf %18, %23 : vector<8x64xf32>
    %25 = tpu.reciprocal %24 {approx = true} : vector<8x64xf32> -> vector<8x64xf32>
    %26 = arith.mulf %18, %25 : vector<8x64xf32>
    %27 = arith.mulf %2, %26 : vector<8x64xf32>
    %28 = vector.broadcast %3 : vector<1x64xf32> to vector<8x64xf32>
    %29 = arith.mulf %27, %28 : vector<8x64xf32>
    %30 = vector.broadcast %4 : vector<1x64xf32> to vector<8x64xf32>
    %31 = arith.addf %29, %30 : vector<8x64xf32>
    %32 = arith.truncf %31 : vector<8x64xf32> to vector<8x64xbf16>
    %c0_14 = arith.constant 0 : index
    %c0_15 = arith.constant 0 : index
    %33 = vector.load %arg5[%c0_14, %c0_15] : memref<8x64xbf16, #tpu.memory_space<vmem>>, vector<8x64xbf16>
    tpu.vector_store %arg5[%c0_14, %c0_15], %32 {strides = array<i32>} : memref<8x64xbf16, #tpu.memory_space<vmem>>, vector<8x64xbf16>,
    return
  }
  func.func @transform_0(%arg0: i32) -> (i32, i32) {
    %c0_i32 = arith.constant 0 : i32
    %c0_i32_0 = arith.constant 0 : i32
    %c0_i32_1 = arith.constant 0 : i32
    return %c0_i32, %c0_i32_0 : i32, i32
  }
  func.func @transform_1(%arg0: i32) -> (i32, i32) {
    %c0_i32 = arith.constant 0 : i32
    %c0_i32_0 = arith.constant 0 : i32
    %c0_i32_1 = arith.constant 0 : i32
    return %c0_i32, %c0_i32_0 : i32, i32
  }
  func.func @transform_2(%arg0: i32) -> (i32, i32) {
    %c0_i32 = arith.constant 0 : i32
    %c0_i32_0 = arith.constant 0 : i32
    %c0_i32_1 = arith.constant 0 : i32
    return %c0_i32, %c0_i32_0 : i32, i32
  }
  func.func @transform_3(%arg0: i32) -> (i32, i32) {
    %c0_i32 = arith.constant 0 : i32
    %c0_i32_0 = arith.constant 0 : i32
    %c0_i32_1 = arith.constant 0 : i32
    return %c0_i32, %c0_i32_0 : i32, i32
  }
  func.func @transform_4(%arg0: i32) -> (i32, i32) {
    %c0_i32 = arith.constant 0 : i32
    %c0_i32_0 = arith.constant 0 : i32
    %c0_i32_1 = arith.constant 0 : i32
    return %c0_i32, %c0_i32_0 : i32, i32
  }
}

module attributes {stable_mosaic.version = 11 : i64} {
  func.func @kernel(%arg0: i32, %arg1: memref<576x64xbf16, #tpu.memory_space<vmem>>, %arg2: memref<8x576xbf16, #tpu.memory_space<vmem>>, %arg3: memref<1x64xf32, #tpu.memory_space<vmem>>, %arg4: memref<1x64xf32, #tpu.memory_space<vmem>>, %arg5: memref<8x64xbf16, #tpu.memory_space<vmem>>, %arg6: memref<8x64xbf16, #tpu.memory_space<vmem>>) attributes {dimension_semantics = [#tpu.dimension_semantics<arbitrary>], iteration_bounds = array<i64: 1>, scalar_prefetch = 0 : i64, scratch_operands = 0 : i64, tpu.core_type = #tpu.core_type<tc>, window_params = [{pipeline_mode = #tpu.pipeline_mode<synchronous>, transform_indices = @transform_0, window_bounds = array<i64: 576, 64>}, {pipeline_mode = #tpu.pipeline_mode<synchronous>, transform_indices = @transform_1, window_bounds = array<i64: 8, 576>}, {pipeline_mode = #tpu.pipeline_mode<synchronous>, transform_indices = @transform_2, window_bounds = array<i64: 1, 64>}, {pipeline_mode = #tpu.pipeline_mode<synchronous>, transform_indices = @transform_3, window_bounds = array<i64: 1, 64>}, {pipeline_mode = #tpu.pipeline_mode<synchronous>, transform_indices = @transform_4, window_bounds = array<i64: 8, 64>}, {pipeline_mode = #tpu.pipeline_mode<synchronous>, transform_indices = @transform_5, window_bounds = array<i64: 8, 64>}]} {
    %c0 = arith.constant 0 : index
    %c0_0 = arith.constant 0 : index
    %0 = vector.load %arg2[%c0, %c0_0] : memref<8x576xbf16, #tpu.memory_space<vmem>>, vector<8x576xbf16>
    %c0_1 = arith.constant 0 : index
    %c0_2 = arith.constant 0 : index
    %1 = vector.load %arg1[%c0_1, %c0_2] : memref<576x64xbf16, #tpu.memory_space<vmem>>, vector<576x64xbf16>
    %cst = arith.constant dense<0.000000e+00> : vector<8x64xf32>
    %2 = tpu.matmul %0, %1, %cst {dimension_numbers = #tpu.dot_dimension_numbers<[1], [0], [0], [1], [0, 0, 1, 1], [], []>} : vector<8x576xbf16>, vector<576x64xbf16>, vector<8x64xf32> -> vector<8x64xf32>
    %c0_3 = arith.constant 0 : index
    %c0_4 = arith.constant 0 : index
    %3 = vector.load %arg3[%c0_3, %c0_4] : memref<1x64xf32, #tpu.memory_space<vmem>>, vector<1x64xf32>
    %c0_5 = arith.constant 0 : index
    %c0_6 = arith.constant 0 : index
    %4 = vector.load %arg4[%c0_5, %c0_6] : memref<1x64xf32, #tpu.memory_space<vmem>>, vector<1x64xf32>
    %5 = math.absf %2 : vector<8x64xf32>
    %cst_7 = arith.constant 0.000000e+00 : f32
    %6 = vector.broadcast %cst_7 : f32 to vector<8x64xf32>
    %7 = arith.subf %6, %5 : vector<8x64xf32>
    %8 = math.exp %7 : vector<8x64xf32>
    %cst_8 = arith.constant 0.000000e+00 : f32
    %9 = vector.broadcast %cst_8 : f32 to vector<8x64xf32>
    %10 = arith.cmpf oge, %2, %9 : vector<8x64xf32>
    %cst_9 = arith.constant 2.000000e+00 : f32
    %11 = vector.broadcast %cst_9 : f32 to vector<8x64xf32>
    %12 = arith.mulf %11, %8 : vector<8x64xf32>
    %cst_10 = arith.constant 1.000000e+00 : f32
    %13 = vector.broadcast %cst_10 : f32 to vector<8x64xf32>
    %14 = arith.addf %13, %12 : vector<8x64xf32>
    %cst_11 = arith.constant 2.000000e+00 : f32
    %15 = vector.broadcast %cst_11 : f32 to vector<8x64xf32>
    %16 = arith.addf %8, %15 : vector<8x64xf32>
    %17 = arith.mulf %8, %16 : vector<8x64xf32>
    %18 = arith.select %10, %14, %17 : vector<8x64xi1>, vector<8x64xf32>
    %cst_12 = arith.constant 2.000000e+00 : f32
    %19 = vector.broadcast %cst_12 : f32 to vector<8x64xf32>
    %20 = arith.mulf %19, %8 : vector<8x64xf32>
    %21 = arith.mulf %20, %8 : vector<8x64xf32>
    %cst_13 = arith.constant 2.000000e+00 : f32
    %22 = vector.broadcast %cst_13 : f32 to vector<8x64xf32>
    %23 = arith.select %10, %21, %22 : vector<8x64xi1>, vector<8x64xf32>
    %24 = arith.addf %18, %23 : vector<8x64xf32>
    %25 = tpu.reciprocal %24 {approx = true} : vector<8x64xf32> -> vector<8x64xf32>
    %26 = arith.mulf %18, %25 : vector<8x64xf32>
    %27 = arith.mulf %2, %26 : vector<8x64xf32>
    %28 = vector.broadcast %3 : vector<1x64xf32> to vector<8x64xf32>
    %29 = arith.mulf %27, %28 : vector<8x64xf32>
    %30 = vector.broadcast %4 : vector<1x64xf32> to vector<8x64xf32>
    %31 = arith.addf %29, %30 : vector<8x64xf32>
    %c0_14 = arith.constant 0 : index
    %c0_15 = arith.constant 0 : index
    %32 = vector.load %arg5[%c0_14, %c0_15] : memref<8x64xbf16, #tpu.memory_space<vmem>>, vector<8x64xbf16>
    %33 = arith.extf %32 : vector<8x64xbf16> to vector<8x64xf32>
    %34 = arith.addf %31, %33 : vector<8x64xf32>
    %35 = arith.truncf %34 : vector<8x64xf32> to vector<8x64xbf16>
    %c0_16 = arith.constant 0 : index
    %c0_17 = arith.constant 0 : index
    %36 = vector.load %arg6[%c0_16, %c0_17] : memref<8x64xbf16, #tpu.memory_space<vmem>>, vector<8x64xbf16>
    tpu.vector_store %arg6[%c0_16, %c0_17], %35 {strides = array<i32>} : memref<8x64xbf16, #tpu.memory_space<vmem>>, vector<8x64xbf16>,
    return
  }
  func.func @transform_0(%arg0: i32) -> (i32, i32) {
    %c0_i32 = arith.constant 0 : i32
    %c0_i32_0 = arith.constant 0 : i32
    %c0_i32_1 = arith.constant 0 : i32
    return %c0_i32, %c0_i32_0 : i32, i32
  }
  func.func @transform_1(%arg0: i32) -> (i32, i32) {
    %c0_i32 = arith.constant 0 : i32
    %c0_i32_0 = arith.constant 0 : i32
    %c0_i32_1 = arith.constant 0 : i32
    return %c0_i32, %c0_i32_0 : i32, i32
  }
  func.func @transform_2(%arg0: i32) -> (i32, i32) {
    %c0_i32 = arith.constant 0 : i32
    %c0_i32_0 = arith.constant 0 : i32
    %c0_i32_1 = arith.constant 0 : i32
    return %c0_i32, %c0_i32_0 : i32, i32
  }
  func.func @transform_3(%arg0: i32) -> (i32, i32) {
    %c0_i32 = arith.constant 0 : i32
    %c0_i32_0 = arith.constant 0 : i32
    %c0_i32_1 = arith.constant 0 : i32
    return %c0_i32, %c0_i32_0 : i32, i32
  }
  func.func @transform_4(%arg0: i32) -> (i32, i32) {
    %c0_i32 = arith.constant 0 : i32
    %c0_i32_0 = arith.constant 0 : i32
    %c0_i32_1 = arith.constant 0 : i32
    return %c0_i32, %c0_i32_0 : i32, i32
  }
  func.func @transform_5(%arg0: i32) -> (i32, i32) {
    %c0_i32 = arith.constant 0 : i32
    %c0_i32_0 = arith.constant 0 : i32
    %c0_i32_1 = arith.constant 0 : i32
    return %c0_i32, %c0_i32_0 : i32, i32
  }
}

module attributes {stable_mosaic.version = 11 : i64} {
  func.func @_fc_l2_kernel(%arg0: i32, %arg1: memref<2x256xbf16, #tpu.memory_space<vmem>>, %arg2: memref<256x64xbf16, #tpu.memory_space<vmem>>, %arg3: memref<1x64xf32, #tpu.memory_space<vmem>>, %arg4: memref<2x64xf32, #tpu.memory_space<vmem>>) attributes {dimension_semantics = [#tpu.dimension_semantics<arbitrary>], iteration_bounds = array<i64: 1>, scalar_prefetch = 0 : i64, scratch_operands = 0 : i64, tpu.core_type = #tpu.core_type<tc>, window_params = [{pipeline_mode = #tpu.pipeline_mode<synchronous>, transform_indices = @transform_0, window_bounds = array<i64: 2, 256>}, {pipeline_mode = #tpu.pipeline_mode<synchronous>, transform_indices = @transform_1, window_bounds = array<i64: 256, 64>}, {pipeline_mode = #tpu.pipeline_mode<synchronous>, transform_indices = @transform_2, window_bounds = array<i64: 1, 64>}, {pipeline_mode = #tpu.pipeline_mode<synchronous>, transform_indices = @transform_3, window_bounds = array<i64: 2, 64>}]} {
    %c0 = arith.constant 0 : index
    %c0_0 = arith.constant 0 : index
    %0 = vector.load %arg1[%c0, %c0_0] : memref<2x256xbf16, #tpu.memory_space<vmem>>, vector<2x256xbf16>
    %c0_1 = arith.constant 0 : index
    %c0_2 = arith.constant 0 : index
    %1 = vector.load %arg2[%c0_1, %c0_2] : memref<256x64xbf16, #tpu.memory_space<vmem>>, vector<256x64xbf16>
    %cst = arith.constant dense<0.000000e+00> : vector<2x64xf32>
    %2 = tpu.matmul %0, %1, %cst {dimension_numbers = #tpu.dot_dimension_numbers<[1], [0], [0], [1], [0, 0, 1, 1], [], []>} : vector<2x256xbf16>, vector<256x64xbf16>, vector<2x64xf32> -> vector<2x64xf32>
    %c0_3 = arith.constant 0 : index
    %c0_4 = arith.constant 0 : index
    %3 = vector.load %arg3[%c0_3, %c0_4] : memref<1x64xf32, #tpu.memory_space<vmem>>, vector<1x64xf32>
    %4 = vector.broadcast %3 : vector<1x64xf32> to vector<2x64xf32>
    %5 = arith.addf %2, %4 : vector<2x64xf32>
    %6 = arith.mulf %5, %5 : vector<2x64xf32>
    %cst_5 = arith.constant dense<0.000000e+00> : vector<2xf32>
    %7 = vector.multi_reduction <add>, %6, %cst_5 [1] : vector<2x64xf32> to vector<2xf32>
    %8 = vector.shape_cast %7 : vector<2xf32> to vector<2x1xf32>
    %cst_6 = arith.constant 1.000000e-24 : f32
    %9 = vector.broadcast %cst_6 : f32 to vector<2x1xf32>
    %10 = arith.maximumf %8, %9 : vector<2x1xf32>
    %11 = math.rsqrt %10 : vector<2x1xf32>
    %12 = vector.broadcast %11 : vector<2x1xf32> to vector<2x64xf32>
    %13 = arith.mulf %5, %12 : vector<2x64xf32>
    %c0_7 = arith.constant 0 : index
    %c0_8 = arith.constant 0 : index
    %14 = vector.load %arg4[%c0_7, %c0_8] : memref<2x64xf32, #tpu.memory_space<vmem>>, vector<2x64xf32>
    tpu.vector_store %arg4[%c0_7, %c0_8], %13 {strides = array<i32>} : memref<2x64xf32, #tpu.memory_space<vmem>>, vector<2x64xf32>,
    return
  }
  func.func @transform_0(%arg0: i32) -> (i32, i32) {
    %c0_i32 = arith.constant 0 : i32
    %c0_i32_0 = arith.constant 0 : i32
    %c0_i32_1 = arith.constant 0 : i32
    return %c0_i32, %c0_i32_0 : i32, i32
  }
  func.func @transform_1(%arg0: i32) -> (i32, i32) {
    %c0_i32 = arith.constant 0 : i32
    %c0_i32_0 = arith.constant 0 : i32
    %c0_i32_1 = arith.constant 0 : i32
    return %c0_i32, %c0_i32_0 : i32, i32
  }
  func.func @transform_2(%arg0: i32) -> (i32, i32) {
    %c0_i32 = arith.constant 0 : i32
    %c0_i32_0 = arith.constant 0 : i32
    %c0_i32_1 = arith.constant 0 : i32
    return %c0_i32, %c0_i32_0 : i32, i32
  }
  func.func @transform_3(%arg0: i32) -> (i32, i32) {
    %c0_i32 = arith.constant 0 : i32
    %c0_i32_0 = arith.constant 0 : i32
    %c0_i32_1 = arith.constant 0 : i32
    return %c0_i32, %c0_i32_0 : i32, i32
  }
}

</mosaic_0001>

<bundles_post_ra>
// kernel: forward.13
= control target key start
LH: loop header
LB: loop body
LE: loop exit
PB: predicated region body
PF: predicated region fallthrough
CT: control target
= control target key end

     0   :  { %s2529_s15 = smov 0   ;;  %s2531_s16 = smov 0   ;;  %s3389_s0 = inlined_call_operand.vmem [shape: bf16[8,27], index: 0, kind: input, shape index: {}]   ;;  %s3390_s1 = inlined_call_operand.vmem [shape: bf16[4,27,2048], index: 1, kind: input, shape index: {}]   ;;  %s3391_s2 = inlined_call_operand.vmem [shape: f32[8,1], index: 2, kind: input, shape index: {}]   ;;  %s3392_s3 = inlined_call_operand.vmem [shape: f32[8,1], index: 3, kind: input, shape index: {}]   ;;  %s3393_s4 = inlined_call_operand.vmem [shape: bf16[8,2048], index: 4, kind: output, shape index: {}]  }
   0x1   :  { %s2533_s17 = smov 0  }
   0x2 LB: > { %s2173_s18 = sadd.s32 4294967295, %s2500_s17   ;;  %s2546_s19 = sadd.s32 1, %s2500_s17   ;;  %s2500_s17 = sphi %s2533_s17, %s3405_s17   ;;  %s2496_s16 = sphi %s2531_s16, %s3404_s16   ;;  %s2492_s15 = sphi %s2529_s15, %s3403_s15  }
   0x3   : > { %s39_s20 = ssub.s32 %s2500_s17, %s2546_s19  ;;  %s42_s21 = sadd.s32 1, %s2496_s16 }
   0x4   : > { %p40_p0 = scmp.eq.s32.totalorder %s39_s20, 0  ;;  %p49_p1 = scmp.ne.s32.totalorder %s2496_s16, %s2492_s15 }
   0x5   : > { %p50_p2 = scmp.eq.s32.totalorder %s2500_s17, 0  ;;  %p2176_p4 = scmp.ge.s32.totalorder %s2500_s17, 2 }
   0x6   : > { %s2555_s22 = scalar_select %p40_p0, %s2496_s16, %s42_s21  }
   0x7   : > { %p51_p3 = por %p50_p2, %p49_p1  ;;  %152 = sbr.rel (%p2176_p4) target bundleno = 50 (0x32), region = 28 }
   0xe   : > { %155 = sbr.rel (!%p51_p3) target bundleno = 50 (0x32), region = 32  ;;  %s157_s23 = sand.u32 (%p51_p3), 1, %s2496_s16  }
   0xf   : > { %s2318_s24 = sshll.u32 (%p51_p3), %s2500_s17, 5  ;;  %s2177_s25 = sshll.u32 (%p51_p3), %s157_s23, 9 }
  0x10   : > { %s2563_s28 = scalar_lea.vmem (%p51_p3), %s3390_s1, %s2318_s24  ;;  %s2568_s29 = scalar_lea.vmem (%p51_p3), [#allocation2], %s2177_s25 }
  0x11   : > { %v175_v0 = vld [vmem:[%s2563_s28] sm:$0xff] (%p51_p3)  ;;  %v177_v1 = vld [vmem:[%s2563_s28 + $0x8] sm:$0xff] (%p51_p3)  ;;  %v179_v2 = vld [vmem:[%s2563_s28 + $0x10] sm:$0xff] (%p51_p3) }
  0x12   : > { %176 = vst [vmem:[%s2568_s29] sm:$0xff] (%p51_p3), %v175_v0  ;;  %178 = vst [vmem:[%s2568_s29 + $0x8] sm:$0xff] (%p51_p3), %v177_v1  ;;  %v181_v3 = vld [vmem:[%s2563_s28 + $0x18] sm:$0xff] (%p51_p3)  ;;  %v183_v4 = vld [vmem:[%s2563_s28 + $0x40] sm:$0xff] (%p51_p3) }
  0x13   : > { %180 = vst [vmem:[%s2568_s29 + $0x10] sm:$0xff] (%p51_p3), %v179_v2  ;;  %v185_v5 = vld [vmem:[%s2563_s28 + $0x48] sm:$0xff] (%p51_p3)  ;;  %182 = vst [vmem:[%s2568_s29 + $0x18] sm:$0xff] (%p51_p3), %v181_v3  ;;  %v187_v6 = vld [vmem:[%s2563_s28 + $0x50] sm:$0xff] (%p51_p3) }
  0x14   : > { %184 = vst [vmem:[%s2568_s29 + $0x20] sm:$0xff] (%p51_p3), %v183_v4  ;;  %186 = vst [vmem:[%s2568_s29 + $0x28] sm:$0xff] (%p51_p3), %v185_v5  ;;  %v189_v7 = vld [vmem:[%s2563_s28 + $0x58] sm:$0xff] (%p51_p3)  ;;  %v191_v8 = vld [vmem:[%s2563_s28 + $0x80] sm:$0xff] (%p51_p3) }
  0x15   : > { %188 = vst [vmem:[%s2568_s29 + $0x30] sm:$0xff] %v187_v6  ;;  %190 = vst [vmem:[%s2568_s29 + $0x38] sm:$0xff] %v189_v7  ;;  %v193_v9 = vld [vmem:[%s2563_s28 + $0x88] sm:$0xff]  ;;  %v195_v10 = vld [vmem:[%s2563_s28 + $0x90] sm:$0xff] }
  0x16   : > { %192 = vst [vmem:[%s2568_s29 + $0x40] sm:$0xff] %v191_v8  ;;  %v197_v11 = vld [vmem:[%s2563_s28 + $0x98] sm:$0xff]  ;;  %194 = vst [vmem:[%s2568_s29 + $0x48] sm:$0xff] %v193_v9  ;;  %v199_v12 = vld [vmem:[%s2563_s28 + $0xc0] sm:$0xff] }
  0x17   : > { %196 = vst [vmem:[%s2568_s29 + $0x50] sm:$0xff] %v195_v10  ;;  %198 = vst [vmem:[%s2568_s29 + $0x58] sm:$0xff] %v197_v11  ;;  %v201_v13 = vld [vmem:[%s2563_s28 + $0xc8] sm:$0xff]  ;;  %v203_v14 = vld [vmem:[%s2563_s28 + $0xd0] sm:$0xff] }
  0x18   : > { %200 = vst [vmem:[%s2568_s29 + $0x60] sm:$0xff] %v199_v12  ;;  %202 = vst [vmem:[%s2568_s29 + $0x68] sm:$0xff] %v201_v13  ;;  %v205_v15 = vld [vmem:[%s2563_s28 + $0xd8] sm:$0xff]  ;;  %v207_v16 = vld [vmem:[%s2563_s28 + $0x100] sm:$0xff] }
  0x19   : > { %204 = vst [vmem:[%s2568_s29 + $0x70] sm:$0xff] %v203_v14  ;;  %v209_v17 = vld [vmem:[%s2563_s28 + $0x108] sm:$0xff]  ;;  %206 = vst [vmem:[%s2568_s29 + $0x78] sm:$0xff] %v205_v15  ;;  %v211_v18 = vld [vmem:[%s2563_s28 + $0x110] sm:$0xff] }
  0x1a   : > { %208 = vst [vmem:[%s2568_s29 + $0x80] sm:$0xff] %v207_v16  ;;  %210 = vst [vmem:[%s2568_s29 + $0x88] sm:$0xff] %v209_v17  ;;  %v213_v19 = vld [vmem:[%s2563_s28 + $0x118] sm:$0xff]  ;;  %v215_v20 = vld [vmem:[%s2563_s28 + $0x140] sm:$0xff] }
  0x1b   : > { %212 = vst [vmem:[%s2568_s29 + $0x90] sm:$0xff] %v211_v18  ;;  %214 = vst [vmem:[%s2568_s29 + $0x98] sm:$0xff] %v213_v19  ;;  %v217_v21 = vld [vmem:[%s2563_s28 + $0x148] sm:$0xff]  ;;  %v219_v22 = vld [vmem:[%s2563_s28 + $0x150] sm:$0xff] }
  0x1c   : > { %216 = vst [vmem:[%s2568_s29 + $0xa0] sm:$0xff] %v215_v20  ;;  %v221_v23 = vld [vmem:[%s2563_s28 + $0x158] sm:$0xff]  ;;  %218 = vst [vmem:[%s2568_s29 + $0xa8] sm:$0xff] %v217_v21  ;;  %v223_v24 = vld [vmem:[%s2563_s28 + $0x180] sm:$0xff] }
  0x1d   : > { %220 = vst [vmem:[%s2568_s29 + $0xb0] sm:$0xff] %v219_v22  ;;  %222 = vst [vmem:[%s2568_s29 + $0xb8] sm:$0xff] %v221_v23  ;;  %v225_v25 = vld [vmem:[%s2563_s28 + $0x188] sm:$0xff]  ;;  %v227_v26 = vld [vmem:[%s2563_s28 + $0x190] sm:$0xff] }
  0x1e   : > { %224 = vst [vmem:[%s2568_s29 + $0xc0] sm:$0xff] %v223_v24  ;;  %226 = vst [vmem:[%s2568_s29 + $0xc8] sm:$0xff] %v225_v25  ;;  %v229_v27 = vld [vmem:[%s2563_s28 + $0x198] sm:$0xff]  ;;  %v231_v28 = vld [vmem:[%s2563_s28 + $0x1c0] sm:$0xff] }
  0x1f   : > { %228 = vst [vmem:[%s2568_s29 + $0xd0] sm:$0xff] %v227_v26  ;;  %v233_v29 = vld [vmem:[%s2563_s28 + $0x1c8] sm:$0xff]  ;;  %230 = vst [vmem:[%s2568_s29 + $0xd8] sm:$0xff] %v229_v27  ;;  %v235_v30 = vld [vmem:[%s2563_s28 + $0x1d0] sm:$0xff] }
  0x20   : > { %232 = vst [vmem:[%s2568_s29 + $0xe0] sm:$0xff] %v231_v28  ;;  %234 = vst [vmem:[%s2568_s29 + $0xe8] sm:$0xff] %v233_v29  ;;  %v237_v31 = vld [vmem:[%s2563_s28 + $0x1d8] sm:$0xff]  ;;  %v239_v32 = vld [vmem:[%s2563_s28 + $0x200] sm:$0xff] }
  0x21   : > { %236 = vst [vmem:[%s2568_s29 + $0xf0] sm:$0xff] %v235_v30  ;;  %238 = vst [vmem:[%s2568_s29 + $0xf8] sm:$0xff] %v237_v31  ;;  %v241_v33 = vld [vmem:[%s2563_s28 + $0x208] sm:$0xff]  ;;  %v243_v34 = vld [vmem:[%s2563_s28 + $0x210] sm:$0xff] }
  0x22   : > { %240 = vst [vmem:[%s2568_s29 + $0x100] sm:$0xff] %v239_v32  ;;  %v245_v35 = vld [vmem:[%s2563_s28 + $0x218] sm:$0xff]  ;;  %242 = vst [vmem:[%s2568_s29 + $0x108] sm:$0xff] %v241_v33  ;;  %v247_v36 = vld [vmem:[%s2563_s28 + $0x240] sm:$0xff] }
  0x23   : > { %244 = vst [vmem:[%s2568_s29 + $0x110] sm:$0xff] %v243_v34  ;;  %246 = vst [vmem:[%s2568_s29 + $0x118] sm:$0xff] %v245_v35  ;;  %v249_v37 = vld [vmem:[%s2563_s28 + $0x248] sm:$0xff]  ;;  %v251_v38 = vld [vmem:[%s2563_s28 + $0x250] sm:$0xff] }
  0x24   : > { %248 = vst [vmem:[%s2568_s29 + $0x120] sm:$0xff] %v247_v36  ;;  %250 = vst [vmem:[%s2568_s29 + $0x128] sm:$0xff] %v249_v37  ;;  %v253_v39 = vld [vmem:[%s2563_s28 + $0x258] sm:$0xff]  ;;  %v255_v40 = vld [vmem:[%s2563_s28 + $0x280] sm:$0xff] }
  0x25   : > { %252 = vst [vmem:[%s2568_s29 + $0x130] sm:$0xff] %v251_v38  ;;  %v257_v41 = vld [vmem:[%s2563_s28 + $0x288] sm:$0xff]  ;;  %254 = vst [vmem:[%s2568_s29 + $0x138] sm:$0xff] %v253_v39  ;;  %v259_v42 = vld [vmem:[%s2563_s28 + $0x290] sm:$0xff] }
  0x26   : > { %256 = vst [vmem:[%s2568_s29 + $0x140] sm:$0xff] %v255_v40  ;;  %258 = vst [vmem:[%s2568_s29 + $0x148] sm:$0xff] %v257_v41  ;;  %v261_v43 = vld [vmem:[%s2563_s28 + $0x298] sm:$0xff]  ;;  %v263_v44 = vld [vmem:[%s2563_s28 + $0x2c0] sm:$0xff] }
  0x27   : > { %260 = vst [vmem:[%s2568_s29 + $0x150] sm:$0xff] %v259_v42  ;;  %262 = vst [vmem:[%s2568_s29 + $0x158] sm:$0xff] %v261_v43  ;;  %v265_v45 = vld [vmem:[%s2563_s28 + $0x2c8] sm:$0xff]  ;;  %v267_v46 = vld [vmem:[%s2563_s28 + $0x2d0] sm:$0xff] }
  0x28   : > { %264 = vst [vmem:[%s2568_s29 + $0x160] sm:$0xff] %v263_v44  ;;  %v269_v47 = vld [vmem:[%s2563_s28 + $0x2d8] sm:$0xff]  ;;  %266 = vst [vmem:[%s2568_s29 + $0x168] sm:$0xff] %v265_v45  ;;  %v271_v48 = vld [vmem:[%s2563_s28 + $0x300] sm:$0xff] }
  0x29   : > { %268 = vst [vmem:[%s2568_s29 + $0x170] sm:$0xff] %v267_v46  ;;  %270 = vst [vmem:[%s2568_s29 + $0x178] sm:$0xff] %v269_v47  ;;  %v273_v49 = vld [vmem:[%s2563_s28 + $0x308] sm:$0xff]  ;;  %v275_v50 = vld [vmem:[%s2563_s28 + $0x310] sm:$0xff] }
  0x2a   : > { %272 = vst [vmem:[%s2568_s29 + $0x180] sm:$0xff] %v271_v48  ;;  %274 = vst [vmem:[%s2568_s29 + $0x188] sm:$0xff] %v273_v49  ;;  %v277_v51 = vld [vmem:[%s2563_s28 + $0x318] sm:$0xff]  ;;  %v279_v52 = vld [vmem:[%s2563_s28 + $0x340] sm:$0xff] }
  0x2b   : > { %276 = vst [vmem:[%s2568_s29 + $0x190] sm:$0xff] %v275_v50  ;;  %v281_v53 = vld [vmem:[%s2563_s28 + $0x348] sm:$0xff]  ;;  %278 = vst [vmem:[%s2568_s29 + $0x198] sm:$0xff] %v277_v51  ;;  %v283_v54 = vld [vmem:[%s2563_s28 + $0x350] sm:$0xff] }
  0x2c   : > { %280 = vst [vmem:[%s2568_s29 + $0x1a0] sm:$0xff] %v279_v52  ;;  %282 = vst [vmem:[%s2568_s29 + $0x1a8] sm:$0xff] %v281_v53  ;;  %v285_v55 = vld [vmem:[%s2563_s28 + $0x358] sm:$0xff]  ;;  %v287_v56 = vld [vmem:[%s2563_s28 + $0x380] sm:$0xff] }
  0x2d   : > { %284 = vst [vmem:[%s2568_s29 + $0x1b0] sm:$0xff] %v283_v54  ;;  %286 = vst [vmem:[%s2568_s29 + $0x1b8] sm:$0xff] %v285_v55  ;;  %v289_v57 = vld [vmem:[%s2563_s28 + $0x388] sm:$0xff]  ;;  %v291_v58 = vld [vmem:[%s2563_s28 + $0x390] sm:$0xff] }
  0x2e   : > { %288 = vst [vmem:[%s2568_s29 + $0x1c0] sm:$0xff] %v287_v56  ;;  %v293_v59 = vld [vmem:[%s2563_s28 + $0x398] sm:$0xff]  ;;  %290 = vst [vmem:[%s2568_s29 + $0x1c8] sm:$0xff] %v289_v57  ;;  %v295_v60 = vld [vmem:[%s2563_s28 + $0x3c0] sm:$0xff] }
  0x2f   : > { %292 = vst [vmem:[%s2568_s29 + $0x1d0] sm:$0xff] %v291_v58  ;;  %294 = vst [vmem:[%s2568_s29 + $0x1d8] sm:$0xff] %v293_v59  ;;  %v297_v61 = vld [vmem:[%s2563_s28 + $0x3c8] sm:$0xff]  ;;  %v299_v62 = vld [vmem:[%s2563_s28 + $0x3d0] sm:$0xff] }
  0x30   : > { %296 = vst [vmem:[%s2568_s29 + $0x1e0] sm:$0xff] %v295_v60  ;;  %298 = vst [vmem:[%s2568_s29 + $0x1e8] sm:$0xff] %v297_v61  ;;  %v301_v63 = vld [vmem:[%s2563_s28 + $0x3d8] sm:$0xff] }
  0x31   : > { %300 = vst [vmem:[%s2568_s29 + $0x1f0] sm:$0xff] %v299_v62  ;;  %302 = vst [vmem:[%s2568_s29 + $0x1f8] sm:$0xff] %v301_v63 }
  0x32 PF: > { %p2180_p5 = scmp.ge.s32.totalorder %s2500_s17, 1  ;;  %p307_p6 = scmp.lt.s32.totalorder %s2500_s17, 3 }
  0x34   : > { %p308_p7 = pnand %p2180_p5, %p307_p6 }
  0x36   : > { %311 = sbr.rel (%p308_p7) target bundleno = 470 (0x1d6), region = 55 }
  0x3d   : > { %s314_s30 = sand.u32 1, %s2492_s15   ;;  %vm440_vm0 = vcmask 1044480   ;;  %v632_v0 = vld [vmem:[%s3391_s2] sm:$0xff]  ;;  %vm441_vm1 = vcmask 1045504   ;;  %v2502_v1 = vmov 65535   ;;  %v2503_v3 = vmov 0  }
  0x3e   : > { %s2181_s7 = sshll.u32 %s314_s30, 9  ;;  %v442_v2 = vsel %vm440_vm0, 4294967295, %v2502_v1  ;;  %500 = vmatprep.mubr.bf16.mxu0 %v2503_v3  ;;  %541 = vmatprep.mubr.bf16.mxu1 %v2503_v3  ;;  %v2732_v37 = vld [vmem:[%s3389_s0] sm:$0xf]  ;;  %vm436_vm2 = vcmask 220160   ;;  %s2182_s13 = sshll.u32 %s2173_s18, 3 }
  0x3f   : > { %2349 = vset.pattern.permute.xlu0 %v2503_v3  ;;  %s2704_s8 = scalar_lea.vmem [#allocation2], %s2181_s7  ;;  %v2713_v12 = vsel %vm441_vm1, %v442_v2, 0  ;;  %p341_p8 = scmp.lt.s32.totalorder %s2182_s13, 15 }
  0x40   : > { %v348_v4 = vld [vmem:[%s2704_s8] sm:$0xff]  ;;  %v349_v6 = vld [vmem:[%s2704_s8 + $0x8] sm:$0xff]  ;;  %764 = vperm.xlu0 %2349, %v632_v0   ;;  %v350_v19 = vld [vmem:[%s2704_s8 + $0x10] sm:$0xff] }
  0x41   : > { %v352_v5 = vld [vmem:[%s2704_s8 + $0x20] sm:$0xff]  ;;  %v353_v8 = vld [vmem:[%s2704_s8 + $0x28] sm:$0xff]  ;;  %v354_v22 = vld [vmem:[%s2704_s8 + $0x30] sm:$0xff]  ;;  %s3407_s13 = smov (!%p341_p8, %s2182_s13), 15 }
  0x42   : > { %v2185_v7 = vcombine.high %v348_v4, %v352_v5  ;;  %v2184_v9 = vcombine.low %v348_v4, %v352_v5  ;;  %v356_v10 = vld [vmem:[%s2704_s8 + $0x40] sm:$0xff]  ;;  %v2187_v13 = vcombine.high %v349_v6, %v353_v8  ;;  %v2186_v14 = vcombine.low %v349_v6, %v353_v8  ;;  %v357_v16 = vld [vmem:[%s2704_s8 + $0x48] sm:$0xff]  ;;  %v351_v23 = vld [vmem:[%s2704_s8 + $0x18] sm:$0xff]  ;;  %s2183_s14 = sshll.u32 %s3407_s13, 2 }
  0x43   : > { %v360_v11 = vld [vmem:[%s2704_s8 + $0x60] sm:$0x33]  ;;  %v361_v17 = vld [vmem:[%s2704_s8 + $0x68] sm:$0x33]  ;;  %v355_v24 = vld [vmem:[%s2704_s8 + $0x38] sm:$0xff]  ;;  %v2189_v32 = vcombine.high %v350_v19, %v354_v22  ;;  %v2188_v38 = vcombine.low %v350_v19, %v354_v22  ;;  %s3345_s18 = scalar_lea.vmem %s3393_s4, %s2183_s14 }
  0x44   : > { %v2193_v15 = vcombine.high %v356_v10, %v360_v11  ;;  %v2192_v18 = vcombine.low %v356_v10, %v360_v11  ;;  %468 = vmatprep.subr.bf16.mxu0 %v2185_v7  ;;  %v2195_v20 = vcombine.high %v357_v16, %v361_v17  ;;  %v2194_v21 = vcombine.low %v357_v16, %v361_v17  ;;  %v358_v27 = vld [vmem:[%s2704_s8 + $0x50] sm:$0xff]  ;;  %v359_v29 = vld [vmem:[%s2704_s8 + $0x58] sm:$0xff]  ;;  %v2204_v43 = vld [vmem:[%s2704_s8 + $0x80] sm:$0xff] }
  0x45   : > { %509 = vmatprep.subr.bf16.mxu1 %v2187_v13  ;;  %469 = vmatpush1.bf16.msra.mxu0 %v2184_v9  ;;  %v362_v28 = vld [vmem:[%s2704_s8 + $0x70] sm:$0x33]  ;;  %v363_v33 = vld [vmem:[%s2704_s8 + $0x78] sm:$0x33]  ;;  %v2191_v34 = vcombine.high %v351_v23, %v355_v24  ;;  %v2190_v40 = vcombine.low %v351_v23, %v355_v24  ;;  %v2208_v44 = vld [vmem:[%s2704_s8 + $0xa0] sm:$0xff] }
  0x46   : > { %v448_v25 = vand.u32 %v2193_v15, %v2713_v12  ;;  %v445_v26 = vand.u32 %v2192_v18, %v2713_v12  ;;  %510 = vmatpush1.bf16.msra.mxu1 %v2186_v14  ;;  %v454_v30 = vand.u32 %v2195_v20, %v2713_v12  ;;  %v451_v31 = vand.u32 %v2194_v21, %v2713_v12  ;;  %v2205_v46 = vld [vmem:[%s2704_s8 + $0x88] sm:$0xff]  ;;  %v2212_v47 = vld [vmem:[%s2704_s8 + $0xc0] sm:$0xff]  ;;  %v2206_v63 = vld [vmem:[%s2704_s8 + $0x90] sm:$0xff] }
  0x47   : > { %v2197_v35 = vcombine.high %v358_v27, %v362_v28  ;;  %v2199_v36 = vcombine.high %v359_v29, %v363_v33  ;;  %v2196_v39 = vcombine.low %v358_v27, %v362_v28  ;;  %v2198_v42 = vcombine.low %v359_v29, %v363_v33  ;;  %v2216_v48 = vld [vmem:[%s2704_s8 + $0xe0] sm:$0x33]  ;;  %v2209_v49 = vld [vmem:[%s2704_s8 + $0xa8] sm:$0xff]  ;;  %v2210_v0 = vld [vmem:[%s2704_s8 + $0xb0] sm:$0xff] }
  0x48   : > { %470 = vmatprep.subr.bf16.mxu0 %v448_v25  ;;  %511 = vmatprep.subr.bf16.mxu1 %v454_v30  ;;  %v2213_v50 = vld [vmem:[%s2704_s8 + $0xc8] sm:$0xff]  ;;  %v2221_v54 = vcombine.high %v2204_v43, %v2208_v44  ;;  %v2229_v55 = vcombine.high %v2212_v47, %v2216_v48  ;;  %v2223_v56 = vcombine.high %v2205_v46, %v2209_v49  ;;  %v2207_v2 = vld [vmem:[%s2704_s8 + $0x98] sm:$0xff]  ;;  %v2214_v4 = vld [vmem:[%s2704_s8 + $0xd0] sm:$0xff] }
  0x49   : > { %471 = vmatpush1.bf16.msra.mxu0 %v445_v26  ;;  %v460_v41 = vand.u32 %v2197_v35, %v2713_v12  ;;  %v466_v45 = vand.u32 %v2199_v36, %v2713_v12  ;;  %v2217_v51 = vld [vmem:[%s2704_s8 + $0xe8] sm:$0x33]  ;;  %v457_v52 = vand.u32 %v2196_v39, %v2713_v12  ;;  %v463_v53 = vand.u32 %v2198_v42, %v2713_v12  ;;  %v2218_v5 = vld [vmem:[%s2704_s8 + $0xf0] sm:$0x33]  ;;  %v2211_v6 = vld [vmem:[%s2704_s8 + $0xb8] sm:$0xff] }
  0x4a   : > { %512 = vmatpush1.bf16.msra.mxu1 %v451_v31  ;;  %550 = vmatprep.subr.bf16.mxu0 %v2189_v32  ;;  %v2231_v57 = vcombine.high %v2213_v50, %v2217_v51  ;;  %v2220_v58 = vcombine.low %v2204_v43, %v2208_v44  ;;  %v2228_v59 = vcombine.low %v2212_v47, %v2216_v48  ;;  %v2215_v7 = vld [vmem:[%s2704_s8 + $0xd8] sm:$0xff]  ;;  %v633_v18 = vld [vmem:[%s3392_s3] sm:$0xff]  ;;  %v2241_v25 = vld [vmem:[%s2704_s8 + $0x108] sm:$0xff] }
  0x4b   : > { %591 = vmatprep.subr.bf16.mxu1 %v2191_v34  ;;  %v2222_v60 = vcombine.low %v2205_v46, %v2209_v49  ;;  %v881_v61 = vand.u32 %v2229_v55, %v2713_v12  ;;  %v2230_v62 = vcombine.low %v2213_v50, %v2217_v51  ;;  %v2219_v8 = vld [vmem:[%s2704_s8 + $0xf8] sm:$0x33]  ;;  %v2225_v11 = vcombine.high %v2206_v63, %v2210_v0  ;;  %v2240_v22 = vld [vmem:[%s2704_s8 + $0x100] sm:$0xff]  ;;  %v2245_v28 = vld [vmem:[%s2704_s8 + $0x128] sm:$0xff] }
  0x4c   : > { %2200 = vmatmul.mubr.msk.bf16.vlgmr.msra.gmra.mrb[0].mxu0 %vm436_vm2, %v2732_v37  ;;  %v887_v1 = vand.u32 %v2231_v57, %v2713_v12  ;;  %v878_v9 = vand.u32 %v2228_v59, %v2713_v12  ;;  %v2233_v13 = vcombine.high %v2214_v4, %v2218_v5  ;;  %v2227_v14 = vcombine.high %v2207_v2, %v2211_v6  ;;  %v2244_v23 = vld [vmem:[%s2704_s8 + $0x120] sm:$0xff]  ;;  %v2249_v29 = vld [vmem:[%s2704_s8 + $0x148] sm:$0xff]  ;;  %v2242_v43 = vld [vmem:[%s2704_s8 + $0x110] sm:$0xff] }
  0x4d   : > { %2201 = vmatmul.mubr.msk.bf16.vlgmr.msra.gmra.mrb[0].mxu1 %vm436_vm2, %v2732_v37  ;;  %551 = vmatpush1.bf16.msra.mxu0 %v2188_v38  ;;  %v884_v10 = vand.u32 %v2230_v62, %v2713_v12  ;;  %v2235_v15 = vcombine.high %v2215_v7, %v2219_v8  ;;  %v2224_v16 = vcombine.low %v2206_v63, %v2210_v0  ;;  %v2248_v26 = vld [vmem:[%s2704_s8 + $0x140] sm:$0xff]  ;;  %v2253_v30 = vld [vmem:[%s2704_s8 + $0x168] sm:$0x33]  ;;  %v2246_v44 = vld [vmem:[%s2704_s8 + $0x130] sm:$0xff] }
  0x4e   : > { %592 = vmatpush1.bf16.msra.mxu1 %v2190_v40  ;;  %552 = vmatprep.subr.bf16.mxu0 %v460_v41  ;;  %v2232_v17 = vcombine.low %v2214_v4, %v2218_v5  ;;  %v2226_v19 = vcombine.low %v2207_v2, %v2211_v6  ;;  %v893_v20 = vand.u32 %v2233_v13, %v2713_v12  ;;  %v2252_v27 = vld [vmem:[%s2704_s8 + $0x160] sm:$0x33]  ;;  %v2243_v46 = vld [vmem:[%s2704_s8 + $0x118] sm:$0xff]  ;;  %v2250_v47 = vld [vmem:[%s2704_s8 + $0x150] sm:$0xff] }
  0x4f   : > { %593 = vmatprep.subr.bf16.mxu1 %v466_v45  ;;  %582 = vmatprep.mubr.bf16.mxu0 %v2503_v3  ;;  %v2234_v21 = vcombine.low %v2215_v7, %v2219_v8  ;;  %v899_v24 = vand.u32 %v2235_v15, %v2713_v12  ;;  %v2257_v33 = vcombine.high %v2240_v22, %v2244_v23  ;;  %v2254_v48 = vld [vmem:[%s2704_s8 + $0x170] sm:$0x33]  ;;  %v2247_v49 = vld [vmem:[%s2704_s8 + $0x138] sm:$0xff]  ;;  %v2276_v63 = vld [vmem:[%s2704_s8 + $0x180] sm:$0xff] }
  0x50   : > { %623 = vmatprep.mubr.bf16.mxu1 %v2503_v3  ;;  %777 = vperm.xlu0 %2349, %v633_v18   ;;  %v890_v31 = vand.u32 %v2232_v17, %v2713_v12  ;;  %v2265_v34 = vcombine.high %v2248_v26, %v2252_v27  ;;  %v2259_v35 = vcombine.high %v2241_v25, %v2245_v28  ;;  %v2251_v50 = vld [vmem:[%s2704_s8 + $0x158] sm:$0xff]  ;;  %v2280_v0 = vld [vmem:[%s2704_s8 + $0x1a0] sm:$0xff]  ;;  %v2277_v2 = vld [vmem:[%s2704_s8 + $0x188] sm:$0xff] }
  0x51   : > { %553 = vmatpush1.bf16.msra.mxu0 %v457_v52  ;;  %v896_v32 = vand.u32 %v2234_v21, %v2713_v12  ;;  %v2267_v36 = vcombine.high %v2249_v29, %v2253_v30  ;;  %v2256_v38 = vcombine.low %v2240_v22, %v2244_v23  ;;  %v2264_v39 = vcombine.low %v2248_v26, %v2252_v27  ;;  %v2255_v51 = vld [vmem:[%s2704_s8 + $0x178] sm:$0x33]  ;;  %v2284_v4 = vld [vmem:[%s2704_s8 + $0x1c0] sm:$0xff]  ;;  %v2281_v6 = vld [vmem:[%s2704_s8 + $0x1a8] sm:$0xff] }
  0x52   : > { %594 = vmatpush1.bf16.msra.mxu1 %v463_v53  ;;  %901 = vmatprep.subr.bf16.mxu0 %v2221_v54  ;;  %v2258_v40 = vcombine.low %v2241_v25, %v2245_v28  ;;  %v1310_v41 = vand.u32 %v2265_v34, %v2713_v12  ;;  %v2266_v42 = vcombine.low %v2249_v29, %v2253_v30  ;;  %v2288_v5 = vld [vmem:[%s2704_s8 + $0x1e0] sm:$0x33]  ;;  %v2285_v7 = vld [vmem:[%s2704_s8 + $0x1c8] sm:$0xff]  ;;  %v2278_v21 = vld [vmem:[%s2704_s8 + $0x190] sm:$0xff] }
  0x53   : > { %942 = vmatprep.subr.bf16.mxu1 %v2223_v56  ;;  %v1316_v45 = vand.u32 %v2267_v36, %v2713_v12  ;;  %v1307_v52 = vand.u32 %v2264_v39, %v2713_v12  ;;  %v2261_v54 = vcombine.high %v2242_v43, %v2246_v44  ;;  %v2269_v55 = vcombine.high %v2250_v47, %v2254_v48  ;;  %v2289_v8 = vld [vmem:[%s2704_s8 + $0x1e8] sm:$0x33]  ;;  %v2282_v22 = vld [vmem:[%s2704_s8 + $0x1b0] sm:$0xff]  ;;  %v2283_v27 = vld [vmem:[%s2704_s8 + $0x1b8] sm:$0xff] }
  0x54   : > { %2202 = vmatmul.mubr.msk.bf16.vlgmr.msra.gmra.mrb[4].mxu0 %vm436_vm2, %v2732_v37  ;;  %v1313_v53 = vand.u32 %v2266_v42, %v2713_v12  ;;  %v2263_v56 = vcombine.high %v2243_v46, %v2247_v49  ;;  %v2271_v57 = vcombine.high %v2251_v50, %v2255_v51  ;;  %v2268_v59 = vcombine.low %v2250_v47, %v2254_v48  ;;  %v2286_v25 = vld [vmem:[%s2704_s8 + $0x1d0] sm:$0xff]  ;;  %v2287_v28 = vld [vmem:[%s2704_s8 + $0x1d8] sm:$0xff] }
  0x55   : > { %2203 = vmatmul.mubr.msk.bf16.vlgmr.msra.gmra.mrb[4].mxu1 %vm436_vm2, %v2732_v37  ;;  %902 = vmatpush1.bf16.msra.mxu0 %v2220_v58  ;;  %v2260_v58 = vcombine.low %v2242_v43, %v2246_v44  ;;  %v2270_v62 = vcombine.low %v2251_v50, %v2255_v51  ;;  %v2301_v13 = vcombine.high %v2284_v4, %v2288_v5  ;;  %v2290_v26 = vld [vmem:[%s2704_s8 + $0x1f0] sm:$0x33]  ;;  %v2291_v29 = vld [vmem:[%s2704_s8 + $0x1f8] sm:$0x33] }
  0x56   : > { %943 = vmatpush1.bf16.msra.mxu1 %v2222_v60  ;;  %903 = vmatprep.subr.bf16.mxu0 %v881_v61  ;;  %v2262_v60 = vcombine.low %v2243_v46, %v2247_v49  ;;  %v1322_v61 = vand.u32 %v2269_v55, %v2713_v12  ;;  %v2303_v15 = vcombine.high %v2285_v7, %v2289_v8 }
  0x57   : > { %944 = vmatprep.subr.bf16.mxu1 %v887_v1  ;;  %933 = vmatprep.mubr.bf16.mxu0 %v2503_v3  ;;  %v1328_v1 = vand.u32 %v2271_v57, %v2713_v12  ;;  %v2300_v17 = vcombine.low %v2284_v4, %v2288_v5  ;;  %v2294_v18 = vcombine.low %v2277_v2, %v2281_v6 }
  0x58   : > { %974 = vmatprep.mubr.bf16.mxu1 %v2503_v3  ;;  %v1745_v23 = vand.u32 %v2303_v15, %v2713_v12  ;;  %v2296_v36 = vcombine.low %v2278_v21, %v2282_v22 }
  0x59   : > { %904 = vmatpush1.bf16.msra.mxu0 %v878_v9  ;;  %v1319_v9 = vand.u32 %v2268_v59, %v2713_v12  ;;  %v1736_v30 = vand.u32 %v2300_v17, %v2713_v12 }
  0x5a   : > { %945 = vmatpush1.bf16.msra.mxu1 %v884_v10  ;;  %983 = vmatprep.subr.bf16.mxu0 %v2225_v11  ;;  %v1325_v10 = vand.u32 %v2270_v62, %v2713_v12  ;;  %v2293_v11 = vcombine.high %v2276_v63, %v2280_v0 }
  0x5b   : > { %1024 = vmatprep.subr.bf16.mxu1 %v2227_v14  ;;  %v2295_v14 = vcombine.high %v2277_v2, %v2281_v6 }
  0x5c   : > { %2236 = vmatmul.mubr.msk.bf16.vlgmr.msra.gmra.mrb[8].mxu0 %vm436_vm2, %v2732_v37 }
  0x5d   : > { %2237 = vmatmul.mubr.msk.bf16.vlgmr.msra.gmra.mrb[8].mxu1 %vm436_vm2, %v2732_v37  ;;  %984 = vmatpush1.bf16.msra.mxu0 %v2224_v16  ;;  %v2292_v16 = vcombine.low %v2276_v63, %v2280_v0 }
  0x5e   : > { %1025 = vmatpush1.bf16.msra.mxu1 %v2226_v19  ;;  %985 = vmatprep.subr.bf16.mxu0 %v893_v20  ;;  %v1739_v19 = vand.u32 %v2301_v13, %v2713_v12  ;;  %v2302_v20 = vcombine.low %v2285_v7, %v2289_v8 }
  0x5f   : > { %1026 = vmatprep.subr.bf16.mxu1 %v899_v24  ;;  %1015 = vmatprep.mubr.bf16.mxu0 %v2503_v3  ;;  %v2279_v24 = vld [vmem:[%s2704_s8 + $0x198] sm:$0xff] }
  0x60   : > { %1056 = vmatprep.mubr.bf16.mxu1 %v2503_v3  ;;  %v2299_v34 = vcombine.high %v2279_v24, %v2283_v27  ;;  %v2298_v39 = vcombine.low %v2279_v24, %v2283_v27 }
  0x61   : > { %986 = vmatpush1.bf16.msra.mxu0 %v890_v31  ;;  %v1742_v31 = vand.u32 %v2302_v20, %v2713_v12 }
  0x62   : > { %1027 = vmatpush1.bf16.msra.mxu1 %v896_v32  ;;  %1330 = vmatprep.subr.bf16.mxu0 %v2257_v33  ;;  %v2297_v32 = vcombine.high %v2278_v21, %v2282_v22  ;;  %v2305_v33 = vcombine.high %v2286_v25, %v2290_v26 }
  0x63   : > { %1371 = vmatprep.subr.bf16.mxu1 %v2259_v35  ;;  %v2307_v35 = vcombine.high %v2287_v28, %v2291_v29 }
  0x64   : > { %2238 = vmatmul.mubr.msk.bf16.vlgmr.msra.gmra.mrb[12].mxu0 %vm436_vm2, %v2732_v37 }
  0x65   : > { %2239 = vmatmul.mubr.msk.bf16.vlgmr.msra.gmra.mrb[12].mxu1 %vm436_vm2, %v2732_v37  ;;  %1331 = vmatpush1.bf16.msra.mxu0 %v2256_v38  ;;  %v2304_v38 = vcombine.low %v2286_v25, %v2290_v26  ;;  %v1757_v42 = vand.u32 %v2307_v35, %v2713_v12 }
  0x66   : > { %1372 = vmatpush1.bf16.msra.mxu1 %v2258_v40  ;;  %1332 = vmatprep.subr.bf16.mxu0 %v1310_v41  ;;  %v1751_v40 = vand.u32 %v2305_v33, %v2713_v12  ;;  %v2306_v41 = vcombine.low %v2287_v28, %v2291_v29 }
  0x67   : > { %1373 = vmatprep.subr.bf16.mxu1 %v1316_v45  ;;  %1362 = vmatprep.mubr.bf16.mxu0 %v2503_v3  ;;  %v1748_v43 = vand.u32 %v2304_v38, %v2713_v12 }
  0x68   : > { %1403 = vmatprep.mubr.bf16.mxu1 %v2503_v3  ;;  %v1754_v44 = vand.u32 %v2306_v41, %v2713_v12 }
  0x69   : > { %1333 = vmatpush1.bf16.msra.mxu0 %v1307_v52 }
  0x6a   : > { %1374 = vmatpush1.bf16.msra.mxu1 %v1313_v53  ;;  %1412 = vmatprep.subr.bf16.mxu0 %v2261_v54 }
  0x6b   : > { %1453 = vmatprep.subr.bf16.mxu1 %v2263_v56 }
  0x6c   : > { %2272 = vmatmul.mubr.msk.bf16.vlgmr.msra.gmra.mrb[16].mxu0 %vm436_vm2, %v2732_v37 }
  0x6d   : > { %2273 = vmatmul.mubr.msk.bf16.vlgmr.msra.gmra.mrb[16].mxu1 %vm436_vm2, %v2732_v37  ;;  %1413 = vmatpush1.bf16.msra.mxu0 %v2260_v58 }
  0x6e   : > { %1454 = vmatpush1.bf16.msra.mxu1 %v2262_v60  ;;  %1414 = vmatprep.subr.bf16.mxu0 %v1322_v61 }
  0x6f   : > { %1455 = vmatprep.subr.bf16.mxu1 %v1328_v1  ;;  %1444 = vmatprep.mubr.bf16.mxu0 %v2503_v3 }
  0x70   : > { %1485 = vmatprep.mubr.bf16.mxu1 %v2503_v3 }
  0x71   : > { %1415 = vmatpush1.bf16.msra.mxu0 %v1319_v9 }
  0x72   : > { %1456 = vmatpush1.bf16.msra.mxu1 %v1325_v10  ;;  %1759 = vmatprep.subr.bf16.mxu0 %v2293_v11 }
  0x73   : > { %1800 = vmatprep.subr.bf16.mxu1 %v2295_v14 }
  0x74   : > { %2274 = vmatmul.mubr.msk.bf16.vlgmr.msra.gmra.mrb[20].mxu0 %vm436_vm2, %v2732_v37 }
  0x75   : > { %2275 = vmatmul.mubr.msk.bf16.vlgmr.msra.gmra.mrb[20].mxu1 %vm436_vm2, %v2732_v37  ;;  %1760 = vmatpush1.bf16.msra.mxu0 %v2292_v16 }
  0x76   : > { %1801 = vmatpush1.bf16.msra.mxu1 %v2294_v18  ;;  %1761 = vmatprep.subr.bf16.mxu0 %v1739_v19 }
  0x77   : > { %1802 = vmatprep.subr.bf16.mxu1 %v1745_v23  ;;  %1791 = vmatprep.mubr.bf16.mxu0 %v2503_v3 }
  0x78   : > { %1832 = vmatprep.mubr.bf16.mxu1 %v2503_v3 }
  0x79   : > { %1762 = vmatpush1.bf16.msra.mxu0 %v1736_v30 }
  0x7a   : > { %1803 = vmatpush1.bf16.msra.mxu1 %v1742_v31  ;;  %1841 = vmatprep.subr.bf16.mxu0 %v2297_v32 }
  0x7b   : > { %1882 = vmatprep.subr.bf16.mxu1 %v2299_v34 }
  0x7c   : > { %2308 = vmatmul.mubr.msk.bf16.vlgmr.msra.gmra.mrb[24].mxu0 %vm436_vm2, %v2732_v37 }
  0x7d   : > { %2309 = vmatmul.mubr.msk.bf16.vlgmr.msra.gmra.mrb[24].mxu1 %vm436_vm2, %v2732_v37  ;;  %1842 = vmatpush1.bf16.msra.mxu0 %v2296_v36 }
  0x7e   : > { %1883 = vmatpush1.bf16.msra.mxu1 %v2298_v39  ;;  %1843 = vmatprep.subr.bf16.mxu0 %v1751_v40 }
  0x7f   : > { %1884 = vmatprep.subr.bf16.mxu1 %v1757_v42  ;;  %1873 = vmatprep.mubr.bf16.mxu0 %v2503_v3 }
  0x80   : > { %1914 = vmatprep.mubr.bf16.mxu1 %v2503_v3 }
  0x81   : > { %1844 = vmatpush1.bf16.msra.mxu0 %v1748_v43 }
  0x82   : > { %1885 = vmatpush1.bf16.msra.mxu1 %v1754_v44 }
  0x84   : > { %2310 = vmatmul.mubr.msk.bf16.vlgmr.msra.gmra.mrb[28].mxu0 %vm436_vm2, %v2732_v37 }
  0x85   : > { %2311 = vmatmul.mubr.msk.bf16.vlgmr.msra.gmra.mrb[28].mxu1 %vm436_vm2, %v2732_v37 }
 0x11f   : > { %v2859_v45 = vpop.f32.mrb[0].mxu0 }
 0x120   : > { %v634_v46 = vand.u32 2147483647, %v2859_v45  ;;  %v2862_v47 = vpop.f32.mrb[0].mxu1  ;;  %v2864_v12 = vpop.f32.mrb[1].mxu0  ;;  %vm666_vm3 = vcmp.ge.f32.partialorder %v2859_v45, 0.0 }
 0x121   : > { %v636_v48 = vand.u32 2147483647, %v2862_v47  ;;  %v635_v3 = vand.u32 2147483647, %v2864_v12  ;;  %v2868_v50 = vpop.f32.mrb[1].mxu1  ;;  %v506_v51 = vpop.f32.mrb[2].mxu0 }
 0x122   : > { %v642_v49 = vsub.f32 0.0, %v634_v46  ;;  %v637_v37 = vand.u32 2147483647, %v2868_v50  ;;  %v547_v54 = vpop.f32.mrb[2].mxu1  ;;  %v507_v56 = vpop.f32.mrb[3].mxu0  ;;  %vm668_vm4 = vcmp.ge.f32.partialorder %v2862_v47, 0.0 }
 0x123   : > { %v644_v52 = vsub.f32 0.0, %v636_v48  ;;  %v643_v53 = vsub.f32 0.0, %v635_v3  ;;  %v548_v57 = vpop.f32.mrb[3].mxu1  ;;  %vm667_vm5 = vcmp.ge.f32.partialorder %v2864_v12, 0.0  ;;  %vm669_vm6 = vcmp.ge.f32.partialorder %v2868_v50, 0.0 }
 0x124   : > { %v650_v55 = vmul.f32 1.442695, %v642_v49  ;;  %v645_v60 = vsub.f32 0.0, %v637_v37 }
 0x125   : > { %v654_v58 = vmul.f32 1.442695, %v644_v52  ;;  %v652_v59 = vmul.f32 1.442695, %v643_v53 }
 0x126   : > { %2350 = vpow2.f32 %v650_v55  ;;  %v656_v61 = vmul.f32 1.442695, %v645_v60 }
 0x127   : > { %2352 = vpow2.f32 %v654_v58  ;;  %v2871_v62 = vpop.f32.mrb[4].mxu0 }
 0x128   : > { %2354 = vpow2.f32 %v652_v59  ;;  %v638_v63 = vand.u32 2147483647, %v2871_v62  ;;  %v2874_v0 = vpop.f32.mrb[4].mxu1  ;;  %v2876_v1 = vpop.f32.mrb[5].mxu0  ;;  %vm670_vm7 = vcmp.ge.f32.partialorder %v2871_v62, 0.0 }
 0x129   : > { %v640_v2 = vand.u32 2147483647, %v2874_v0  ;;  %v639_v4 = vand.u32 2147483647, %v2876_v1  ;;  %v2880_v5 = vpop.f32.mrb[5].mxu1  ;;  %2356 = vpow2.f32 %v656_v61  ;;  %v588_v8 = vpop.f32.mrb[6].mxu0 }
 0x12a   : > { %v646_v6 = vsub.f32 0.0, %v638_v63  ;;  %v641_v7 = vand.u32 2147483647, %v2880_v5  ;;  %v629_v11 = vpop.f32.mrb[6].mxu1  ;;  %v589_v13 = vpop.f32.mrb[7].mxu0  ;;  %vm672_vm8 = vcmp.ge.f32.partialorder %v2874_v0, 0.0 }
 0x12b   : > { %v648_v9 = vsub.f32 0.0, %v640_v2  ;;  %v647_v10 = vsub.f32 0.0, %v639_v4  ;;  %v630_v16 = vpop.f32.mrb[7].mxu1  ;;  %vm671_vm9 = vcmp.ge.f32.partialorder %v2876_v1, 0.0  ;;  %vm673_vm10 = vcmp.ge.f32.partialorder %v2880_v5, 0.0 }
 0x12c   : > { %v658_v14 = vmul.f32 1.442695, %v646_v6  ;;  %v649_v15 = vsub.f32 0.0, %v641_v7 }
 0x12d   : > { %v662_v17 = vmul.f32 1.442695, %v648_v9  ;;  %v660_v18 = vmul.f32 1.442695, %v647_v10 }
 0x12e   : > { %2358 = vpow2.f32 %v658_v14  ;;  %v664_v19 = vmul.f32 1.442695, %v649_v15 }
 0x12f   : > { %2360 = vpow2.f32 %v662_v17  ;;  %v2883_v20 = vpop.f32.mrb[8].mxu0 }
 0x130   : > { %v2351_v21 = vpop.eup %2350  ;;  %2362 = vpow2.f32 %v660_v18  ;;  %v2886_v22 = vpop.f32.mrb[8].mxu1  ;;  %v1065_v32 = vand.u32 2147483647, %v2883_v20  ;;  %vm1097_vm11 = vcmp.ge.f32.partialorder %v2883_v20, 0.0 }
 0x131   : > { %v2888_v23 = vpop.f32.mrb[9].mxu0  ;;  %v2353_v24 = vpop.eup %2352  ;;  %v674_v25 = vmul.f32 2.0, %v2351_v21  ;;  %v690_v26 = vadd.f32 2.0, %v2351_v21  ;;  %2364 = vpow2.f32 %v664_v19  ;;  %v1067_v63 = vand.u32 2147483647, %v2886_v22 }
 0x132   : > { %v2892_v27 = vpop.f32.mrb[9].mxu1  ;;  %v939_v28 = vpop.f32.mrb[10].mxu0  ;;  %v676_v30 = vmul.f32 2.0, %v2353_v24  ;;  %v692_v31 = vadd.f32 2.0, %v2353_v24  ;;  %v1073_v61 = vsub.f32 0.0, %v1065_v32  ;;  %vm1099_vm12 = vcmp.ge.f32.partialorder %v2886_v22, 0.0 }
 0x133   : > { %v2355_v29 = vpop.eup %2354  ;;  %v980_v33 = vpop.f32.mrb[10].mxu1  ;;  %v682_v35 = vadd.f32 1.0, %v674_v25  ;;  %v698_v36 = vmul.f32 %v2351_v21, %v690_v26  ;;  %v714_v38 = vmul.f32 %v2351_v21, %v674_v25  ;;  %vm1098_vm13 = vcmp.ge.f32.partialorder %v2888_v23, 0.0 }
 0x134   : > { %v940_v34 = vpop.f32.mrb[11].mxu0  ;;  %v675_v39 = vmul.f32 2.0, %v2355_v29  ;;  %v981_v40 = vpop.f32.mrb[11].mxu1  ;;  %v684_v42 = vadd.f32 1.0, %v676_v30  ;;  %v700_v43 = vmul.f32 %v2353_v24, %v692_v31  ;;  %v716_v44 = vmul.f32 %v2353_v24, %v676_v30 }
 0x135   : > { %v2357_v41 = vpop.eup %2356  ;;  %v691_v46 = vadd.f32 2.0, %v2355_v29  ;;  %v2898_v48 = vsel %vm666_vm3, %v682_v35, %v698_v36  ;;  %v722_v3 = vsel %vm666_vm3, %v714_v38, 2.0  ;;  %v1075_v38 = vsub.f32 0.0, %v1067_v63 }
 0x136   : > { %v683_v49 = vadd.f32 1.0, %v675_v39  ;;  %v715_v51 = vmul.f32 %v2355_v29, %v675_v39  ;;  %v730_v52 = vadd.f32 %v722_v3, %v2898_v48  ;;  %v2905_v53 = vsel %vm668_vm4, %v684_v42, %v700_v43 }
 0x137   : > { %v724_v37 = vsel %vm668_vm4, %v716_v44, 2.0  ;;  %v699_v54 = vmul.f32 %v2355_v29, %v691_v46  ;;  %v677_v55 = vmul.f32 2.0, %v2357_v41  ;;  %v693_v56 = vadd.f32 2.0, %v2357_v41  ;;  %v2911_v57 = vpop.f32.mrb[12].mxu0 }
 0x138   : > { %v2359_v58 = vpop.eup %2358  ;;  %v723_v60 = vsel %vm667_vm5, %v715_v51, 2.0  ;;  %v2920_v2 = vpop.f32.mrb[12].mxu1  ;;  %2366 = vrcp.f32 %v730_v52  ;;  %v732_v7 = vadd.f32 %v724_v37, %v2905_v53  ;;  %v1081_v51 = vmul.f32 1.442695, %v1073_v61 }
 0x139   : > { %v2915_v59 = vsel %vm667_vm5, %v683_v49, %v699_v54  ;;  %v2922_v4 = vpop.f32.mrb[13].mxu0  ;;  %v2361_v6 = vpop.eup %2360  ;;  %v685_v8 = vadd.f32 1.0, %v677_v55  ;;  %v701_v9 = vmul.f32 %v2357_v41, %v693_v56  ;;  %v717_v14 = vmul.f32 %v2357_v41, %v677_v55 }
 0x13a   : > { %v2925_v10 = vpop.f32.mrb[13].mxu1  ;;  %v1021_v11 = vpop.f32.mrb[14].mxu0  ;;  %v678_v15 = vmul.f32 2.0, %v2359_v58  ;;  %v694_v16 = vadd.f32 2.0, %v2359_v58  ;;  %v680_v17 = vmul.f32 2.0, %v2361_v6  ;;  %v731_v21 = vadd.f32 %v723_v60, %v2915_v59 }
 0x13b   : > { %v2363_v13 = vpop.eup %2362  ;;  %v1062_v18 = vpop.f32.mrb[14].mxu1  ;;  %v2930_v24 = vsel %vm669_vm6, %v685_v8, %v701_v9  ;;  %v696_v25 = vadd.f32 2.0, %v2361_v6  ;;  %v725_v30 = vsel %vm669_vm6, %v717_v14, 2.0  ;;  %2368 = vrcp.f32 %v732_v7 }
 0x13c   : > { %v1022_v19 = vpop.f32.mrb[15].mxu0  ;;  %v679_v26 = vmul.f32 2.0, %v2363_v13  ;;  %v1063_v28 = vpop.f32.mrb[15].mxu1  ;;  %v686_v31 = vadd.f32 1.0, %v678_v15  ;;  %v702_v32 = vmul.f32 %v2359_v58, %v694_v16  ;;  %v718_v33 = vmul.f32 %v2359_v58, %v678_v15 }
 0x13d   : > { %v2365_v29 = vpop.eup %2364  ;;  %v688_v34 = vadd.f32 1.0, %v680_v17  ;;  %v704_v35 = vmul.f32 %v2361_v6, %v696_v25  ;;  %v720_v36 = vmul.f32 %v2361_v6, %v680_v17  ;;  %v733_v39 = vadd.f32 %v725_v30, %v2930_v24 }
 0x13e   : > { %v2937_v40 = vsel %vm670_vm7, %v686_v31, %v702_v32  ;;  %v726_v41 = vsel %vm670_vm7, %v718_v33, 2.0  ;;  %v695_v42 = vadd.f32 2.0, %v2363_v13  ;;  %2370 = vrcp.f32 %v731_v21 }
 0x13f   : > { %v734_v43 = vadd.f32 %v726_v41, %v2937_v40  ;;  %v2944_v44 = vsel %vm672_vm8, %v688_v34, %v704_v35  ;;  %v728_v46 = vsel %vm672_vm8, %v720_v36, 2.0  ;;  %v2948_v3 = vpop.f32.mrb[16].mxu0  ;;  %v687_v49 = vadd.f32 1.0, %v679_v26 }
 0x140   : > { %v2950_v52 = vpop.f32.mrb[16].mxu1  ;;  %v2952_v37 = vpop.f32.mrb[17].mxu0  ;;  %v736_v54 = vadd.f32 %v728_v46, %v2944_v44  ;;  %v703_v55 = vmul.f32 %v2363_v13, %v695_v42  ;;  %v719_v56 = vmul.f32 %v2363_v13, %v679_v26  ;;  %v1066_v58 = vand.u32 2147483647, %v2888_v23 }
 0x141   : > { %v2956_v60 = vpop.f32.mrb[17].mxu1  ;;  %2372 = vrcp.f32 %v733_v39  ;;  %v1085_v63 = vmul.f32 1.442695, %v1075_v38  ;;  %v1368_v6 = vpop.f32.mrb[18].mxu0  ;;  %v681_v9 = vmul.f32 2.0, %v2365_v29  ;;  %v697_v14 = vadd.f32 2.0, %v2365_v29 }
 0x142   : > { %v1409_v7 = vpop.f32.mrb[18].mxu1  ;;  %v2367_v8 = vpop.eup %2366  ;;  %2374 = vrcp.f32 %v734_v43  ;;  %v1074_v15 = vsub.f32 0.0, %v1066_v58  ;;  %v2959_v13 = vsel %vm671_vm9, %v687_v49, %v703_v55  ;;  %v727_v16 = vsel %vm671_vm9, %v719_v56, 2.0 }
 0x143   : > { %v1369_v61 = vpop.f32.mrb[19].mxu0  ;;  %v1410_v11 = vpop.f32.mrb[19].mxu1  ;;  %2376 = vpow2.f32 %v1081_v51  ;;  %v689_v17 = vadd.f32 1.0, %v681_v9  ;;  %v721_v18 = vmul.f32 %v2365_v29, %v681_v9  ;;  %v1068_v21 = vand.u32 2147483647, %v2892_v27 }
 0x144   : > { %2378 = vrcp.f32 %v736_v54  ;;  %v1083_v19 = vmul.f32 1.442695, %v1074_v15  ;;  %v735_v25 = vadd.f32 %v727_v16, %v2959_v13  ;;  %v705_v26 = vmul.f32 %v2365_v29, %v697_v14 }
 0x145   : > { %2380 = vpow2.f32 %v1085_v63  ;;  %v1069_v28 = vand.u32 2147483647, %v2911_v57  ;;  %v1071_v30 = vand.u32 2147483647, %v2920_v2  ;;  %v2369_v33 = vpop.eup %2368  ;;  %v1076_v34 = vsub.f32 0.0, %v1068_v21 }
 0x146   : > { %2382 = vpow2.f32 %v1083_v19  ;;  %v1070_v35 = vand.u32 2147483647, %v2922_v4  ;;  %v746_v39 = vmul.f32 %v2367_v8, %v2898_v48  ;;  %v729_v49 = vsel %vm673_vm10, %v721_v18, 2.0 }
 0x147   : > { %v2965_v31 = vpop.f32.mrb[20].mxu0  ;;  %v1077_v41 = vsub.f32 0.0, %v1069_v28  ;;  %v1079_v42 = vsub.f32 0.0, %v1071_v30  ;;  %v1087_v51 = vmul.f32 1.442695, %v1076_v34  ;;  %2384 = vrcp.f32 %v735_v25 }
 0x148   : > { %v2967_v32 = vpop.f32.mrb[20].mxu1  ;;  %v2971_v36 = vpop.f32.mrb[21].mxu0  ;;  %v1078_v54 = vsub.f32 0.0, %v1070_v35  ;;  %v1072_v55 = vand.u32 2147483647, %v2925_v10  ;;  %v2982_v58 = vsel %vm673_vm10, %v689_v17, %v705_v26  ;;  %v748_v9 = vmul.f32 %v2369_v33, %v2905_v53 }
 0x149   : > { %v2973_v38 = vpop.f32.mrb[21].mxu1  ;;  %v2371_v29 = vpop.eup %2370  ;;  %v1089_v48 = vmul.f32 1.442695, %v1077_v41  ;;  %v1093_v63 = vmul.f32 1.442695, %v1079_v42  ;;  %2386 = vpow2.f32 %v1087_v51  ;;  %v2987_v15 = vmul.f32 %v746_v39, %v2859_v45 }
 0x14a   : > { %v1450_v43 = vpop.f32.mrb[22].mxu0  ;;  %v1491_v46 = vpop.f32.mrb[22].mxu1  ;;  %v1091_v61 = vmul.f32 1.442695, %v1078_v54  ;;  %v1080_v11 = vsub.f32 0.0, %v1072_v55  ;;  %v747_v16 = vmul.f32 %v2371_v29, %v2915_v59  ;;  %v737_v19 = vadd.f32 %v729_v49, %v2982_v58 }
 0x14b   : > { %v2373_v56 = vpop.eup %2372  ;;  %v1451_v6 = vpop.f32.mrb[23].mxu0  ;;  %2388 = vpow2.f32 %v1089_v48  ;;  %v1494_v17 = vand.u32 2147483647, %v2948_v3  ;;  %v3003_v43 = vmul.f32 %v748_v9, %v2862_v47  ;;  %vm1100_vm14 = vcmp.ge.f32.partialorder %v2892_v27, 0.0 }
 0x14c   : > { %v1492_v7 = vpop.f32.mrb[23].mxu1  ;;  %v2375_v8 = vpop.eup %2374  ;;  %2390 = vpow2.f32 %v1093_v63  ;;  %v749_v28 = vmul.f32 %v2373_v56, %v2930_v24  ;;  %v1095_v45 = vmul.f32 1.442695, %v1080_v11  ;;  %v3014_v6 = vmul.f32 %v747_v16, %v2864_v12 }
 0x14d   : > { %v2377_v14 = vpop.eup %2376  ;;  %2392 = vpow2.f32 %v1091_v61  ;;  %v1502_v30 = vsub.f32 0.0, %v1494_v17  ;;  %v750_v24 = vmul.f32 %v2375_v8, %v2937_v40  ;;  %vm1101_vm15 = vcmp.ge.f32.partialorder %v2911_v57, 0.0 }
 0x14e   : > { %v2379_v18 = vpop.eup %2378  ;;  %v1105_v21 = vmul.f32 2.0, %v2377_v14  ;;  %v1121_v25 = vadd.f32 2.0, %v2377_v14  ;;  %2394 = vpow2.f32 %v1095_v45  ;;  %v3018_v9 = vmul.f32 %v749_v28, %v2868_v50 }
 0x14f   : > { %v2992_v53 = vpop.f32.mrb[24].mxu0  ;;  %v2381_v26 = vpop.eup %2380  ;;  %v1510_v63 = vmul.f32 1.442695, %v1502_v30  ;;  %2396 = vrcp.f32 %v737_v19  ;;  %v3024_v17 = vmul.f32 %v2379_v18, %v2944_v44  ;;  %v3033_v50 = vmul.f32 %v750_v24, %v2871_v62 }
 0x150   : > { %v2996_v59 = vpop.f32.mrb[24].mxu1  ;;  %v2998_v33 = vpop.f32.mrb[25].mxu0  ;;  %v1113_v34 = vadd.f32 1.0, %v1105_v21  ;;  %v1129_v35 = vmul.f32 %v2377_v14, %v1121_v25  ;;  %v1145_v29 = vmul.f32 %v2377_v14, %v1105_v21  ;;  %v1107_v39 = vmul.f32 2.0, %v2381_v26 }
 0x151   : > { %v3000_v41 = vpop.f32.mrb[25].mxu1  ;;  %v1797_v42 = vpop.f32.mrb[26].mxu0  ;;  %v1123_v46 = vadd.f32 2.0, %v2381_v26  ;;  %2398 = vpow2.f32 %v1510_v63  ;;  %vm1103_vm0 = vcmp.ge.f32.partialorder %v2920_v2, 0.0  ;;  %vm1102_vm1 = vcmp.ge.f32.partialorder %v2922_v4, 0.0 }
 0x152   : > { %v1838_v49 = vpop.f32.mrb[26].mxu1  ;;  %v1798_v51 = vpop.f32.mrb[27].mxu0  ;;  %v3008_v55 = vsel %vm1097_vm11, %v1113_v34, %v1129_v35  ;;  %v1153_v56 = vsel %vm1097_vm11, %v1145_v29, 2.0  ;;  %v1115_v48 = vadd.f32 1.0, %v1107_v39  ;;  %v1147_v7 = vmul.f32 %v2381_v26, %v1107_v39 }
 0x153   : > { %v2383_v54 = vpop.eup %2382  ;;  %v1839_v47 = vpop.f32.mrb[27].mxu1  ;;  %v1131_v40 = vmul.f32 %v2381_v26, %v1123_v46  ;;  %v1161_v61 = vadd.f32 %v1153_v56, %v3008_v55  ;;  %v1496_v34 = vand.u32 2147483647, %v2950_v52  ;;  %vm1104_vm2 = vcmp.ge.f32.partialorder %v2925_v10, 0.0 }
 0x154   : > { %v1106_v8 = vmul.f32 2.0, %v2383_v54  ;;  %v1122_v11 = vadd.f32 2.0, %v2383_v54  ;;  %v3021_v14 = vpop.eup %2384  ;;  %v1155_v16 = vsel %vm1099_vm12, %v1147_v7, 2.0  ;;  %vm1526_vm3 = vcmp.ge.f32.partialorder %v2948_v3, 0.0 }
 0x155   : > { %v3028_v12 = vsel %vm1099_vm12, %v1115_v48, %v1131_v40  ;;  %v2387_v25 = vpop.eup %2386  ;;  %2400 = vrcp.f32 %v1161_v61  ;;  %vm1528_vm4 = vcmp.ge.f32.partialorder %v2950_v52, 0.0  ;;  %vm1527_vm5 = vcmp.ge.f32.partialorder %v2952_v37, 0.0 }
 0x156   : > { %v1114_v21 = vadd.f32 1.0, %v1106_v8  ;;  %v1130_v19 = vmul.f32 %v2383_v54, %v1122_v11  ;;  %v1146_v26 = vmul.f32 %v2383_v54, %v1106_v8  ;;  %v2389_v45 = vpop.eup %2388  ;;  %v1163_v44 = vadd.f32 %v1155_v16, %v3028_v12 }
 0x157   : > { %v3035_v28 = vpop.f32.mrb[28].mxu0  ;;  %v1108_v18 = vmul.f32 2.0, %v2387_v25  ;;  %v1124_v30 = vadd.f32 2.0, %v2387_v25  ;;  %v2391_v29 = vpop.eup %2390  ;;  %v1109_v42 = vmul.f32 2.0, %v2389_v45  ;;  %v1125_v7 = vadd.f32 2.0, %v2389_v45 }
 0x158   : > { %v3039_v35 = vpop.f32.mrb[28].mxu1  ;;  %v3043_v62 = vsel %vm1098_vm13, %v1114_v21, %v1130_v19  ;;  %v1154_v39 = vsel %vm1098_vm13, %v1146_v26, 2.0  ;;  %v3047_v24 = vpop.f32.mrb[29].mxu0  ;;  %v1111_v61 = vmul.f32 2.0, %v2391_v29  ;;  %2402 = vrcp.f32 %v1163_v44 }
 0x159   : > { %3397 = vst [vmem:[#allocation3_spill] sm:$0xff] %v3039_v35  ;;  %3398 = vst [vmem:[#allocation4_spill] sm:$0xff] %v3047_v24  ;;  %v3049_v46 = vpop.f32.mrb[29].mxu1  ;;  %v2393_v49 = vpop.eup %2392  ;;  %v1162_v51 = vadd.f32 %v1154_v39, %v3043_v62  ;;  %v1116_v54 = vadd.f32 1.0, %v1108_v18  ;;  %v1132_v56 = vmul.f32 %v2387_v25, %v1124_v30  ;;  %v1148_v48 = vmul.f32 %v2387_v25, %v1108_v18 }
 0x15a   : > { %3399 = vst [vmem:[#allocation5_spill] sm:$0xff] %v3049_v46  ;;  %v1879_v63 = vpop.f32.mrb[30].mxu0  ;;  %v1920_v47 = vpop.f32.mrb[30].mxu1  ;;  %v1117_v40 = vadd.f32 1.0, %v1109_v42  ;;  %v1149_v8 = vmul.f32 %v2389_v45, %v1109_v42  ;;  %v1127_v26 = vadd.f32 2.0, %v2391_v29  ;;  %v1133_v30 = vmul.f32 %v2389_v45, %v1125_v7 }
 0x15b   : > { %v1880_v11 = vpop.f32.mrb[31].mxu0  ;;  %v1921_v16 = vpop.f32.mrb[31].mxu1  ;;  %v3057_v19 = vsel %vm1100_vm14, %v1116_v54, %v1132_v56  ;;  %v1156_v25 = vsel %vm1100_vm14, %v1148_v48, 2.0  ;;  %2404 = vrcp.f32 %v1162_v51  ;;  %v1119_v42 = vadd.f32 1.0, %v1111_v61 }
 0x15c   : > { %v2395_v21 = vpop.eup %2394  ;;  %v1164_v18 = vadd.f32 %v1156_v25, %v3057_v19  ;;  %v1157_v39 = vsel %vm1101_vm15, %v1149_v8, 2.0  ;;  %v1135_v63 = vmul.f32 %v2391_v29, %v1127_v26  ;;  %v1110_v47 = vmul.f32 2.0, %v2393_v49 }
 0x15d   : > { %v1126_v11 = vadd.f32 2.0, %v2393_v49  ;;  %v2397_v44 = vpop.eup %2396  ;;  %v3066_v54 = vsel %vm1101_vm15, %v1117_v40, %v1133_v30  ;;  %v1112_v56 = vmul.f32 2.0, %v2395_v21  ;;  %v1128_v48 = vadd.f32 2.0, %v2395_v21 }
 0x15e   : > { %2406 = vrcp.f32 %v1164_v18  ;;  %v1165_v51 = vadd.f32 %v1157_v39, %v3066_v54  ;;  %v1151_v16 = vmul.f32 %v2391_v29, %v1111_v61  ;;  %v1118_v25 = vadd.f32 1.0, %v1110_v47  ;;  %v2399_v45 = vpop.eup %2398 }
 0x15f   : > { %v751_v7 = vmul.f32 %v3021_v14, %v2959_v13  ;;  %v1134_v8 = vmul.f32 %v2393_v49, %v1126_v11  ;;  %v1150_v26 = vmul.f32 %v2393_v49, %v1110_v47  ;;  %v1504_v46 = vsub.f32 0.0, %v1496_v34  ;;  %v2401_v30 = vpop.eup %2400 }
 0x160   : > { %v1120_v18 = vadd.f32 1.0, %v1112_v56  ;;  %v1136_v24 = vmul.f32 %v2395_v21, %v1128_v48  ;;  %v1152_v35 = vmul.f32 %v2395_v21, %v1112_v56  ;;  %v1495_v40 = vand.u32 2147483647, %v2952_v37 }
 0x161   : > { %2408 = vrcp.f32 %v1165_v51  ;;  %v3075_v29 = vsel %vm1103_vm0, %v1119_v42, %v1135_v63  ;;  %v3079_v61 = vsel %vm1102_vm1, %v1118_v25, %v1134_v8  ;;  %v1158_v13 = vsel %vm1102_vm1, %v1150_v26, 2.0 }
 0x162   : > { %v1159_v14 = vsel %vm1103_vm0, %v1151_v16, 2.0  ;;  %v1166_v34 = vadd.f32 %v1158_v13, %v3079_v61  ;;  %v3088_v49 = vsel %vm1104_vm2, %v1120_v18, %v1136_v24  ;;  %v1160_v21 = vsel %vm1104_vm2, %v1152_v35, 2.0  ;;  %v2403_v11 = vpop.eup %2402 }
 0x163   : > { %v1168_v39 = vadd.f32 %v1160_v21, %v3088_v49  ;;  %v1534_v42 = vmul.f32 2.0, %v2399_v45  ;;  %v1550_v63 = vadd.f32 2.0, %v2399_v45  ;;  %v1514_v47 = vmul.f32 1.442695, %v1504_v46 }
 0x164   : > { %v759_v56 = vmul.f32 %v751_v7, %v2876_v1  ;;  %v753_v48 = vmul.f32 %v2397_v44, %v2982_v58  ;;  %2410 = vrcp.f32 %v1166_v34  ;;  %v1503_v51 = vsub.f32 0.0, %v1495_v40 }
 0x165   : > { %v2405_v16 = vpop.eup %2404  ;;  %v1167_v25 = vadd.f32 %v1159_v14, %v3075_v29  ;;  %2412 = vrcp.f32 %v1168_v39  ;;  %v1542_v24 = vadd.f32 1.0, %v1534_v42  ;;  %v1558_v8 = vmul.f32 %v2399_v45, %v1550_v63  ;;  %v3107_v14 = vpop.permute.xlu0 %764 }
 0x166   : > { %v1574_v26 = vmul.f32 %v2399_v45, %v1534_v42  ;;  %2414 = vpow2.f32 %v1514_v47  ;;  %v1512_v35 = vmul.f32 1.442695, %v1503_v51  ;;  %v1497_v18 = vand.u32 2147483647, %v2956_v60 }
 0x167   : > { %v1177_v46 = vmul.f32 %v2401_v30, %v3008_v55  ;;  %v1179_v1 = vmul.f32 %v2403_v11, %v3028_v12  ;;  %v3101_v58 = vsel %vm1526_vm3, %v1542_v24, %v1558_v8  ;;  %v1498_v44 = vand.u32 2147483647, %v2965_v31 }
 0x168   : > { %v2407_v13 = vpop.eup %2406  ;;  %v1178_v7 = vmul.f32 %v2405_v16, %v3043_v62  ;;  %v1582_v45 = vsel %vm1526_vm3, %v1574_v26, 2.0  ;;  %2416 = vpow2.f32 %v1512_v35  ;;  %v1505_v40 = vsub.f32 0.0, %v1497_v18 }
 0x169   : > { %v1180_v34 = vmul.f32 %v2407_v13, %v3057_v19  ;;  %v1590_v55 = vadd.f32 %v1582_v45, %v3101_v58  ;;  %v1506_v12 = vsub.f32 0.0, %v1498_v44  ;;  %v1500_v30 = vand.u32 2147483647, %v2967_v32 }
 0x16a   : > { %v3114_v21 = vmul.f32 %v3024_v17, %v2874_v0  ;;  %v761_v62 = vmul.f32 %v753_v48, %v2880_v5  ;;  %2418 = vrcp.f32 %v1167_v25  ;;  %v1516_v39 = vmul.f32 1.442695, %v1505_v40 }
 0x16b   : > { %v2409_v42 = vpop.eup %2408  ;;  %2420 = vrcp.f32 %v1590_v55  ;;  %v1518_v63 = vmul.f32 1.442695, %v1506_v12  ;;  %v1508_v47 = vsub.f32 0.0, %v1500_v30  ;;  %v772_v11 = vmul.f32 %v3107_v14, %v759_v56 }
 0x16c   : > { %v1185_v19 = vmul.f32 %v1177_v46, %v2883_v20  ;;  %v3120_v51 = vmul.f32 %v1179_v1, %v2886_v22  ;;  %2422 = vpow2.f32 %v1516_v39  ;;  %v1499_v0 = vand.u32 2147483647, %v2971_v36  ;;  %v3134_v20 = vpop.permute.xlu0 %777 }
 0x16d   : > { %v3125_v5 = vmul.f32 %v1178_v7, %v2888_v23  ;;  %v3128_v17 = vmul.f32 %v1180_v34, %v2892_v27  ;;  %2424 = vpow2.f32 %v1518_v63  ;;  %v1522_v48 = vmul.f32 1.442695, %v1508_v47 }
 0x16e   : > { %v2411_v16 = vpop.eup %2410  ;;  %v3131_v56 = vmul.f32 %v2409_v42, %v3066_v54  ;;  %v1507_v22 = vsub.f32 0.0, %v1499_v0  ;;  %v774_v25 = vmul.f32 %v3107_v14, %v761_v62  ;;  %v1501_v24 = vand.u32 2147483647, %v2973_v38 }
 0x16f   : > { %v2413_v23 = vpop.eup %2412  ;;  %v1182_v8 = vmul.f32 %v2411_v16, %v3079_v61  ;;  %2426 = vpow2.f32 %v1522_v48  ;;  %v3140_v27 = vadd.f32 %v3134_v20, %v772_v11  ;;  %v767_v54 = vmul.f32 %v3107_v14, %v2987_v15 }
 0x170   : > { %v2415_v26 = vpop.eup %2414  ;;  %v1184_v35 = vmul.f32 %v2413_v23, %v3088_v49  ;;  %v1520_v18 = vmul.f32 1.442695, %v1507_v22  ;;  %v3146_v13 = vadd.f32 %v3134_v20, %v774_v25  ;;  %v1509_v46 = vsub.f32 0.0, %v1501_v24 }
 0x171   : > { %v1190_v1 = vmul.f32 %v1182_v8, %v2922_v4  ;;  %v1536_v44 = vmul.f32 2.0, %v2415_v26  ;;  %v1552_v7 = vadd.f32 2.0, %v2415_v26  ;;  %v3150_v61 = vadd.f32 %v3134_v20, %v767_v54 }
 0x172   : > { %v2417_v45 = vpop.eup %2416  ;;  %v1192_v40 = vmul.f32 %v1184_v35, %v2925_v10  ;;  %vm1529_vm6 = vcmp.ge.f32.partialorder %v2956_v60, 0.0  ;;  %2428 = vpow2.f32 %v1520_v18  ;;  %v1524_v15 = vmul.f32 1.442695, %v1509_v46 }
 0x173   : > { %v3155_v49 = vmul.f32 %v1185_v19, %v3107_v14  ;;  %v1544_v34 = vadd.f32 1.0, %v1536_v44  ;;  %v1560_v55 = vmul.f32 %v2415_v26, %v1552_v7  ;;  %v1576_v12 = vmul.f32 %v2415_v26, %v1536_v44 }
 0x174   : > { %v1535_v30 = vmul.f32 2.0, %v2417_v45  ;;  %vm1530_vm7 = vcmp.ge.f32.partialorder %v2965_v31, 0.0  ;;  %v3158_v4 = vpop.eup %2418  ;;  %v1551_v62 = vadd.f32 2.0, %v2417_v45  ;;  %v1198_v39 = vmul.f32 %v1190_v1, %v3107_v14 }
 0x175   : > { %v1200_v10 = vmul.f32 %v1192_v40, %v3107_v14  ;;  %2430 = vpow2.f32 %v1524_v15  ;;  %v2421_v42 = vpop.eup %2420  ;;  %v3164_v63 = vsel %vm1528_vm4, %v1544_v34, %v1560_v55  ;;  %v1584_v47 = vsel %vm1528_vm4, %v1576_v12, 2.0 }
 0x176   : > { %v1543_v11 = vadd.f32 1.0, %v1535_v30  ;;  %v1575_v19 = vmul.f32 %v2417_v45, %v1535_v30  ;;  %v2423_v0 = vpop.eup %2422  ;;  %v1606_v48 = vmul.f32 %v2421_v42, %v3101_v58  ;;  %v1592_v16 = vadd.f32 %v1584_v47, %v3164_v63 }
 0x177   : > { %v1559_v22 = vmul.f32 %v2417_v45, %v1551_v62  ;;  %vm1532_vm8 = vcmp.ge.f32.partialorder %v2967_v32, 0.0  ;;  %v3172_v25 = vadd.f32 %v1198_v39, %v3134_v20  ;;  %v2425_v24 = vpop.eup %2424  ;;  %v1537_v8 = vmul.f32 2.0, %v2423_v0 }
 0x178   : > { %v1583_v23 = vsel %vm1527_vm5, %v1575_v19, 2.0  ;;  %v1553_v54 = vadd.f32 2.0, %v2423_v0  ;;  %v3177_v26 = vadd.f32 %v1200_v10, %v3134_v20  ;;  %v1614_v35 = vmul.f32 %v1606_v48, %v2948_v3 }
 0x179   : > { %2432 = vrcp.f32 %v1592_v16  ;;  %v1567_v58 = vsel %vm1527_vm5, %v1543_v11, %v1559_v22  ;;  %v1538_v18 = vmul.f32 2.0, %v2425_v24  ;;  %v2427_v46 = vpop.eup %2426  ;;  %v1545_v44 = vadd.f32 1.0, %v1537_v8 }
 0x17a   : > { %v1591_v1 = vadd.f32 %v1583_v23, %v1567_v58  ;;  %v1561_v7 = vmul.f32 %v2423_v0, %v1553_v54  ;;  %v1577_v45 = vmul.f32 %v2423_v0, %v1537_v8  ;;  %vm1531_vm9 = vcmp.ge.f32.partialorder %v2971_v36, 0.0 }
 0x17b   : > { %v1546_v40 = vadd.f32 1.0, %v1538_v18  ;;  %v1554_v15 = vadd.f32 2.0, %v2425_v24  ;;  %v1578_v34 = vmul.f32 %v2425_v24, %v1538_v18  ;;  %v1540_v55 = vmul.f32 2.0, %v2427_v46 }
 0x17c   : > { %2434 = vrcp.f32 %v1591_v1  ;;  %v1569_v3 = vsel %vm1529_vm6, %v1545_v44, %v1561_v7  ;;  %v1585_v12 = vsel %vm1529_vm6, %v1577_v45, 2.0  ;;  %v1556_v30 = vadd.f32 2.0, %v2427_v46  ;;  %v2429_v62 = vpop.eup %2428 }
 0x17d   : > { %v1593_v39 = vadd.f32 %v1585_v12, %v1569_v3  ;;  %v1562_v10 = vmul.f32 %v2425_v24, %v1554_v15  ;;  %v1586_v42 = vsel %vm1530_vm7, %v1578_v34, 2.0  ;;  %v1548_v47 = vadd.f32 1.0, %v1540_v55 }
 0x17e   : > { %v1564_v11 = vmul.f32 %v2427_v46, %v1556_v30  ;;  %v1580_v19 = vmul.f32 %v2427_v46, %v1540_v55  ;;  %v1214_v0 = vmax.f32 %v3140_v27, %v3172_v25  ;;  %v1539_v48 = vmul.f32 2.0, %v2429_v62 }
 0x17f   : > { %v2431_v16 = vpop.eup %2430  ;;  %2436 = vrcp.f32 %v1593_v39  ;;  %v1570_v22 = vsel %vm1530_vm7, %v1546_v40, %v1562_v10  ;;  %v1555_v23 = vadd.f32 2.0, %v2429_v62  ;;  %v1216_v8 = vmax.f32 %v3146_v13, %v3177_v26 }
 0x180   : > { %v1594_v24 = vadd.f32 %v1586_v42, %v1570_v22  ;;  %v3197_v54 = vsel %vm1532_vm8, %v1548_v47, %v1564_v11  ;;  %v1588_v18 = vsel %vm1532_vm8, %v1580_v19, 2.0  ;;  %v1547_v46 = vadd.f32 1.0, %v1539_v48 }
 0x181   : > { %v1596_v1 = vadd.f32 %v1588_v18, %v3197_v54  ;;  %v1563_v44 = vmul.f32 %v2429_v62, %v1555_v23  ;;  %v1579_v7 = vmul.f32 %v2429_v62, %v1539_v48  ;;  %v1541_v45 = vmul.f32 2.0, %v2431_v16 }
 0x182   : > { %2438 = vrcp.f32 %v1594_v24  ;;  %v1557_v40 = vadd.f32 2.0, %v2431_v16  ;;  %v1201_v15 = vadd.f32 %v3155_v49, %v3134_v20  ;;  %v1622_v34 = vmul.f32 %v1614_v35, %v3107_v14 }
 0x183   : > { %v2433_v55 = vpop.eup %2432  ;;  %2440 = vrcp.f32 %v1596_v1  ;;  %v1571_v12 = vsel %vm1531_vm9, %v1547_v46, %v1563_v44  ;;  %v1587_v30 = vsel %vm1531_vm9, %v1579_v7, 2.0  ;;  %v1549_v39 = vadd.f32 1.0, %v1541_v45 }
 0x184   : > { %v1608_v10 = vmul.f32 %v2433_v55, %v3164_v63  ;;  %v1595_v62 = vadd.f32 %v1587_v30, %v1571_v12  ;;  %v1565_v42 = vmul.f32 %v2431_v16, %v1557_v40  ;;  %v1581_v47 = vmul.f32 %v2431_v16, %v1541_v45 }
 0x185   : > { %vm1533_vm10 = vcmp.ge.f32.partialorder %v2973_v38, 0.0  ;;  %v1209_v49 = vmax.f32 %v3150_v61, %v1201_v15  ;;  %v1630_v35 = vadd.f32 %v1622_v34, %v3134_v20  ;;  %v1923_v11 = vand.u32 2147483647, %v2992_v53 }
 0x186   : > { %v2435_v19 = vpop.eup %2434  ;;  %v1616_v48 = vmul.f32 %v1608_v10, %v2950_v52  ;;  %2442 = vrcp.f32 %v1595_v62  ;;  %v1573_v23 = vsel %vm1533_vm10, %v1549_v39, %v1565_v42  ;;  %v1589_v24 = vsel %vm1533_vm10, %v1581_v47, 2.0 }
 0x187   : > { %v1607_v18 = vmul.f32 %v2435_v19, %v1567_v58  ;;  %v1597_v46 = vadd.f32 %v1589_v24, %v1573_v23  ;;  %v3215_v63 = vmax.f32 %v1209_v49, %v1630_v35  ;;  %v1931_v1 = vsub.f32 0.0, %v1923_v11 }
 0x188   : > { %v769_v16 = vmul.f32 %v3107_v14, %v3003_v43  ;;  %v1195_v61 = vmul.f32 %v3120_v51, %v3107_v14  ;;  %v1624_v44 = vmul.f32 %v1616_v48, %v3107_v14  ;;  %v1925_v7 = vand.u32 2147483647, %v2996_v59 }
 0x189   : > { %v2437_v45 = vpop.eup %2436  ;;  %v1183_v52 = vmul.f32 %v3158_v4, %v3075_v29  ;;  %v1615_v58 = vmul.f32 %v1607_v18, %v2952_v37  ;;  %2444 = vrcp.f32 %v1597_v46  ;;  %v1939_v40 = vmul.f32 1.442695, %v1931_v1 }
 0x18a   : > { %v1609_v15 = vmul.f32 %v2437_v45, %v1569_v3  ;;  %v782_v34 = vadd.f32 %v3134_v20, %v769_v16  ;;  %v1203_v43 = vadd.f32 %v1195_v61, %v3134_v20  ;;  %v1632_v55 = vadd.f32 %v1624_v44, %v3134_v20 }
 0x18b   : > { %2446 = vpow2.f32 %v1939_v40  ;;  %v1933_v51 = vsub.f32 0.0, %v1925_v7  ;;  %v768_v30 = vmul.f32 %v3107_v14, %v3014_v6  ;;  %v1194_v39 = vmul.f32 %v3125_v5, %v3107_v14 }
 0x18c   : > { %v2439_v29 = vpop.eup %2438  ;;  %v1617_v37 = vmul.f32 %v1609_v15, %v2956_v60  ;;  %v1211_v4 = vmax.f32 %v782_v34, %v1203_v43  ;;  %v1623_v3 = vmul.f32 %v1615_v58, %v3107_v14  ;;  %v1924_v10 = vand.u32 2147483647, %v2998_v33 }
 0x18d   : > { %v2441_v62 = vpop.eup %2440  ;;  %v1610_v42 = vmul.f32 %v2439_v29, %v1570_v22  ;;  %v1943_v47 = vmul.f32 1.442695, %v1933_v51  ;;  %v781_v49 = vadd.f32 %v3134_v20, %v768_v30  ;;  %v1202_v35 = vadd.f32 %v1194_v39, %v3134_v20 }
 0x18e   : > { %v1189_v6 = vmul.f32 %v3131_v56, %v2911_v57  ;;  %v3240_v11 = vmax.f32 %v1211_v4, %v1632_v55  ;;  %v1631_v5 = vadd.f32 %v1623_v3, %v3134_v20  ;;  %v1932_v60 = vsub.f32 0.0, %v1924_v10 }
 0x18f   : > { %v1618_v19 = vmul.f32 %v1610_v42, %v2965_v31  ;;  %v1612_v48 = vmul.f32 %v2441_v62, %v3197_v54  ;;  %2448 = vpow2.f32 %v1943_v47  ;;  %v1210_v24 = vmax.f32 %v781_v49, %v1202_v35 }
 0x190   : > { %v2443_v22 = vpop.eup %2442  ;;  %v3246_v18 = vmul.f32 %v1183_v52, %v2920_v2  ;;  %v1941_v46 = vmul.f32 1.442695, %v1932_v60  ;;  %v770_v1 = vmul.f32 %v3107_v14, %v3018_v9  ;;  %v1196_v57 = vmul.f32 %v3128_v17, %v3107_v14 }
 0x191   : > { %v1626_v56 = vmul.f32 %v1618_v19, %v3107_v14  ;;  %v1611_v16 = vmul.f32 %v2443_v22, %v1571_v12  ;;  %v3253_v61 = vmax.f32 %v1210_v24, %v1631_v5  ;;  %v1625_v31 = vmul.f32 %v1617_v37, %v3107_v14 }
 0x192   : > { %vm1955_vm11 = vcmp.ge.f32.partialorder %v2992_v53, 0.0  ;;  %2450 = vpow2.f32 %v1941_v46  ;;  %v783_v2 = vadd.f32 %v3134_v20, %v770_v1  ;;  %v1204_v54 = vadd.f32 %v1196_v57, %v3134_v20 }
 0x193   : > { %v2445_v44 = vpop.eup %2444  ;;  %v1620_v9 = vmul.f32 %v1612_v48, %v2967_v32  ;;  %v1619_v7 = vmul.f32 %v1611_v16, %v2971_v36  ;;  %v1633_v17 = vadd.f32 %v1625_v31, %v3134_v20  ;;  %v1926_v12 = vand.u32 2147483647, %v3000_v41 }
 0x194   : > { %v1613_v45 = vmul.f32 %v2445_v44, %v1573_v23  ;;  %v1212_v52 = vmax.f32 %v783_v2, %v1204_v54  ;;  %v771_v58 = vmul.f32 %v3107_v14, %v3033_v50  ;;  %v1197_v40 = vmul.f32 %v1189_v6, %v3107_v14 }
 0x195   : > { %v2447_v15 = vpop.eup %2446  ;;  %v1627_v34 = vmul.f32 %v1619_v7, %v3107_v14  ;;  %vm1957_vm12 = vcmp.ge.f32.partialorder %v2996_v59, 0.0  ;;  %v1934_v43 = vsub.f32 0.0, %v1926_v12  ;;  %v1634_v32 = vadd.f32 %v1626_v56, %v3134_v20 }
 0x196   : > { %v1927_v36 = vand.u32 2147483647, %v3035_v28  ;;  %v1621_v55 = vmul.f32 %v1613_v45, %v2973_v38  ;;  %v1963_v51 = vmul.f32 2.0, %v2447_v15  ;;  %v1979_v23 = vadd.f32 2.0, %v2447_v15 }
 0x197   : > { %v3271_v30 = vmax.f32 %v1212_v52, %v1633_v17  ;;  %v1635_v50 = vadd.f32 %v1627_v34, %v3134_v20  ;;  %v1945_v39 = vmul.f32 1.442695, %v1934_v43  ;;  %v784_v29 = vadd.f32 %v3134_v20, %v771_v58 }
 0x198   : > { %v1205_v37 = vadd.f32 %v1197_v40, %v3134_v20  ;;  %v1629_v4 = vmul.f32 %v1621_v55, %v3107_v14  ;;  %v1971_v3 = vadd.f32 1.0, %v1963_v51  ;;  %v1987_v10 = vmul.f32 %v2447_v15, %v1979_v23 }
 0x199   : > { %v2003_v62 = vmul.f32 %v2447_v15, %v1963_v51  ;;  %vm1956_vm13 = vcmp.ge.f32.partialorder %v2998_v33, 0.0  ;;  %v2449_v42 = vpop.eup %2448  ;;  %v3281_v38 = vmax.f32 %v1214_v0, %v1635_v50  ;;  %2452 = vpow2.f32 %v1945_v39  ;;  %v3401_v15 = vld [vmem:[#allocation4_spill] sm:$0xff] }
 0x19a   : > { %v1213_v47 = vmax.f32 %v784_v29, %v1205_v37  ;;  %v1935_v49 = vsub.f32 0.0, %v1927_v36  ;;  %v1637_v35 = vadd.f32 %v1629_v4, %v3134_v20  ;;  %v1995_v6 = vsel %vm1955_vm11, %v1971_v3, %v1987_v10  ;;  %v3402_v36 = vld [vmem:[#allocation5_spill] sm:$0xff] }
 0x19b   : > { %v2011_v5 = vsel %vm1955_vm11, %v2003_v62, 2.0  ;;  %v1965_v60 = vmul.f32 2.0, %v2449_v42  ;;  %v1981_v48 = vadd.f32 2.0, %v2449_v42  ;;  %v1628_v25 = vmul.f32 %v1620_v9, %v3107_v14 }
 0x19c   : > { %v2019_v19 = vadd.f32 %v2011_v5, %v1995_v6  ;;  %v3288_v24 = vmax.f32 %v1213_v47, %v1634_v32  ;;  %v1947_v22 = vmul.f32 1.442695, %v1935_v49  ;;  %v2451_v27 = vpop.eup %2450  ;;  %v3294_v0 = vmax.f32 %v1216_v8, %v1637_v35 }
 0x19d   : > { %v1973_v46 = vadd.f32 1.0, %v1965_v60  ;;  %v2005_v1 = vmul.f32 %v2449_v42, %v1965_v60  ;;  %v1989_v57 = vmul.f32 %v2449_v42, %v1981_v48  ;;  %v1964_v56 = vmul.f32 2.0, %v2451_v27 }
 0x19e   : > { %2454 = vrcp.f32 %v2019_v19  ;;  %v1980_v16 = vadd.f32 2.0, %v2451_v27  ;;  %v773_v2 = vmul.f32 %v3107_v14, %v3114_v21  ;;  %v1199_v54 = vmul.f32 %v3246_v18, %v3107_v14  ;;  %v3400_v18 = vld [vmem:[#allocation3_spill] sm:$0xff] }
 0x19f   : > { %v2013_v31 = vsel %vm1957_vm12, %v2005_v1, 2.0  ;;  %2456 = vpow2.f32 %v1947_v22  ;;  %v1997_v13 = vsel %vm1957_vm12, %v1973_v46, %v1989_v57  ;;  %v1972_v26 = vadd.f32 1.0, %v1964_v56 }
 0x1a0   : > { %v1988_v8 = vmul.f32 %v2451_v27, %v1980_v16  ;;  %v2004_v44 = vmul.f32 %v2451_v27, %v1964_v56  ;;  %v2021_v9 = vadd.f32 %v2013_v31, %v1997_v13  ;;  %v786_v7 = vadd.f32 %v3134_v20, %v773_v2 }
 0x1a1   : > { %v1207_v17 = vadd.f32 %v1199_v54, %v3134_v20  ;;  %v1636_v12 = vadd.f32 %v1628_v25, %v3134_v20  ;;  %v1929_v52 = vand.u32 2147483647, %v3400_v18  ;;  %v1928_v34 = vand.u32 2147483647, %v3401_v15 }
 0x1a2   : > { %v1996_v45 = vsel %vm1956_vm13, %v1972_v26, %v1988_v8  ;;  %v2012_v21 = vsel %vm1956_vm13, %v2004_v44, 2.0  ;;  %2458 = vrcp.f32 %v2021_v9  ;;  %v1930_v55 = vand.u32 2147483647, %v3402_v36 }
 0x1a3   : > { %v2020_v58 = vadd.f32 %v2012_v21, %v1996_v45  ;;  %v1215_v40 = vmax.f32 %v786_v7, %v1207_v17  ;;  %v2453_v43 = vpop.eup %2452  ;;  %v1937_v32 = vsub.f32 0.0, %v1929_v52  ;;  %v1936_v29 = vsub.f32 0.0, %v1928_v34 }
 0x1a4   : > { %v1966_v51 = vmul.f32 2.0, %v2453_v43  ;;  %v1982_v23 = vadd.f32 2.0, %v2453_v43  ;;  %v1938_v37 = vsub.f32 0.0, %v1930_v55  ;;  %vm1958_vm14 = vcmp.ge.f32.partialorder %v3000_v41, 0.0 }
 0x1a5   : > { %2460 = vrcp.f32 %v2020_v58  ;;  %v3314_v50 = vmax.f32 %v1215_v40, %v1636_v12  ;;  %v1951_v39 = vmul.f32 1.442695, %v1937_v32  ;;  %v1949_v42 = vmul.f32 1.442695, %v1936_v29 }
 0x1a6   : > { %v1974_v4 = vadd.f32 1.0, %v1966_v51  ;;  %v1990_v3 = vmul.f32 %v2453_v43, %v1982_v23  ;;  %v2006_v10 = vmul.f32 %v2453_v43, %v1966_v51  ;;  %v1953_v47 = vmul.f32 1.442695, %v1938_v37 }
 0x1a7   : > { %2462 = vpow2.f32 %v1951_v39  ;;  %vm1959_vm15 = vcmp.ge.f32.partialorder %v3035_v28, 0.0  ;;  %vm1961_vm0 = vcmp.ge.f32.partialorder %v3400_v18, 0.0  ;;  %vm1960_vm1 = vcmp.ge.f32.partialorder %v3401_v15, 0.0 }
 0x1a8   : > { %v2455_v62 = vpop.eup %2454  ;;  %v1998_v5 = vsel %vm1958_vm14, %v1974_v4, %v1990_v3  ;;  %v2014_v60 = vsel %vm1958_vm14, %v2006_v10, 2.0  ;;  %2464 = vpow2.f32 %v1949_v42  ;;  %vm1962_vm2 = vcmp.ge.f32.partialorder %v3402_v36, 0.0 }
 0x1a9   : > { %v2457_v49 = vpop.eup %2456  ;;  %v2035_v35 = vmul.f32 %v2455_v62, %v1995_v6  ;;  %v2022_v19 = vadd.f32 %v2014_v60, %v1998_v5  ;;  %2466 = vpow2.f32 %v1953_v47 }
 0x1aa   : > { %v1967_v48 = vmul.f32 2.0, %v2457_v49  ;;  %v1983_v22 = vadd.f32 2.0, %v2457_v49 }
 0x1ab   : > { %v2043_v27 = vmul.f32 %v2035_v35, %v2992_v53  ;;  %2468 = vrcp.f32 %v2022_v19 }
 0x1ac   : > { %v1975_v25 = vadd.f32 1.0, %v1967_v48  ;;  %v1991_v46 = vmul.f32 %v2457_v49, %v1983_v22  ;;  %v2007_v1 = vmul.f32 %v2457_v49, %v1967_v48  ;;  %v2459_v57 = vpop.eup %2458 }
 0x1ad   : > { %v2051_v56 = vmul.f32 %v2043_v27, %v3107_v14  ;;  %v2037_v6 = vmul.f32 %v2459_v57, %v1997_v13 }
 0x1ae   : > { %v1999_v16 = vsel %vm1959_vm15, %v1975_v25, %v1991_v46  ;;  %v2015_v31 = vsel %vm1959_vm15, %v2007_v1, 2.0 }
 0x1af   : > { %v2461_v2 = vpop.eup %2460  ;;  %v2059_v54 = vadd.f32 %v2051_v56, %v3134_v20  ;;  %v2023_v53 = vadd.f32 %v2015_v31, %v1999_v16  ;;  %v2045_v26 = vmul.f32 %v2037_v6, %v2996_v59 }
 0x1b0   : > { %v2036_v8 = vmul.f32 %v2461_v2, %v1996_v45 }
 0x1b1   : > { %v2067_v44 = vmax.f32 %v3215_v63, %v2059_v54  ;;  %2470 = vrcp.f32 %v2023_v53  ;;  %v2463_v9 = vpop.eup %2462  ;;  %v2053_v7 = vmul.f32 %v2045_v26, %v3107_v14 }
 0x1b2   : > { %v2044_v13 = vmul.f32 %v2036_v8, %v2998_v33  ;;  %v1969_v17 = vmul.f32 2.0, %v2463_v9  ;;  %v1985_v12 = vadd.f32 2.0, %v2463_v9  ;;  %v2465_v21 = vpop.eup %2464 }
 0x1b3   : > { %v2061_v52 = vadd.f32 %v2053_v7, %v3134_v20  ;;  %v2467_v63 = vpop.eup %2466  ;;  %v1968_v34 = vmul.f32 2.0, %v2465_v21  ;;  %v1984_v55 = vadd.f32 2.0, %v2465_v21 }
 0x1b4   : > { %v2052_v59 = vmul.f32 %v2044_v13, %v3107_v14  ;;  %v1977_v45 = vadd.f32 1.0, %v1969_v17  ;;  %v1993_v58 = vmul.f32 %v2463_v9, %v1985_v12  ;;  %v2009_v40 = vmul.f32 %v2463_v9, %v1969_v17 }
 0x1b5   : > { %v2469_v33 = vpop.eup %2468  ;;  %v2069_v43 = vmax.f32 %v3240_v11, %v2061_v52  ;;  %v1970_v51 = vmul.f32 2.0, %v2467_v63  ;;  %v1976_v37 = vadd.f32 1.0, %v1968_v34  ;;  %v1992_v10 = vmul.f32 %v2465_v21, %v1984_v55 }
 0x1b6   : > { %v2060_v32 = vadd.f32 %v2052_v59, %v3134_v20  ;;  %v2038_v23 = vmul.f32 %v2469_v33, %v1998_v5  ;;  %v2001_v39 = vsel %vm1961_vm0, %v1977_v45, %v1993_v58  ;;  %v2017_v29 = vsel %vm1961_vm0, %v2009_v40, 2.0 }
 0x1b7   : > { %v2025_v3 = vadd.f32 %v2017_v29, %v2001_v39  ;;  %v2008_v62 = vmul.f32 %v2465_v21, %v1968_v34  ;;  %v1978_v42 = vadd.f32 1.0, %v1970_v51  ;;  %v1986_v47 = vadd.f32 2.0, %v2467_v63 }
 0x1b8   : > { %v2068_v4 = vmax.f32 %v3253_v61, %v2060_v32  ;;  %v2046_v11 = vmul.f32 %v2038_v23, %v3000_v41  ;;  %v2010_v49 = vmul.f32 %v2467_v63, %v1970_v51  ;;  %v2000_v5 = vsel %vm1960_vm1, %v1976_v37, %v1992_v10 }
 0x1b9   : > { %2472 = vrcp.f32 %v2025_v3  ;;  %v2016_v61 = vsel %vm1960_vm1, %v2008_v62, 2.0  ;;  %v1994_v22 = vmul.f32 %v2467_v63, %v1986_v47 }
 0x1ba   : > { %v2319_v35 = vpack.c.bf16 %v2068_v4, %v2067_v44  ;;  %v2054_v19 = vmul.f32 %v2046_v11, %v3107_v14  ;;  %v2024_v48 = vadd.f32 %v2016_v61, %v2000_v5  ;;  %v2018_v41 = vsel %vm1962_vm2, %v2010_v49, 2.0 }
 0x1bb   : > { %v2471_v60 = vpop.eup %2470  ;;  %v2002_v46 = vsel %vm1962_vm2, %v1978_v42, %v1994_v22 }
 0x1bc   : > { %2107 = vst [vmem:[%s3345_s18] sm:$0xff] %v2319_v35  ;;  %v2039_v27 = vmul.f32 %v2471_v60, %v1999_v16  ;;  %v2062_v25 = vadd.f32 %v2054_v19, %v3134_v20  ;;  %2474 = vrcp.f32 %v2024_v48  ;;  %v2026_v57 = vadd.f32 %v2018_v41, %v2002_v46 }
 0x1be   : > { %v2047_v1 = vmul.f32 %v2039_v27, %v3035_v28  ;;  %v2070_v56 = vmax.f32 %v3271_v30, %v2062_v25  ;;  %2476 = vrcp.f32 %v2026_v57 }
 0x1c0   : > { %v2055_v6 = vmul.f32 %v2047_v1, %v3107_v14  ;;  %v2320_v31 = vpack.c.bf16 %v2070_v56, %v2069_v43 }
 0x1c2   : > { %v2063_v2 = vadd.f32 %v2055_v6, %v3134_v20  ;;  %2108 = vst [vmem:[%s3345_s18 + $0x8] sm:$0xff] %v2320_v31 }
 0x1c3   : > { %v2473_v54 = vpop.eup %2472 }
 0x1c4   : > { %v2071_v16 = vmax.f32 %v3288_v24, %v2063_v2  ;;  %v2041_v53 = vmul.f32 %v2473_v54, %v2001_v39 }
 0x1c6   : > { %v2475_v26 = vpop.eup %2474  ;;  %v2049_v8 = vmul.f32 %v2041_v53, %v3400_v18 }
 0x1c7   : > { %v2040_v44 = vmul.f32 %v2475_v26, %v2000_v5 }
 0x1c8   : > { %v2057_v28 = vmul.f32 %v2049_v8, %v3107_v14  ;;  %v2477_v30 = vpop.eup %2476 }
 0x1c9   : > { %v2048_v9 = vmul.f32 %v2040_v44, %v3401_v15  ;;  %v2042_v13 = vmul.f32 %v2477_v30, %v2002_v46 }
 0x1ca   : > { %v2065_v7 = vadd.f32 %v2057_v28, %v3134_v20 }
 0x1cb   : > { %v2056_v17 = vmul.f32 %v2048_v9, %v3107_v14  ;;  %v2050_v24 = vmul.f32 %v2042_v13, %v3402_v36 }
 0x1cc   : > { %v2073_v12 = vmax.f32 %v3314_v50, %v2065_v7 }
 0x1cd   : > { %v2064_v21 = vadd.f32 %v2056_v17, %v3134_v20  ;;  %v2058_v18 = vmul.f32 %v2050_v24, %v3107_v14 }
 0x1cf   : > { %v2072_v52 = vmax.f32 %v3281_v38, %v2064_v21  ;;  %v2066_v59 = vadd.f32 %v2058_v18, %v3134_v20 }
 0x1d1   : > { %v2321_v63 = vpack.c.bf16 %v2072_v52, %v2071_v16  ;;  %v2074_v15 = vmax.f32 %v3294_v0, %v2066_v59 }
 0x1d3   : > { %2109 = vst [vmem:[%s3345_s18 + $0x10] sm:$0xff] %v2321_v63  ;;  %v2322_v45 = vpack.c.bf16 %v2074_v15, %v2073_v12 }
 0x1d5   : > { %2110 = vst [vmem:[%s3345_s18 + $0x18] sm:$0xff] %v2322_v45 }
 0x1d6 PF: > { %p11_p9 = scmp.ge.s32.totalorder %s2546_s19, 4   ;;  %s3403_s15 = smov %s2496_s16 }
 0x1d7   : > { %s3404_s16 = smov %s2555_s22  ;;  %s3405_s17 = smov %s2546_s19 }
 0x1d8   :  { %13 = sbr.rel (!%p11_p9) target bundleno = 2 (0x2), region = 97 }

// kernel: forward.14
= control target key start
LH: loop header
LB: loop body
LE: loop exit
PB: predicated region body
PF: predicated region fallthrough
CT: control target
= control target key end

     0   :  { %s1141_s15 = smov 0   ;;  %s1143_s16 = smov 0   ;;  %s1436_s0 = inlined_call_operand.vmem [shape: bf16[8,72], index: 0, kind: input, shape index: {}]   ;;  %s1437_s1 = inlined_call_operand.vmem [shape: bf16[72,2048], index: 1, kind: input, shape index: {}]   ;;  %s1438_s2 = inlined_call_operand.vmem [shape: f32[8,1], index: 2, kind: input, shape index: {}]   ;;  %s1439_s3 = inlined_call_operand.vmem [shape: f32[8,1], index: 3, kind: input, shape index: {}]   ;;  %s1440_s4 = inlined_call_operand.vmem [shape: bf16[8,2048], index: 4, kind: output, shape index: {}]  }
   0x1   :  { %s1145_s17 = smov 0  }
   0x2 LB: > { %s955_s18 = sadd.s32 4294967295, %s1113_s17   ;;  %s1158_s19 = sadd.s32 1, %s1113_s17   ;;  %s1113_s17 = sphi %s1145_s17, %s1443_s17   ;;  %s1109_s16 = sphi %s1143_s16, %s1442_s16   ;;  %s1105_s15 = sphi %s1141_s15, %s1441_s15  }
   0x3   : > { %s39_s20 = ssub.s32 %s1113_s17, %s1158_s19  ;;  %s42_s21 = sadd.s32 1, %s1109_s16 }
   0x4   : > { %p40_p0 = scmp.eq.s32.totalorder %s39_s20, 0  ;;  %p49_p1 = scmp.ne.s32.totalorder %s1109_s16, %s1105_s15 }
   0x5   : > { %p50_p2 = scmp.eq.s32.totalorder %s1113_s17, 0  ;;  %p958_p4 = scmp.ge.s32.totalorder %s1113_s17, 2 }
   0x6   : > { %s1167_s22 = scalar_select %p40_p0, %s1109_s16, %s42_s21  }
   0x7   : > { %p51_p3 = por %p50_p2, %p49_p1  ;;  %152 = sbr.rel (%p958_p4) target bundleno = 37 (0x25), region = 28 }
   0xe   : > { %155 = sbr.rel (!%p51_p3) target bundleno = 37 (0x25), region = 32  ;;  %s157_s23 = sand.u32 (%p51_p3), 1, %s1109_s16  }
   0xf   : > { %s1018_s24 = sshll.u32 (%p51_p3), %s1113_s17, 5  ;;  %s1023_s25 = smul.u32 (%p51_p3), 288, %s157_s23 }
  0x10   : > { %s1175_s28 = scalar_lea.vmem (%p51_p3), %s1437_s1, %s1018_s24 }
  0x11   : > { %v175_v0 = vld [vmem:[%s1175_s28] sm:$0xff] (%p51_p3)  ;;  %v177_v1 = vld [vmem:[%s1175_s28 + $0x8] sm:$0xff] (%p51_p3)  ;;  %v179_v2 = vld [vmem:[%s1175_s28 + $0x10] sm:$0xff] (%p51_p3)  ;;  %s1183_s29 = scalar_lea.vmem (%p51_p3), [#allocation2], %s1023_s25 }
  0x12   : > { %v181_v3 = vld [vmem:[%s1175_s28 + $0x18] sm:$0xff] (%p51_p3)  ;;  %v183_v4 = vld [vmem:[%s1175_s28 + $0x40] sm:$0xff] (%p51_p3)  ;;  %v185_v5 = vld [vmem:[%s1175_s28 + $0x48] sm:$0xff] (%p51_p3)  ;;  %176 = vst [vmem:[%s1183_s29] sm:$0xff] (%p51_p3), %v175_v0 }
  0x13   : > { %178 = vst [vmem:[%s1183_s29 + $0x8] sm:$0xff] (%p51_p3), %v177_v1  ;;  %180 = vst [vmem:[%s1183_s29 + $0x10] sm:$0xff] (%p51_p3), %v179_v2  ;;  %v187_v6 = vld [vmem:[%s1175_s28 + $0x50] sm:$0xff] (%p51_p3)  ;;  %v189_v7 = vld [vmem:[%s1175_s28 + $0x58] sm:$0xff] (%p51_p3) }
  0x14   : > { %182 = vst [vmem:[%s1183_s29 + $0x18] sm:$0xff] (%p51_p3), %v181_v3  ;;  %184 = vst [vmem:[%s1183_s29 + $0x20] sm:$0xff] (%p51_p3), %v183_v4  ;;  %v191_v8 = vld [vmem:[%s1175_s28 + $0x80] sm:$0xff] (%p51_p3)  ;;  %v193_v9 = vld [vmem:[%s1175_s28 + $0x88] sm:$0xff] (%p51_p3) }
  0x15   : > { %186 = vst [vmem:[%s1183_s29 + $0x28] sm:$0xff] %v185_v5  ;;  %188 = vst [vmem:[%s1183_s29 + $0x30] sm:$0xff] %v187_v6  ;;  %v195_v10 = vld [vmem:[%s1175_s28 + $0x90] sm:$0xff]  ;;  %v197_v11 = vld [vmem:[%s1175_s28 + $0x98] sm:$0xff] }
  0x16   : > { %190 = vst [vmem:[%s1183_s29 + $0x38] sm:$0xff] %v189_v7  ;;  %192 = vst [vmem:[%s1183_s29 + $0x40] sm:$0xff] %v191_v8  ;;  %v199_v12 = vld [vmem:[%s1175_s28 + $0xc0] sm:$0xff]  ;;  %v201_v13 = vld [vmem:[%s1175_s28 + $0xc8] sm:$0xff] }
  0x17   : > { %194 = vst [vmem:[%s1183_s29 + $0x48] sm:$0xff] %v193_v9  ;;  %196 = vst [vmem:[%s1183_s29 + $0x50] sm:$0xff] %v195_v10  ;;  %v203_v14 = vld [vmem:[%s1175_s28 + $0xd0] sm:$0xff]  ;;  %v205_v15 = vld [vmem:[%s1175_s28 + $0xd8] sm:$0xff] }
  0x18   : > { %198 = vst [vmem:[%s1183_s29 + $0x58] sm:$0xff] %v197_v11  ;;  %200 = vst [vmem:[%s1183_s29 + $0x60] sm:$0xff] %v199_v12  ;;  %v207_v16 = vld [vmem:[%s1175_s28 + $0x100] sm:$0xff]  ;;  %v209_v17 = vld [vmem:[%s1175_s28 + $0x108] sm:$0xff] }
  0x19   : > { %202 = vst [vmem:[%s1183_s29 + $0x68] sm:$0xff] %v201_v13  ;;  %204 = vst [vmem:[%s1183_s29 + $0x70] sm:$0xff] %v203_v14  ;;  %v211_v18 = vld [vmem:[%s1175_s28 + $0x110] sm:$0xff]  ;;  %v213_v19 = vld [vmem:[%s1175_s28 + $0x118] sm:$0xff] }
  0x1a   : > { %206 = vst [vmem:[%s1183_s29 + $0x78] sm:$0xff] %v205_v15  ;;  %208 = vst [vmem:[%s1183_s29 + $0x80] sm:$0xff] %v207_v16  ;;  %v215_v20 = vld [vmem:[%s1175_s28 + $0x140] sm:$0xff]  ;;  %v217_v21 = vld [vmem:[%s1175_s28 + $0x148] sm:$0xff] }
  0x1b   : > { %210 = vst [vmem:[%s1183_s29 + $0x88] sm:$0xff] %v209_v17  ;;  %212 = vst [vmem:[%s1183_s29 + $0x90] sm:$0xff] %v211_v18  ;;  %v219_v22 = vld [vmem:[%s1175_s28 + $0x150] sm:$0xff]  ;;  %v221_v23 = vld [vmem:[%s1175_s28 + $0x158] sm:$0xff] }
  0x1c   : > { %214 = vst [vmem:[%s1183_s29 + $0x98] sm:$0xff] %v213_v19  ;;  %216 = vst [vmem:[%s1183_s29 + $0xa0] sm:$0xff] %v215_v20  ;;  %v223_v24 = vld [vmem:[%s1175_s28 + $0x180] sm:$0xff]  ;;  %v225_v25 = vld [vmem:[%s1175_s28 + $0x188] sm:$0xff] }
  0x1d   : > { %218 = vst [vmem:[%s1183_s29 + $0xa8] sm:$0xff] %v217_v21  ;;  %220 = vst [vmem:[%s1183_s29 + $0xb0] sm:$0xff] %v219_v22  ;;  %v227_v26 = vld [vmem:[%s1175_s28 + $0x190] sm:$0xff]  ;;  %v229_v27 = vld [vmem:[%s1175_s28 + $0x198] sm:$0xff] }
  0x1e   : > { %222 = vst [vmem:[%s1183_s29 + $0xb8] sm:$0xff] %v221_v23  ;;  %224 = vst [vmem:[%s1183_s29 + $0xc0] sm:$0xff] %v223_v24  ;;  %v231_v28 = vld [vmem:[%s1175_s28 + $0x1c0] sm:$0xff]  ;;  %v233_v29 = vld [vmem:[%s1175_s28 + $0x1c8] sm:$0xff] }
  0x1f   : > { %226 = vst [vmem:[%s1183_s29 + $0xc8] sm:$0xff] %v225_v25  ;;  %228 = vst [vmem:[%s1183_s29 + $0xd0] sm:$0xff] %v227_v26  ;;  %v235_v30 = vld [vmem:[%s1175_s28 + $0x1d0] sm:$0xff]  ;;  %v237_v31 = vld [vmem:[%s1175_s28 + $0x1d8] sm:$0xff] }
  0x20   : > { %230 = vst [vmem:[%s1183_s29 + $0xd8] sm:$0xff] %v229_v27  ;;  %232 = vst [vmem:[%s1183_s29 + $0xe0] sm:$0xff] %v231_v28  ;;  %v239_v32 = vld [vmem:[%s1175_s28 + $0x200] sm:$0xff]  ;;  %v241_v33 = vld [vmem:[%s1175_s28 + $0x208] sm:$0xff] }
  0x21   : > { %234 = vst [vmem:[%s1183_s29 + $0xe8] sm:$0xff] %v233_v29  ;;  %236 = vst [vmem:[%s1183_s29 + $0xf0] sm:$0xff] %v235_v30  ;;  %v243_v34 = vld [vmem:[%s1175_s28 + $0x210] sm:$0xff]  ;;  %v245_v35 = vld [vmem:[%s1175_s28 + $0x218] sm:$0xff] }
  0x22   : > { %238 = vst [vmem:[%s1183_s29 + $0xf8] sm:$0xff] %v237_v31  ;;  %240 = vst [vmem:[%s1183_s29 + $0x100] sm:$0xff] %v239_v32 }
  0x23   : > { %242 = vst [vmem:[%s1183_s29 + $0x108] sm:$0xff] %v241_v33  ;;  %244 = vst [vmem:[%s1183_s29 + $0x110] sm:$0xff] %v243_v34 }
  0x24   : > { %246 = vst [vmem:[%s1183_s29 + $0x118] sm:$0xff] %v245_v35 }
  0x25 PF: > { %p961_p5 = scmp.ge.s32.totalorder %s1113_s17, 1  ;;  %p251_p6 = scmp.lt.s32.totalorder %s1113_s17, 3 }
  0x27   : > { %p252_p7 = pnand %p961_p5, %p251_p6 }
  0x28   : > { %s258_s30 = sand.u32 (!%p252_p7), 1, %s1105_s15   ;;  %v1115_v36 = vmov (!%p252_p7), 0   ;;  %v701_v37 = vld [vmem:[%s1438_s2] sm:$0xff] (!%p252_p7)  ;;  %vm512_vm0 = vcmask (!%p252_p7), 1043456   ;;  %vm508_vm1 = vcmask (!%p252_p7), 588800   ;;  %s1363_s13 = sshll.u32 (!%p252_p7), %s955_s18, 3 }
  0x29   : > { %255 = sbr.rel (%p252_p7) target bundleno = 358 (0x166), region = 55  ;;  %569 = vmatprep.mubr.bf16.mxu0 (!%p252_p7), %v1115_v36  ;;  %610 = vmatprep.mubr.bf16.mxu1 (!%p252_p7), %v1115_v36  ;;  %v702_v38 = vld [vmem:[%s1439_s3] sm:$0xff] (!%p252_p7)  ;;  %p285_p8 = scmp.lt.s32.totalorder (!%p252_p7), %s1363_s13, 15 }
  0x2a   : > { %s1024_s5 = smul.u32 (!%p252_p7), 288, %s258_s30  ;;  %1050 = vset.pattern.permute.xlu0 (!%p252_p7), %v1115_v36  ;;  %v291_v25 = vld [vmem:[%s1436_s0] sm:$0xf] (!%p252_p7) }
  0x2b   : > { %833 = vperm.xlu0 (!%p252_p7), %1050, %v701_v37  }
  0x2c   : > { %s1263_s10 = scalar_lea.vmem (!%p252_p7), [#allocation2], %s1024_s5 }
  0x2d   : > { %v292_v39 = vld [vmem:[%s1263_s10] sm:$0xff] (!%p252_p7)  ;;  %v293_v41 = vld [vmem:[%s1263_s10 + $0x8] sm:$0xff] (!%p252_p7)  ;;  %v294_v13 = vld [vmem:[%s1263_s10 + $0x10] sm:$0xff] (!%p252_p7) }
  0x2e   : > { %v296_v40 = vld [vmem:[%s1263_s10 + $0x20] sm:$0xff] (!%p252_p7)  ;;  %v297_v43 = vld [vmem:[%s1263_s10 + $0x28] sm:$0xff] (!%p252_p7)  ;;  %v298_v14 = vld [vmem:[%s1263_s10 + $0x30] sm:$0xff] (!%p252_p7) }
  0x2f   : > { %v965_v42 = vcombine.high (!%p252_p7), %v292_v39, %v296_v40  ;;  %v964_v44 = vcombine.low (!%p252_p7), %v292_v39, %v296_v40  ;;  %v300_v45 = vld [vmem:[%s1263_s10 + $0x40] sm:$0xff] (!%p252_p7)  ;;  %v967_v47 = vcombine.high (!%p252_p7), %v293_v41, %v297_v43  ;;  %v966_v48 = vcombine.low (!%p252_p7), %v293_v41, %v297_v43  ;;  %v301_v50 = vld [vmem:[%s1263_s10 + $0x48] sm:$0xff] (!%p252_p7)  ;;  %846 = vperm.xlu0 (!%p252_p7), %1050, %v702_v38   ;;  %v295_v15 = vld [vmem:[%s1263_s10 + $0x18] sm:$0xff] (!%p252_p7) }
  0x30   : > { %v304_v46 = vld [vmem:[%s1263_s10 + $0x60] sm:$0xff]  ;;  %v305_v51 = vld [vmem:[%s1263_s10 + $0x68] sm:$0xff]  ;;  %v299_v16 = vld [vmem:[%s1263_s10 + $0x38] sm:$0xff]  ;;  %v969_v18 = vcombine.high %v294_v13, %v298_v14  ;;  %v968_v26 = vcombine.low %v294_v13, %v298_v14  ;;  %s1445_s13 = smov (!%p285_p8, %s1363_s13), 15 }
  0x31   : > { %v973_v49 = vcombine.high %v300_v45, %v304_v46  ;;  %v308_v52 = vld [vmem:[%s1263_s10 + $0x80] sm:$0xff]  ;;  %537 = vmatprep.subr.bf16.mxu0 %v965_v42  ;;  %v975_v53 = vcombine.high %v301_v50, %v305_v51  ;;  %v309_v55 = vld [vmem:[%s1263_s10 + $0x88] sm:$0xff]  ;;  %578 = vmatprep.subr.bf16.mxu1 %v967_v47  ;;  %v972_v57 = vcombine.low %v300_v45, %v304_v46  ;;  %v302_v21 = vld [vmem:[%s1263_s10 + $0x50] sm:$0xff]  ;;  %s963_s14 = sshll.u32 %s1445_s13, 2 }
  0x32   : > { %v312_v54 = vld [vmem:[%s1263_s10 + $0xa0] sm:$0xff]  ;;  %v313_v56 = vld [vmem:[%s1263_s10 + $0xa8] sm:$0xff]  ;;  %538 = vmatpush1.bf16.msra.mxu0 %v964_v44  ;;  %579 = vmatpush1.bf16.msra.mxu1 %v966_v48  ;;  %v974_v58 = vcombine.low %v301_v50, %v305_v51  ;;  %v971_v20 = vcombine.high %v295_v15, %v299_v16  ;;  %v306_v22 = vld [vmem:[%s1263_s10 + $0x70] sm:$0xff]  ;;  %v970_v27 = vcombine.low %v295_v15, %v299_v16  ;;  %s1406_s18 = scalar_lea.vmem %s1440_s4, %s963_s14 }
  0x33   : > { %539 = vmatprep.subr.bf16.mxu0 %v973_v49  ;;  %v981_v59 = vcombine.high %v308_v52, %v312_v54  ;;  %580 = vmatprep.subr.bf16.mxu1 %v975_v53  ;;  %v983_v60 = vcombine.high %v309_v55, %v313_v56  ;;  %v316_v61 = vld [vmem:[%s1263_s10 + $0xc0] sm:$0xff]  ;;  %v317_v63 = vld [vmem:[%s1263_s10 + $0xc8] sm:$0xff]  ;;  %v980_v1 = vcombine.low %v308_v52, %v312_v54  ;;  %v303_v23 = vld [vmem:[%s1263_s10 + $0x58] sm:$0xff] }
  0x34   : > { %v320_v62 = vld [vmem:[%s1263_s10 + $0xe0] sm:$0xff]  ;;  %v321_v0 = vld [vmem:[%s1263_s10 + $0xe8] sm:$0xff]  ;;  %v982_v2 = vcombine.low %v309_v55, %v313_v56  ;;  %v307_v24 = vld [vmem:[%s1263_s10 + $0x78] sm:$0xff]  ;;  %v977_v28 = vcombine.high %v302_v21, %v306_v22  ;;  %v976_v34 = vcombine.low %v302_v21, %v306_v22 }
  0x35   : > { %v989_v3 = vcombine.high %v316_v61, %v320_v62  ;;  %v991_v4 = vcombine.high %v317_v63, %v321_v0  ;;  %v324_v5 = vld [vmem:[%s1263_s10 + $0x100] sm:$0xff]  ;;  %v325_v6 = vld [vmem:[%s1263_s10 + $0x108] sm:$0xff]  ;;  %v988_v7 = vcombine.low %v316_v61, %v320_v62  ;;  %v990_v8 = vcombine.low %v317_v63, %v321_v0  ;;  %v310_v30 = vld [vmem:[%s1263_s10 + $0x90] sm:$0xff] }
  0x36   : > { %540 = vmatpush1.bf16.msra.mxu0 %v972_v57  ;;  %581 = vmatpush1.bf16.msra.mxu1 %v974_v58  ;;  %v997_v9 = vcombine.high %v324_v5, %v324_v5  ;;  %v996_v10 = vcombine.low %v324_v5, %v324_v5  ;;  %v999_v11 = vcombine.high %v325_v6, %v325_v6  ;;  %v314_v31 = vld [vmem:[%s1263_s10 + $0xb0] sm:$0xff]  ;;  %v311_v32 = vld [vmem:[%s1263_s10 + $0x98] sm:$0xff] }
  0x37   : > { %541 = vmatprep.subr.bf16.mxu0 %v981_v59  ;;  %582 = vmatprep.subr.bf16.mxu1 %v983_v60  ;;  %v998_v12 = vcombine.low %v325_v6, %v325_v6  ;;  %v979_v29 = vcombine.high %v303_v23, %v307_v24  ;;  %v315_v33 = vld [vmem:[%s1263_s10 + $0xb8] sm:$0xff]  ;;  %v978_v35 = vcombine.low %v303_v23, %v307_v24  ;;  %v318_v39 = vld [vmem:[%s1263_s10 + $0xd0] sm:$0xff] }
  0x38   : > { %v514_v17 = vsel %vm512_vm0, %v996_v10, 0  ;;  %v985_v37 = vcombine.high %v310_v30, %v314_v31  ;;  %v987_v38 = vcombine.high %v311_v32, %v315_v33  ;;  %v322_v40 = vld [vmem:[%s1263_s10 + $0xf0] sm:$0xff]  ;;  %v319_v41 = vld [vmem:[%s1263_s10 + $0xd8] sm:$0xff]  ;;  %v984_v43 = vcombine.low %v310_v30, %v314_v31 }
  0x39   : > { %v520_v19 = vsel %vm512_vm0, %v998_v12, 0  ;;  %v323_v42 = vld [vmem:[%s1263_s10 + $0xf8] sm:$0xff]  ;;  %v986_v44 = vcombine.low %v311_v32, %v315_v33  ;;  %v993_v45 = vcombine.high %v318_v39, %v322_v40  ;;  %v326_v47 = vld [vmem:[%s1263_s10 + $0x110] sm:$0xff]  ;;  %v992_v49 = vcombine.low %v318_v39, %v322_v40 }
  0x3a   : > { %542 = vmatpush1.bf16.msra.mxu0 %v980_v1  ;;  %583 = vmatpush1.bf16.msra.mxu1 %v982_v2  ;;  %v995_v46 = vcombine.high %v319_v41, %v323_v42  ;;  %v327_v48 = vld [vmem:[%s1263_s10 + $0x118] sm:$0xff]  ;;  %v994_v50 = vcombine.low %v319_v41, %v323_v42  ;;  %v1001_v51 = vcombine.high %v326_v47, %v326_v47 }
  0x3b   : > { %543 = vmatprep.subr.bf16.mxu0 %v989_v3  ;;  %584 = vmatprep.subr.bf16.mxu1 %v991_v4  ;;  %v1000_v52 = vcombine.low %v326_v47, %v326_v47  ;;  %v1003_v53 = vcombine.high %v327_v48, %v327_v48 }
  0x3d   : > { %v526_v54 = vsel %vm512_vm0, %v1000_v52, 0 }
  0x3e   : > { %544 = vmatpush1.bf16.msra.mxu0 %v988_v7  ;;  %585 = vmatpush1.bf16.msra.mxu1 %v990_v8 }
  0x3f   : > { %1004 = vmatprep.subr.msk.bf16.mxu0 %vm512_vm0, %v997_v9  ;;  %1006 = vmatprep.subr.msk.bf16.mxu1 %vm512_vm0, %v999_v11 }
  0x42   : > { %546 = vmatpush1.bf16.msra.mxu0 %v514_v17  ;;  %587 = vmatpush1.bf16.msra.mxu1 %v520_v19 }
  0x43   : > { %619 = vmatprep.subr.bf16.mxu0 %v969_v18  ;;  %660 = vmatprep.subr.bf16.mxu1 %v971_v20 }
  0x45   : > { %1005 = vmatmul.mubr.msk.bf16.vlgmr.msra.gmra.mrb[0].mxu0 %vm508_vm1, %v291_v25  ;;  %1007 = vmatmul.mubr.msk.bf16.vlgmr.msra.gmra.mrb[0].mxu1 %vm508_vm1, %v291_v25 }
  0x46   : > { %620 = vmatpush1.bf16.msra.mxu0 %v968_v26  ;;  %661 = vmatpush1.bf16.msra.mxu1 %v970_v27 }
  0x47   : > { %621 = vmatprep.subr.bf16.mxu0 %v977_v28  ;;  %662 = vmatprep.subr.bf16.mxu1 %v979_v29 }
  0x48   : > { %651 = vmatprep.mubr.bf16.mxu0 %v1115_v36  ;;  %692 = vmatprep.mubr.bf16.mxu1 %v1115_v36  ;;  %v1002_v36 = vcombine.low %v327_v48, %v327_v48 }
  0x4a   : > { %622 = vmatpush1.bf16.msra.mxu0 %v976_v34  ;;  %663 = vmatpush1.bf16.msra.mxu1 %v978_v35  ;;  %v532_v55 = vsel %vm512_vm0, %v1002_v36, 0 }
  0x4b   : > { %623 = vmatprep.subr.bf16.mxu0 %v985_v37  ;;  %664 = vmatprep.subr.bf16.mxu1 %v987_v38 }
  0x4e   : > { %624 = vmatpush1.bf16.msra.mxu0 %v984_v43  ;;  %665 = vmatpush1.bf16.msra.mxu1 %v986_v44 }
  0x4f   : > { %625 = vmatprep.subr.bf16.mxu0 %v993_v45  ;;  %666 = vmatprep.subr.bf16.mxu1 %v995_v46 }
  0x52   : > { %626 = vmatpush1.bf16.msra.mxu0 %v992_v49  ;;  %667 = vmatpush1.bf16.msra.mxu1 %v994_v50 }
  0x53   : > { %1008 = vmatprep.subr.msk.bf16.mxu0 %vm512_vm0, %v1001_v51  ;;  %1010 = vmatprep.subr.msk.bf16.mxu1 %vm512_vm0, %v1003_v53 }
  0x56   : > { %628 = vmatpush1.bf16.msra.mxu0 %v526_v54  ;;  %669 = vmatpush1.bf16.msra.mxu1 %v532_v55 }
  0x59   : > { %1009 = vmatmul.mubr.msk.bf16.vlgmr.msra.gmra.mrb[4].mxu0 %vm508_vm1, %v291_v25  ;;  %1011 = vmatmul.mubr.msk.bf16.vlgmr.msra.gmra.mrb[4].mxu1 %vm508_vm1, %v291_v25 }
 0x118   : > { %v1318_v56 = vpop.f32.mrb[0].mxu0  ;;  %v1321_v58 = vpop.f32.mrb[0].mxu1 }
 0x119   : > { %v703_v57 = vand.u32 2147483647, %v1318_v56  ;;  %v1323_v59 = vpop.f32.mrb[1].mxu0  ;;  %v705_v60 = vand.u32 2147483647, %v1321_v58  ;;  %v1327_v63 = vpop.f32.mrb[1].mxu1 }
 0x11a   : > { %v704_v61 = vand.u32 2147483647, %v1323_v59  ;;  %v575_v0 = vpop.f32.mrb[2].mxu0  ;;  %v706_v3 = vand.u32 2147483647, %v1327_v63  ;;  %v616_v4 = vpop.f32.mrb[2].mxu1 }
 0x11b   : > { %v711_v62 = vsub.f32 0.0, %v703_v57  ;;  %v713_v1 = vsub.f32 0.0, %v705_v60  ;;  %v576_v6 = vpop.f32.mrb[3].mxu0  ;;  %v617_v7 = vpop.f32.mrb[3].mxu1  ;;  %vm735_vm2 = vcmp.ge.f32.partialorder %v1318_v56, 0.0  ;;  %vm737_vm3 = vcmp.ge.f32.partialorder %v1321_v58, 0.0 }
 0x11c   : > { %v712_v2 = vsub.f32 0.0, %v704_v61  ;;  %v714_v10 = vsub.f32 0.0, %v706_v3  ;;  %vm736_vm4 = vcmp.ge.f32.partialorder %v1323_v59, 0.0  ;;  %vm738_vm5 = vcmp.ge.f32.partialorder %v1327_v63, 0.0 }
 0x11d   : > { %v719_v5 = vmul.f32 1.442695, %v711_v62  ;;  %v723_v8 = vmul.f32 1.442695, %v713_v1 }
 0x11e   : > { %v721_v9 = vmul.f32 1.442695, %v712_v2  ;;  %v725_v11 = vmul.f32 1.442695, %v714_v10 }
 0x11f   : > { %1059 = vpow2.f32 %v719_v5 }
 0x120   : > { %1061 = vpow2.f32 %v723_v8  ;;  %v1358_v8 = vpop.permute.xlu0 %833 }
 0x121   : > { %1063 = vpow2.f32 %v721_v9 }
 0x122   : > { %1065 = vpow2.f32 %v725_v11 }
 0x129   : > { %v1060_v12 = vpop.eup %1059 }
 0x12a   : > { %v1062_v13 = vpop.eup %1061  ;;  %v743_v14 = vmul.f32 2.0, %v1060_v12  ;;  %v759_v15 = vadd.f32 2.0, %v1060_v12 }
 0x12b   : > { %v1064_v16 = vpop.eup %1063  ;;  %v745_v17 = vmul.f32 2.0, %v1062_v13  ;;  %v761_v18 = vadd.f32 2.0, %v1062_v13 }
 0x12c   : > { %v751_v19 = vadd.f32 1.0, %v743_v14  ;;  %v767_v20 = vmul.f32 %v1060_v12, %v759_v15  ;;  %v783_v21 = vmul.f32 %v1060_v12, %v743_v14  ;;  %v744_v22 = vmul.f32 2.0, %v1064_v16  ;;  %v1333_v23 = vpop.f32.mrb[4].mxu0  ;;  %v1066_v24 = vpop.eup %1065 }
 0x12d   : > { %v753_v25 = vadd.f32 1.0, %v745_v17  ;;  %v769_v26 = vmul.f32 %v1062_v13, %v761_v18  ;;  %v785_v27 = vmul.f32 %v1062_v13, %v745_v17  ;;  %v760_v28 = vadd.f32 2.0, %v1064_v16  ;;  %v1335_v29 = vpop.f32.mrb[4].mxu1  ;;  %v1337_v30 = vpop.f32.mrb[5].mxu0 }
 0x12e   : > { %v775_v31 = vsel %vm735_vm2, %v751_v19, %v767_v20  ;;  %v791_v32 = vsel %vm735_vm2, %v783_v21, 2.0  ;;  %v752_v33 = vadd.f32 1.0, %v744_v22  ;;  %v784_v34 = vmul.f32 %v1064_v16, %v744_v22  ;;  %v1343_v35 = vpop.f32.mrb[5].mxu1  ;;  %v657_v37 = vpop.f32.mrb[6].mxu0 }
 0x12f   : > { %v799_v38 = vadd.f32 %v791_v32, %v775_v31  ;;  %v777_v39 = vsel %vm737_vm3, %v753_v25, %v769_v26  ;;  %v793_v40 = vsel %vm737_vm3, %v785_v27, 2.0  ;;  %v768_v41 = vmul.f32 %v1064_v16, %v760_v28  ;;  %v698_v42 = vpop.f32.mrb[6].mxu1  ;;  %v658_v43 = vpop.f32.mrb[7].mxu0 }
 0x130   : > { %v801_v44 = vadd.f32 %v793_v40, %v777_v39  ;;  %v792_v45 = vsel %vm736_vm4, %v784_v34, 2.0  ;;  %v746_v46 = vmul.f32 2.0, %v1066_v24  ;;  %v762_v47 = vadd.f32 2.0, %v1066_v24  ;;  %v699_v48 = vpop.f32.mrb[7].mxu1  ;;  %v1366_v17 = vpop.permute.xlu0 %846 }
 0x131   : > { %1067 = vrcp.f32 %v799_v38  ;;  %v776_v49 = vsel %vm736_vm4, %v752_v33, %v768_v41  ;;  %v707_v50 = vand.u32 2147483647, %v1333_v23  ;;  %v709_v55 = vand.u32 2147483647, %v1335_v29 }
 0x132   : > { %1069 = vrcp.f32 %v801_v44  ;;  %v800_v51 = vadd.f32 %v792_v45, %v776_v49  ;;  %v754_v52 = vadd.f32 1.0, %v746_v46  ;;  %v770_v53 = vmul.f32 %v1066_v24, %v762_v47 }
 0x133   : > { %v786_v36 = vmul.f32 %v1066_v24, %v746_v46  ;;  %v715_v54 = vsub.f32 0.0, %v707_v50  ;;  %v708_v60 = vand.u32 2147483647, %v1337_v30  ;;  %v717_v0 = vsub.f32 0.0, %v709_v55 }
 0x134   : > { %1071 = vrcp.f32 %v800_v51  ;;  %v778_v57 = vsel %vm738_vm5, %v754_v52, %v770_v53  ;;  %v710_v1 = vand.u32 2147483647, %v1343_v35  ;;  %vm739_vm6 = vcmp.ge.f32.partialorder %v1333_v23, 0.0 }
 0x135   : > { %v794_v61 = vsel %vm738_vm5, %v786_v36, 2.0  ;;  %v727_v62 = vmul.f32 1.442695, %v715_v54  ;;  %v716_v3 = vsub.f32 0.0, %v708_v60  ;;  %v731_v4 = vmul.f32 1.442695, %v717_v0 }
 0x136   : > { %v802_v2 = vadd.f32 %v794_v61, %v778_v57  ;;  %v718_v5 = vsub.f32 0.0, %v710_v1  ;;  %vm741_vm7 = vcmp.ge.f32.partialorder %v1335_v29, 0.0  ;;  %vm740_vm8 = vcmp.ge.f32.partialorder %v1337_v30, 0.0 }
 0x137   : > { %1073 = vpow2.f32 %v727_v62  ;;  %v729_v6 = vmul.f32 1.442695, %v716_v3  ;;  %vm742_vm9 = vcmp.ge.f32.partialorder %v1343_v35, 0.0 }
 0x138   : > { %1075 = vrcp.f32 %v802_v2  ;;  %v733_v7 = vmul.f32 1.442695, %v718_v5 }
 0x139   : > { %1077 = vpow2.f32 %v731_v4 }
 0x13a   : > { %1079 = vpow2.f32 %v729_v6 }
 0x13b   : > { %v1068_v9 = vpop.eup %1067  ;;  %1081 = vpow2.f32 %v733_v7 }
 0x13c   : > { %v1070_v10 = vpop.eup %1069  ;;  %v815_v11 = vmul.f32 %v1068_v9, %v775_v31 }
 0x13d   : > { %v817_v12 = vmul.f32 %v1070_v10, %v777_v39 }
 0x13e   : > { %v1072_v13 = vpop.eup %1071  ;;  %v823_v14 = vmul.f32 %v815_v11, %v1318_v56 }
 0x13f   : > { %v825_v15 = vmul.f32 %v817_v12, %v1321_v58  ;;  %v816_v16 = vmul.f32 %v1072_v13, %v776_v49 }
 0x140   : > { %v836_v18 = vmul.f32 %v1358_v8, %v823_v14 }
 0x141   : > { %v1074_v19 = vpop.eup %1073  ;;  %v824_v20 = vmul.f32 %v816_v16, %v1323_v59  ;;  %v838_v21 = vmul.f32 %v1358_v8, %v825_v15 }
 0x142   : > { %v1076_v56 = vpop.eup %1075  ;;  %v747_v22 = vmul.f32 2.0, %v1074_v19  ;;  %v763_v24 = vadd.f32 2.0, %v1074_v19  ;;  %v849_v26 = vadd.f32 %v1366_v17, %v836_v18 }
 0x143   : > { %v1078_v58 = vpop.eup %1077  ;;  %v818_v25 = vmul.f32 %v1076_v56, %v778_v57  ;;  %v837_v59 = vmul.f32 %v1358_v8, %v824_v20  ;;  %v851_v27 = vadd.f32 %v1366_v17, %v838_v21 }
 0x144   : > { %v1080_v28 = vpop.eup %1079  ;;  %v755_v31 = vadd.f32 1.0, %v747_v22  ;;  %v771_v32 = vmul.f32 %v1074_v19, %v763_v24  ;;  %v787_v33 = vmul.f32 %v1074_v19, %v747_v22  ;;  %v749_v34 = vmul.f32 2.0, %v1078_v58 }
 0x145   : > { %v1082_v37 = vpop.eup %1081  ;;  %v826_v38 = vmul.f32 %v818_v25, %v1327_v63  ;;  %v765_v39 = vadd.f32 2.0, %v1078_v58  ;;  %v748_v40 = vmul.f32 2.0, %v1080_v28  ;;  %v764_v41 = vadd.f32 2.0, %v1080_v28 }
 0x146   : > { %v779_v42 = vsel %vm739_vm6, %v755_v31, %v771_v32  ;;  %v795_v43 = vsel %vm739_vm6, %v787_v33, 2.0  ;;  %v757_v44 = vadd.f32 1.0, %v749_v34  ;;  %v789_v45 = vmul.f32 %v1078_v58, %v749_v34 }
 0x147   : > { %v803_v46 = vadd.f32 %v795_v43, %v779_v42  ;;  %v773_v47 = vmul.f32 %v1078_v58, %v765_v39  ;;  %v756_v48 = vadd.f32 1.0, %v748_v40  ;;  %v772_v49 = vmul.f32 %v1080_v28, %v764_v41 }
 0x148   : > { %v797_v63 = vsel %vm741_vm7, %v789_v45, 2.0  ;;  %v788_v50 = vmul.f32 %v1080_v28, %v748_v40  ;;  %v750_v51 = vmul.f32 2.0, %v1082_v37  ;;  %v766_v52 = vadd.f32 2.0, %v1082_v37 }
 0x149   : > { %1083 = vrcp.f32 %v803_v46  ;;  %v781_v53 = vsel %vm741_vm7, %v757_v44, %v773_v47  ;;  %v780_v36 = vsel %vm740_vm8, %v756_v48, %v772_v49  ;;  %v839_v54 = vmul.f32 %v1358_v8, %v826_v38 }
 0x14a   : > { %v805_v55 = vadd.f32 %v797_v63, %v781_v53  ;;  %v796_v57 = vsel %vm740_vm8, %v788_v50, 2.0  ;;  %v758_v60 = vadd.f32 1.0, %v750_v51  ;;  %v774_v61 = vmul.f32 %v1082_v37, %v766_v52 }
 0x14b   : > { %v804_v62 = vadd.f32 %v796_v57, %v780_v36  ;;  %v790_v0 = vmul.f32 %v1082_v37, %v750_v51  ;;  %v850_v1 = vadd.f32 %v1366_v17, %v837_v59  ;;  %v852_v2 = vadd.f32 %v1366_v17, %v839_v54 }
 0x14c   : > { %1085 = vrcp.f32 %v805_v55  ;;  %v782_v3 = vsel %vm742_vm9, %v758_v60, %v774_v61 }
 0x14d   : > { %1087 = vrcp.f32 %v804_v62  ;;  %v798_v4 = vsel %vm742_vm9, %v790_v0, 2.0  ;;  %v1019_v5 = vpack.c.bf16 %v850_v1, %v849_v26  ;;  %v1020_v6 = vpack.c.bf16 %v852_v2, %v851_v27 }
 0x14e   : > { %v806_v7 = vadd.f32 %v798_v4, %v782_v3 }
 0x14f   : > { %889 = vst [vmem:[%s1406_s18] sm:$0xff] %v1019_v5  ;;  %890 = vst [vmem:[%s1406_s18 + $0x8] sm:$0xff] %v1020_v6 }
 0x150   : > { %1089 = vrcp.f32 %v806_v7 }
 0x153   : > { %v1084_v9 = vpop.eup %1083 }
 0x154   : > { %v819_v10 = vmul.f32 %v1084_v9, %v779_v42 }
 0x156   : > { %v1086_v11 = vpop.eup %1085  ;;  %v827_v12 = vmul.f32 %v819_v10, %v1333_v23 }
 0x157   : > { %v1088_v13 = vpop.eup %1087  ;;  %v821_v14 = vmul.f32 %v1086_v11, %v781_v53 }
 0x158   : > { %v820_v15 = vmul.f32 %v1088_v13, %v780_v36  ;;  %v840_v16 = vmul.f32 %v1358_v8, %v827_v12 }
 0x159   : > { %v829_v18 = vmul.f32 %v821_v14, %v1335_v29 }
 0x15a   : > { %v1090_v19 = vpop.eup %1089  ;;  %v828_v20 = vmul.f32 %v820_v15, %v1337_v30  ;;  %v853_v24 = vadd.f32 %v1366_v17, %v840_v16 }
 0x15b   : > { %v822_v21 = vmul.f32 %v1090_v19, %v782_v3  ;;  %v842_v56 = vmul.f32 %v1358_v8, %v829_v18 }
 0x15c   : > { %v841_v22 = vmul.f32 %v1358_v8, %v828_v20 }
 0x15d   : > { %v830_v23 = vmul.f32 %v822_v21, %v1343_v35  ;;  %v855_v59 = vadd.f32 %v1366_v17, %v842_v56 }
 0x15e   : > { %v854_v58 = vadd.f32 %v1366_v17, %v841_v22 }
 0x15f   : > { %v843_v25 = vmul.f32 %v1358_v8, %v830_v23 }
 0x160   : > { %v1021_v26 = vpack.c.bf16 %v854_v58, %v853_v24 }
 0x161   : > { %v856_v29 = vadd.f32 %v1366_v17, %v843_v25 }
 0x162   : > { %891 = vst [vmem:[%s1406_s18 + $0x10] sm:$0xff] %v1021_v26 }
 0x163   : > { %v1022_v30 = vpack.c.bf16 %v856_v29, %v855_v59 }
 0x165   : > { %892 = vst [vmem:[%s1406_s18 + $0x18] sm:$0xff] %v1022_v30 }
 0x166 PF: > { %p11_p9 = scmp.ge.s32.totalorder %s1158_s19, 4   ;;  %s1441_s15 = smov %s1109_s16 }
 0x167   : > { %s1442_s16 = smov %s1167_s22  ;;  %s1443_s17 = smov %s1158_s19 }
 0x168   :  { %13 = sbr.rel (!%p11_p9) target bundleno = 2 (0x2), region = 94 }

// kernel: forward.15
= control target key start
LH: loop header
LB: loop body
LE: loop exit
PB: predicated region body
PF: predicated region fallthrough
CT: control target
= control target key end

     0   :  { %s1229_s18 = smov 0   ;;  %s1231_s19 = smov 0   ;;  %s1545_s0 = inlined_call_operand.vmem [shape: bf16[8,72], index: 0, kind: input, shape index: {}]   ;;  %s1546_s1 = inlined_call_operand.vmem [shape: bf16[72,2048], index: 1, kind: input, shape index: {}]   ;;  %s1547_s2 = inlined_call_operand.vmem [shape: f32[8,1], index: 2, kind: input, shape index: {}]   ;;  %s1548_s3 = inlined_call_operand.vmem [shape: f32[8,1], index: 3, kind: input, shape index: {}]   ;;  %s1549_s4 = inlined_call_operand.vmem [shape: bf16[8,2048], index: 4, kind: input, shape index: {}]   ;;  %s1550_s5 = inlined_call_operand.vmem [shape: bf16[8,2048], index: 5, kind: output, shape index: {}]  }
   0x1   :  { %s1233_s20 = smov 0  }
   0x2 LB: > { %s1036_s21 = sadd.s32 4294967295, %s1196_s20   ;;  %s1246_s22 = sadd.s32 1, %s1196_s20   ;;  %s1196_s20 = sphi %s1233_s20, %s1553_s20   ;;  %s1192_s19 = sphi %s1231_s19, %s1552_s19   ;;  %s1188_s18 = sphi %s1229_s18, %s1551_s18  }
   0x3   : > { %s40_s23 = ssub.s32 %s1196_s20, %s1246_s22  ;;  %s43_s24 = sadd.s32 1, %s1192_s19 }
   0x4   : > { %p41_p0 = scmp.eq.s32.totalorder %s40_s23, 0  ;;  %p50_p1 = scmp.ne.s32.totalorder %s1192_s19, %s1188_s18 }
   0x5   : > { %p51_p2 = scmp.eq.s32.totalorder %s1196_s20, 0  ;;  %p1039_p4 = scmp.ge.s32.totalorder %s1196_s20, 2 }
   0x6   : > { %s1255_s25 = scalar_select %p41_p0, %s1192_s19, %s43_s24  }
   0x7   : > { %p52_p3 = por %p51_p2, %p50_p1  ;;  %179 = sbr.rel (%p1039_p4) target bundleno = 37 (0x25), region = 28 }
   0xe   : > { %182 = sbr.rel (!%p52_p3) target bundleno = 37 (0x25), region = 32  ;;  %s184_s26 = sand.u32 (%p52_p3), 1, %s1192_s19  }
   0xf   : > { %s1101_s27 = sshll.u32 (%p52_p3), %s1196_s20, 5  ;;  %s1106_s28 = smul.u32 (%p52_p3), 288, %s184_s26 }
  0x10   : > { %s1263_s6 = scalar_lea.vmem (%p52_p3), %s1546_s1, %s1101_s27 }
  0x11   : > { %v202_v0 = vld [vmem:[%s1263_s6] sm:$0xff] (%p52_p3)  ;;  %v204_v1 = vld [vmem:[%s1263_s6 + $0x8] sm:$0xff] (%p52_p3)  ;;  %v206_v2 = vld [vmem:[%s1263_s6 + $0x10] sm:$0xff] (%p52_p3)  ;;  %s1271_s7 = scalar_lea.vmem (%p52_p3), [#allocation2], %s1106_s28 }
  0x12   : > { %v208_v3 = vld [vmem:[%s1263_s6 + $0x18] sm:$0xff] (%p52_p3)  ;;  %v210_v4 = vld [vmem:[%s1263_s6 + $0x40] sm:$0xff] (%p52_p3)  ;;  %v212_v5 = vld [vmem:[%s1263_s6 + $0x48] sm:$0xff] (%p52_p3)  ;;  %203 = vst [vmem:[%s1271_s7] sm:$0xff] (%p52_p3), %v202_v0 }
  0x13   : > { %205 = vst [vmem:[%s1271_s7 + $0x8] sm:$0xff] (%p52_p3), %v204_v1  ;;  %207 = vst [vmem:[%s1271_s7 + $0x10] sm:$0xff] (%p52_p3), %v206_v2  ;;  %v214_v6 = vld [vmem:[%s1263_s6 + $0x50] sm:$0xff] (%p52_p3)  ;;  %v216_v7 = vld [vmem:[%s1263_s6 + $0x58] sm:$0xff] (%p52_p3) }
  0x14   : > { %209 = vst [vmem:[%s1271_s7 + $0x18] sm:$0xff] (%p52_p3), %v208_v3  ;;  %211 = vst [vmem:[%s1271_s7 + $0x20] sm:$0xff] (%p52_p3), %v210_v4  ;;  %v218_v8 = vld [vmem:[%s1263_s6 + $0x80] sm:$0xff] (%p52_p3)  ;;  %v220_v9 = vld [vmem:[%s1263_s6 + $0x88] sm:$0xff] (%p52_p3) }
  0x15   : > { %213 = vst [vmem:[%s1271_s7 + $0x28] sm:$0xff] %v212_v5  ;;  %215 = vst [vmem:[%s1271_s7 + $0x30] sm:$0xff] %v214_v6  ;;  %v222_v10 = vld [vmem:[%s1263_s6 + $0x90] sm:$0xff]  ;;  %v224_v11 = vld [vmem:[%s1263_s6 + $0x98] sm:$0xff] }
  0x16   : > { %217 = vst [vmem:[%s1271_s7 + $0x38] sm:$0xff] %v216_v7  ;;  %219 = vst [vmem:[%s1271_s7 + $0x40] sm:$0xff] %v218_v8  ;;  %v226_v12 = vld [vmem:[%s1263_s6 + $0xc0] sm:$0xff]  ;;  %v228_v13 = vld [vmem:[%s1263_s6 + $0xc8] sm:$0xff] }
  0x17   : > { %221 = vst [vmem:[%s1271_s7 + $0x48] sm:$0xff] %v220_v9  ;;  %223 = vst [vmem:[%s1271_s7 + $0x50] sm:$0xff] %v222_v10  ;;  %v230_v14 = vld [vmem:[%s1263_s6 + $0xd0] sm:$0xff]  ;;  %v232_v15 = vld [vmem:[%s1263_s6 + $0xd8] sm:$0xff] }
  0x18   : > { %225 = vst [vmem:[%s1271_s7 + $0x58] sm:$0xff] %v224_v11  ;;  %227 = vst [vmem:[%s1271_s7 + $0x60] sm:$0xff] %v226_v12  ;;  %v234_v16 = vld [vmem:[%s1263_s6 + $0x100] sm:$0xff]  ;;  %v236_v17 = vld [vmem:[%s1263_s6 + $0x108] sm:$0xff] }
  0x19   : > { %229 = vst [vmem:[%s1271_s7 + $0x68] sm:$0xff] %v228_v13  ;;  %231 = vst [vmem:[%s1271_s7 + $0x70] sm:$0xff] %v230_v14  ;;  %v238_v18 = vld [vmem:[%s1263_s6 + $0x110] sm:$0xff]  ;;  %v240_v19 = vld [vmem:[%s1263_s6 + $0x118] sm:$0xff] }
  0x1a   : > { %233 = vst [vmem:[%s1271_s7 + $0x78] sm:$0xff] %v232_v15  ;;  %235 = vst [vmem:[%s1271_s7 + $0x80] sm:$0xff] %v234_v16  ;;  %v242_v20 = vld [vmem:[%s1263_s6 + $0x140] sm:$0xff]  ;;  %v244_v21 = vld [vmem:[%s1263_s6 + $0x148] sm:$0xff] }
  0x1b   : > { %237 = vst [vmem:[%s1271_s7 + $0x88] sm:$0xff] %v236_v17  ;;  %239 = vst [vmem:[%s1271_s7 + $0x90] sm:$0xff] %v238_v18  ;;  %v246_v22 = vld [vmem:[%s1263_s6 + $0x150] sm:$0xff]  ;;  %v248_v23 = vld [vmem:[%s1263_s6 + $0x158] sm:$0xff] }
  0x1c   : > { %241 = vst [vmem:[%s1271_s7 + $0x98] sm:$0xff] %v240_v19  ;;  %243 = vst [vmem:[%s1271_s7 + $0xa0] sm:$0xff] %v242_v20  ;;  %v250_v24 = vld [vmem:[%s1263_s6 + $0x180] sm:$0xff]  ;;  %v252_v25 = vld [vmem:[%s1263_s6 + $0x188] sm:$0xff] }
  0x1d   : > { %245 = vst [vmem:[%s1271_s7 + $0xa8] sm:$0xff] %v244_v21  ;;  %247 = vst [vmem:[%s1271_s7 + $0xb0] sm:$0xff] %v246_v22  ;;  %v254_v26 = vld [vmem:[%s1263_s6 + $0x190] sm:$0xff]  ;;  %v256_v27 = vld [vmem:[%s1263_s6 + $0x198] sm:$0xff] }
  0x1e   : > { %249 = vst [vmem:[%s1271_s7 + $0xb8] sm:$0xff] %v248_v23  ;;  %251 = vst [vmem:[%s1271_s7 + $0xc0] sm:$0xff] %v250_v24  ;;  %v258_v28 = vld [vmem:[%s1263_s6 + $0x1c0] sm:$0xff]  ;;  %v260_v29 = vld [vmem:[%s1263_s6 + $0x1c8] sm:$0xff] }
  0x1f   : > { %253 = vst [vmem:[%s1271_s7 + $0xc8] sm:$0xff] %v252_v25  ;;  %255 = vst [vmem:[%s1271_s7 + $0xd0] sm:$0xff] %v254_v26  ;;  %v262_v30 = vld [vmem:[%s1263_s6 + $0x1d0] sm:$0xff]  ;;  %v264_v31 = vld [vmem:[%s1263_s6 + $0x1d8] sm:$0xff] }
  0x20   : > { %257 = vst [vmem:[%s1271_s7 + $0xd8] sm:$0xff] %v256_v27  ;;  %259 = vst [vmem:[%s1271_s7 + $0xe0] sm:$0xff] %v258_v28  ;;  %v266_v32 = vld [vmem:[%s1263_s6 + $0x200] sm:$0xff]  ;;  %v268_v33 = vld [vmem:[%s1263_s6 + $0x208] sm:$0xff] }
  0x21   : > { %261 = vst [vmem:[%s1271_s7 + $0xe8] sm:$0xff] %v260_v29  ;;  %263 = vst [vmem:[%s1271_s7 + $0xf0] sm:$0xff] %v262_v30  ;;  %v270_v34 = vld [vmem:[%s1263_s6 + $0x210] sm:$0xff]  ;;  %v272_v35 = vld [vmem:[%s1263_s6 + $0x218] sm:$0xff] }
  0x22   : > { %265 = vst [vmem:[%s1271_s7 + $0xf8] sm:$0xff] %v264_v31  ;;  %267 = vst [vmem:[%s1271_s7 + $0x100] sm:$0xff] %v266_v32 }
  0x23   : > { %269 = vst [vmem:[%s1271_s7 + $0x108] sm:$0xff] %v268_v33  ;;  %271 = vst [vmem:[%s1271_s7 + $0x110] sm:$0xff] %v270_v34 }
  0x24   : > { %273 = vst [vmem:[%s1271_s7 + $0x118] sm:$0xff] %v272_v35 }
  0x25 PF: > { %p1042_p5 = scmp.ge.s32.totalorder %s1196_s20, 1  ;;  %p287_p6 = scmp.lt.s32.totalorder %s1196_s20, 3 }
  0x27   : > { %p288_p7 = pnand %p1042_p5, %p287_p6 }
  0x28   : > { %s294_s8 = sand.u32 (!%p288_p7), 1, %s1188_s18   ;;  %v1198_v36 = vmov (!%p288_p7), 0   ;;  %v750_v37 = vld [vmem:[%s1547_s2] sm:$0xff] (!%p288_p7)  ;;  %vm561_vm0 = vcmask (!%p288_p7), 1043456   ;;  %vm557_vm1 = vcmask (!%p288_p7), 588800   ;;  %s1425_s17 = sshll.u32 (!%p288_p7), %s1036_s21, 3 }
  0x29   : > { %291 = sbr.rel (%p288_p7) target bundleno = 360 (0x168), region = 59  ;;  %618 = vmatprep.mubr.bf16.mxu0 (!%p288_p7), %v1198_v36  ;;  %659 = vmatprep.mubr.bf16.mxu1 (!%p288_p7), %v1198_v36  ;;  %v751_v38 = vld [vmem:[%s1548_s3] sm:$0xff] (!%p288_p7)  ;;  %p328_p8 = scmp.lt.s32.totalorder (!%p288_p7), %s1425_s17, 15 }
  0x2a   : > { %s1107_s9 = smul.u32 (!%p288_p7), 288, %s294_s8  ;;  %1133 = vset.pattern.permute.xlu0 (!%p288_p7), %v1198_v36  ;;  %v340_v25 = vld [vmem:[%s1545_s0] sm:$0xf] (!%p288_p7) }
  0x2b   : > { %882 = vperm.xlu0 (!%p288_p7), %1133, %v750_v37  }
  0x2c   : > { %s1351_s14 = scalar_lea.vmem (!%p288_p7), [#allocation2], %s1107_s9 }
  0x2d   : > { %v341_v39 = vld [vmem:[%s1351_s14] sm:$0xff] (!%p288_p7)  ;;  %v342_v41 = vld [vmem:[%s1351_s14 + $0x8] sm:$0xff] (!%p288_p7)  ;;  %v343_v13 = vld [vmem:[%s1351_s14 + $0x10] sm:$0xff] (!%p288_p7) }
  0x2e   : > { %v345_v40 = vld [vmem:[%s1351_s14 + $0x20] sm:$0xff] (!%p288_p7)  ;;  %v346_v43 = vld [vmem:[%s1351_s14 + $0x28] sm:$0xff] (!%p288_p7)  ;;  %v347_v14 = vld [vmem:[%s1351_s14 + $0x30] sm:$0xff] (!%p288_p7) }
  0x2f   : > { %v1048_v42 = vcombine.high (!%p288_p7), %v341_v39, %v345_v40  ;;  %v1047_v44 = vcombine.low (!%p288_p7), %v341_v39, %v345_v40  ;;  %v349_v45 = vld [vmem:[%s1351_s14 + $0x40] sm:$0xff] (!%p288_p7)  ;;  %v1050_v47 = vcombine.high (!%p288_p7), %v342_v41, %v346_v43  ;;  %v1049_v48 = vcombine.low (!%p288_p7), %v342_v41, %v346_v43  ;;  %v350_v50 = vld [vmem:[%s1351_s14 + $0x48] sm:$0xff] (!%p288_p7)  ;;  %895 = vperm.xlu0 (!%p288_p7), %1133, %v751_v38   ;;  %v344_v15 = vld [vmem:[%s1351_s14 + $0x18] sm:$0xff] (!%p288_p7) }
  0x30   : > { %v353_v46 = vld [vmem:[%s1351_s14 + $0x60] sm:$0xff]  ;;  %v354_v51 = vld [vmem:[%s1351_s14 + $0x68] sm:$0xff]  ;;  %v348_v16 = vld [vmem:[%s1351_s14 + $0x38] sm:$0xff]  ;;  %v1052_v18 = vcombine.high %v343_v13, %v347_v14  ;;  %v1051_v26 = vcombine.low %v343_v13, %v347_v14  ;;  %s1555_s17 = smov (!%p328_p8, %s1425_s17), 15 }
  0x31   : > { %v1056_v49 = vcombine.high %v349_v45, %v353_v46  ;;  %v357_v52 = vld [vmem:[%s1351_s14 + $0x80] sm:$0xff]  ;;  %586 = vmatprep.subr.bf16.mxu0 %v1048_v42  ;;  %v1058_v53 = vcombine.high %v350_v50, %v354_v51  ;;  %v358_v55 = vld [vmem:[%s1351_s14 + $0x88] sm:$0xff]  ;;  %627 = vmatprep.subr.bf16.mxu1 %v1050_v47  ;;  %v1055_v57 = vcombine.low %v349_v45, %v353_v46  ;;  %v351_v21 = vld [vmem:[%s1351_s14 + $0x50] sm:$0xff]  ;;  %s1044_s18 = sshll.u32 %s1555_s17, 2 }
  0x32   : > { %v361_v54 = vld [vmem:[%s1351_s14 + $0xa0] sm:$0xff]  ;;  %v362_v56 = vld [vmem:[%s1351_s14 + $0xa8] sm:$0xff]  ;;  %587 = vmatpush1.bf16.msra.mxu0 %v1047_v44  ;;  %628 = vmatpush1.bf16.msra.mxu1 %v1049_v48  ;;  %v1057_v58 = vcombine.low %v350_v50, %v354_v51  ;;  %v1054_v20 = vcombine.high %v344_v15, %v348_v16  ;;  %v355_v22 = vld [vmem:[%s1351_s14 + $0x70] sm:$0xff]  ;;  %v1053_v27 = vcombine.low %v344_v15, %v348_v16  ;;  %s1464_s23 = scalar_lea.vmem %s1549_s4, %s1044_s18  ;;  %s1515_s27 = scalar_lea.vmem %s1550_s5, %s1044_s18 }
  0x33   : > { %588 = vmatprep.subr.bf16.mxu0 %v1056_v49  ;;  %v1064_v59 = vcombine.high %v357_v52, %v361_v54  ;;  %629 = vmatprep.subr.bf16.mxu1 %v1058_v53  ;;  %v1066_v60 = vcombine.high %v358_v55, %v362_v56  ;;  %v365_v61 = vld [vmem:[%s1351_s14 + $0xc0] sm:$0xff]  ;;  %v366_v63 = vld [vmem:[%s1351_s14 + $0xc8] sm:$0xff]  ;;  %v1063_v1 = vcombine.low %v357_v52, %v361_v54  ;;  %v352_v23 = vld [vmem:[%s1351_s14 + $0x58] sm:$0xff] }
  0x34   : > { %v369_v62 = vld [vmem:[%s1351_s14 + $0xe0] sm:$0xff]  ;;  %v370_v0 = vld [vmem:[%s1351_s14 + $0xe8] sm:$0xff]  ;;  %v1065_v2 = vcombine.low %v358_v55, %v362_v56  ;;  %v356_v24 = vld [vmem:[%s1351_s14 + $0x78] sm:$0xff]  ;;  %v1060_v28 = vcombine.high %v351_v21, %v355_v22  ;;  %v1059_v34 = vcombine.low %v351_v21, %v355_v22 }
  0x35   : > { %v1072_v3 = vcombine.high %v365_v61, %v369_v62  ;;  %v1074_v4 = vcombine.high %v366_v63, %v370_v0  ;;  %v373_v5 = vld [vmem:[%s1351_s14 + $0x100] sm:$0xff]  ;;  %v374_v6 = vld [vmem:[%s1351_s14 + $0x108] sm:$0xff]  ;;  %v1071_v7 = vcombine.low %v365_v61, %v369_v62  ;;  %v1073_v8 = vcombine.low %v366_v63, %v370_v0  ;;  %v359_v30 = vld [vmem:[%s1351_s14 + $0x90] sm:$0xff] }
  0x36   : > { %589 = vmatpush1.bf16.msra.mxu0 %v1055_v57  ;;  %630 = vmatpush1.bf16.msra.mxu1 %v1057_v58  ;;  %v1080_v9 = vcombine.high %v373_v5, %v373_v5  ;;  %v1079_v10 = vcombine.low %v373_v5, %v373_v5  ;;  %v1082_v11 = vcombine.high %v374_v6, %v374_v6  ;;  %v363_v31 = vld [vmem:[%s1351_s14 + $0xb0] sm:$0xff]  ;;  %v360_v32 = vld [vmem:[%s1351_s14 + $0x98] sm:$0xff] }
  0x37   : > { %590 = vmatprep.subr.bf16.mxu0 %v1064_v59  ;;  %631 = vmatprep.subr.bf16.mxu1 %v1066_v60  ;;  %v1081_v12 = vcombine.low %v374_v6, %v374_v6  ;;  %v1062_v29 = vcombine.high %v352_v23, %v356_v24  ;;  %v364_v33 = vld [vmem:[%s1351_s14 + $0xb8] sm:$0xff]  ;;  %v1061_v35 = vcombine.low %v352_v23, %v356_v24  ;;  %v367_v39 = vld [vmem:[%s1351_s14 + $0xd0] sm:$0xff] }
  0x38   : > { %v563_v17 = vsel %vm561_vm0, %v1079_v10, 0  ;;  %v1068_v37 = vcombine.high %v359_v30, %v363_v31  ;;  %v1070_v38 = vcombine.high %v360_v32, %v364_v33  ;;  %v371_v40 = vld [vmem:[%s1351_s14 + $0xf0] sm:$0xff]  ;;  %v368_v41 = vld [vmem:[%s1351_s14 + $0xd8] sm:$0xff]  ;;  %v1067_v43 = vcombine.low %v359_v30, %v363_v31 }
  0x39   : > { %v569_v19 = vsel %vm561_vm0, %v1081_v12, 0  ;;  %v372_v42 = vld [vmem:[%s1351_s14 + $0xf8] sm:$0xff]  ;;  %v1069_v44 = vcombine.low %v360_v32, %v364_v33  ;;  %v1076_v45 = vcombine.high %v367_v39, %v371_v40  ;;  %v375_v47 = vld [vmem:[%s1351_s14 + $0x110] sm:$0xff]  ;;  %v1075_v49 = vcombine.low %v367_v39, %v371_v40 }
  0x3a   : > { %591 = vmatpush1.bf16.msra.mxu0 %v1063_v1  ;;  %632 = vmatpush1.bf16.msra.mxu1 %v1065_v2  ;;  %v1078_v46 = vcombine.high %v368_v41, %v372_v42  ;;  %v376_v48 = vld [vmem:[%s1351_s14 + $0x118] sm:$0xff]  ;;  %v1077_v50 = vcombine.low %v368_v41, %v372_v42  ;;  %v1084_v51 = vcombine.high %v375_v47, %v375_v47 }
  0x3b   : > { %592 = vmatprep.subr.bf16.mxu0 %v1072_v3  ;;  %633 = vmatprep.subr.bf16.mxu1 %v1074_v4  ;;  %v1083_v52 = vcombine.low %v375_v47, %v375_v47  ;;  %v1086_v53 = vcombine.high %v376_v48, %v376_v48 }
  0x3d   : > { %v575_v54 = vsel %vm561_vm0, %v1083_v52, 0 }
  0x3e   : > { %593 = vmatpush1.bf16.msra.mxu0 %v1071_v7  ;;  %634 = vmatpush1.bf16.msra.mxu1 %v1073_v8 }
  0x3f   : > { %1087 = vmatprep.subr.msk.bf16.mxu0 %vm561_vm0, %v1080_v9  ;;  %1089 = vmatprep.subr.msk.bf16.mxu1 %vm561_vm0, %v1082_v11 }
  0x42   : > { %595 = vmatpush1.bf16.msra.mxu0 %v563_v17  ;;  %636 = vmatpush1.bf16.msra.mxu1 %v569_v19 }
  0x43   : > { %668 = vmatprep.subr.bf16.mxu0 %v1052_v18  ;;  %709 = vmatprep.subr.bf16.mxu1 %v1054_v20 }
  0x45   : > { %1088 = vmatmul.mubr.msk.bf16.vlgmr.msra.gmra.mrb[0].mxu0 %vm557_vm1, %v340_v25  ;;  %1090 = vmatmul.mubr.msk.bf16.vlgmr.msra.gmra.mrb[0].mxu1 %vm557_vm1, %v340_v25 }
  0x46   : > { %669 = vmatpush1.bf16.msra.mxu0 %v1051_v26  ;;  %710 = vmatpush1.bf16.msra.mxu1 %v1053_v27 }
  0x47   : > { %670 = vmatprep.subr.bf16.mxu0 %v1060_v28  ;;  %711 = vmatprep.subr.bf16.mxu1 %v1062_v29 }
  0x48   : > { %700 = vmatprep.mubr.bf16.mxu0 %v1198_v36  ;;  %741 = vmatprep.mubr.bf16.mxu1 %v1198_v36  ;;  %v1085_v36 = vcombine.low %v376_v48, %v376_v48 }
  0x4a   : > { %671 = vmatpush1.bf16.msra.mxu0 %v1059_v34  ;;  %712 = vmatpush1.bf16.msra.mxu1 %v1061_v35  ;;  %v581_v55 = vsel %vm561_vm0, %v1085_v36, 0 }
  0x4b   : > { %672 = vmatprep.subr.bf16.mxu0 %v1068_v37  ;;  %713 = vmatprep.subr.bf16.mxu1 %v1070_v38 }
  0x4e   : > { %673 = vmatpush1.bf16.msra.mxu0 %v1067_v43  ;;  %714 = vmatpush1.bf16.msra.mxu1 %v1069_v44 }
  0x4f   : > { %674 = vmatprep.subr.bf16.mxu0 %v1076_v45  ;;  %715 = vmatprep.subr.bf16.mxu1 %v1078_v46 }
  0x52   : > { %675 = vmatpush1.bf16.msra.mxu0 %v1075_v49  ;;  %716 = vmatpush1.bf16.msra.mxu1 %v1077_v50 }
  0x53   : > { %1091 = vmatprep.subr.msk.bf16.mxu0 %vm561_vm0, %v1084_v51  ;;  %1093 = vmatprep.subr.msk.bf16.mxu1 %vm561_vm0, %v1086_v53 }
  0x56   : > { %677 = vmatpush1.bf16.msra.mxu0 %v575_v54  ;;  %718 = vmatpush1.bf16.msra.mxu1 %v581_v55 }
  0x59   : > { %1092 = vmatmul.mubr.msk.bf16.vlgmr.msra.gmra.mrb[4].mxu0 %vm557_vm1, %v340_v25  ;;  %1094 = vmatmul.mubr.msk.bf16.vlgmr.msra.gmra.mrb[4].mxu1 %vm557_vm1, %v340_v25 }
 0x118   : > { %v1406_v56 = vpop.f32.mrb[0].mxu0  ;;  %v1409_v58 = vpop.f32.mrb[0].mxu1 }
 0x119   : > { %v752_v57 = vand.u32 2147483647, %v1406_v56  ;;  %v1411_v59 = vpop.f32.mrb[1].mxu0  ;;  %v754_v60 = vand.u32 2147483647, %v1409_v58  ;;  %v1415_v63 = vpop.f32.mrb[1].mxu1 }
 0x11a   : > { %v753_v61 = vand.u32 2147483647, %v1411_v59  ;;  %v624_v0 = vpop.f32.mrb[2].mxu0  ;;  %v755_v3 = vand.u32 2147483647, %v1415_v63  ;;  %v665_v4 = vpop.f32.mrb[2].mxu1 }
 0x11b   : > { %v760_v62 = vsub.f32 0.0, %v752_v57  ;;  %v762_v1 = vsub.f32 0.0, %v754_v60  ;;  %v625_v6 = vpop.f32.mrb[3].mxu0  ;;  %v666_v7 = vpop.f32.mrb[3].mxu1  ;;  %vm784_vm2 = vcmp.ge.f32.partialorder %v1406_v56, 0.0  ;;  %vm786_vm3 = vcmp.ge.f32.partialorder %v1409_v58, 0.0 }
 0x11c   : > { %v761_v2 = vsub.f32 0.0, %v753_v61  ;;  %v763_v10 = vsub.f32 0.0, %v755_v3  ;;  %vm785_vm4 = vcmp.ge.f32.partialorder %v1411_v59, 0.0  ;;  %vm787_vm5 = vcmp.ge.f32.partialorder %v1415_v63, 0.0 }
 0x11d   : > { %v768_v5 = vmul.f32 1.442695, %v760_v62  ;;  %v772_v8 = vmul.f32 1.442695, %v762_v1 }
 0x11e   : > { %v770_v9 = vmul.f32 1.442695, %v761_v2  ;;  %v774_v11 = vmul.f32 1.442695, %v763_v10 }
 0x11f   : > { %1142 = vpow2.f32 %v768_v5 }
 0x120   : > { %1144 = vpow2.f32 %v772_v8  ;;  %v1457_v8 = vpop.permute.xlu0 %882 }
 0x121   : > { %1146 = vpow2.f32 %v770_v9 }
 0x122   : > { %1148 = vpow2.f32 %v774_v11 }
 0x129   : > { %v1143_v12 = vpop.eup %1142 }
 0x12a   : > { %v1145_v13 = vpop.eup %1144  ;;  %v792_v14 = vmul.f32 2.0, %v1143_v12  ;;  %v808_v15 = vadd.f32 2.0, %v1143_v12 }
 0x12b   : > { %v1147_v16 = vpop.eup %1146  ;;  %v794_v17 = vmul.f32 2.0, %v1145_v13  ;;  %v810_v18 = vadd.f32 2.0, %v1145_v13 }
 0x12c   : > { %v800_v19 = vadd.f32 1.0, %v792_v14  ;;  %v816_v20 = vmul.f32 %v1143_v12, %v808_v15  ;;  %v832_v21 = vmul.f32 %v1143_v12, %v792_v14  ;;  %v793_v22 = vmul.f32 2.0, %v1147_v16  ;;  %v1421_v23 = vpop.f32.mrb[4].mxu0  ;;  %v1149_v24 = vpop.eup %1148  ;;  %v1470_v14 = vld [vmem:[%s1464_s23 + $0x8] sm:$0xff] }
 0x12d   : > { %v802_v25 = vadd.f32 1.0, %v794_v17  ;;  %v818_v26 = vmul.f32 %v1145_v13, %v810_v18  ;;  %v834_v27 = vmul.f32 %v1145_v13, %v794_v17  ;;  %v809_v28 = vadd.f32 2.0, %v1147_v16  ;;  %v1427_v29 = vpop.f32.mrb[4].mxu1  ;;  %v1429_v30 = vpop.f32.mrb[5].mxu0  ;;  %v1467_v13 = vld [vmem:[%s1464_s23] sm:$0xff] }
 0x12e   : > { %v824_v31 = vsel %vm784_vm2, %v800_v19, %v816_v20  ;;  %v840_v32 = vsel %vm784_vm2, %v832_v21, 2.0  ;;  %v801_v33 = vadd.f32 1.0, %v793_v22  ;;  %v833_v34 = vmul.f32 %v1147_v16, %v793_v22  ;;  %v1435_v35 = vpop.f32.mrb[5].mxu1  ;;  %v706_v37 = vpop.f32.mrb[6].mxu0 }
 0x12f   : > { %v848_v38 = vadd.f32 %v840_v32, %v824_v31  ;;  %v826_v39 = vsel %vm786_vm3, %v802_v25, %v818_v26  ;;  %v842_v40 = vsel %vm786_vm3, %v834_v27, 2.0  ;;  %v817_v41 = vmul.f32 %v1147_v16, %v809_v28  ;;  %v747_v42 = vpop.f32.mrb[6].mxu1  ;;  %v707_v43 = vpop.f32.mrb[7].mxu0 }
 0x130   : > { %v850_v44 = vadd.f32 %v842_v40, %v826_v39  ;;  %v841_v45 = vsel %vm785_vm4, %v833_v34, 2.0  ;;  %v795_v46 = vmul.f32 2.0, %v1149_v24  ;;  %v811_v47 = vadd.f32 2.0, %v1149_v24  ;;  %v748_v48 = vpop.f32.mrb[7].mxu1  ;;  %v1474_v19 = vpop.permute.xlu0 %895 }
 0x131   : > { %1150 = vrcp.f32 %v848_v38  ;;  %v825_v49 = vsel %vm785_vm4, %v801_v33, %v817_v41  ;;  %v756_v50 = vand.u32 2147483647, %v1421_v23  ;;  %v758_v55 = vand.u32 2147483647, %v1427_v29 }
 0x132   : > { %1152 = vrcp.f32 %v850_v44  ;;  %v849_v51 = vadd.f32 %v841_v45, %v825_v49  ;;  %v803_v52 = vadd.f32 1.0, %v795_v46  ;;  %v819_v53 = vmul.f32 %v1149_v24, %v811_v47 }
 0x133   : > { %v835_v36 = vmul.f32 %v1149_v24, %v795_v46  ;;  %v764_v54 = vsub.f32 0.0, %v756_v50  ;;  %v757_v60 = vand.u32 2147483647, %v1429_v30  ;;  %v766_v0 = vsub.f32 0.0, %v758_v55 }
 0x134   : > { %1154 = vrcp.f32 %v849_v51  ;;  %v827_v57 = vsel %vm787_vm5, %v803_v52, %v819_v53  ;;  %v759_v1 = vand.u32 2147483647, %v1435_v35  ;;  %v910_v21 = vunpack.c.l.bf16 %v1467_v13 }
 0x135   : > { %v843_v61 = vsel %vm787_vm5, %v835_v36, 2.0  ;;  %v776_v62 = vmul.f32 1.442695, %v764_v54  ;;  %v765_v3 = vsub.f32 0.0, %v757_v60  ;;  %v780_v4 = vmul.f32 1.442695, %v766_v0 }
 0x136   : > { %v851_v2 = vadd.f32 %v843_v61, %v827_v57  ;;  %v767_v5 = vsub.f32 0.0, %v759_v1  ;;  %v911_v22 = vunpack.c.h.bf16 %v1467_v13  ;;  %v912_v24 = vunpack.c.l.bf16 %v1470_v14 }
 0x137   : > { %1156 = vpow2.f32 %v776_v62  ;;  %v778_v6 = vmul.f32 1.442695, %v765_v3  ;;  %vm788_vm6 = vcmp.ge.f32.partialorder %v1421_v23, 0.0  ;;  %vm790_vm7 = vcmp.ge.f32.partialorder %v1427_v29, 0.0 }
 0x138   : > { %1158 = vrcp.f32 %v851_v2  ;;  %v782_v7 = vmul.f32 1.442695, %v767_v5  ;;  %vm789_vm8 = vcmp.ge.f32.partialorder %v1429_v30, 0.0  ;;  %vm791_vm9 = vcmp.ge.f32.partialorder %v1435_v35, 0.0 }
 0x139   : > { %1160 = vpow2.f32 %v780_v4 }
 0x13a   : > { %1162 = vpow2.f32 %v778_v6 }
 0x13b   : > { %v1151_v9 = vpop.eup %1150  ;;  %1164 = vpow2.f32 %v782_v7 }
 0x13c   : > { %v1153_v10 = vpop.eup %1152  ;;  %v864_v11 = vmul.f32 %v1151_v9, %v824_v31 }
 0x13d   : > { %v866_v12 = vmul.f32 %v1153_v10, %v826_v39 }
 0x13e   : > { %v1155_v15 = vpop.eup %1154  ;;  %v872_v16 = vmul.f32 %v864_v11, %v1406_v56 }
 0x13f   : > { %v874_v17 = vmul.f32 %v866_v12, %v1409_v58  ;;  %v865_v18 = vmul.f32 %v1155_v15, %v825_v49  ;;  %v913_v58 = vunpack.c.h.bf16 %v1470_v14 }
 0x140   : > { %v885_v20 = vmul.f32 %v1457_v8, %v872_v16 }
 0x141   : > { %v1157_v25 = vpop.eup %1156  ;;  %v873_v26 = vmul.f32 %v865_v18, %v1411_v59  ;;  %v887_v56 = vmul.f32 %v1457_v8, %v874_v17 }
 0x142   : > { %v1159_v27 = vpop.eup %1158  ;;  %v796_v28 = vmul.f32 2.0, %v1157_v25  ;;  %v812_v31 = vadd.f32 2.0, %v1157_v25  ;;  %v898_v59 = vadd.f32 %v1474_v19, %v885_v20 }
 0x143   : > { %v1161_v32 = vpop.eup %1160  ;;  %v867_v33 = vmul.f32 %v1159_v27, %v827_v57  ;;  %v886_v34 = vmul.f32 %v1457_v8, %v873_v26  ;;  %v900_v37 = vadd.f32 %v1474_v19, %v887_v56  ;;  %v908_v56 = vld [vmem:[%s1464_s23 + $0x10] sm:$0xff] }
 0x144   : > { %v1163_v38 = vpop.eup %1162  ;;  %v804_v39 = vadd.f32 1.0, %v796_v28  ;;  %v820_v40 = vmul.f32 %v1157_v25, %v812_v31  ;;  %v836_v41 = vmul.f32 %v1157_v25, %v796_v28  ;;  %v798_v42 = vmul.f32 2.0, %v1161_v32 }
 0x145   : > { %v1165_v43 = vpop.eup %1164  ;;  %v875_v44 = vmul.f32 %v867_v33, %v1415_v63  ;;  %v814_v45 = vadd.f32 2.0, %v1161_v32  ;;  %v797_v46 = vmul.f32 2.0, %v1163_v38  ;;  %v813_v47 = vadd.f32 2.0, %v1163_v38 }
 0x146   : > { %v828_v48 = vsel %vm788_vm6, %v804_v39, %v820_v40  ;;  %v844_v49 = vsel %vm788_vm6, %v836_v41, 2.0  ;;  %v806_v50 = vadd.f32 1.0, %v798_v42  ;;  %v838_v51 = vmul.f32 %v1161_v32, %v798_v42 }
 0x147   : > { %v852_v52 = vadd.f32 %v844_v49, %v828_v48  ;;  %v822_v53 = vmul.f32 %v1161_v32, %v814_v45  ;;  %v805_v36 = vadd.f32 1.0, %v797_v46  ;;  %v821_v54 = vmul.f32 %v1163_v38, %v813_v47 }
 0x148   : > { %v846_v55 = vsel %vm790_vm7, %v838_v51, 2.0  ;;  %v837_v57 = vmul.f32 %v1163_v38, %v797_v46  ;;  %v799_v63 = vmul.f32 2.0, %v1165_v43  ;;  %v815_v60 = vadd.f32 2.0, %v1165_v43 }
 0x149   : > { %1166 = vrcp.f32 %v852_v52  ;;  %v830_v61 = vsel %vm790_vm7, %v806_v50, %v822_v53  ;;  %v829_v62 = vsel %vm789_vm8, %v805_v36, %v821_v54  ;;  %v888_v0 = vmul.f32 %v1457_v8, %v875_v44 }
 0x14a   : > { %v854_v1 = vadd.f32 %v846_v55, %v830_v61  ;;  %v845_v2 = vsel %vm789_vm8, %v837_v57, 2.0  ;;  %v807_v3 = vadd.f32 1.0, %v799_v63  ;;  %v823_v4 = vmul.f32 %v1165_v43, %v815_v60 }
 0x14b   : > { %v853_v5 = vadd.f32 %v845_v2, %v829_v62  ;;  %v839_v6 = vmul.f32 %v1165_v43, %v799_v63  ;;  %v899_v7 = vadd.f32 %v1474_v19, %v886_v34  ;;  %v901_v9 = vadd.f32 %v1474_v19, %v888_v0  ;;  %v909_v34 = vld [vmem:[%s1464_s23 + $0x18] sm:$0xff] }
 0x14c   : > { %1168 = vrcp.f32 %v854_v1  ;;  %v831_v10 = vsel %vm791_vm9, %v807_v3, %v823_v4  ;;  %v918_v11 = vadd.f32 %v910_v21, %v898_v59  ;;  %v920_v12 = vadd.f32 %v912_v24, %v900_v37 }
 0x14d   : > { %1170 = vrcp.f32 %v853_v5  ;;  %v847_v13 = vsel %vm791_vm9, %v839_v6, 2.0  ;;  %v919_v14 = vadd.f32 %v911_v22, %v899_v7  ;;  %v921_v15 = vadd.f32 %v913_v58, %v901_v9 }
 0x14e   : > { %v855_v16 = vadd.f32 %v847_v13, %v831_v10  ;;  %v914_v59 = vunpack.c.l.bf16 %v908_v56  ;;  %v915_v39 = vunpack.c.h.bf16 %v908_v56  ;;  %v917_v44 = vunpack.c.h.bf16 %v909_v34 }
 0x14f   : > { %v1102_v17 = vpack.c.bf16 %v919_v14, %v918_v11  ;;  %v1103_v18 = vpack.c.bf16 %v921_v15, %v920_v12 }
 0x150   : > { %1172 = vrcp.f32 %v855_v16 }
 0x151   : > { %958 = vst [vmem:[%s1515_s27] sm:$0xff] %v1102_v17  ;;  %959 = vst [vmem:[%s1515_s27 + $0x8] sm:$0xff] %v1103_v18 }
 0x153   : > { %v1167_v20 = vpop.eup %1166 }
 0x154   : > { %v868_v21 = vmul.f32 %v1167_v20, %v828_v48 }
 0x156   : > { %v1169_v24 = vpop.eup %1168  ;;  %v876_v22 = vmul.f32 %v868_v21, %v1421_v23 }
 0x157   : > { %v1171_v25 = vpop.eup %1170  ;;  %v870_v26 = vmul.f32 %v1169_v24, %v830_v61 }
 0x158   : > { %v869_v58 = vmul.f32 %v1171_v25, %v829_v62  ;;  %v889_v27 = vmul.f32 %v1457_v8, %v876_v22 }
 0x159   : > { %v878_v28 = vmul.f32 %v870_v26, %v1427_v29  ;;  %v916_v29 = vunpack.c.l.bf16 %v909_v34 }
 0x15a   : > { %v1173_v31 = vpop.eup %1172  ;;  %v877_v32 = vmul.f32 %v869_v58, %v1429_v30  ;;  %v902_v33 = vadd.f32 %v1474_v19, %v889_v27 }
 0x15b   : > { %v871_v37 = vmul.f32 %v1173_v31, %v831_v10  ;;  %v891_v38 = vmul.f32 %v1457_v8, %v878_v28 }
 0x15c   : > { %v890_v23 = vmul.f32 %v1457_v8, %v877_v32  ;;  %v922_v30 = vadd.f32 %v914_v59, %v902_v33 }
 0x15d   : > { %v879_v40 = vmul.f32 %v871_v37, %v1435_v35  ;;  %v904_v41 = vadd.f32 %v1474_v19, %v891_v38 }
 0x15e   : > { %v903_v42 = vadd.f32 %v1474_v19, %v890_v23 }
 0x15f   : > { %v892_v43 = vmul.f32 %v1457_v8, %v879_v40  ;;  %v924_v47 = vadd.f32 %v916_v29, %v904_v41 }
 0x160   : > { %v923_v45 = vadd.f32 %v915_v39, %v903_v42 }
 0x161   : > { %v905_v46 = vadd.f32 %v1474_v19, %v892_v43 }
 0x162   : > { %v1104_v48 = vpack.c.bf16 %v923_v45, %v922_v30 }
 0x163   : > { %v925_v49 = vadd.f32 %v917_v44, %v905_v46 }
 0x164   : > { %960 = vst [vmem:[%s1515_s27 + $0x10] sm:$0xff] %v1104_v48 }
 0x165   : > { %v1105_v50 = vpack.c.bf16 %v925_v49, %v924_v47 }
 0x167   : > { %961 = vst [vmem:[%s1515_s27 + $0x18] sm:$0xff] %v1105_v50 }
 0x168 PF: > { %p12_p9 = scmp.ge.s32.totalorder %s1246_s22, 4   ;;  %s1551_s18 = smov %s1192_s19 }
 0x169   : > { %s1552_s19 = smov %s1255_s25  ;;  %s1553_s20 = smov %s1246_s22 }
 0x16a   :  { %14 = sbr.rel (!%p12_p9) target bundleno = 2 (0x2), region = 101 }

// kernel: forward.16
= control target key start
LH: loop header
LB: loop body
LE: loop exit
PB: predicated region body
PF: predicated region fallthrough
CT: control target
= control target key end

     0   :  { %v1916_v1 = vmov 0   ;;  %vm137_vm0 = vcmask 1043456   ;;  %vm133_vm1 = vcmask 588800   ;;  %s2773_s1 = inlined_call_operand.vmem [shape: bf16[4,72,512], index: 1, kind: input, shape index: {}]   ;;  %s2774_s0 = inlined_call_operand.vmem [shape: bf16[16,72], index: 0, kind: input, shape index: {}]   ;;  %s2775_s2 = inlined_call_operand.vmem [shape: f32[16,1], index: 2, kind: input, shape index: {}]   ;;  %s2776_s3 = inlined_call_operand.vmem [shape: f32[16,1], index: 3, kind: input, shape index: {}]   ;;  %s2777_s4 = inlined_call_operand.vmem [shape: bf16[16,512], index: 4, kind: output, shape index: {}]  }
   0x1   :  { %v1675_v0 = vld [vmem:[%s2773_s1 + $0x4] ss:$16 sps:$4 sm:$0xff]   ;;  %182 = vmatprep.mubr.bf16.mxu0 %v1916_v1  ;;  %225 = vmatprep.mubr.bf16.mxu1 %v1916_v1  ;;  %v1677_v2 = vld [vmem:[%s2773_s1 + $0xc] ss:$16 sps:$4 sm:$0xff]   ;;  %v1679_v3 = vld [vmem:[%s2773_s1] ss:$16 sps:$4 sm:$0xff]  }
   0x2   :  { %1673 = vset.pattern.permute.xlu0 %v1916_v1  ;;  %1674 = vset.pattern.permute.xlu1 %v1916_v1  ;;  %v1680_v4 = vld [vmem:[%s2773_s1 + $0x8] ss:$16 sps:$4 sm:$0xff]   ;;  %v1681_v5 = vld [vmem:[%s2773_s1 + $0x24] ss:$16 sps:$4 sm:$0xff]   ;;  %v1683_v6 = vld [vmem:[%s2773_s1 + $0x2c] ss:$16 sps:$4 sm:$0xff]  }
   0x3   :  { %150 = vmatprep.subr.bf16.mxu0 %v1675_v0  ;;  %193 = vmatprep.subr.bf16.mxu1 %v1677_v2  ;;  %v1685_v7 = vld [vmem:[%s2773_s1 + $0x20] ss:$16 sps:$4 sm:$0xff]   ;;  %v1686_v8 = vld [vmem:[%s2773_s1 + $0x28] ss:$16 sps:$4 sm:$0xff]   ;;  %v1687_v9 = vld [vmem:[%s2773_s1 + $0x44] ss:$16 sps:$4 sm:$0xff]  }
   0x4   :  { %151 = vmatpush1.bf16.msra.mxu0 %v1679_v3  ;;  %194 = vmatpush1.bf16.msra.mxu1 %v1680_v4  ;;  %v1689_v10 = vld [vmem:[%s2773_s1 + $0x4c] ss:$16 sps:$4 sm:$0xff]   ;;  %v1691_v11 = vld [vmem:[%s2773_s1 + $0x40] ss:$16 sps:$4 sm:$0xff]   ;;  %v1692_v12 = vld [vmem:[%s2773_s1 + $0x48] ss:$16 sps:$4 sm:$0xff]  }
   0x5   :  { %152 = vmatprep.subr.bf16.mxu0 %v1681_v5  ;;  %195 = vmatprep.subr.bf16.mxu1 %v1683_v6  ;;  %v1693_v13 = vld [vmem:[%s2773_s1 + $0x64] ss:$16 sps:$4 sm:$0xff]   ;;  %v1695_v14 = vld [vmem:[%s2773_s1 + $0x6c] ss:$16 sps:$4 sm:$0xff]   ;;  %v1697_v15 = vld [vmem:[%s2773_s1 + $0x60] ss:$16 sps:$4 sm:$0xff]  }
   0x6   :  { %v36_v16 = vld [vmem:[%s2773_s1 + $0x80] sm:$0xff]  ;;  %v37_v17 = vld [vmem:[%s2773_s1 + $0x88] sm:$0xff]  ;;  %v1554_v40 = vld [vmem:[%s2773_s1 + $0x110] sm:$0xff] }
   0x7   :  { %v1698_v18 = vld [vmem:[%s2773_s1 + $0x68] ss:$16 sps:$4 sm:$0xff]   ;;  %v1530_v19 = vcombine.low %v36_v16, %v36_v16  ;;  %v1531_v20 = vcombine.high %v36_v16, %v36_v16  ;;  %v1533_v21 = vcombine.high %v37_v17, %v37_v17  ;;  %v1532_v22 = vcombine.low %v37_v17, %v37_v17  ;;  %v1706_v25 = vld [vmem:[%s2773_s1 + $0x94] ss:$16 sps:$4 sm:$0xff]   ;;  %v1709_v26 = vld [vmem:[%s2773_s1 + $0x9c] ss:$16 sps:$4 sm:$0xff]  }
   0x8   :  { %153 = vmatpush1.bf16.msra.mxu0 %v1685_v7  ;;  %196 = vmatpush1.bf16.msra.mxu1 %v1686_v8  ;;  %v2013_v27 = vld [vmem:[%s2774_s0] sm:$0xff]   ;;  %v1707_v29 = vld [vmem:[%s2773_s1 + $0x98] ss:$16 sps:$4 sm:$0xff]   ;;  %v1715_v31 = vld [vmem:[%s2773_s1 + $0xbc] ss:$16 sps:$4 sm:$0xff]   ;;  %v1573_v44 = vcombine.high %v1554_v40, %v1554_v40  ;;  %v1572_v46 = vcombine.low %v1554_v40, %v1554_v40 }
   0x9   :  { %154 = vmatprep.subr.bf16.mxu0 %v1687_v9  ;;  %197 = vmatprep.subr.bf16.mxu1 %v1689_v10  ;;  %v139_v23 = vsel %vm137_vm0, %v1530_v19, 0  ;;  %v145_v24 = vsel %vm137_vm0, %v1532_v22, 0  ;;  %v1704_v28 = vld [vmem:[%s2773_s1 + $0x90] ss:$16 sps:$4 sm:$0xff]   ;;  %v1712_v30 = vld [vmem:[%s2773_s1 + $0xb4] ss:$16 sps:$4 sm:$0xff]  }
   0xa   :  { %v1710_v32 = vld [vmem:[%s2773_s1 + $0xb0] ss:$16 sps:$4 sm:$0xff]   ;;  %v1713_v33 = vld [vmem:[%s2773_s1 + $0xb8] ss:$16 sps:$4 sm:$0xff]   ;;  %v1718_v34 = vld [vmem:[%s2773_s1 + $0xd4] ss:$16 sps:$4 sm:$0xff]  }
   0xb   :  { %v1721_v35 = vld [vmem:[%s2773_s1 + $0xdc] ss:$16 sps:$4 sm:$0xff]   ;;  %v1716_v36 = vld [vmem:[%s2773_s1 + $0xd0] ss:$16 sps:$4 sm:$0xff]   ;;  %v1719_v37 = vld [vmem:[%s2773_s1 + $0xd8] ss:$16 sps:$4 sm:$0xff]  }
   0xc   :  { %155 = vmatpush1.bf16.msra.mxu0 %v1691_v11  ;;  %198 = vmatpush1.bf16.msra.mxu1 %v1692_v12  ;;  %v1724_v38 = vld [vmem:[%s2773_s1 + $0xf4] ss:$16 sps:$4 sm:$0xff]   ;;  %v1727_v39 = vld [vmem:[%s2773_s1 + $0xfc] ss:$16 sps:$4 sm:$0xff]   ;;  %v1722_v42 = vld [vmem:[%s2773_s1 + $0xf0] ss:$16 sps:$4 sm:$0xff]  }
   0xd   :  { %156 = vmatprep.subr.bf16.mxu0 %v1693_v13  ;;  %199 = vmatprep.subr.bf16.mxu1 %v1695_v14  ;;  %v1555_v41 = vld [vmem:[%s2773_s1 + $0x118] sm:$0xff]  ;;  %v514_v48 = vsel %vm137_vm0, %v1572_v46, 0  ;;  %v1734_v50 = vld [vmem:[%s2773_s1 + $0x124] ss:$16 sps:$4 sm:$0xff]   ;;  %v1732_v52 = vld [vmem:[%s2773_s1 + $0x120] ss:$16 sps:$4 sm:$0xff]  }
   0xe   :  { %v1725_v43 = vld [vmem:[%s2773_s1 + $0xf8] ss:$16 sps:$4 sm:$0xff]   ;;  %v1575_v45 = vcombine.high %v1555_v41, %v1555_v41  ;;  %v1574_v47 = vcombine.low %v1555_v41, %v1555_v41  ;;  %v1737_v51 = vld [vmem:[%s2773_s1 + $0x12c] ss:$16 sps:$4 sm:$0xff]   ;;  %v1740_v54 = vld [vmem:[%s2773_s1 + $0x144] ss:$16 sps:$4 sm:$0xff]  }
   0xf   :  { %v1735_v53 = vld [vmem:[%s2773_s1 + $0x128] ss:$16 sps:$4 sm:$0xff]   ;;  %v1743_v55 = vld [vmem:[%s2773_s1 + $0x14c] ss:$16 sps:$4 sm:$0xff]   ;;  %v1738_v56 = vld [vmem:[%s2773_s1 + $0x140] ss:$16 sps:$4 sm:$0xff]  }
  0x10   :  { %157 = vmatpush1.bf16.msra.mxu0 %v1697_v15  ;;  %200 = vmatpush1.bf16.msra.mxu1 %v1698_v18  ;;  %v520_v49 = vsel %vm137_vm0, %v1574_v47, 0  ;;  %v1741_v57 = vld [vmem:[%s2773_s1 + $0x148] ss:$16 sps:$4 sm:$0xff]   ;;  %v1746_v58 = vld [vmem:[%s2773_s1 + $0x164] ss:$16 sps:$4 sm:$0xff]  }
  0x11   :  { %1534 = vmatprep.subr.msk.bf16.mxu0 %vm137_vm0, %v1531_v20  ;;  %1536 = vmatprep.subr.msk.bf16.mxu1 %vm137_vm0, %v1533_v21  ;;  %v1749_v59 = vld [vmem:[%s2773_s1 + $0x16c] ss:$16 sps:$4 sm:$0xff]   ;;  %v236_v60 = vld [vmem:[%s2775_s2] sm:$0xff]  ;;  %v1747_v63 = vld [vmem:[%s2773_s1 + $0x168] ss:$16 sps:$4 sm:$0xff]  }
  0x12   :  { %370 = vperm.xlu0 %1673, %v236_v60   ;;  %v238_v61 = vld [vmem:[%s2776_s3] sm:$0xff]  ;;  %v237_v0 = vld [vmem:[%s2775_s2 + $0x8] sm:$0xff] }
  0x13   :  { %v1744_v62 = vld [vmem:[%s2773_s1 + $0x160] ss:$16 sps:$4 sm:$0xff]   ;;  %v1752_v2 = vld [vmem:[%s2773_s1 + $0x184] ss:$16 sps:$4 sm:$0xff]   ;;  %v1755_v3 = vld [vmem:[%s2773_s1 + $0x18c] ss:$16 sps:$4 sm:$0xff]   ;;  %388 = vperm.xlu1 %1674, %v238_v61  }
  0x14   :  { %159 = vmatpush1.bf16.msra.mxu0 %v139_v23  ;;  %202 = vmatpush1.bf16.msra.mxu1 %v145_v24  ;;  %v1596_v4 = vld [vmem:[%s2773_s1 + $0x1a0] sm:$0xff]  ;;  %v1597_v5 = vld [vmem:[%s2773_s1 + $0x1a8] sm:$0xff] }
  0x15   :  { %525 = vmatprep.subr.bf16.mxu0 %v1706_v25  ;;  %568 = vmatprep.subr.bf16.mxu1 %v1709_v26  ;;  %v239_v6 = vld [vmem:[%s2776_s3 + $0x8] sm:$0xff]  ;;  %v1750_v7 = vld [vmem:[%s2773_s1 + $0x180] ss:$16 sps:$4 sm:$0xff]   ;;  %v1615_v9 = vcombine.high %v1596_v4, %v1596_v4  ;;  %v1617_v10 = vcombine.high %v1597_v5, %v1597_v5  ;;  %v1614_v11 = vcombine.low %v1596_v4, %v1596_v4  ;;  %v1762_v15 = vld [vmem:[%s2773_s1 + $0x1b4] ss:$16 sps:$4 sm:$0xff]  }
  0x16   :  { %375 = vperm.xlu0 %1673, %v237_v0   ;;  %v1753_v8 = vld [vmem:[%s2773_s1 + $0x188] ss:$16 sps:$4 sm:$0xff]   ;;  %v1616_v12 = vcombine.low %v1597_v5, %v1597_v5  ;;  %v1765_v16 = vld [vmem:[%s2773_s1 + $0x1bc] ss:$16 sps:$4 sm:$0xff]   ;;  %v1760_v17 = vld [vmem:[%s2773_s1 + $0x1b0] ss:$16 sps:$4 sm:$0xff]  }
  0x17   :  { %1535 = vmatmul.mubr.msk.bf16.vlgmr.msra.gmra.mrb[0].mxu0 %vm133_vm1, %v2013_v27  ;;  %1537 = vmatmul.mubr.msk.bf16.vlgmr.msra.gmra.mrb[0].mxu1 %vm133_vm1, %v2013_v27  ;;  %v873_v13 = vsel %vm137_vm0, %v1614_v11, 0  ;;  %v1763_v18 = vld [vmem:[%s2773_s1 + $0x1b8] ss:$16 sps:$4 sm:$0xff]   ;;  %v1768_v19 = vld [vmem:[%s2773_s1 + $0x1d4] ss:$16 sps:$4 sm:$0xff]  }
  0x18   :  { %526 = vmatpush1.bf16.msra.mxu0 %v1704_v28  ;;  %569 = vmatpush1.bf16.msra.mxu1 %v1707_v29  ;;  %v879_v14 = vsel %vm137_vm0, %v1616_v12, 0  ;;  %v1771_v20 = vld [vmem:[%s2773_s1 + $0x1dc] ss:$16 sps:$4 sm:$0xff]   ;;  %v1766_v21 = vld [vmem:[%s2773_s1 + $0x1d0] ss:$16 sps:$4 sm:$0xff]  }
  0x19   :  { %527 = vmatprep.subr.bf16.mxu0 %v1712_v30  ;;  %570 = vmatprep.subr.bf16.mxu1 %v1715_v31  ;;  %v1769_v22 = vld [vmem:[%s2773_s1 + $0x1d8] ss:$16 sps:$4 sm:$0xff]   ;;  %v1774_v23 = vld [vmem:[%s2773_s1 + $0x1f4] ss:$16 sps:$4 sm:$0xff]   ;;  %v1777_v24 = vld [vmem:[%s2773_s1 + $0x1fc] ss:$16 sps:$4 sm:$0xff]  }
  0x1a   :  { %557 = vmatprep.mubr.bf16.mxu0 %v1916_v1  ;;  %600 = vmatprep.mubr.bf16.mxu1 %v1916_v1  ;;  %v1772_v25 = vld [vmem:[%s2773_s1 + $0x1f0] ss:$16 sps:$4 sm:$0xff]   ;;  %v1775_v26 = vld [vmem:[%s2773_s1 + $0x1f8] ss:$16 sps:$4 sm:$0xff]   ;;  %v1780_v28 = vld [vmem:[%s2773_s1 + $0x214] ss:$16 sps:$4 sm:$0xff]  }
  0x1b   :  { %393 = vperm.xlu1 %1674, %v239_v6   ;;  %v1638_v29 = vld [vmem:[%s2773_s1 + $0x230] sm:$0xff]  ;;  %v1639_v30 = vld [vmem:[%s2773_s1 + $0x238] sm:$0xff] }
  0x1c   :  { %528 = vmatpush1.bf16.msra.mxu0 %v1710_v32  ;;  %571 = vmatpush1.bf16.msra.mxu1 %v1713_v33  ;;  %v1778_v31 = vld [vmem:[%s2773_s1 + $0x210] ss:$16 sps:$4 sm:$0xff]   ;;  %v1781_v32 = vld [vmem:[%s2773_s1 + $0x218] ss:$16 sps:$4 sm:$0xff]   ;;  %v1657_v33 = vcombine.high %v1638_v29, %v1638_v29 }
  0x1d   :  { %529 = vmatprep.subr.bf16.mxu0 %v1718_v34  ;;  %572 = vmatprep.subr.bf16.mxu1 %v1721_v35  ;;  %v1659_v34 = vcombine.high %v1639_v30, %v1639_v30  ;;  %v1656_v35 = vcombine.low %v1638_v29, %v1638_v29 }
  0x20   :  { %530 = vmatpush1.bf16.msra.mxu0 %v1716_v36  ;;  %573 = vmatpush1.bf16.msra.mxu1 %v1719_v37  ;;  %v1658_v36 = vcombine.low %v1639_v30, %v1639_v30  ;;  %v1232_v37 = vsel %vm137_vm0, %v1656_v35, 0 }
  0x21   :  { %531 = vmatprep.subr.bf16.mxu0 %v1724_v38  ;;  %574 = vmatprep.subr.bf16.mxu1 %v1727_v39 }
  0x22   :  { %v1238_v38 = vsel %vm137_vm0, %v1658_v36, 0 }
  0x24   :  { %532 = vmatpush1.bf16.msra.mxu0 %v1722_v42  ;;  %575 = vmatpush1.bf16.msra.mxu1 %v1725_v43 }
  0x25   :  { %1576 = vmatprep.subr.msk.bf16.mxu0 %vm137_vm0, %v1573_v44  ;;  %1578 = vmatprep.subr.msk.bf16.mxu1 %vm137_vm0, %v1575_v45 }
  0x28   :  { %534 = vmatpush1.bf16.msra.mxu0 %v514_v48  ;;  %577 = vmatpush1.bf16.msra.mxu1 %v520_v49 }
  0x29   :  { %884 = vmatprep.subr.bf16.mxu0 %v1734_v50  ;;  %927 = vmatprep.subr.bf16.mxu1 %v1737_v51 }
  0x2b   :  { %1577 = vmatmul.mubr.msk.bf16.vlgmr.msra.gmra.mrb[4].mxu0 %vm133_vm1, %v2013_v27  ;;  %1579 = vmatmul.mubr.msk.bf16.vlgmr.msra.gmra.mrb[4].mxu1 %vm133_vm1, %v2013_v27 }
  0x2c   :  { %885 = vmatpush1.bf16.msra.mxu0 %v1732_v52  ;;  %928 = vmatpush1.bf16.msra.mxu1 %v1735_v53 }
  0x2d   :  { %886 = vmatprep.subr.bf16.mxu0 %v1740_v54  ;;  %929 = vmatprep.subr.bf16.mxu1 %v1743_v55 }
  0x2e   :  { %916 = vmatprep.mubr.bf16.mxu0 %v1916_v1  ;;  %959 = vmatprep.mubr.bf16.mxu1 %v1916_v1 }
  0x30   :  { %887 = vmatpush1.bf16.msra.mxu0 %v1738_v56  ;;  %930 = vmatpush1.bf16.msra.mxu1 %v1741_v57 }
  0x31   :  { %888 = vmatprep.subr.bf16.mxu0 %v1746_v58  ;;  %931 = vmatprep.subr.bf16.mxu1 %v1749_v59 }
  0x34   :  { %889 = vmatpush1.bf16.msra.mxu0 %v1744_v62  ;;  %932 = vmatpush1.bf16.msra.mxu1 %v1747_v63 }
  0x35   :  { %890 = vmatprep.subr.bf16.mxu0 %v1752_v2  ;;  %933 = vmatprep.subr.bf16.mxu1 %v1755_v3 }
  0x38   :  { %891 = vmatpush1.bf16.msra.mxu0 %v1750_v7  ;;  %934 = vmatpush1.bf16.msra.mxu1 %v1753_v8 }
  0x39   :  { %1618 = vmatprep.subr.msk.bf16.mxu0 %vm137_vm0, %v1615_v9  ;;  %1620 = vmatprep.subr.msk.bf16.mxu1 %vm137_vm0, %v1617_v10 }
  0x3c   :  { %893 = vmatpush1.bf16.msra.mxu0 %v873_v13  ;;  %936 = vmatpush1.bf16.msra.mxu1 %v879_v14 }
  0x3d   :  { %1243 = vmatprep.subr.bf16.mxu0 %v1762_v15  ;;  %1286 = vmatprep.subr.bf16.mxu1 %v1765_v16 }
  0x3f   :  { %1619 = vmatmul.mubr.msk.bf16.vlgmr.msra.gmra.mrb[8].mxu0 %vm133_vm1, %v2013_v27  ;;  %1621 = vmatmul.mubr.msk.bf16.vlgmr.msra.gmra.mrb[8].mxu1 %vm133_vm1, %v2013_v27 }
  0x40   :  { %1244 = vmatpush1.bf16.msra.mxu0 %v1760_v17  ;;  %1287 = vmatpush1.bf16.msra.mxu1 %v1763_v18 }
  0x41   :  { %1245 = vmatprep.subr.bf16.mxu0 %v1768_v19  ;;  %1288 = vmatprep.subr.bf16.mxu1 %v1771_v20 }
  0x42   :  { %1275 = vmatprep.mubr.bf16.mxu0 %v1916_v1  ;;  %1318 = vmatprep.mubr.bf16.mxu1 %v1916_v1  ;;  %v1783_v1 = vld [vmem:[%s2773_s1 + $0x21c] ss:$16 sps:$4 sm:$0xff]  }
  0x44   :  { %1246 = vmatpush1.bf16.msra.mxu0 %v1766_v21  ;;  %1289 = vmatpush1.bf16.msra.mxu1 %v1769_v22 }
  0x45   :  { %1247 = vmatprep.subr.bf16.mxu0 %v1774_v23  ;;  %1290 = vmatprep.subr.bf16.mxu1 %v1777_v24 }
  0x48   :  { %1248 = vmatpush1.bf16.msra.mxu0 %v1772_v25  ;;  %1291 = vmatpush1.bf16.msra.mxu1 %v1775_v26 }
  0x49   :  { %1249 = vmatprep.subr.bf16.mxu0 %v1780_v28  ;;  %1292 = vmatprep.subr.bf16.mxu1 %v1783_v1 }
  0x4c   :  { %1250 = vmatpush1.bf16.msra.mxu0 %v1778_v31  ;;  %1293 = vmatpush1.bf16.msra.mxu1 %v1781_v32 }
  0x4d   :  { %1660 = vmatprep.subr.msk.bf16.mxu0 %vm137_vm0, %v1657_v33  ;;  %1662 = vmatprep.subr.msk.bf16.mxu1 %vm137_vm0, %v1659_v34 }
  0x50   :  { %1252 = vmatpush1.bf16.msra.mxu0 %v1232_v37  ;;  %1295 = vmatpush1.bf16.msra.mxu1 %v1238_v38 }
  0x53   :  { %1661 = vmatmul.mubr.msk.bf16.vlgmr.msra.gmra.mrb[12].mxu0 %vm133_vm1, %v2013_v27  ;;  %1663 = vmatmul.mubr.msk.bf16.vlgmr.msra.gmra.mrb[12].mxu1 %vm133_vm1, %v2013_v27 }
  0xea   :  { %v2217_v39 = vpop.f32.mrb[0].mxu0  ;;  %v2219_v40 = vpop.f32.mrb[0].mxu1 }
  0xeb   :  { %v240_v41 = vand.u32 2147483647, %v2217_v39  ;;  %v242_v42 = vand.u32 2147483647, %v2219_v40  ;;  %v2223_v43 = vpop.f32.mrb[1].mxu0  ;;  %v2225_v44 = vpop.f32.mrb[1].mxu1 }
  0xec   :  { %v241_v47 = vand.u32 2147483647, %v2223_v43  ;;  %v2228_v48 = vpop.f32.mrb[2].mxu0  ;;  %v243_v27 = vand.u32 2147483647, %v2225_v44  ;;  %v2232_v53 = vpop.f32.mrb[2].mxu1 }
  0xed   :  { %v248_v45 = vsub.f32 0.0, %v240_v41  ;;  %v250_v46 = vsub.f32 0.0, %v242_v42  ;;  %v244_v49 = vand.u32 2147483647, %v2228_v48  ;;  %v246_v56 = vand.u32 2147483647, %v2232_v53 }
  0xee   :  { %v249_v52 = vsub.f32 0.0, %v241_v47  ;;  %v251_v54 = vsub.f32 0.0, %v243_v27  ;;  %v2235_v57 = vpop.f32.mrb[3].mxu0  ;;  %v2238_v60 = vpop.f32.mrb[3].mxu1  ;;  %vm272_vm2 = vcmp.ge.f32.partialorder %v2217_v39, 0.0  ;;  %vm274_vm3 = vcmp.ge.f32.partialorder %v2219_v40, 0.0 }
  0xef   :  { %v256_v50 = vmul.f32 1.442695, %v248_v45  ;;  %v260_v51 = vmul.f32 1.442695, %v250_v46  ;;  %v252_v55 = vsub.f32 0.0, %v244_v49  ;;  %v254_v63 = vsub.f32 0.0, %v246_v56 }
  0xf0   :  { %v258_v58 = vmul.f32 1.442695, %v249_v52  ;;  %v245_v59 = vand.u32 2147483647, %v2235_v57  ;;  %v262_v61 = vmul.f32 1.442695, %v251_v54 }
  0xf1   :  { %1788 = vpow2.f32 %v256_v50  ;;  %v264_v62 = vmul.f32 1.442695, %v252_v55  ;;  %v247_v2 = vand.u32 2147483647, %v2238_v60  ;;  %v268_v3 = vmul.f32 1.442695, %v254_v63 }
  0xf2   :  { %1790 = vpow2.f32 %v260_v51  ;;  %v253_v0 = vsub.f32 0.0, %v245_v59  ;;  %vm273_vm4 = vcmp.ge.f32.partialorder %v2223_v43, 0.0  ;;  %vm275_vm5 = vcmp.ge.f32.partialorder %v2225_v44, 0.0 }
  0xf3   :  { %1792 = vpow2.f32 %v258_v58  ;;  %v255_v4 = vsub.f32 0.0, %v247_v2  ;;  %vm276_vm6 = vcmp.ge.f32.partialorder %v2228_v48, 0.0  ;;  %vm278_vm7 = vcmp.ge.f32.partialorder %v2232_v53, 0.0 }
  0xf4   :  { %1794 = vpow2.f32 %v262_v61  ;;  %v266_v5 = vmul.f32 1.442695, %v253_v0  ;;  %vm277_vm8 = vcmp.ge.f32.partialorder %v2235_v57, 0.0  ;;  %vm279_vm9 = vcmp.ge.f32.partialorder %v2238_v60, 0.0 }
  0xf5   :  { %1796 = vpow2.f32 %v264_v62  ;;  %v270_v6 = vmul.f32 1.442695, %v255_v4 }
  0xf6   :  { %1798 = vpow2.f32 %v268_v3 }
  0xf7   :  { %1800 = vpow2.f32 %v266_v5 }
  0xf8   :  { %1802 = vpow2.f32 %v270_v6 }
  0xfb   :  { %v1789_v7 = vpop.eup %1788 }
  0xfc   :  { %v1791_v8 = vpop.eup %1790  ;;  %v280_v9 = vmul.f32 2.0, %v1789_v7  ;;  %v296_v10 = vadd.f32 2.0, %v1789_v7 }
  0xfd   :  { %v1793_v11 = vpop.eup %1792  ;;  %v282_v12 = vmul.f32 2.0, %v1791_v8  ;;  %v298_v13 = vadd.f32 2.0, %v1791_v8 }
  0xfe   :  { %v288_v14 = vadd.f32 1.0, %v280_v9  ;;  %v304_v15 = vmul.f32 %v1789_v7, %v296_v10  ;;  %v320_v16 = vmul.f32 %v1789_v7, %v280_v9  ;;  %v281_v17 = vmul.f32 2.0, %v1793_v11  ;;  %v2246_v18 = vpop.f32.mrb[4].mxu0  ;;  %v2248_v19 = vpop.f32.mrb[4].mxu1 }
  0xff   :  { %v1795_v20 = vpop.eup %1794  ;;  %v290_v21 = vadd.f32 1.0, %v282_v12  ;;  %v306_v22 = vmul.f32 %v1791_v8, %v298_v13  ;;  %v322_v23 = vmul.f32 %v1791_v8, %v282_v12  ;;  %v297_v24 = vadd.f32 2.0, %v1793_v11  ;;  %v2250_v25 = vpop.f32.mrb[5].mxu0 }
 0x100   :  { %v2252_v26 = vpop.f32.mrb[5].mxu1  ;;  %v1797_v28 = vpop.eup %1796  ;;  %v2256_v1 = vsel %vm272_vm2, %v288_v14, %v304_v15  ;;  %v328_v29 = vsel %vm272_vm2, %v320_v16, 2.0  ;;  %v289_v30 = vadd.f32 1.0, %v281_v17  ;;  %v321_v31 = vmul.f32 %v1793_v11, %v281_v17 }
 0x101   :  { %v2260_v32 = vpop.f32.mrb[6].mxu0  ;;  %v2262_v33 = vpop.f32.mrb[6].mxu1  ;;  %v336_v34 = vadd.f32 %v328_v29, %v2256_v1  ;;  %v2267_v35 = vsel %vm274_vm3, %v290_v21, %v306_v22  ;;  %v330_v36 = vsel %vm274_vm3, %v322_v23, 2.0  ;;  %v305_v37 = vmul.f32 %v1793_v11, %v297_v24 }
 0x102   :  { %v2272_v38 = vpop.f32.mrb[7].mxu0  ;;  %v2274_v41 = vpop.f32.mrb[7].mxu1  ;;  %v338_v42 = vadd.f32 %v330_v36, %v2267_v35  ;;  %v329_v45 = vsel %vm273_vm4, %v321_v31, 2.0  ;;  %v283_v46 = vmul.f32 2.0, %v1795_v20  ;;  %v299_v47 = vadd.f32 2.0, %v1795_v20 }
 0x103   :  { %v1799_v27 = vpop.eup %1798  ;;  %v2281_v49 = vsel %vm273_vm4, %v289_v30, %v305_v37  ;;  %v284_v50 = vmul.f32 2.0, %v1797_v28  ;;  %v300_v51 = vadd.f32 2.0, %v1797_v28  ;;  %1804 = vrcp.f32 %v336_v34 }
 0x104   :  { %v1801_v52 = vpop.eup %1800  ;;  %v337_v54 = vadd.f32 %v329_v45, %v2281_v49  ;;  %v291_v55 = vadd.f32 1.0, %v283_v46  ;;  %v307_v56 = vmul.f32 %v1795_v20, %v299_v47  ;;  %v323_v58 = vmul.f32 %v1795_v20, %v283_v46 }
 0x105   :  { %v292_v59 = vadd.f32 1.0, %v284_v50  ;;  %v308_v61 = vmul.f32 %v1797_v28, %v300_v51  ;;  %v324_v62 = vmul.f32 %v1797_v28, %v284_v50  ;;  %1806 = vrcp.f32 %v338_v42  ;;  %v1803_v3 = vpop.eup %1802 }
 0x106   :  { %v2287_v63 = vsel %vm275_vm5, %v291_v55, %v307_v56  ;;  %v286_v0 = vmul.f32 2.0, %v1799_v27  ;;  %v302_v2 = vadd.f32 2.0, %v1799_v27  ;;  %v331_v4 = vsel %vm275_vm5, %v323_v58, 2.0 }
 0x107   :  { %v2293_v5 = vsel %vm276_vm6, %v292_v59, %v308_v61  ;;  %v332_v6 = vsel %vm276_vm6, %v324_v62, 2.0  ;;  %v285_v7 = vmul.f32 2.0, %v1801_v52  ;;  %1808 = vrcp.f32 %v337_v54 }
 0x108   :  { %v339_v8 = vadd.f32 %v331_v4, %v2287_v63  ;;  %v294_v9 = vadd.f32 1.0, %v286_v0  ;;  %v310_v10 = vmul.f32 %v1799_v27, %v302_v2  ;;  %v326_v11 = vmul.f32 %v1799_v27, %v286_v0 }
 0x109   :  { %v293_v12 = vadd.f32 1.0, %v285_v7  ;;  %v301_v13 = vadd.f32 2.0, %v1801_v52  ;;  %v325_v14 = vmul.f32 %v1801_v52, %v285_v7  ;;  %v340_v15 = vadd.f32 %v332_v6, %v2293_v5 }
 0x10a   :  { %v2301_v16 = vsel %vm278_vm7, %v294_v9, %v310_v10  ;;  %v287_v17 = vmul.f32 2.0, %v1803_v3  ;;  %v303_v20 = vadd.f32 2.0, %v1803_v3  ;;  %1810 = vrcp.f32 %v339_v8 }
 0x10b   :  { %v334_v21 = vsel %vm278_vm7, %v326_v11, 2.0  ;;  %v309_v22 = vmul.f32 %v1801_v52, %v301_v13  ;;  %v333_v23 = vsel %vm277_vm8, %v325_v14, 2.0  ;;  %v611_v34 = vand.u32 2147483647, %v2246_v18 }
 0x10c   :  { %v342_v24 = vadd.f32 %v334_v21, %v2301_v16  ;;  %v295_v28 = vadd.f32 1.0, %v287_v17  ;;  %v311_v29 = vmul.f32 %v1803_v3, %v303_v20  ;;  %v327_v30 = vmul.f32 %v1803_v3, %v287_v17 }
 0x10d   :  { %v2310_v31 = vsel %vm277_vm8, %v293_v12, %v309_v22  ;;  %v613_v36 = vand.u32 2147483647, %v2248_v19  ;;  %v1805_v37 = vpop.eup %1804  ;;  %1812 = vrcp.f32 %v340_v15  ;;  %v619_v47 = vsub.f32 0.0, %v611_v34 }
 0x10e   :  { %v341_v42 = vadd.f32 %v333_v23, %v2310_v31  ;;  %v2316_v45 = vsel %vm279_vm9, %v295_v28, %v311_v29  ;;  %1814 = vrcp.f32 %v342_v24  ;;  %v335_v46 = vsel %vm279_vm9, %v327_v30, 2.0 }
 0x10f   :  { %v621_v27 = vsub.f32 0.0, %v613_v36  ;;  %v1807_v50 = vpop.eup %1806  ;;  %v343_v51 = vadd.f32 %v335_v46, %v2316_v45  ;;  %v627_v52 = vmul.f32 1.442695, %v619_v47  ;;  %v352_v56 = vmul.f32 %v1805_v37, %v2256_v1  ;;  %v2346_v36 = vpop.permute.xlu0 %370 }
 0x110   :  { %1816 = vrcp.f32 %v341_v42  ;;  %v612_v58 = vand.u32 2147483647, %v2250_v25  ;;  %v614_v59 = vand.u32 2147483647, %v2252_v26  ;;  %v615_v62 = vand.u32 2147483647, %v2260_v32 }
 0x111   :  { %v631_v54 = vmul.f32 1.442695, %v621_v27  ;;  %v1809_v55 = vpop.eup %1808  ;;  %1818 = vrcp.f32 %v343_v51  ;;  %v617_v9 = vand.u32 2147483647, %v2262_v33  ;;  %v360_v12 = vmul.f32 %v352_v56, %v2217_v39 }
 0x112   :  { %v2322_v61 = vpop.f32.mrb[8].mxu0  ;;  %1820 = vpow2.f32 %v627_v52  ;;  %v2325_v0 = vpop.f32.mrb[8].mxu1  ;;  %v620_v3 = vsub.f32 0.0, %v612_v58  ;;  %v622_v4 = vsub.f32 0.0, %v614_v59  ;;  %v623_v8 = vsub.f32 0.0, %v615_v62 }
 0x113   :  { %v2327_v2 = vpop.f32.mrb[9].mxu0  ;;  %1822 = vpow2.f32 %v631_v54  ;;  %v2329_v6 = vpop.f32.mrb[9].mxu1  ;;  %v616_v15 = vand.u32 2147483647, %v2272_v38  ;;  %v354_v17 = vmul.f32 %v1807_v50, %v2267_v35  ;;  %v625_v21 = vsub.f32 0.0, %v617_v9 }
 0x114   :  { %v2331_v1 = vpop.f32.mrb[10].mxu0  ;;  %v1811_v7 = vpop.eup %1810  ;;  %v629_v13 = vmul.f32 1.442695, %v620_v3  ;;  %v633_v14 = vmul.f32 1.442695, %v622_v4  ;;  %v353_v24 = vmul.f32 %v1809_v55, %v2281_v49  ;;  %v378_v46 = vmul.f32 %v2346_v36, %v360_v12 }
 0x115   :  { %v2334_v10 = vpop.f32.mrb[10].mxu1  ;;  %v2336_v11 = vpop.f32.mrb[11].mxu0  ;;  %v635_v20 = vmul.f32 1.442695, %v623_v8  ;;  %v624_v28 = vsub.f32 0.0, %v616_v15  ;;  %v355_v39 = vmul.f32 %v1811_v7, %v2287_v63  ;;  %vm643_vm10 = vcmp.ge.f32.partialorder %v2246_v18, 0.0 }
 0x116   :  { %v2341_v22 = vpop.f32.mrb[11].mxu1  ;;  %1824 = vpow2.f32 %v629_v13  ;;  %v618_v29 = vand.u32 2147483647, %v2274_v41  ;;  %v639_v34 = vmul.f32 1.442695, %v625_v21  ;;  %vm645_vm11 = vcmp.ge.f32.partialorder %v2248_v19, 0.0  ;;  %v2368_v58 = vpop.permute.xlu1 %388 }
 0x117   :  { %v1813_v23 = vpop.eup %1812  ;;  %1826 = vpow2.f32 %v633_v14  ;;  %v637_v35 = vmul.f32 1.442695, %v624_v28  ;;  %v970_v49 = vand.u32 2147483647, %v2322_v61  ;;  %v362_v63 = vmul.f32 %v354_v17, %v2219_v40 }
 0x118   :  { %v1815_v30 = vpop.eup %1814  ;;  %1828 = vpow2.f32 %v635_v20  ;;  %v626_v42 = vsub.f32 0.0, %v618_v29  ;;  %v2354_v27 = vmul.f32 %v353_v24, %v2223_v43  ;;  %v2357_v50 = vmul.f32 %v1813_v23, %v2293_v5 }
 0x119   :  { %1830 = vpow2.f32 %v639_v34  ;;  %v2360_v54 = vmul.f32 %v355_v39, %v2225_v44  ;;  %v2363_v55 = vmul.f32 %v1815_v30, %v2301_v16  ;;  %v978_v40 = vsub.f32 0.0, %v970_v49 }
 0x11a   :  { %v1817_v37 = vpop.eup %1816  ;;  %v641_v51 = vmul.f32 1.442695, %v626_v42  ;;  %vm644_vm12 = vcmp.ge.f32.partialorder %v2250_v25, 0.0  ;;  %1832 = vpow2.f32 %v637_v35  ;;  %v2372_v5 = vadd.f32 %v2368_v58, %v378_v46 }
 0x11b   :  { %v1819_v47 = vpop.eup %1818  ;;  %v2366_v56 = vmul.f32 %v1817_v37, %v2310_v31  ;;  %vm646_vm13 = vcmp.ge.f32.partialorder %v2252_v26, 0.0  ;;  %v986_v31 = vmul.f32 1.442695, %v978_v40  ;;  %vm647_vm14 = vcmp.ge.f32.partialorder %v2260_v32, 0.0 }
 0x11c   :  { %v1821_v52 = vpop.eup %1820  ;;  %v2375_v44 = vmul.f32 %v1819_v47, %v2316_v45  ;;  %1834 = vpow2.f32 %v641_v51  ;;  %v2380_v14 = vmul.f32 %v2346_v36, %v362_v63  ;;  %v972_v20 = vand.u32 2147483647, %v2325_v0 }
 0x11d   :  { %v1823_v59 = vpop.eup %1822  ;;  %v651_v43 = vmul.f32 2.0, %v1821_v52  ;;  %v667_v62 = vadd.f32 2.0, %v1821_v52  ;;  %1836 = vpow2.f32 %v986_v31  ;;  %vm649_vm15 = vcmp.ge.f32.partialorder %v2262_v33, 0.0 }
 0x11e   :  { %v653_v16 = vmul.f32 2.0, %v1823_v59  ;;  %v669_v3 = vadd.f32 2.0, %v1823_v59  ;;  %vm648_vm0 = vcmp.ge.f32.partialorder %v2272_v38, 0.0  ;;  %vm650_vm1 = vcmp.ge.f32.partialorder %v2274_v41, 0.0 }
 0x11f   :  { %v659_v4 = vadd.f32 1.0, %v651_v43  ;;  %v675_v7 = vmul.f32 %v1821_v52, %v667_v62  ;;  %v691_v8 = vmul.f32 %v1821_v52, %v651_v43  ;;  %vm1002_vm2 = vcmp.ge.f32.partialorder %v2322_v61, 0.0 }
 0x120   :  { %v661_v9 = vadd.f32 1.0, %v653_v16  ;;  %v677_v12 = vmul.f32 %v1823_v59, %v669_v3  ;;  %v693_v13 = vmul.f32 %v1823_v59, %v653_v16  ;;  %v1825_v15 = vpop.eup %1824  ;;  %vm1004_vm3 = vcmp.ge.f32.partialorder %v2325_v0, 0.0 }
 0x121   :  { %v2384_v45 = vsel %vm643_vm10, %v659_v4, %v675_v7  ;;  %v699_v17 = vsel %vm643_vm10, %v691_v8, 2.0  ;;  %v1827_v21 = vpop.eup %1826  ;;  %v652_v29 = vmul.f32 2.0, %v1825_v15  ;;  %v668_v34 = vadd.f32 2.0, %v1825_v15 }
 0x122   :  { %v707_v23 = vadd.f32 %v699_v17, %v2384_v45  ;;  %v2392_v24 = vsel %vm645_vm11, %v661_v9, %v677_v12  ;;  %v701_v28 = vsel %vm645_vm11, %v693_v13, 2.0  ;;  %v1829_v30 = vpop.eup %1828  ;;  %v654_v37 = vmul.f32 2.0, %v1827_v21 }
 0x123   :  { %v709_v39 = vadd.f32 %v701_v28, %v2392_v24  ;;  %v670_v35 = vadd.f32 2.0, %v1827_v21  ;;  %v1831_v42 = vpop.eup %1830  ;;  %v660_v46 = vadd.f32 1.0, %v652_v29  ;;  %v692_v49 = vmul.f32 %v1825_v15, %v652_v29 }
 0x124   :  { %1838 = vrcp.f32 %v707_v23  ;;  %v655_v47 = vmul.f32 2.0, %v1829_v30  ;;  %v676_v63 = vmul.f32 %v1825_v15, %v668_v34  ;;  %v662_v51 = vadd.f32 1.0, %v654_v37  ;;  %v1833_v7 = vpop.eup %1832 }
 0x125   :  { %1840 = vrcp.f32 %v709_v39  ;;  %v678_v52 = vmul.f32 %v1827_v21, %v670_v35  ;;  %v700_v43 = vsel %vm644_vm12, %v692_v49, 2.0  ;;  %v694_v62 = vmul.f32 %v1827_v21, %v654_v37 }
 0x126   :  { %v2399_v40 = vpop.f32.mrb[12].mxu0  ;;  %v2401_v59 = vpop.f32.mrb[12].mxu1  ;;  %v663_v16 = vadd.f32 1.0, %v655_v47  ;;  %v671_v3 = vadd.f32 2.0, %v1829_v30  ;;  %v2411_v8 = vsel %vm644_vm12, %v660_v46, %v676_v63  ;;  %v695_v12 = vmul.f32 %v1829_v30, %v655_v47 }
 0x127   :  { %v2405_v31 = vpop.f32.mrb[13].mxu0  ;;  %v2407_v4 = vpop.f32.mrb[13].mxu1  ;;  %v2415_v9 = vsel %vm646_vm13, %v662_v51, %v678_v52  ;;  %v657_v13 = vmul.f32 2.0, %v1831_v42  ;;  %v708_v21 = vadd.f32 %v700_v43, %v2411_v8  ;;  %v702_v23 = vsel %vm646_vm13, %v694_v62, 2.0 }
 0x128   :  { %v2418_v15 = vpop.f32.mrb[14].mxu0  ;;  %v2420_v17 = vpop.f32.mrb[14].mxu1  ;;  %v679_v28 = vmul.f32 %v1829_v30, %v671_v3  ;;  %v673_v29 = vadd.f32 2.0, %v1831_v42  ;;  %v710_v35 = vadd.f32 %v702_v23, %v2415_v9  ;;  %v703_v46 = vsel %vm647_vm14, %v695_v12, 2.0 }
 0x129   :  { %2781 = vst [vmem:[#allocation2_spill] sm:$0xff] %v2420_v17  ;;  %v2425_v39 = vpop.f32.mrb[15].mxu0  ;;  %v2427_v34 = vpop.f32.mrb[15].mxu1  ;;  %v665_v49 = vadd.f32 1.0, %v657_v13  ;;  %v697_v47 = vmul.f32 %v1831_v42, %v657_v13  ;;  %1842 = vrcp.f32 %v708_v21  ;;  %v656_v30 = vmul.f32 2.0, %v1833_v7 }
 0x12a   :  { %2782 = vst [vmem:[#allocation3_spill] sm:$0xff] %v2425_v39  ;;  %2783 = vst [vmem:[#allocation4_spill] sm:$0xff] %v2427_v34  ;;  %v1835_v37 = vpop.eup %1834  ;;  %v2434_v63 = vsel %vm647_vm14, %v663_v16, %v679_v28  ;;  %v681_v51 = vmul.f32 %v1831_v42, %v673_v29  ;;  %1844 = vrcp.f32 %v710_v35  ;;  %v672_v3 = vadd.f32 2.0, %v1833_v7 }
 0x12b   :  { %v1837_v52 = vpop.eup %1836  ;;  %v711_v43 = vadd.f32 %v703_v46, %v2434_v63  ;;  %v705_v62 = vsel %vm649_vm15, %v697_v47, 2.0  ;;  %v664_v13 = vadd.f32 1.0, %v656_v30  ;;  %v696_v21 = vmul.f32 %v1833_v7, %v656_v30 }
 0x12c   :  { %v2442_v12 = vsel %vm649_vm15, %v665_v49, %v681_v51  ;;  %v658_v16 = vmul.f32 2.0, %v1835_v37  ;;  %v680_v42 = vmul.f32 %v1833_v7, %v672_v3  ;;  %v674_v23 = vadd.f32 2.0, %v1835_v37 }
 0x12d   :  { %1846 = vrcp.f32 %v711_v43  ;;  %v980_v28 = vsub.f32 0.0, %v972_v20  ;;  %v704_v35 = vsel %vm648_vm0, %v696_v21, 2.0  ;;  %v1010_v34 = vmul.f32 2.0, %v1837_v52 }
 0x12e   :  { %v1839_v29 = vpop.eup %1838  ;;  %v666_v46 = vadd.f32 1.0, %v658_v16  ;;  %v698_v47 = vmul.f32 %v1835_v37, %v658_v16  ;;  %v713_v51 = vadd.f32 %v705_v62, %v2442_v12  ;;  %v688_v30 = vsel %vm648_vm0, %v664_v13, %v680_v42 }
 0x12f   :  { %v1841_v39 = vpop.eup %1840  ;;  %v723_v49 = vmul.f32 %v1839_v29, %v2384_v45  ;;  %v682_v7 = vmul.f32 %v1835_v37, %v674_v23  ;;  %v712_v3 = vadd.f32 %v704_v35, %v688_v30  ;;  %v1018_v17 = vadd.f32 1.0, %v1010_v34 }
 0x130   :  { %v725_v43 = vmul.f32 %v1841_v39, %v2392_v24  ;;  %v706_v20 = vsel %vm650_vm1, %v698_v47, 2.0  ;;  %v1026_v45 = vadd.f32 2.0, %v1837_v52  ;;  %v1050_v29 = vmul.f32 %v1837_v52, %v1010_v34 }
 0x131   :  { %v731_v21 = vmul.f32 %v723_v49, %v2246_v18  ;;  %v2458_v16 = vsel %vm650_vm1, %v666_v46, %v682_v7  ;;  %1848 = vrcp.f32 %v712_v3  ;;  %v990_v13 = vmul.f32 1.442695, %v980_v28 }
 0x132   :  { %v733_v62 = vmul.f32 %v725_v43, %v2248_v19  ;;  %v714_v37 = vadd.f32 %v706_v20, %v2458_v16  ;;  %1850 = vrcp.f32 %v713_v51  ;;  %v1034_v39 = vmul.f32 %v1837_v52, %v1026_v45 }
 0x133   :  { %v739_v24 = vmul.f32 %v731_v21, %v2346_v36  ;;  %v1058_v42 = vsel %vm1002_vm2, %v1050_v29, 2.0  ;;  %v1843_v18 = vpop.eup %1842  ;;  %v2467_v23 = vadd.f32 %v2368_v58, %v2380_v14  ;;  %v971_v19 = vand.u32 2147483647, %v2327_v2 }
 0x134   :  { %1852 = vrcp.f32 %v714_v37  ;;  %v741_v34 = vmul.f32 %v733_v62, %v2346_v36  ;;  %v1845_v35 = vpop.eup %1844  ;;  %v724_v28 = vmul.f32 %v1843_v18, %v2411_v8  ;;  %v2477_v52 = vsel %vm1002_vm2, %v1018_v17, %v1034_v39  ;;  %v2512_v62 = vpop.permute.xlu0 %375 }
 0x135   :  { %v2473_v46 = vadd.f32 %v739_v24, %v2368_v58  ;;  %1854 = vpow2.f32 %v990_v13  ;;  %v726_v47 = vmul.f32 %v1845_v35, %v2415_v9  ;;  %v1066_v14 = vadd.f32 %v1058_v42, %v2477_v52 }
 0x136   :  { %v2482_v49 = vadd.f32 %v741_v34, %v2368_v58  ;;  %v379_v51 = vmul.f32 %v2346_v36, %v2354_v27  ;;  %v2488_v8 = vmul.f32 %v2357_v50, %v2228_v48  ;;  %v732_v43 = vmul.f32 %v724_v28, %v2250_v25 }
 0x137   :  { %v1847_v7 = vpop.eup %1846  ;;  %v755_v17 = vmax.f32 %v2372_v5, %v2473_v46  ;;  %v979_v3 = vsub.f32 0.0, %v971_v19  ;;  %v734_v9 = vmul.f32 %v726_v47, %v2252_v26  ;;  %1856 = vrcp.f32 %v1066_v14 }
 0x138   :  { %v757_v20 = vmax.f32 %v2467_v23, %v2482_v49  ;;  %v381_v27 = vmul.f32 %v2346_v36, %v2360_v54  ;;  %v2500_v21 = vmul.f32 %v2363_v55, %v2232_v53  ;;  %v740_v48 = vmul.f32 %v732_v43, %v2346_v36 }
 0x139   :  { %v988_v25 = vmul.f32 1.442695, %v979_v3  ;;  %v973_v50 = vand.u32 2147483647, %v2329_v6  ;;  %v365_v45 = vmul.f32 %v2366_v56, %v2235_v57  ;;  %v367_v26 = vmul.f32 %v2375_v44, %v2238_v60 }
 0x13a   :  { %v2509_v29 = vadd.f32 %v2368_v58, %v379_v51  ;;  %v742_v54 = vmul.f32 %v734_v9, %v2346_v36  ;;  %v2515_v53 = vadd.f32 %v740_v48, %v2368_v58  ;;  %v974_v37 = vand.u32 2147483647, %v2331_v1 }
 0x13b   :  { %1858 = vpow2.f32 %v988_v25  ;;  %v981_v55 = vsub.f32 0.0, %v973_v50  ;;  %v1849_v13 = vpop.eup %1848  ;;  %v2520_v57 = vadd.f32 %v2368_v58, %v381_v27  ;;  %v976_v56 = vand.u32 2147483647, %v2334_v10 }
 0x13c   :  { %v2523_v60 = vadd.f32 %v742_v54, %v2368_v58  ;;  %v1851_v44 = vpop.eup %1850  ;;  %v728_v24 = vmul.f32 %v1849_v13, %v688_v30  ;;  %v756_v39 = vmax.f32 %v2509_v29, %v2515_v53  ;;  %v982_v18 = vsub.f32 0.0, %v974_v37 }
 0x13d   :  { %v992_v42 = vmul.f32 1.442695, %v981_v55  ;;  %v2529_v19 = vmul.f32 %v1847_v7, %v2434_v63  ;;  %v984_v28 = vsub.f32 0.0, %v976_v56  ;;  %v383_v47 = vmul.f32 %v2512_v62, %v365_v45  ;;  %v2539_v7 = vpop.permute.xlu1 %393 }
 0x13e   :  { %v1853_v34 = vpop.eup %1852  ;;  %v758_v35 = vmax.f32 %v2520_v57, %v2523_v60  ;;  %v736_v51 = vmul.f32 %v728_v24, %v2272_v38  ;;  %v994_v43 = vmul.f32 1.442695, %v982_v18  ;;  %v2537_v3 = vmul.f32 %v1851_v44, %v2442_v12 }
 0x13f   :  { %v1855_v14 = vpop.eup %1854  ;;  %v730_v30 = vmul.f32 %v1853_v34, %v2458_v16  ;;  %1860 = vpow2.f32 %v992_v42  ;;  %v998_v63 = vmul.f32 1.442695, %v984_v28  ;;  %vm1003_vm4 = vcmp.ge.f32.partialorder %v2327_v2, 0.0 }
 0x140   :  { %v1012_v9 = vmul.f32 2.0, %v1855_v14  ;;  %v1028_v27 = vadd.f32 2.0, %v1855_v14  ;;  %1862 = vpow2.f32 %v994_v43  ;;  %v744_v25 = vmul.f32 %v736_v51, %v2512_v62 }
 0x141   :  { %v738_v48 = vmul.f32 %v730_v30, %v2274_v41  ;;  %v975_v38 = vand.u32 2147483647, %v2336_v11  ;;  %v1857_v16 = vpop.eup %1856  ;;  %1864 = vpow2.f32 %v998_v63  ;;  %v2547_v55 = vadd.f32 %v2539_v7, %v383_v47 }
 0x142   :  { %v1020_v50 = vadd.f32 1.0, %v1012_v9  ;;  %v1036_v45 = vmul.f32 %v1855_v14, %v1028_v27  ;;  %v1052_v54 = vmul.f32 %v1855_v14, %v1012_v9  ;;  %v1082_v12 = vmul.f32 %v1857_v16, %v2477_v52 }
 0x143   :  { %v2550_v37 = vadd.f32 %v744_v25, %v2539_v7  ;;  %v983_v41 = vsub.f32 0.0, %v975_v38  ;;  %v385_v44 = vmul.f32 %v2512_v62, %v367_v26  ;;  %v746_v24 = vmul.f32 %v738_v48, %v2512_v62 }
 0x144   :  { %v2554_v13 = vsel %vm1004_vm3, %v1020_v50, %v1036_v45  ;;  %v1060_v56 = vsel %vm1004_vm3, %v1052_v54, 2.0  ;;  %v1090_v52 = vmul.f32 %v1082_v12, %v2322_v61  ;;  %vm1005_vm5 = vcmp.ge.f32.partialorder %v2329_v6, 0.0 }
 0x145   :  { %v1859_v42 = vpop.eup %1858  ;;  %v1068_v18 = vadd.f32 %v1060_v56, %v2554_v13  ;;  %v760_v34 = vmax.f32 %v2547_v55, %v2550_v37  ;;  %v996_v28 = vmul.f32 1.442695, %v983_v41  ;;  %v2566_v51 = vadd.f32 %v746_v24, %v2539_v7  ;;  %v2784_v37 = vld [vmem:[#allocation2_spill] sm:$0xff] }
 0x146   :  { %v1011_v47 = vmul.f32 2.0, %v1859_v42  ;;  %v1027_v14 = vadd.f32 2.0, %v1859_v42  ;;  %v1098_v26 = vmul.f32 %v1090_v52, %v2346_v36  ;;  %vm1006_vm6 = vcmp.ge.f32.partialorder %v2331_v1, 0.0 }
 0x147   :  { %1866 = vrcp.f32 %v1068_v18  ;;  %v2571_v61 = vadd.f32 %v2539_v7, %v385_v44  ;;  %v977_v30 = vand.u32 2147483647, %v2341_v22  ;;  %vm1008_vm7 = vcmp.ge.f32.partialorder %v2334_v10, 0.0 }
 0x148   :  { %v1019_v43 = vadd.f32 1.0, %v1011_v47  ;;  %v1035_v9 = vmul.f32 %v1859_v42, %v1027_v14  ;;  %v1051_v27 = vmul.f32 %v1859_v42, %v1011_v47  ;;  %1868 = vpow2.f32 %v996_v28 }
 0x149   :  { %v1861_v63 = vpop.eup %1860  ;;  %v1106_v48 = vadd.f32 %v1098_v26, %v2368_v58  ;;  %v762_v25 = vmax.f32 %v2571_v61, %v2566_v51  ;;  %v985_v38 = vsub.f32 0.0, %v977_v30  ;;  %v1329_v16 = vand.u32 2147483647, %v2399_v40 }
 0x14a   :  { %v1043_v50 = vsel %vm1003_vm4, %v1019_v43, %v1035_v9  ;;  %v1059_v45 = vsel %vm1003_vm4, %v1051_v27, 2.0  ;;  %v1013_v54 = vmul.f32 2.0, %v1861_v63  ;;  %v1029_v12 = vadd.f32 2.0, %v1861_v63  ;;  %v1863_v41 = vpop.eup %1862 }
 0x14b   :  { %v2586_v56 = vmax.f32 %v755_v17, %v1106_v48  ;;  %v1067_v44 = vadd.f32 %v1059_v45, %v1043_v50  ;;  %v1000_v24 = vmul.f32 1.442695, %v985_v38  ;;  %v1337_v42 = vsub.f32 0.0, %v1329_v16  ;;  %v1865_v52 = vpop.eup %1864 }
 0x14c   :  { %v1021_v18 = vadd.f32 1.0, %v1013_v54  ;;  %v1037_v28 = vmul.f32 %v1861_v63, %v1029_v12  ;;  %v1053_v47 = vmul.f32 %v1861_v63, %v1013_v54  ;;  %v1014_v14 = vmul.f32 2.0, %v1863_v41 }
 0x14d   :  { %1870 = vrcp.f32 %v1067_v44  ;;  %v1030_v26 = vadd.f32 2.0, %v1863_v41  ;;  %v1016_v30 = vmul.f32 2.0, %v1865_v52  ;;  %v1032_v43 = vadd.f32 2.0, %v1865_v52 }
 0x14e   :  { %v2590_v9 = vsel %vm1005_vm5, %v1021_v18, %v1037_v28  ;;  %v1061_v5 = vsel %vm1005_vm5, %v1053_v47, 2.0  ;;  %v1022_v46 = vadd.f32 1.0, %v1014_v14  ;;  %v1054_v17 = vmul.f32 %v1863_v41, %v1014_v14 }
 0x14f   :  { %v1069_v27 = vadd.f32 %v1061_v5, %v2590_v9  ;;  %v1038_v48 = vmul.f32 %v1863_v41, %v1030_v26  ;;  %v1024_v38 = vadd.f32 1.0, %v1016_v30  ;;  %v1040_v16 = vmul.f32 %v1865_v52, %v1032_v43 }
 0x150   :  { %v1062_v63 = vsel %vm1006_vm6, %v1054_v17, 2.0  ;;  %v1056_v45 = vmul.f32 %v1865_v52, %v1016_v30  ;;  %1872 = vpow2.f32 %v1000_v24  ;;  %v1345_v54 = vmul.f32 1.442695, %v1337_v42 }
 0x151   :  { %v1867_v12 = vpop.eup %1866  ;;  %v735_v44 = vmul.f32 %v2529_v19, %v2260_v32  ;;  %1874 = vrcp.f32 %v1069_v27  ;;  %v1046_v18 = vsel %vm1006_vm6, %v1022_v46, %v1038_v48  ;;  %v2603_v28 = vsel %vm1008_vm7, %v1024_v38, %v1040_v16 }
 0x152   :  { %v1869_v41 = vpop.eup %1868  ;;  %v1084_v47 = vmul.f32 %v1867_v12, %v2554_v13  ;;  %v1070_v14 = vadd.f32 %v1062_v63, %v1046_v18  ;;  %v1064_v24 = vsel %vm1008_vm7, %v1056_v45, 2.0  ;;  %1876 = vpow2.f32 %v1345_v54 }
 0x153   :  { %v1072_v42 = vadd.f32 %v1064_v24, %v2603_v28  ;;  %v1015_v52 = vmul.f32 2.0, %v1869_v41  ;;  %v1031_v32 = vadd.f32 2.0, %v1869_v41  ;;  %v1331_v19 = vand.u32 2147483647, %v2401_v59 }
 0x154   :  { %v2612_v26 = vmul.f32 %v2537_v3, %v2262_v33  ;;  %v1092_v30 = vmul.f32 %v1084_v47, %v2325_v0  ;;  %1878 = vrcp.f32 %v1070_v14  ;;  %v1330_v13 = vand.u32 2147483647, %v2405_v31 }
 0x155   :  { %1880 = vrcp.f32 %v1072_v42  ;;  %v1023_v43 = vadd.f32 1.0, %v1015_v52  ;;  %v1039_v5 = vmul.f32 %v1869_v41, %v1031_v32  ;;  %v1055_v46 = vmul.f32 %v1869_v41, %v1015_v52 }
 0x156   :  { %v1100_v17 = vmul.f32 %v1092_v30, %v2346_v36  ;;  %vm1007_vm8 = vcmp.ge.f32.partialorder %v2336_v11, 0.0  ;;  %v1339_v27 = vsub.f32 0.0, %v1331_v19  ;;  %v1338_v48 = vsub.f32 0.0, %v1330_v13 }
 0x157   :  { %v1871_v38 = vpop.eup %1870  ;;  %v2618_v16 = vsel %vm1007_vm8, %v1023_v43, %v1039_v5  ;;  %v1063_v33 = vsel %vm1007_vm8, %v1055_v46, 2.0  ;;  %vm1009_vm9 = vcmp.ge.f32.partialorder %v2341_v22, 0.0  ;;  %v1332_v0 = vand.u32 2147483647, %v2407_v4 }
 0x158   :  { %v1108_v3 = vadd.f32 %v1100_v17, %v2368_v58  ;;  %v1083_v63 = vmul.f32 %v1871_v38, %v1043_v50  ;;  %v1071_v45 = vadd.f32 %v1063_v33, %v2618_v16  ;;  %v1349_v54 = vmul.f32 1.442695, %v1339_v27 }
 0x159   :  { %v1347_v12 = vmul.f32 1.442695, %v1338_v48  ;;  %v1340_v41 = vsub.f32 0.0, %v1332_v0  ;;  %v382_v47 = vmul.f32 %v2512_v62, %v2488_v8  ;;  %v743_v14 = vmul.f32 %v735_v44, %v2512_v62 }
 0x15a   :  { %v1873_v24 = vpop.eup %1872  ;;  %v2630_v42 = vmax.f32 %v757_v20, %v1108_v3  ;;  %v1091_v52 = vmul.f32 %v1083_v63, %v2327_v2  ;;  %1882 = vrcp.f32 %v1071_v45  ;;  %vm1361_vm10 = vcmp.ge.f32.partialorder %v2399_v40, 0.0 }
 0x15b   :  { %v1333_v50 = vand.u32 2147483647, %v2418_v15  ;;  %v1875_v32 = vpop.eup %1874  ;;  %v1017_v19 = vmul.f32 2.0, %v1873_v24  ;;  %v1033_v30 = vadd.f32 2.0, %v1873_v24  ;;  %1884 = vpow2.f32 %v1349_v54 }
 0x15c   :  { %v1351_v8 = vmul.f32 1.442695, %v1340_v41  ;;  %v1877_v13 = vpop.eup %1876  ;;  %v1099_v44 = vmul.f32 %v1091_v52, %v2346_v36  ;;  %v1085_v43 = vmul.f32 %v1875_v32, %v2590_v9  ;;  %1886 = vpow2.f32 %v1347_v12 }
 0x15d   :  { %v400_v23 = vadd.f32 %v2539_v7, %v382_v47  ;;  %v1025_v49 = vadd.f32 1.0, %v1017_v19  ;;  %v1041_v2 = vmul.f32 %v1873_v24, %v1033_v30  ;;  %v1057_v20 = vmul.f32 %v1873_v24, %v1017_v19 }
 0x15e   :  { %v1369_v5 = vmul.f32 2.0, %v1877_v13  ;;  %v1879_v46 = vpop.eup %1878  ;;  %v1107_v17 = vadd.f32 %v1099_v44, %v2368_v58  ;;  %v1093_v27 = vmul.f32 %v1085_v43, %v2329_v6  ;;  %v1385_v48 = vadd.f32 2.0, %v1877_v13 }
 0x15f   :  { %1888 = vpow2.f32 %v1351_v8  ;;  %v1881_v38 = vpop.eup %1880  ;;  %v1086_v33 = vmul.f32 %v1879_v46, %v1046_v18  ;;  %v2642_v0 = vsel %vm1009_vm9, %v1025_v49, %v1041_v2  ;;  %v1065_v9 = vsel %vm1009_vm9, %v1057_v20, 2.0 }
 0x160   :  { %v1377_v3 = vadd.f32 1.0, %v1369_v5  ;;  %v2649_v63 = vmax.f32 %v756_v39, %v1107_v17  ;;  %v1101_v45 = vmul.f32 %v1093_v27, %v2346_v36  ;;  %v1088_v6 = vmul.f32 %v1881_v38, %v2603_v28 }
 0x161   :  { %v1073_v54 = vadd.f32 %v1065_v9, %v2642_v0  ;;  %v1094_v18 = vmul.f32 %v1086_v33, %v2331_v1  ;;  %v1393_v12 = vmul.f32 %v1877_v13, %v1385_v48  ;;  %v1409_v41 = vmul.f32 %v1877_v13, %v1369_v5 }
 0x162   :  { %vm1363_vm11 = vcmp.ge.f32.partialorder %v2401_v59, 0.0  ;;  %v751_v47 = vadd.f32 %v743_v14, %v2539_v7  ;;  %v1109_v24 = vadd.f32 %v1101_v45, %v2368_v58  ;;  %v1096_v29 = vmul.f32 %v1088_v6, %v2334_v10 }
 0x163   :  { %1890 = vrcp.f32 %v1073_v54  ;;  %v1341_v53 = vsub.f32 0.0, %v1333_v50  ;;  %v1102_v39 = vmul.f32 %v1094_v18, %v2512_v62  ;;  %v1401_v28 = vsel %vm1361_vm10, %v1377_v3, %v1393_v12 }
 0x164   :  { %v1417_v1 = vsel %vm1361_vm10, %v1409_v41, 2.0  ;;  %v759_v52 = vmax.f32 %v400_v23, %v751_v47  ;;  %v1883_v32 = vpop.eup %1882  ;;  %v2667_v14 = vmax.f32 %v758_v35, %v1109_v24  ;;  %vm1362_vm12 = vcmp.ge.f32.partialorder %v2405_v31, 0.0 }
 0x165   :  { %v1425_v19 = vadd.f32 %v1417_v1, %v1401_v28  ;;  %v1353_v10 = vmul.f32 1.442695, %v1341_v53  ;;  %v1885_v50 = vpop.eup %1884  ;;  %v1104_v30 = vmul.f32 %v1096_v29, %v2512_v62  ;;  %v1087_v8 = vmul.f32 %v1883_v32, %v2618_v16 }
 0x166   :  { %vm1364_vm13 = vcmp.ge.f32.partialorder %v2407_v4, 0.0  ;;  %v1110_v13 = vadd.f32 %v1102_v39, %v2539_v7  ;;  %v384_v44 = vmul.f32 %v2512_v62, %v2500_v21  ;;  %v1887_v43 = vpop.eup %1886  ;;  %v1371_v57 = vmul.f32 2.0, %v1885_v50 }
 0x167   :  { %1892 = vrcp.f32 %v1425_v19  ;;  %v1387_v60 = vadd.f32 2.0, %v1885_v50  ;;  %v745_v35 = vmul.f32 %v2612_v26, %v2512_v62  ;;  %v1095_v23 = vmul.f32 %v1087_v8, %v2336_v11  ;;  %v2785_v8 = vld [vmem:[#allocation3_spill] sm:$0xff] }
 0x168   :  { %v1370_v49 = vmul.f32 2.0, %v1887_v43  ;;  %v1386_v2 = vadd.f32 2.0, %v1887_v43  ;;  %v2679_v20 = vmax.f32 %v759_v52, %v1110_v13  ;;  %v1379_v5 = vadd.f32 1.0, %v1371_v57 }
 0x169   :  { %v1889_v16 = vpop.eup %1888  ;;  %v1395_v46 = vmul.f32 %v1885_v50, %v1387_v60  ;;  %v1411_v17 = vmul.f32 %v1885_v50, %v1371_v57  ;;  %1894 = vpow2.f32 %v1353_v10  ;;  %v1103_v21 = vmul.f32 %v1095_v23, %v2512_v62 }
 0x16a   :  { %v1378_v27 = vadd.f32 1.0, %v1370_v49  ;;  %v1394_v48 = vmul.f32 %v1887_v43, %v1386_v2  ;;  %v1410_v38 = vmul.f32 %v1887_v43, %v1370_v49  ;;  %v1372_v26 = vmul.f32 2.0, %v1889_v16  ;;  %v2786_v49 = vld [vmem:[#allocation4_spill] sm:$0xff] }
 0x16b   :  { %v1403_v33 = vsel %vm1363_vm11, %v1379_v5, %v1395_v46  ;;  %v1419_v11 = vsel %vm1363_vm11, %v1411_v17, 2.0  ;;  %v1388_v9 = vadd.f32 2.0, %v1889_v16  ;;  %v1111_v3 = vadd.f32 %v1103_v21, %v2539_v7 }
 0x16c   :  { %v1427_v45 = vadd.f32 %v1419_v11, %v1403_v33  ;;  %v1402_v6 = vsel %vm1362_vm12, %v1378_v27, %v1394_v48  ;;  %v1418_v54 = vsel %vm1362_vm12, %v1410_v38, 2.0  ;;  %v1380_v41 = vadd.f32 1.0, %v1372_v26 }
 0x16d   :  { %v1891_v18 = vpop.eup %1890  ;;  %v1426_v12 = vadd.f32 %v1418_v54, %v1402_v6  ;;  %v1396_v47 = vmul.f32 %v1889_v16, %v1388_v9  ;;  %v1412_v24 = vmul.f32 %v1889_v16, %v1372_v26  ;;  %v2694_v29 = vmax.f32 %v760_v34, %v1111_v3 }
 0x16e   :  { %v1089_v53 = vmul.f32 %v1891_v18, %v2642_v0  ;;  %1896 = vrcp.f32 %v1427_v45  ;;  %v402_v39 = vadd.f32 %v2539_v7, %v384_v44  ;;  %v753_v32 = vadd.f32 %v745_v35, %v2539_v7 }
 0x16f   :  { %1898 = vrcp.f32 %v1426_v12  ;;  %v1404_v1 = vsel %vm1364_vm13, %v1380_v41, %v1396_v47  ;;  %v1420_v52 = vsel %vm1364_vm13, %v1412_v24, 2.0  ;;  %v1112_v55 = vadd.f32 %v1104_v30, %v2539_v7 }
 0x170   :  { %v1097_v19 = vmul.f32 %v1089_v53, %v2341_v22  ;;  %v1428_v10 = vadd.f32 %v1420_v52, %v1404_v1  ;;  %v1335_v34 = vand.u32 2147483647, %v2784_v37  ;;  %v761_v50 = vmax.f32 %v402_v39, %v753_v32 }
 0x171   :  { %v1893_v0 = vpop.eup %1892  ;;  %v1334_v13 = vand.u32 2147483647, %v2785_v8  ;;  %v1336_v22 = vand.u32 2147483647, %v2786_v49  ;;  %vm1365_vm14 = vcmp.ge.f32.partialorder %v2418_v15, 0.0  ;;  %vm1367_vm15 = vcmp.ge.f32.partialorder %v2784_v37, 0.0 }
 0x172   :  { %v1105_v44 = vmul.f32 %v1097_v19, %v2512_v62  ;;  %v1441_v43 = vmul.f32 %v1893_v0, %v1401_v28  ;;  %1900 = vrcp.f32 %v1428_v10  ;;  %v1343_v57 = vsub.f32 0.0, %v1335_v34 }
 0x173   :  { %v1895_v60 = vpop.eup %1894  ;;  %v2708_v23 = vmax.f32 %v761_v50, %v1112_v55  ;;  %v1342_v35 = vsub.f32 0.0, %v1334_v13  ;;  %v1344_v21 = vsub.f32 0.0, %v1336_v22  ;;  %vm1366_vm0 = vcmp.ge.f32.partialorder %v2785_v8, 0.0 }
 0x174   :  { %v1113_v2 = vadd.f32 %v1105_v44, %v2539_v7  ;;  %v1449_v30 = vmul.f32 %v1441_v43, %v2399_v40  ;;  %v1373_v16 = vmul.f32 2.0, %v1895_v60  ;;  %v1389_v5 = vadd.f32 2.0, %v1895_v60 }
 0x175   :  { %v1357_v46 = vmul.f32 1.442695, %v1343_v57  ;;  %v1355_v17 = vmul.f32 1.442695, %v1342_v35  ;;  %v1359_v26 = vmul.f32 1.442695, %v1344_v21 }
 0x176   :  { %v2716_v28 = vmax.f32 %v762_v25, %v1113_v2  ;;  %v1457_v27 = vmul.f32 %v1449_v30, %v2346_v36  ;;  %v1381_v48 = vadd.f32 1.0, %v1373_v16  ;;  %v1397_v38 = vmul.f32 %v1895_v60, %v1389_v5 }
 0x177   :  { %v1413_v11 = vmul.f32 %v1895_v60, %v1373_v16  ;;  %1902 = vpow2.f32 %v1357_v46  ;;  %vm1368_vm1 = vcmp.ge.f32.partialorder %v2786_v49, 0.0 }
 0x178   :  { %v1897_v40 = vpop.eup %1896  ;;  %v1465_v9 = vadd.f32 %v1457_v27, %v2368_v58  ;;  %v1405_v3 = vsel %vm1365_vm14, %v1381_v48, %v1397_v38  ;;  %1904 = vpow2.f32 %v1355_v17 }
 0x179   :  { %v1899_v45 = vpop.eup %1898  ;;  %v1443_v54 = vmul.f32 %v1897_v40, %v1403_v33  ;;  %v1421_v18 = vsel %vm1365_vm14, %v1413_v11, 2.0  ;;  %1906 = vpow2.f32 %v1359_v26 }
 0x17a   :  { %v1473_v51 = vmax.f32 %v2586_v56, %v1465_v9  ;;  %v1442_v61 = vmul.f32 %v1899_v45, %v1402_v6  ;;  %v1429_v25 = vadd.f32 %v1421_v18, %v1405_v3 }
 0x17b   :  { %v1451_v12 = vmul.f32 %v1443_v54, %v2401_v59 }
 0x17c   :  { %v1901_v41 = vpop.eup %1900  ;;  %v1450_v47 = vmul.f32 %v1442_v61, %v2405_v31  ;;  %1908 = vrcp.f32 %v1429_v25 }
 0x17d   :  { %v1459_v24 = vmul.f32 %v1451_v12, %v2346_v36  ;;  %v1444_v53 = vmul.f32 %v1901_v41, %v1404_v1 }
 0x17e   :  { %v1458_v39 = vmul.f32 %v1450_v47, %v2346_v36 }
 0x17f   :  { %v1467_v52 = vadd.f32 %v1459_v24, %v2368_v58  ;;  %v1452_v33 = vmul.f32 %v1444_v53, %v2407_v4 }
 0x180   :  { %v1466_v32 = vadd.f32 %v1458_v39, %v2368_v58 }
 0x181   :  { %v1903_v56 = vpop.eup %1902  ;;  %v1475_v6 = vmax.f32 %v2630_v42, %v1467_v52  ;;  %v1460_v59 = vmul.f32 %v1452_v33, %v2346_v36 }
 0x182   :  { %v1905_v19 = vpop.eup %1904  ;;  %v1474_v31 = vmax.f32 %v2649_v63, %v1466_v32  ;;  %v1375_v10 = vmul.f32 2.0, %v1903_v56  ;;  %v1391_v1 = vadd.f32 2.0, %v1903_v56 }
 0x183   :  { %v1907_v55 = vpop.eup %1906  ;;  %v1468_v34 = vadd.f32 %v1460_v59, %v2368_v58  ;;  %v1374_v4 = vmul.f32 2.0, %v1905_v19  ;;  %v1390_v0 = vadd.f32 2.0, %v1905_v19 }
 0x184   :  { %v1668_v50 = vpack.c.bf16 %v1474_v31, %v1473_v51  ;;  %v1383_v13 = vadd.f32 1.0, %v1375_v10  ;;  %v1399_v44 = vmul.f32 %v1903_v56, %v1391_v1  ;;  %v1415_v42 = vmul.f32 %v1903_v56, %v1375_v10 }
 0x185   :  { %v1476_v36 = vmax.f32 %v2667_v14, %v1468_v34  ;;  %v1382_v43 = vadd.f32 1.0, %v1374_v4  ;;  %v1398_v57 = vmul.f32 %v1905_v19, %v1390_v0  ;;  %v1414_v63 = vmul.f32 %v1905_v19, %v1374_v4 }
 0x186   :  { %v1909_v60 = vpop.eup %1908  ;;  %1505 = vst [vmem:[%s2777_s4] sm:$0xff] %v1668_v50  ;;  %v1407_v58 = vsel %vm1367_vm15, %v1383_v13, %v1399_v44  ;;  %v1423_v35 = vsel %vm1367_vm15, %v1415_v42, 2.0  ;;  %v1376_v22 = vmul.f32 2.0, %v1907_v55  ;;  %v1392_v2 = vadd.f32 2.0, %v1907_v55 }
 0x187   :  { %v1669_v30 = vpack.c.bf16 %v1476_v36, %v1475_v6  ;;  %v1445_v16 = vmul.f32 %v1909_v60, %v1405_v3  ;;  %v1431_v5 = vadd.f32 %v1423_v35, %v1407_v58  ;;  %v1406_v14 = vsel %vm1366_vm0, %v1382_v43, %v1398_v57 }
 0x188   :  { %v1422_v46 = vsel %vm1366_vm0, %v1414_v63, 2.0  ;;  %v1384_v17 = vadd.f32 1.0, %v1376_v22  ;;  %v1400_v21 = vmul.f32 %v1907_v55, %v1392_v2  ;;  %v1416_v27 = vmul.f32 %v1907_v55, %v1376_v22 }
 0x189   :  { %1506 = vst [vmem:[%s2777_s4 + $0x8] sm:$0xff] %v1669_v30  ;;  %v1453_v48 = vmul.f32 %v1445_v16, %v2418_v15  ;;  %1910 = vrcp.f32 %v1431_v5  ;;  %v1430_v38 = vadd.f32 %v1422_v46, %v1406_v14 }
 0x18a   :  { %v1408_v11 = vsel %vm1368_vm1, %v1384_v17, %v1400_v21  ;;  %v1424_v26 = vsel %vm1368_vm1, %v1416_v27, 2.0 }
 0x18b   :  { %v1461_v40 = vmul.f32 %v1453_v48, %v2512_v62  ;;  %1912 = vrcp.f32 %v1430_v38  ;;  %v1432_v9 = vadd.f32 %v1424_v26, %v1408_v11 }
 0x18d   :  { %v1469_v3 = vadd.f32 %v1461_v40, %v2539_v7  ;;  %1914 = vrcp.f32 %v1432_v9 }
 0x18f   :  { %v1477_v45 = vmax.f32 %v2679_v20, %v1469_v3 }
 0x193   :  { %v1911_v54 = vpop.eup %1910 }
 0x194   :  { %v1447_v18 = vmul.f32 %v1911_v54, %v1407_v58 }
 0x195   :  { %v1913_v51 = vpop.eup %1912 }
 0x196   :  { %v1455_v15 = vmul.f32 %v1447_v18, %v2784_v37  ;;  %v1446_v61 = vmul.f32 %v1913_v51, %v1406_v14 }
 0x197   :  { %v1915_v25 = vpop.eup %1914 }
 0x198   :  { %v1463_v12 = vmul.f32 %v1455_v15, %v2512_v62  ;;  %v1454_v41 = vmul.f32 %v1446_v61, %v2785_v8  ;;  %v1448_v47 = vmul.f32 %v1915_v25, %v1408_v11 }
 0x19a   :  { %v1471_v24 = vadd.f32 %v1463_v12, %v2539_v7  ;;  %v1462_v53 = vmul.f32 %v1454_v41, %v2512_v62  ;;  %v1456_v39 = vmul.f32 %v1448_v47, %v2786_v49 }
 0x19c   :  { %v1479_v20 = vmax.f32 %v2708_v23, %v1471_v24  ;;  %v1470_v52 = vadd.f32 %v1462_v53, %v2539_v7  ;;  %v1464_v33 = vmul.f32 %v1456_v39, %v2512_v62 }
 0x19e   :  { %v1478_v37 = vmax.f32 %v2694_v29, %v1470_v52  ;;  %v1472_v32 = vadd.f32 %v1464_v33, %v2539_v7 }
 0x1a0   :  { %v1670_v56 = vpack.c.bf16 %v1478_v37, %v1477_v45  ;;  %v1480_v8 = vmax.f32 %v2716_v28, %v1472_v32 }
 0x1a2   :  { %1507 = vst [vmem:[%s2777_s4 + $0x10] sm:$0xff] %v1670_v56  ;;  %v1671_v6 = vpack.c.bf16 %v1480_v8, %v1479_v20 }
 0x1a4   :  { %1508 = vst [vmem:[%s2777_s4 + $0x18] sm:$0xff] %v1671_v6 }

// kernel: forward.18
= control target key start
LH: loop header
LB: loop body
LE: loop exit
PB: predicated region body
PF: predicated region fallthrough
CT: control target
= control target key end

     0   :  { %v698_v1 = vmov 0   ;;  %vm248_vm0 = vcmask 130048   ;;  %s947_s1 = inlined_call_operand.vmem [shape: bf16[144,512], index: 1, kind: input, shape index: {}]   ;;  %s948_s0 = inlined_call_operand.vmem [shape: bf16[16,144], index: 0, kind: input, shape index: {}]   ;;  %s949_s2 = inlined_call_operand.vmem [shape: f32[16,1], index: 2, kind: input, shape index: {}]   ;;  %s950_s3 = inlined_call_operand.vmem [shape: f32[16,1], index: 3, kind: input, shape index: {}]   ;;  %s951_s4 = inlined_call_operand.vmem [shape: bf16[16,512], index: 4, kind: input, shape index: {}]   ;;  %s952_s5 = inlined_call_operand.vmem [shape: bf16[16,512], index: 5, kind: output, shape index: {}]  }
   0x1   :  { %v609_v0 = vld [vmem:[%s947_s1 + $0x4] ss:$16 sps:$4 sm:$0xff]   ;;  %607 = vset.pattern.permute.xlu0 %v698_v1  ;;  %608 = vset.pattern.permute.xlu1 %v698_v1  ;;  %v611_v2 = vld [vmem:[%s947_s1 + $0xc] ss:$16 sps:$4 sm:$0xff]   ;;  %v613_v3 = vld [vmem:[%s947_s1] ss:$16 sps:$4 sm:$0xff]  }
   0x2   :  { %252 = vmatprep.subr.bf16.mxu0 %v609_v0  ;;  %v614_v4 = vld [vmem:[%s947_s1 + $0x8] ss:$16 sps:$4 sm:$0xff]   ;;  %295 = vmatprep.subr.bf16.mxu1 %v611_v2  ;;  %v615_v5 = vld [vmem:[%s947_s1 + $0x24] ss:$16 sps:$4 sm:$0xff]   ;;  %v617_v6 = vld [vmem:[%s947_s1 + $0x2c] ss:$16 sps:$4 sm:$0xff]  }
   0x3   :  { %253 = vmatpush1.bf16.msra.mxu0 %v613_v3  ;;  %296 = vmatpush1.bf16.msra.mxu1 %v614_v4  ;;  %v619_v7 = vld [vmem:[%s947_s1 + $0x20] ss:$16 sps:$4 sm:$0xff]   ;;  %v620_v8 = vld [vmem:[%s947_s1 + $0x28] ss:$16 sps:$4 sm:$0xff]   ;;  %v621_v9 = vld [vmem:[%s947_s1 + $0x44] ss:$16 sps:$4 sm:$0xff]  }
   0x4   :  { %254 = vmatprep.subr.bf16.mxu0 %v615_v5  ;;  %297 = vmatprep.subr.bf16.mxu1 %v617_v6  ;;  %v623_v10 = vld [vmem:[%s947_s1 + $0x4c] ss:$16 sps:$4 sm:$0xff]   ;;  %v625_v11 = vld [vmem:[%s947_s1 + $0x40] ss:$16 sps:$4 sm:$0xff]   ;;  %v626_v12 = vld [vmem:[%s947_s1 + $0x48] ss:$16 sps:$4 sm:$0xff]  }
   0x5   :  { %v627_v13 = vld [vmem:[%s947_s1 + $0x64] ss:$16 sps:$4 sm:$0xff]   ;;  %v629_v14 = vld [vmem:[%s947_s1 + $0x6c] ss:$16 sps:$4 sm:$0xff]   ;;  %v631_v15 = vld [vmem:[%s947_s1 + $0x60] ss:$16 sps:$4 sm:$0xff]  }
   0x6   :  { %v632_v16 = vld [vmem:[%s947_s1 + $0x68] ss:$16 sps:$4 sm:$0xff]   ;;  %v633_v17 = vld [vmem:[%s947_s1 + $0x84] ss:$16 sps:$4 sm:$0xff]   ;;  %v635_v18 = vld [vmem:[%s947_s1 + $0x8c] ss:$16 sps:$4 sm:$0xff]  }
   0x7   :  { %255 = vmatpush1.bf16.msra.mxu0 %v619_v7  ;;  %298 = vmatpush1.bf16.msra.mxu1 %v620_v8  ;;  %v637_v19 = vld [vmem:[%s947_s1 + $0x80] ss:$16 sps:$4 sm:$0xff]   ;;  %v638_v20 = vld [vmem:[%s947_s1 + $0x88] ss:$16 sps:$4 sm:$0xff]   ;;  %v639_v21 = vld [vmem:[%s947_s1 + $0xa4] ss:$16 sps:$4 sm:$0xff]  }
   0x8   :  { %256 = vmatprep.subr.bf16.mxu0 %v621_v9  ;;  %299 = vmatprep.subr.bf16.mxu1 %v623_v10  ;;  %v641_v22 = vld [vmem:[%s947_s1 + $0xac] ss:$16 sps:$4 sm:$0xff]   ;;  %v643_v23 = vld [vmem:[%s947_s1 + $0xa0] ss:$16 sps:$4 sm:$0xff]   ;;  %v644_v24 = vld [vmem:[%s947_s1 + $0xa8] ss:$16 sps:$4 sm:$0xff]  }
   0x9   :  { %v645_v25 = vld [vmem:[%s947_s1 + $0xc4] ss:$16 sps:$4 sm:$0xff]   ;;  %v647_v26 = vld [vmem:[%s947_s1 + $0xcc] ss:$16 sps:$4 sm:$0xff]   ;;  %v649_v27 = vld [vmem:[%s947_s1 + $0xc0] ss:$16 sps:$4 sm:$0xff]  }
   0xa   :  { %v650_v28 = vld [vmem:[%s947_s1 + $0xc8] ss:$16 sps:$4 sm:$0xff]   ;;  %v651_v29 = vld [vmem:[%s947_s1 + $0xe4] ss:$16 sps:$4 sm:$0xff]   ;;  %v653_v30 = vld [vmem:[%s947_s1 + $0xec] ss:$16 sps:$4 sm:$0xff]  }
   0xb   :  { %257 = vmatpush1.bf16.msra.mxu0 %v625_v11  ;;  %300 = vmatpush1.bf16.msra.mxu1 %v626_v12  ;;  %v665_v31 = vld [vmem:[%s948_s0 + $0x4] ss:$8 sps:$4 sm:$0xff]   ;;  %v655_v36 = vld [vmem:[%s947_s1 + $0xe0] ss:$16 sps:$4 sm:$0xff]   ;;  %v656_v37 = vld [vmem:[%s947_s1 + $0xe8] ss:$16 sps:$4 sm:$0xff]  }
   0xc   :  { %258 = vmatprep.subr.bf16.mxu0 %v627_v13  ;;  %301 = vmatprep.subr.bf16.mxu1 %v629_v14  ;;  %v338_v32 = vld [vmem:[%s949_s2] sm:$0xff]  ;;  %v339_v34 = vld [vmem:[%s949_s2 + $0x8] sm:$0xff] }
   0xd   :  { %v340_v33 = vld [vmem:[%s950_s3] sm:$0xff]  ;;  %472 = vperm.xlu0 %607, %v338_v32   ;;  %596 = vmatprep.mubr.msk.bf16.mxu0 %vm248_vm0, %v665_v31  ;;  %v341_v35 = vld [vmem:[%s950_s3 + $0x8] sm:$0xff] }
   0xe   :  { %490 = vperm.xlu1 %608, %v340_v33   ;;  %597 = vmatprep.mubr.msk.bf16.mxu1 %vm248_vm0, %v665_v31  ;;  %v657_v38 = vld [vmem:[%s947_s1 + $0x104] ss:$16 sps:$4 sm:$0xff]   ;;  %v659_v39 = vld [vmem:[%s947_s1 + $0x10c] ss:$16 sps:$4 sm:$0xff]   ;;  %v661_v40 = vld [vmem:[%s947_s1 + $0x100] ss:$16 sps:$4 sm:$0xff]  }
   0xf   :  { %259 = vmatpush1.bf16.msra.mxu0 %v631_v15  ;;  %302 = vmatpush1.bf16.msra.mxu1 %v632_v16  ;;  %v662_v41 = vld [vmem:[%s947_s1 + $0x108] ss:$16 sps:$4 sm:$0xff]  }
  0x10   :  { %260 = vmatprep.subr.bf16.mxu0 %v633_v17  ;;  %303 = vmatprep.subr.bf16.mxu1 %v635_v18  ;;  %v663_v42 = vld [vmem:[%s948_s0] ss:$8 sps:$4 sm:$0xff]  }
  0x11   :  { %477 = vperm.xlu0 %607, %v339_v34  }
  0x12   :  { %495 = vperm.xlu1 %608, %v341_v35  }
  0x13   :  { %261 = vmatpush1.bf16.msra.mxu0 %v637_v19  ;;  %304 = vmatpush1.bf16.msra.mxu1 %v638_v20 }
  0x14   :  { %262 = vmatprep.subr.bf16.mxu0 %v639_v21  ;;  %305 = vmatprep.subr.bf16.mxu1 %v641_v22 }
  0x17   :  { %263 = vmatpush1.bf16.msra.mxu0 %v643_v23  ;;  %306 = vmatpush1.bf16.msra.mxu1 %v644_v24 }
  0x18   :  { %264 = vmatprep.subr.bf16.mxu0 %v645_v25  ;;  %307 = vmatprep.subr.bf16.mxu1 %v647_v26 }
  0x1b   :  { %265 = vmatpush1.bf16.msra.mxu0 %v649_v27  ;;  %308 = vmatpush1.bf16.msra.mxu1 %v650_v28 }
  0x1c   :  { %266 = vmatprep.subr.bf16.mxu0 %v651_v29  ;;  %309 = vmatprep.subr.bf16.mxu1 %v653_v30 }
  0x1f   :  { %267 = vmatpush1.bf16.msra.mxu0 %v655_v36  ;;  %310 = vmatpush1.bf16.msra.mxu1 %v656_v37 }
  0x20   :  { %268 = vmatprep.subr.bf16.mxu0 %v657_v38  ;;  %311 = vmatprep.subr.bf16.mxu1 %v659_v39 }
  0x23   :  { %269 = vmatpush1.bf16.msra.mxu0 %v661_v40  ;;  %312 = vmatpush1.bf16.msra.mxu1 %v662_v41 }
  0x26   :  { %285 = vmatmul.mubr.bf16.vlgmr.msra.gmra.mrb[0].mxu0 %v663_v42  ;;  %328 = vmatmul.mubr.bf16.vlgmr.msra.gmra.mrb[0].mxu1 %v663_v42 }
  0xf9   :  { %v855_v43 = vpop.f32.mrb[0].mxu0  ;;  %v857_v44 = vpop.f32.mrb[0].mxu1 }
  0xfa   :  { %v342_v45 = vand.u32 2147483647, %v855_v43  ;;  %v344_v46 = vand.u32 2147483647, %v857_v44  ;;  %v861_v47 = vpop.f32.mrb[1].mxu0  ;;  %v863_v48 = vpop.f32.mrb[1].mxu1 }
  0xfb   :  { %v343_v51 = vand.u32 2147483647, %v861_v47  ;;  %v866_v52 = vpop.f32.mrb[2].mxu0  ;;  %v345_v53 = vand.u32 2147483647, %v863_v48  ;;  %v870_v58 = vpop.f32.mrb[2].mxu1 }
  0xfc   :  { %v350_v49 = vsub.f32 0.0, %v342_v45  ;;  %v352_v50 = vsub.f32 0.0, %v344_v46  ;;  %v346_v54 = vand.u32 2147483647, %v866_v52  ;;  %v348_v61 = vand.u32 2147483647, %v870_v58 }
  0xfd   :  { %v351_v57 = vsub.f32 0.0, %v343_v51  ;;  %v353_v59 = vsub.f32 0.0, %v345_v53  ;;  %v873_v62 = vpop.f32.mrb[3].mxu0  ;;  %v876_v1 = vpop.f32.mrb[3].mxu1  ;;  %vm374_vm1 = vcmp.ge.f32.partialorder %v855_v43, 0.0  ;;  %vm376_vm2 = vcmp.ge.f32.partialorder %v857_v44, 0.0 }
  0xfe   :  { %v358_v55 = vmul.f32 1.442695, %v350_v49  ;;  %v362_v56 = vmul.f32 1.442695, %v352_v50  ;;  %v354_v60 = vsub.f32 0.0, %v346_v54  ;;  %v356_v4 = vsub.f32 0.0, %v348_v61 }
  0xff   :  { %v360_v63 = vmul.f32 1.442695, %v351_v57  ;;  %v347_v0 = vand.u32 2147483647, %v873_v62  ;;  %v364_v2 = vmul.f32 1.442695, %v353_v59 }
 0x100   :  { %666 = vpow2.f32 %v358_v55  ;;  %v366_v3 = vmul.f32 1.442695, %v354_v60  ;;  %v349_v6 = vand.u32 2147483647, %v876_v1  ;;  %v370_v7 = vmul.f32 1.442695, %v356_v4 }
 0x101   :  { %668 = vpow2.f32 %v362_v56  ;;  %v355_v5 = vsub.f32 0.0, %v347_v0  ;;  %vm375_vm3 = vcmp.ge.f32.partialorder %v861_v47, 0.0  ;;  %vm377_vm4 = vcmp.ge.f32.partialorder %v863_v48, 0.0 }
 0x102   :  { %670 = vpow2.f32 %v360_v63  ;;  %v357_v8 = vsub.f32 0.0, %v349_v6  ;;  %vm378_vm5 = vcmp.ge.f32.partialorder %v866_v52, 0.0  ;;  %vm380_vm6 = vcmp.ge.f32.partialorder %v870_v58, 0.0 }
 0x103   :  { %672 = vpow2.f32 %v364_v2  ;;  %v368_v9 = vmul.f32 1.442695, %v355_v5  ;;  %vm379_vm7 = vcmp.ge.f32.partialorder %v873_v62, 0.0  ;;  %vm381_vm8 = vcmp.ge.f32.partialorder %v876_v1, 0.0 }
 0x104   :  { %674 = vpow2.f32 %v366_v3  ;;  %v372_v10 = vmul.f32 1.442695, %v357_v8 }
 0x105   :  { %676 = vpow2.f32 %v370_v7 }
 0x106   :  { %678 = vpow2.f32 %v368_v9 }
 0x107   :  { %680 = vpow2.f32 %v372_v10 }
 0x10a   :  { %v667_v11 = vpop.eup %666 }
 0x10b   :  { %v669_v12 = vpop.eup %668  ;;  %v382_v13 = vmul.f32 2.0, %v667_v11  ;;  %v398_v14 = vadd.f32 2.0, %v667_v11 }
 0x10c   :  { %v671_v15 = vpop.eup %670  ;;  %v384_v16 = vmul.f32 2.0, %v669_v12  ;;  %v400_v17 = vadd.f32 2.0, %v669_v12 }
 0x10d   :  { %v390_v18 = vadd.f32 1.0, %v382_v13  ;;  %v406_v19 = vmul.f32 %v667_v11, %v398_v14  ;;  %v422_v20 = vmul.f32 %v667_v11, %v382_v13  ;;  %v383_v21 = vmul.f32 2.0, %v671_v15  ;;  %v673_v22 = vpop.eup %672 }
 0x10e   :  { %v392_v23 = vadd.f32 1.0, %v384_v16  ;;  %v408_v24 = vmul.f32 %v669_v12, %v400_v17  ;;  %v424_v25 = vmul.f32 %v669_v12, %v384_v16  ;;  %v399_v26 = vadd.f32 2.0, %v671_v15  ;;  %v675_v27 = vpop.eup %674 }
 0x10f   :  { %v414_v28 = vsel %vm374_vm1, %v390_v18, %v406_v19  ;;  %v430_v29 = vsel %vm374_vm1, %v422_v20, 2.0  ;;  %v391_v30 = vadd.f32 1.0, %v383_v21  ;;  %v423_v31 = vmul.f32 %v671_v15, %v383_v21  ;;  %v677_v40 = vpop.eup %676 }
 0x110   :  { %v438_v32 = vadd.f32 %v430_v29, %v414_v28  ;;  %v416_v33 = vsel %vm376_vm2, %v392_v23, %v408_v24  ;;  %v432_v34 = vsel %vm376_vm2, %v424_v25, 2.0  ;;  %v407_v35 = vmul.f32 %v671_v15, %v399_v26  ;;  %v679_v46 = vpop.eup %678 }
 0x111   :  { %v440_v36 = vadd.f32 %v432_v34, %v416_v33  ;;  %v431_v37 = vsel %vm375_vm3, %v423_v31, 2.0  ;;  %v385_v38 = vmul.f32 2.0, %v673_v22  ;;  %v401_v39 = vadd.f32 2.0, %v673_v22  ;;  %v681_v61 = vpop.eup %680 }
 0x112   :  { %682 = vrcp.f32 %v438_v32  ;;  %v415_v41 = vsel %vm375_vm3, %v391_v30, %v407_v35  ;;  %v386_v42 = vmul.f32 2.0, %v675_v27  ;;  %v402_v45 = vadd.f32 2.0, %v675_v27  ;;  %v506_v35 = vld [vmem:[%s951_s4] sm:$0xff] }
 0x113   :  { %684 = vrcp.f32 %v440_v36  ;;  %v439_v49 = vadd.f32 %v431_v37, %v415_v41  ;;  %v393_v50 = vadd.f32 1.0, %v385_v38  ;;  %v409_v51 = vmul.f32 %v673_v22, %v401_v39 }
 0x114   :  { %v425_v53 = vmul.f32 %v673_v22, %v385_v38  ;;  %v394_v54 = vadd.f32 1.0, %v386_v42  ;;  %v410_v55 = vmul.f32 %v675_v27, %v402_v45  ;;  %v426_v56 = vmul.f32 %v675_v27, %v386_v42  ;;  %v473_v38 = vpop.permute.xlu0 %472  ;;  %v491_v42 = vpop.permute.xlu1 %490 }
 0x115   :  { %686 = vrcp.f32 %v439_v49  ;;  %v417_v57 = vsel %vm377_vm4, %v393_v50, %v409_v51  ;;  %v388_v59 = vmul.f32 2.0, %v677_v40  ;;  %v404_v60 = vadd.f32 2.0, %v677_v40 }
 0x116   :  { %v433_v63 = vsel %vm377_vm4, %v425_v53, 2.0  ;;  %v418_v0 = vsel %vm378_vm5, %v394_v54, %v410_v55  ;;  %v434_v2 = vsel %vm378_vm5, %v426_v56, 2.0  ;;  %v387_v3 = vmul.f32 2.0, %v679_v46 }
 0x117   :  { %v441_v4 = vadd.f32 %v433_v63, %v417_v57  ;;  %v442_v5 = vadd.f32 %v434_v2, %v418_v0  ;;  %v396_v6 = vadd.f32 1.0, %v388_v59  ;;  %v412_v7 = vmul.f32 %v677_v40, %v404_v60 }
 0x118   :  { %v428_v8 = vmul.f32 %v677_v40, %v388_v59  ;;  %v395_v9 = vadd.f32 1.0, %v387_v3  ;;  %v403_v10 = vadd.f32 2.0, %v679_v46  ;;  %v427_v11 = vmul.f32 %v679_v46, %v387_v3 }
 0x119   :  { %688 = vrcp.f32 %v441_v4  ;;  %v420_v12 = vsel %vm380_vm6, %v396_v6, %v412_v7  ;;  %v389_v13 = vmul.f32 2.0, %v681_v61  ;;  %v405_v14 = vadd.f32 2.0, %v681_v61  ;;  %v478_v4 = vpop.permute.xlu0 %477 }
 0x11a   :  { %690 = vrcp.f32 %v442_v5  ;;  %v436_v15 = vsel %vm380_vm6, %v428_v8, 2.0  ;;  %v411_v16 = vmul.f32 %v679_v46, %v403_v10  ;;  %v435_v17 = vsel %vm379_vm7, %v427_v11, 2.0  ;;  %v496_v10 = vpop.permute.xlu1 %495 }
 0x11b   :  { %v444_v18 = vadd.f32 %v436_v15, %v420_v12  ;;  %v397_v19 = vadd.f32 1.0, %v389_v13  ;;  %v413_v20 = vmul.f32 %v681_v61, %v405_v14  ;;  %v429_v21 = vmul.f32 %v681_v61, %v389_v13 }
 0x11c   :  { %v683_v22 = vpop.eup %682  ;;  %v419_v23 = vsel %vm379_vm7, %v395_v9, %v411_v16  ;;  %v511_v53 = vunpack.c.h.bf16 %v506_v35 }
 0x11d   :  { %v685_v24 = vpop.eup %684  ;;  %v454_v25 = vmul.f32 %v683_v22, %v414_v28  ;;  %692 = vrcp.f32 %v444_v18  ;;  %v443_v26 = vadd.f32 %v435_v17, %v419_v23  ;;  %v421_v27 = vsel %vm381_vm8, %v397_v19, %v413_v20 }
 0x11e   :  { %v456_v29 = vmul.f32 %v685_v24, %v416_v33  ;;  %v437_v30 = vsel %vm381_vm8, %v429_v21, 2.0  ;;  %v507_v33 = vld [vmem:[%s951_s4 + $0x8] sm:$0xff] }
 0x11f   :  { %v687_v31 = vpop.eup %686  ;;  %v462_v32 = vmul.f32 %v454_v25, %v855_v43  ;;  %694 = vrcp.f32 %v443_v26  ;;  %v445_v34 = vadd.f32 %v437_v30, %v421_v27  ;;  %v510_v43 = vunpack.c.l.bf16 %v506_v35 }
 0x120   :  { %v464_v36 = vmul.f32 %v456_v29, %v857_v44  ;;  %v455_v37 = vmul.f32 %v687_v31, %v415_v41  ;;  %v512_v41 = vunpack.c.l.bf16 %v507_v33  ;;  %v513_v2 = vunpack.c.h.bf16 %v507_v33 }
 0x121   :  { %696 = vrcp.f32 %v445_v34  ;;  %v480_v28 = vmul.f32 %v473_v38, %v462_v32 }
 0x122   :  { %v463_v39 = vmul.f32 %v455_v37, %v861_v47  ;;  %v482_v40 = vmul.f32 %v473_v38, %v464_v36 }
 0x123   :  { %v689_v45 = vpop.eup %688  ;;  %v498_v46 = vadd.f32 %v491_v42, %v480_v28 }
 0x124   :  { %v691_v49 = vpop.eup %690  ;;  %v457_v50 = vmul.f32 %v689_v45, %v417_v57  ;;  %v481_v51 = vmul.f32 %v473_v38, %v463_v39  ;;  %v500_v54 = vadd.f32 %v491_v42, %v482_v40  ;;  %v508_v57 = vld [vmem:[%s951_s4 + $0x10] sm:$0xff] }
 0x125   :  { %v458_v44 = vmul.f32 %v691_v49, %v418_v0  ;;  %v518_v47 = vadd.f32 %v510_v43, %v498_v46  ;;  %v515_v17 = vunpack.c.h.bf16 %v508_v57 }
 0x126   :  { %v465_v55 = vmul.f32 %v457_v50, %v863_v48  ;;  %v499_v56 = vadd.f32 %v491_v42, %v481_v51  ;;  %v520_v0 = vadd.f32 %v512_v41, %v500_v54 }
 0x127   :  { %v693_v59 = vpop.eup %692  ;;  %v466_v60 = vmul.f32 %v458_v44, %v866_v52  ;;  %v509_v52 = vld [vmem:[%s951_s4 + $0x18] sm:$0xff] }
 0x128   :  { %v460_v61 = vmul.f32 %v693_v59, %v420_v12  ;;  %v483_v63 = vmul.f32 %v473_v38, %v465_v55  ;;  %v519_v3 = vadd.f32 %v511_v53, %v499_v56  ;;  %v514_v12 = vunpack.c.l.bf16 %v508_v57 }
 0x129   :  { %v695_v5 = vpop.eup %694  ;;  %v484_v6 = vmul.f32 %v478_v4, %v466_v60  ;;  %v516_v18 = vunpack.c.l.bf16 %v509_v52 }
 0x12a   :  { %v468_v7 = vmul.f32 %v460_v61, %v870_v58  ;;  %v459_v48 = vmul.f32 %v695_v5, %v419_v23  ;;  %v501_v8 = vadd.f32 %v491_v42, %v483_v63  ;;  %v602_v9 = vpack.c.bf16 %v519_v3, %v518_v47 }
 0x12b   :  { %v697_v11 = vpop.eup %696  ;;  %v502_v13 = vadd.f32 %v496_v10, %v484_v6 }
 0x12c   :  { %v467_v14 = vmul.f32 %v459_v48, %v873_v62  ;;  %v461_v15 = vmul.f32 %v697_v11, %v421_v27  ;;  %v521_v16 = vadd.f32 %v513_v2, %v501_v8  ;;  %550 = vst [vmem:[%s952_s5] sm:$0xff] %v602_v9  ;;  %v486_v58 = vmul.f32 %v478_v4, %v468_v7 }
 0x12d   :  { %v517_v62 = vunpack.c.h.bf16 %v509_v52  ;;  %v522_v25 = vadd.f32 %v514_v12, %v502_v13 }
 0x12e   :  { %v469_v19 = vmul.f32 %v461_v15, %v876_v1  ;;  %v603_v20 = vpack.c.bf16 %v521_v16, %v520_v0  ;;  %v485_v21 = vmul.f32 %v478_v4, %v467_v14  ;;  %v504_v22 = vadd.f32 %v496_v10, %v486_v58 }
 0x130   :  { %551 = vst [vmem:[%s952_s5 + $0x8] sm:$0xff] %v603_v20  ;;  %v487_v23 = vmul.f32 %v478_v4, %v469_v19  ;;  %v503_v24 = vadd.f32 %v496_v10, %v485_v21  ;;  %v524_v29 = vadd.f32 %v516_v18, %v504_v22 }
 0x132   :  { %v505_v26 = vadd.f32 %v496_v10, %v487_v23  ;;  %v523_v27 = vadd.f32 %v515_v17, %v503_v24 }
 0x134   :  { %v525_v30 = vadd.f32 %v517_v62, %v505_v26  ;;  %v604_v31 = vpack.c.bf16 %v523_v27, %v522_v25 }
 0x136   :  { %v605_v32 = vpack.c.bf16 %v525_v30, %v524_v29  ;;  %552 = vst [vmem:[%s952_s5 + $0x10] sm:$0xff] %v604_v31 }
 0x138   :  { %553 = vst [vmem:[%s952_s5 + $0x18] sm:$0xff] %v605_v32 }

// kernel: forward.17
= control target key start
LH: loop header
LB: loop body
LE: loop exit
PB: predicated region body
PF: predicated region fallthrough
CT: control target
= control target key end

     0   :  { %v675_v1 = vmov 0   ;;  %vm245_vm0 = vcmask 130048   ;;  %s907_s1 = inlined_call_operand.vmem [shape: bf16[144,512], index: 1, kind: input, shape index: {}]   ;;  %s908_s0 = inlined_call_operand.vmem [shape: bf16[16,144], index: 0, kind: input, shape index: {}]   ;;  %s909_s2 = inlined_call_operand.vmem [shape: f32[16,1], index: 2, kind: input, shape index: {}]   ;;  %s910_s3 = inlined_call_operand.vmem [shape: f32[16,1], index: 3, kind: input, shape index: {}]   ;;  %s911_s4 = inlined_call_operand.vmem [shape: bf16[16,512], index: 4, kind: output, shape index: {}]  }
   0x1   :  { %v586_v0 = vld [vmem:[%s907_s1 + $0x4] ss:$16 sps:$4 sm:$0xff]   ;;  %584 = vset.pattern.permute.xlu0 %v675_v1  ;;  %585 = vset.pattern.permute.xlu1 %v675_v1  ;;  %v588_v2 = vld [vmem:[%s907_s1 + $0xc] ss:$16 sps:$4 sm:$0xff]   ;;  %v590_v3 = vld [vmem:[%s907_s1] ss:$16 sps:$4 sm:$0xff]  }
   0x2   :  { %249 = vmatprep.subr.bf16.mxu0 %v586_v0  ;;  %v591_v4 = vld [vmem:[%s907_s1 + $0x8] ss:$16 sps:$4 sm:$0xff]   ;;  %292 = vmatprep.subr.bf16.mxu1 %v588_v2  ;;  %v592_v5 = vld [vmem:[%s907_s1 + $0x24] ss:$16 sps:$4 sm:$0xff]   ;;  %v594_v6 = vld [vmem:[%s907_s1 + $0x2c] ss:$16 sps:$4 sm:$0xff]  }
   0x3   :  { %250 = vmatpush1.bf16.msra.mxu0 %v590_v3  ;;  %293 = vmatpush1.bf16.msra.mxu1 %v591_v4  ;;  %v596_v7 = vld [vmem:[%s907_s1 + $0x20] ss:$16 sps:$4 sm:$0xff]   ;;  %v597_v8 = vld [vmem:[%s907_s1 + $0x28] ss:$16 sps:$4 sm:$0xff]   ;;  %v598_v9 = vld [vmem:[%s907_s1 + $0x44] ss:$16 sps:$4 sm:$0xff]  }
   0x4   :  { %251 = vmatprep.subr.bf16.mxu0 %v592_v5  ;;  %294 = vmatprep.subr.bf16.mxu1 %v594_v6  ;;  %v600_v10 = vld [vmem:[%s907_s1 + $0x4c] ss:$16 sps:$4 sm:$0xff]   ;;  %v602_v11 = vld [vmem:[%s907_s1 + $0x40] ss:$16 sps:$4 sm:$0xff]   ;;  %v603_v12 = vld [vmem:[%s907_s1 + $0x48] ss:$16 sps:$4 sm:$0xff]  }
   0x5   :  { %v604_v13 = vld [vmem:[%s907_s1 + $0x64] ss:$16 sps:$4 sm:$0xff]   ;;  %v606_v14 = vld [vmem:[%s907_s1 + $0x6c] ss:$16 sps:$4 sm:$0xff]   ;;  %v608_v15 = vld [vmem:[%s907_s1 + $0x60] ss:$16 sps:$4 sm:$0xff]  }
   0x6   :  { %v609_v16 = vld [vmem:[%s907_s1 + $0x68] ss:$16 sps:$4 sm:$0xff]   ;;  %v610_v17 = vld [vmem:[%s907_s1 + $0x84] ss:$16 sps:$4 sm:$0xff]   ;;  %v612_v18 = vld [vmem:[%s907_s1 + $0x8c] ss:$16 sps:$4 sm:$0xff]  }
   0x7   :  { %252 = vmatpush1.bf16.msra.mxu0 %v596_v7  ;;  %295 = vmatpush1.bf16.msra.mxu1 %v597_v8  ;;  %v614_v19 = vld [vmem:[%s907_s1 + $0x80] ss:$16 sps:$4 sm:$0xff]   ;;  %v615_v20 = vld [vmem:[%s907_s1 + $0x88] ss:$16 sps:$4 sm:$0xff]   ;;  %v616_v21 = vld [vmem:[%s907_s1 + $0xa4] ss:$16 sps:$4 sm:$0xff]  }
   0x8   :  { %253 = vmatprep.subr.bf16.mxu0 %v598_v9  ;;  %296 = vmatprep.subr.bf16.mxu1 %v600_v10  ;;  %v618_v22 = vld [vmem:[%s907_s1 + $0xac] ss:$16 sps:$4 sm:$0xff]   ;;  %v620_v23 = vld [vmem:[%s907_s1 + $0xa0] ss:$16 sps:$4 sm:$0xff]   ;;  %v621_v24 = vld [vmem:[%s907_s1 + $0xa8] ss:$16 sps:$4 sm:$0xff]  }
   0x9   :  { %v622_v25 = vld [vmem:[%s907_s1 + $0xc4] ss:$16 sps:$4 sm:$0xff]   ;;  %v624_v26 = vld [vmem:[%s907_s1 + $0xcc] ss:$16 sps:$4 sm:$0xff]   ;;  %v626_v27 = vld [vmem:[%s907_s1 + $0xc0] ss:$16 sps:$4 sm:$0xff]  }
   0xa   :  { %v627_v28 = vld [vmem:[%s907_s1 + $0xc8] ss:$16 sps:$4 sm:$0xff]   ;;  %v628_v29 = vld [vmem:[%s907_s1 + $0xe4] ss:$16 sps:$4 sm:$0xff]   ;;  %v630_v30 = vld [vmem:[%s907_s1 + $0xec] ss:$16 sps:$4 sm:$0xff]  }
   0xb   :  { %254 = vmatpush1.bf16.msra.mxu0 %v602_v11  ;;  %297 = vmatpush1.bf16.msra.mxu1 %v603_v12  ;;  %v642_v31 = vld [vmem:[%s908_s0 + $0x4] ss:$8 sps:$4 sm:$0xff]   ;;  %v632_v36 = vld [vmem:[%s907_s1 + $0xe0] ss:$16 sps:$4 sm:$0xff]   ;;  %v633_v37 = vld [vmem:[%s907_s1 + $0xe8] ss:$16 sps:$4 sm:$0xff]  }
   0xc   :  { %255 = vmatprep.subr.bf16.mxu0 %v604_v13  ;;  %298 = vmatprep.subr.bf16.mxu1 %v606_v14  ;;  %v335_v32 = vld [vmem:[%s909_s2] sm:$0xff]  ;;  %v336_v34 = vld [vmem:[%s909_s2 + $0x8] sm:$0xff] }
   0xd   :  { %v337_v33 = vld [vmem:[%s910_s3] sm:$0xff]  ;;  %469 = vperm.xlu0 %584, %v335_v32   ;;  %573 = vmatprep.mubr.msk.bf16.mxu0 %vm245_vm0, %v642_v31  ;;  %v338_v35 = vld [vmem:[%s910_s3 + $0x8] sm:$0xff] }
   0xe   :  { %487 = vperm.xlu1 %585, %v337_v33   ;;  %574 = vmatprep.mubr.msk.bf16.mxu1 %vm245_vm0, %v642_v31  ;;  %v634_v38 = vld [vmem:[%s907_s1 + $0x104] ss:$16 sps:$4 sm:$0xff]   ;;  %v636_v39 = vld [vmem:[%s907_s1 + $0x10c] ss:$16 sps:$4 sm:$0xff]   ;;  %v638_v40 = vld [vmem:[%s907_s1 + $0x100] ss:$16 sps:$4 sm:$0xff]  }
   0xf   :  { %256 = vmatpush1.bf16.msra.mxu0 %v608_v15  ;;  %299 = vmatpush1.bf16.msra.mxu1 %v609_v16  ;;  %v639_v41 = vld [vmem:[%s907_s1 + $0x108] ss:$16 sps:$4 sm:$0xff]  }
  0x10   :  { %257 = vmatprep.subr.bf16.mxu0 %v610_v17  ;;  %300 = vmatprep.subr.bf16.mxu1 %v612_v18  ;;  %v640_v42 = vld [vmem:[%s908_s0] ss:$8 sps:$4 sm:$0xff]  }
  0x11   :  { %474 = vperm.xlu0 %584, %v336_v34  }
  0x12   :  { %492 = vperm.xlu1 %585, %v338_v35  }
  0x13   :  { %258 = vmatpush1.bf16.msra.mxu0 %v614_v19  ;;  %301 = vmatpush1.bf16.msra.mxu1 %v615_v20 }
  0x14   :  { %259 = vmatprep.subr.bf16.mxu0 %v616_v21  ;;  %302 = vmatprep.subr.bf16.mxu1 %v618_v22 }
  0x17   :  { %260 = vmatpush1.bf16.msra.mxu0 %v620_v23  ;;  %303 = vmatpush1.bf16.msra.mxu1 %v621_v24 }
  0x18   :  { %261 = vmatprep.subr.bf16.mxu0 %v622_v25  ;;  %304 = vmatprep.subr.bf16.mxu1 %v624_v26 }
  0x1b   :  { %262 = vmatpush1.bf16.msra.mxu0 %v626_v27  ;;  %305 = vmatpush1.bf16.msra.mxu1 %v627_v28 }
  0x1c   :  { %263 = vmatprep.subr.bf16.mxu0 %v628_v29  ;;  %306 = vmatprep.subr.bf16.mxu1 %v630_v30 }
  0x1f   :  { %264 = vmatpush1.bf16.msra.mxu0 %v632_v36  ;;  %307 = vmatpush1.bf16.msra.mxu1 %v633_v37 }
  0x20   :  { %265 = vmatprep.subr.bf16.mxu0 %v634_v38  ;;  %308 = vmatprep.subr.bf16.mxu1 %v636_v39 }
  0x23   :  { %266 = vmatpush1.bf16.msra.mxu0 %v638_v40  ;;  %309 = vmatpush1.bf16.msra.mxu1 %v639_v41 }
  0x26   :  { %282 = vmatmul.mubr.bf16.vlgmr.msra.gmra.mrb[0].mxu0 %v640_v42  ;;  %325 = vmatmul.mubr.bf16.vlgmr.msra.gmra.mrb[0].mxu1 %v640_v42 }
  0xf9   :  { %v827_v43 = vpop.f32.mrb[0].mxu0  ;;  %v829_v44 = vpop.f32.mrb[0].mxu1 }
  0xfa   :  { %v339_v45 = vand.u32 2147483647, %v827_v43  ;;  %v341_v46 = vand.u32 2147483647, %v829_v44  ;;  %v833_v47 = vpop.f32.mrb[1].mxu0  ;;  %v835_v48 = vpop.f32.mrb[1].mxu1 }
  0xfb   :  { %v340_v51 = vand.u32 2147483647, %v833_v47  ;;  %v838_v52 = vpop.f32.mrb[2].mxu0  ;;  %v342_v53 = vand.u32 2147483647, %v835_v48  ;;  %v842_v58 = vpop.f32.mrb[2].mxu1 }
  0xfc   :  { %v347_v49 = vsub.f32 0.0, %v339_v45  ;;  %v349_v50 = vsub.f32 0.0, %v341_v46  ;;  %v343_v54 = vand.u32 2147483647, %v838_v52  ;;  %v345_v61 = vand.u32 2147483647, %v842_v58 }
  0xfd   :  { %v348_v57 = vsub.f32 0.0, %v340_v51  ;;  %v350_v59 = vsub.f32 0.0, %v342_v53  ;;  %v845_v62 = vpop.f32.mrb[3].mxu0  ;;  %v848_v1 = vpop.f32.mrb[3].mxu1  ;;  %vm371_vm1 = vcmp.ge.f32.partialorder %v827_v43, 0.0  ;;  %vm373_vm2 = vcmp.ge.f32.partialorder %v829_v44, 0.0 }
  0xfe   :  { %v355_v55 = vmul.f32 1.442695, %v347_v49  ;;  %v359_v56 = vmul.f32 1.442695, %v349_v50  ;;  %v351_v60 = vsub.f32 0.0, %v343_v54  ;;  %v353_v4 = vsub.f32 0.0, %v345_v61 }
  0xff   :  { %v357_v63 = vmul.f32 1.442695, %v348_v57  ;;  %v344_v0 = vand.u32 2147483647, %v845_v62  ;;  %v361_v2 = vmul.f32 1.442695, %v350_v59 }
 0x100   :  { %643 = vpow2.f32 %v355_v55  ;;  %v363_v3 = vmul.f32 1.442695, %v351_v60  ;;  %v346_v6 = vand.u32 2147483647, %v848_v1  ;;  %v367_v7 = vmul.f32 1.442695, %v353_v4 }
 0x101   :  { %645 = vpow2.f32 %v359_v56  ;;  %v352_v5 = vsub.f32 0.0, %v344_v0  ;;  %vm372_vm3 = vcmp.ge.f32.partialorder %v833_v47, 0.0  ;;  %vm374_vm4 = vcmp.ge.f32.partialorder %v835_v48, 0.0 }
 0x102   :  { %647 = vpow2.f32 %v357_v63  ;;  %v354_v8 = vsub.f32 0.0, %v346_v6  ;;  %vm375_vm5 = vcmp.ge.f32.partialorder %v838_v52, 0.0  ;;  %vm377_vm6 = vcmp.ge.f32.partialorder %v842_v58, 0.0 }
 0x103   :  { %649 = vpow2.f32 %v361_v2  ;;  %v365_v9 = vmul.f32 1.442695, %v352_v5  ;;  %vm376_vm7 = vcmp.ge.f32.partialorder %v845_v62, 0.0  ;;  %vm378_vm8 = vcmp.ge.f32.partialorder %v848_v1, 0.0 }
 0x104   :  { %651 = vpow2.f32 %v363_v3  ;;  %v369_v10 = vmul.f32 1.442695, %v354_v8 }
 0x105   :  { %653 = vpow2.f32 %v367_v7 }
 0x106   :  { %655 = vpow2.f32 %v365_v9 }
 0x107   :  { %657 = vpow2.f32 %v369_v10 }
 0x10a   :  { %v644_v11 = vpop.eup %643 }
 0x10b   :  { %v646_v12 = vpop.eup %645  ;;  %v379_v13 = vmul.f32 2.0, %v644_v11  ;;  %v395_v14 = vadd.f32 2.0, %v644_v11 }
 0x10c   :  { %v648_v15 = vpop.eup %647  ;;  %v381_v16 = vmul.f32 2.0, %v646_v12  ;;  %v397_v17 = vadd.f32 2.0, %v646_v12 }
 0x10d   :  { %v387_v18 = vadd.f32 1.0, %v379_v13  ;;  %v403_v19 = vmul.f32 %v644_v11, %v395_v14  ;;  %v419_v20 = vmul.f32 %v644_v11, %v379_v13  ;;  %v380_v21 = vmul.f32 2.0, %v648_v15  ;;  %v650_v22 = vpop.eup %649 }
 0x10e   :  { %v389_v23 = vadd.f32 1.0, %v381_v16  ;;  %v405_v24 = vmul.f32 %v646_v12, %v397_v17  ;;  %v421_v25 = vmul.f32 %v646_v12, %v381_v16  ;;  %v396_v26 = vadd.f32 2.0, %v648_v15  ;;  %v652_v27 = vpop.eup %651 }
 0x10f   :  { %v411_v28 = vsel %vm371_vm1, %v387_v18, %v403_v19  ;;  %v427_v29 = vsel %vm371_vm1, %v419_v20, 2.0  ;;  %v388_v30 = vadd.f32 1.0, %v380_v21  ;;  %v420_v31 = vmul.f32 %v648_v15, %v380_v21  ;;  %v654_v40 = vpop.eup %653 }
 0x110   :  { %v435_v32 = vadd.f32 %v427_v29, %v411_v28  ;;  %v413_v33 = vsel %vm373_vm2, %v389_v23, %v405_v24  ;;  %v429_v34 = vsel %vm373_vm2, %v421_v25, 2.0  ;;  %v404_v35 = vmul.f32 %v648_v15, %v396_v26  ;;  %v656_v46 = vpop.eup %655 }
 0x111   :  { %v437_v36 = vadd.f32 %v429_v34, %v413_v33  ;;  %v428_v37 = vsel %vm372_vm3, %v420_v31, 2.0  ;;  %v382_v38 = vmul.f32 2.0, %v650_v22  ;;  %v398_v39 = vadd.f32 2.0, %v650_v22  ;;  %v658_v61 = vpop.eup %657 }
 0x112   :  { %659 = vrcp.f32 %v435_v32  ;;  %v412_v41 = vsel %vm372_vm3, %v388_v30, %v404_v35  ;;  %v383_v42 = vmul.f32 2.0, %v652_v27  ;;  %v399_v45 = vadd.f32 2.0, %v652_v27 }
 0x113   :  { %661 = vrcp.f32 %v437_v36  ;;  %v436_v49 = vadd.f32 %v428_v37, %v412_v41  ;;  %v390_v50 = vadd.f32 1.0, %v382_v38  ;;  %v406_v51 = vmul.f32 %v650_v22, %v398_v39  ;;  %v470_v37 = vpop.permute.xlu0 %469 }
 0x114   :  { %v422_v53 = vmul.f32 %v650_v22, %v382_v38  ;;  %v391_v54 = vadd.f32 1.0, %v383_v42  ;;  %v407_v55 = vmul.f32 %v652_v27, %v399_v45  ;;  %v423_v56 = vmul.f32 %v652_v27, %v383_v42 }
 0x115   :  { %663 = vrcp.f32 %v436_v49  ;;  %v414_v57 = vsel %vm374_vm4, %v390_v50, %v406_v51  ;;  %v385_v59 = vmul.f32 2.0, %v654_v40  ;;  %v401_v60 = vadd.f32 2.0, %v654_v40 }
 0x116   :  { %v430_v63 = vsel %vm374_vm4, %v422_v53, 2.0  ;;  %v415_v0 = vsel %vm375_vm5, %v391_v54, %v407_v55  ;;  %v431_v2 = vsel %vm375_vm5, %v423_v56, 2.0  ;;  %v384_v3 = vmul.f32 2.0, %v656_v46 }
 0x117   :  { %v438_v4 = vadd.f32 %v430_v63, %v414_v57  ;;  %v439_v5 = vadd.f32 %v431_v2, %v415_v0  ;;  %v393_v6 = vadd.f32 1.0, %v385_v59  ;;  %v409_v7 = vmul.f32 %v654_v40, %v401_v60 }
 0x118   :  { %v425_v8 = vmul.f32 %v654_v40, %v385_v59  ;;  %v392_v9 = vadd.f32 1.0, %v384_v3  ;;  %v400_v10 = vadd.f32 2.0, %v656_v46  ;;  %v424_v11 = vmul.f32 %v656_v46, %v384_v3 }
 0x119   :  { %665 = vrcp.f32 %v438_v4  ;;  %v417_v12 = vsel %vm377_vm6, %v393_v6, %v409_v7  ;;  %v386_v13 = vmul.f32 2.0, %v658_v61  ;;  %v402_v14 = vadd.f32 2.0, %v658_v61 }
 0x11a   :  { %667 = vrcp.f32 %v439_v5  ;;  %v433_v15 = vsel %vm377_vm6, %v425_v8, 2.0  ;;  %v408_v16 = vmul.f32 %v656_v46, %v400_v10  ;;  %v432_v17 = vsel %vm376_vm7, %v424_v11, 2.0 }
 0x11b   :  { %v441_v18 = vadd.f32 %v433_v15, %v417_v12  ;;  %v394_v19 = vadd.f32 1.0, %v386_v13  ;;  %v410_v20 = vmul.f32 %v658_v61, %v402_v14  ;;  %v426_v21 = vmul.f32 %v658_v61, %v386_v13 }
 0x11c   :  { %v660_v22 = vpop.eup %659  ;;  %v416_v23 = vsel %vm376_vm7, %v392_v9, %v408_v16 }
 0x11d   :  { %v662_v24 = vpop.eup %661  ;;  %v451_v25 = vmul.f32 %v660_v22, %v411_v28  ;;  %669 = vrcp.f32 %v441_v18  ;;  %v440_v26 = vadd.f32 %v432_v17, %v416_v23  ;;  %v418_v27 = vsel %vm378_vm8, %v394_v19, %v410_v20  ;;  %v488_v28 = vpop.permute.xlu1 %487 }
 0x11e   :  { %v453_v29 = vmul.f32 %v662_v24, %v413_v33  ;;  %v434_v30 = vsel %vm378_vm8, %v426_v21, 2.0 }
 0x11f   :  { %v664_v31 = vpop.eup %663  ;;  %v459_v32 = vmul.f32 %v451_v25, %v827_v43  ;;  %671 = vrcp.f32 %v440_v26  ;;  %v442_v34 = vadd.f32 %v434_v30, %v418_v27 }
 0x120   :  { %v461_v35 = vmul.f32 %v453_v29, %v829_v44  ;;  %v452_v36 = vmul.f32 %v664_v31, %v412_v41 }
 0x121   :  { %673 = vrcp.f32 %v442_v34  ;;  %v477_v38 = vmul.f32 %v470_v37, %v459_v32  ;;  %v493_v4 = vpop.permute.xlu1 %492 }
 0x122   :  { %v460_v39 = vmul.f32 %v452_v36, %v833_v47  ;;  %v479_v33 = vmul.f32 %v470_v37, %v461_v35  ;;  %v475_v47 = vpop.permute.xlu0 %474 }
 0x123   :  { %v666_v40 = vpop.eup %665  ;;  %v495_v49 = vadd.f32 %v488_v28, %v477_v38 }
 0x124   :  { %v668_v42 = vpop.eup %667  ;;  %v454_v45 = vmul.f32 %v666_v40, %v414_v57  ;;  %v478_v46 = vmul.f32 %v470_v37, %v460_v39  ;;  %v497_v55 = vadd.f32 %v488_v28, %v479_v33 }
 0x125   :  { %v455_v50 = vmul.f32 %v668_v42, %v415_v0 }
 0x126   :  { %v462_v43 = vmul.f32 %v454_v45, %v835_v48  ;;  %v496_v51 = vadd.f32 %v488_v28, %v478_v46 }
 0x127   :  { %v670_v53 = vpop.eup %669  ;;  %v463_v44 = vmul.f32 %v455_v50, %v838_v52 }
 0x128   :  { %v457_v41 = vmul.f32 %v670_v53, %v417_v12  ;;  %v480_v54 = vmul.f32 %v470_v37, %v462_v43  ;;  %v579_v56 = vpack.c.bf16 %v496_v51, %v495_v49 }
 0x129   :  { %v672_v59 = vpop.eup %671  ;;  %v481_v63 = vmul.f32 %v475_v47, %v463_v44 }
 0x12a   :  { %v465_v60 = vmul.f32 %v457_v41, %v842_v58  ;;  %v456_v61 = vmul.f32 %v672_v59, %v416_v23  ;;  %v498_v57 = vadd.f32 %v488_v28, %v480_v54  ;;  %527 = vst [vmem:[%s911_s4] sm:$0xff] %v579_v56 }
 0x12b   :  { %v674_v48 = vpop.eup %673  ;;  %v499_v6 = vadd.f32 %v493_v4, %v481_v63 }
 0x12c   :  { %v464_v0 = vmul.f32 %v456_v61, %v845_v62  ;;  %v458_v2 = vmul.f32 %v674_v48, %v418_v27  ;;  %v580_v52 = vpack.c.bf16 %v498_v57, %v497_v55  ;;  %v483_v3 = vmul.f32 %v475_v47, %v465_v60 }
 0x12e   :  { %v466_v5 = vmul.f32 %v458_v2, %v848_v1  ;;  %528 = vst [vmem:[%s911_s4 + $0x8] sm:$0xff] %v580_v52  ;;  %v482_v58 = vmul.f32 %v475_v47, %v464_v0  ;;  %v501_v9 = vadd.f32 %v493_v4, %v483_v3 }
 0x130   :  { %v484_v7 = vmul.f32 %v475_v47, %v466_v5  ;;  %v500_v8 = vadd.f32 %v493_v4, %v482_v58 }
 0x132   :  { %v502_v10 = vadd.f32 %v493_v4, %v484_v7  ;;  %v581_v11 = vpack.c.bf16 %v500_v8, %v499_v6 }
 0x134   :  { %v582_v12 = vpack.c.bf16 %v502_v10, %v501_v9  ;;  %529 = vst [vmem:[%s911_s4 + $0x10] sm:$0xff] %v581_v11 }
 0x136   :  { %530 = vst [vmem:[%s911_s4 + $0x18] sm:$0xff] %v582_v12 }

// kernel: forward.19
= control target key start
LH: loop header
LB: loop body
LE: loop exit
PB: predicated region body
PF: predicated region fallthrough
CT: control target
= control target key end

     0   :  { %v1140_v0 = vmov 0   ;;  %vm112_vm0 = vcmask 130048   ;;  %s1626_s1 = inlined_call_operand.vmem [shape: bf16[4,144,128], index: 1, kind: input, shape index: {}]   ;;  %s1627_s0 = inlined_call_operand.vmem [shape: bf16[32,144], index: 0, kind: input, shape index: {}]   ;;  %s1628_s2 = inlined_call_operand.vmem [shape: f32[32,1], index: 2, kind: input, shape index: {}]   ;;  %s1629_s3 = inlined_call_operand.vmem [shape: f32[32,1], index: 3, kind: input, shape index: {}]   ;;  %s1630_s4 = inlined_call_operand.vmem [shape: bf16[32,128], index: 4, kind: output, shape index: {}]  }
   0x1   :  { %119 = vmatprep.subr.bf16.mxu0 %v1140_v0  ;;  %361 = vmatprep.subr.bf16.mxu1 %v1140_v0  ;;  %v1034_v1 = vld [vmem:[%s1626_s1] sm:$0xff]   ;;  %v1035_v2 = vld [vmem:[%s1626_s1 + $0x48] sm:$0xff]   ;;  %v1037_v4 = vld [vmem:[%s1626_s1 + $0x50] sm:$0xff]  }
   0x2   :  { %1032 = vset.pattern.permute.xlu0 %v1140_v0  ;;  %1033 = vset.pattern.permute.xlu1 %v1140_v0  ;;  %v1036_v3 = vld [vmem:[%s1626_s1 + $0x8] sm:$0xff]   ;;  %v1038_v5 = vld [vmem:[%s1626_s1 + $0x10] sm:$0xff]   ;;  %v1039_v6 = vld [vmem:[%s1626_s1 + $0x58] sm:$0xff]  }
   0x3   :  { %120 = vmatpush1.bf16.msra.mxu0 %v1034_v1  ;;  %362 = vmatpush1.bf16.msra.mxu1 %v1035_v2  ;;  %v1040_v7 = vld [vmem:[%s1626_s1 + $0x18] sm:$0xff]   ;;  %v1041_v8 = vld [vmem:[%s1626_s1 + $0x60] sm:$0xff]   ;;  %v1043_v10 = vld [vmem:[%s1626_s1 + $0x68] sm:$0xff]  }
   0x4   :  { %121 = vmatprep.subr.bf16.mxu0 %v1140_v0  ;;  %363 = vmatprep.subr.bf16.mxu1 %v1140_v0  ;;  %v1042_v9 = vld [vmem:[%s1626_s1 + $0x20] sm:$0xff]   ;;  %v1044_v11 = vld [vmem:[%s1626_s1 + $0x28] sm:$0xff]   ;;  %v1045_v13 = vld [vmem:[%s1626_s1 + $0x70] sm:$0xff]  }
   0x5   :  { %v1214_v12 = vld [vmem:[%s1627_s0 + $0x4] ss:$8 sps:$4 sm:$0xff]   ;;  %v1046_v14 = vld [vmem:[%s1626_s1 + $0x30] sm:$0xff]   ;;  %v1047_v15 = vld [vmem:[%s1626_s1 + $0x78] sm:$0xff]  }
   0x6   :  { %923 = vmatprep.mubr.msk.bf16.mxu0 %vm112_vm0, %v1214_v12  ;;  %952 = vmatprep.mubr.msk.bf16.mxu1 %vm112_vm0, %v1214_v12  ;;  %v1048_v16 = vld [vmem:[%s1626_s1 + $0x38] sm:$0xff]   ;;  %v1049_v17 = vld [vmem:[%s1626_s1 + $0x80] sm:$0xff]   ;;  %v1051_v19 = vld [vmem:[%s1626_s1 + $0x88] sm:$0xff]  }
   0x7   :  { %122 = vmatpush1.bf16.msra.mxu0 %v1036_v3  ;;  %364 = vmatpush1.bf16.msra.mxu1 %v1037_v4  ;;  %v1050_v18 = vld [vmem:[%s1626_s1 + $0x40] sm:$0xff]   ;;  %v1055_v21 = vld [vmem:[%s1626_s1 + $0x90] sm:$0xff]   ;;  %v1056_v22 = vld [vmem:[%s1626_s1 + $0xd8] sm:$0xff]  }
   0x8   :  { %123 = vmatprep.subr.bf16.mxu0 %v1140_v0  ;;  %365 = vmatprep.subr.bf16.mxu1 %v1140_v0  ;;  %v1252_v20 = vld [vmem:[%s1627_s0] ss:$8 sps:$4 sm:$0xff]   ;;  %v1265_v23 = vld [vmem:[%s1627_s0 + $0x14] ss:$8 sps:$4 sm:$0xff]   ;;  %v1290_v28 = vld [vmem:[%s1627_s0 + $0x10] ss:$8 sps:$4 sm:$0xff]  }
   0x9   :  { %v1057_v24 = vld [vmem:[%s1626_s1 + $0x98] sm:$0xff]   ;;  %v168_v25 = vld [vmem:[%s1628_s2] sm:$0xff]  ;;  %v170_v27 = vld [vmem:[%s1628_s2 + $0x10] sm:$0xff] }
   0xa   :  { %v1058_v26 = vld [vmem:[%s1626_s1 + $0xe0] sm:$0xff]   ;;  %242 = vperm.xlu0 %1032, %v168_v25   ;;  %252 = vperm.xlu1 %1033, %v170_v27   ;;  %v169_v30 = vld [vmem:[%s1628_s2 + $0x8] sm:$0xff]  ;;  %v171_v33 = vld [vmem:[%s1628_s2 + $0x18] sm:$0xff] }
   0xb   :  { %124 = vmatpush1.bf16.msra.mxu0 %v1038_v5  ;;  %366 = vmatpush1.bf16.msra.mxu1 %v1039_v6  ;;  %v1062_v29 = vld [vmem:[%s1626_s1 + $0xa0] sm:$0xff]   ;;  %v1063_v31 = vld [vmem:[%s1626_s1 + $0xe8] sm:$0xff]   ;;  %v1065_v34 = vld [vmem:[%s1626_s1 + $0xf0] sm:$0xff]  }
   0xc   :  { %125 = vmatprep.subr.bf16.mxu0 %v1140_v0  ;;  %367 = vmatprep.subr.bf16.mxu1 %v1140_v0  ;;  %v1064_v32 = vld [vmem:[%s1626_s1 + $0xa8] sm:$0xff]   ;;  %v172_v35 = vld [vmem:[%s1629_s3] sm:$0xff]  ;;  %v1066_v36 = vld [vmem:[%s1626_s1 + $0xb0] sm:$0xff]  }
   0xd   :  { %v173_v37 = vld [vmem:[%s1629_s3 + $0x8] sm:$0xff]  ;;  %v1067_v38 = vld [vmem:[%s1626_s1 + $0xf8] sm:$0xff]   ;;  %v174_v39 = vld [vmem:[%s1629_s3 + $0x10] sm:$0xff] }
   0xe   :  { %247 = vperm.xlu0 %1032, %v169_v30   ;;  %257 = vperm.xlu1 %1033, %v171_v33   ;;  %v1068_v40 = vld [vmem:[%s1626_s1 + $0xb8] sm:$0xff]   ;;  %v1069_v42 = vld [vmem:[%s1626_s1 + $0x100] sm:$0xff]   ;;  %v1071_v44 = vld [vmem:[%s1626_s1 + $0x108] sm:$0xff]  }
   0xf   :  { %126 = vmatpush1.bf16.msra.mxu0 %v1040_v7  ;;  %368 = vmatpush1.bf16.msra.mxu1 %v1041_v8  ;;  %v175_v41 = vld [vmem:[%s1629_s3 + $0x18] sm:$0xff]  ;;  %v1070_v43 = vld [vmem:[%s1626_s1 + $0xc0] sm:$0xff]   ;;  %v1072_v45 = vld [vmem:[%s1626_s1 + $0xc8] sm:$0xff]  }
  0x10   :  { %127 = vmatprep.subr.bf16.mxu0 %v1140_v0  ;;  %369 = vmatprep.subr.bf16.mxu1 %v1140_v0  ;;  %v1073_v46 = vld [vmem:[%s1626_s1 + $0x110] sm:$0xff]   ;;  %v1075_v48 = vld [vmem:[%s1626_s1 + $0x118] sm:$0xff]  }
  0x11   :  { %v1074_v47 = vld [vmem:[%s1626_s1 + $0xd0] sm:$0xff]  }
  0x12   :  { %266 = vperm.xlu0 %1032, %v172_v35   ;;  %271 = vperm.xlu1 %1033, %v173_v37  }
  0x13   :  { %128 = vmatpush1.bf16.msra.mxu0 %v1042_v9  ;;  %370 = vmatpush1.bf16.msra.mxu1 %v1043_v10 }
  0x14   :  { %129 = vmatprep.subr.bf16.mxu0 %v1140_v0  ;;  %371 = vmatprep.subr.bf16.mxu1 %v1140_v0 }
  0x16   :  { %276 = vperm.xlu0 %1032, %v174_v39   ;;  %281 = vperm.xlu1 %1033, %v175_v41  }
  0x17   :  { %130 = vmatpush1.bf16.msra.mxu0 %v1044_v11  ;;  %372 = vmatpush1.bf16.msra.mxu1 %v1045_v13 }
  0x18   :  { %131 = vmatprep.subr.bf16.mxu0 %v1140_v0  ;;  %373 = vmatprep.subr.bf16.mxu1 %v1140_v0 }
  0x1b   :  { %132 = vmatpush1.bf16.msra.mxu0 %v1046_v14  ;;  %374 = vmatpush1.bf16.msra.mxu1 %v1047_v15 }
  0x1c   :  { %133 = vmatprep.subr.bf16.mxu0 %v1140_v0  ;;  %375 = vmatprep.subr.bf16.mxu1 %v1140_v0 }
  0x1f   :  { %134 = vmatpush1.bf16.msra.mxu0 %v1048_v16  ;;  %376 = vmatpush1.bf16.msra.mxu1 %v1049_v17 }
  0x20   :  { %135 = vmatprep.subr.bf16.mxu0 %v1140_v0  ;;  %377 = vmatprep.subr.bf16.mxu1 %v1140_v0 }
  0x23   :  { %136 = vmatpush1.bf16.msra.mxu0 %v1050_v18  ;;  %378 = vmatpush1.bf16.msra.mxu1 %v1051_v19 }
  0x24   :  { %559 = vmatprep.subr.bf16.mxu0 %v1140_v0  ;;  %757 = vmatprep.subr.bf16.mxu1 %v1140_v0 }
  0x26   :  { %152 = vmatmul.mubr.bf16.vlgmr.msra.gmra.mrb[0].mxu0 %v1252_v20  ;;  %394 = vmatmul.mubr.bf16.vlgmr.msra.gmra.mrb[0].mxu1 %v1252_v20 }
  0x27   :  { %560 = vmatpush1.bf16.msra.mxu0 %v1055_v21  ;;  %758 = vmatpush1.bf16.msra.mxu1 %v1056_v22 }
  0x28   :  { %561 = vmatprep.subr.bf16.mxu0 %v1140_v0  ;;  %759 = vmatprep.subr.bf16.mxu1 %v1140_v0 }
  0x29   :  { %924 = vmatprep.mubr.msk.bf16.mxu0 %vm112_vm0, %v1265_v23  ;;  %953 = vmatprep.mubr.msk.bf16.mxu1 %vm112_vm0, %v1265_v23 }
  0x2b   :  { %562 = vmatpush1.bf16.msra.mxu0 %v1057_v24  ;;  %760 = vmatpush1.bf16.msra.mxu1 %v1058_v26 }
  0x2c   :  { %563 = vmatprep.subr.bf16.mxu0 %v1140_v0  ;;  %761 = vmatprep.subr.bf16.mxu1 %v1140_v0 }
  0x2e   :  { %160 = vmatmul.mubr.bf16.gmra.mrb[4].mxu0 %v1290_v28  ;;  %402 = vmatmul.mubr.bf16.gmra.mrb[4].mxu1 %v1290_v28 }
  0x2f   :  { %564 = vmatpush1.bf16.msra.mxu0 %v1062_v29  ;;  %762 = vmatpush1.bf16.msra.mxu1 %v1063_v31 }
  0x30   :  { %565 = vmatprep.subr.bf16.mxu0 %v1140_v0  ;;  %763 = vmatprep.subr.bf16.mxu1 %v1140_v0 }
  0x31   :  { %981 = vmatprep.mubr.msk.bf16.mxu0 %vm112_vm0, %v1214_v12  ;;  %1010 = vmatprep.mubr.msk.bf16.mxu1 %vm112_vm0, %v1214_v12 }
  0x33   :  { %566 = vmatpush1.bf16.msra.mxu0 %v1064_v32  ;;  %764 = vmatpush1.bf16.msra.mxu1 %v1065_v34 }
  0x34   :  { %567 = vmatprep.subr.bf16.mxu0 %v1140_v0  ;;  %765 = vmatprep.subr.bf16.mxu1 %v1140_v0 }
  0x37   :  { %568 = vmatpush1.bf16.msra.mxu0 %v1066_v36  ;;  %766 = vmatpush1.bf16.msra.mxu1 %v1067_v38 }
  0x38   :  { %569 = vmatprep.subr.bf16.mxu0 %v1140_v0  ;;  %767 = vmatprep.subr.bf16.mxu1 %v1140_v0 }
  0x3b   :  { %570 = vmatpush1.bf16.msra.mxu0 %v1068_v40  ;;  %768 = vmatpush1.bf16.msra.mxu1 %v1069_v42 }
  0x3c   :  { %571 = vmatprep.subr.bf16.mxu0 %v1140_v0  ;;  %769 = vmatprep.subr.bf16.mxu1 %v1140_v0 }
  0x3f   :  { %572 = vmatpush1.bf16.msra.mxu0 %v1070_v43  ;;  %770 = vmatpush1.bf16.msra.mxu1 %v1071_v44 }
  0x40   :  { %573 = vmatprep.subr.bf16.mxu0 %v1140_v0  ;;  %771 = vmatprep.subr.bf16.mxu1 %v1140_v0 }
  0x43   :  { %574 = vmatpush1.bf16.msra.mxu0 %v1072_v45  ;;  %772 = vmatpush1.bf16.msra.mxu1 %v1073_v46 }
  0x44   :  { %575 = vmatprep.subr.bf16.mxu0 %v1140_v0  ;;  %773 = vmatprep.subr.bf16.mxu1 %v1140_v0 }
  0x47   :  { %576 = vmatpush1.bf16.msra.mxu0 %v1074_v47  ;;  %774 = vmatpush1.bf16.msra.mxu1 %v1075_v48 }
  0x4a   :  { %592 = vmatmul.mubr.bf16.vlgmr.msra.gmra.mrb[8].mxu0 %v1252_v20  ;;  %790 = vmatmul.mubr.bf16.vlgmr.msra.gmra.mrb[8].mxu1 %v1252_v20 }
  0x4b   :  { %982 = vmatprep.mubr.msk.bf16.mxu0 %vm112_vm0, %v1265_v23  ;;  %1011 = vmatprep.mubr.msk.bf16.mxu1 %vm112_vm0, %v1265_v23 }
  0x52   :  { %600 = vmatmul.mubr.bf16.gmra.mrb[12].mxu0 %v1290_v28  ;;  %798 = vmatmul.mubr.bf16.gmra.mrb[12].mxu1 %v1290_v28 }
  0xf9   :  { %v1380_v49 = vpop.f32.mrb[0].mxu0  ;;  %v1383_v51 = vpop.f32.mrb[0].mxu1 }
  0xfa   :  { %v176_v50 = vand.u32 2147483647, %v1380_v49  ;;  %v155_v52 = vpop.f32.mrb[1].mxu0  ;;  %v410_v53 = vand.u32 2147483647, %v1383_v51  ;;  %v397_v54 = vpop.f32.mrb[1].mxu1 }
  0xfb   :  { %v1386_v55 = vpop.f32.mrb[2].mxu0  ;;  %v1389_v58 = vpop.f32.mrb[2].mxu1  ;;  %vm192_vm1 = vcmp.ge.f32.partialorder %v1380_v49, 0.0  ;;  %vm426_vm2 = vcmp.ge.f32.partialorder %v1383_v51, 0.0 }
  0xfc   :  { %v180_v56 = vsub.f32 0.0, %v176_v50  ;;  %v177_v57 = vand.u32 2147483647, %v1386_v55  ;;  %v158_v59 = vpop.f32.mrb[3].mxu0  ;;  %v414_v60 = vsub.f32 0.0, %v410_v53  ;;  %v400_v62 = vpop.f32.mrb[3].mxu1 }
  0xfd   :  { %v411_v61 = vand.u32 2147483647, %v1389_v58  ;;  %vm193_vm3 = vcmp.ge.f32.partialorder %v1386_v55, 0.0  ;;  %vm427_vm4 = vcmp.ge.f32.partialorder %v1389_v58, 0.0 }
  0xfe   :  { %v184_v63 = vmul.f32 1.442695, %v180_v56  ;;  %v181_v0 = vsub.f32 0.0, %v177_v57  ;;  %v418_v1 = vmul.f32 1.442695, %v414_v60 }
  0xff   :  { %v415_v2 = vsub.f32 0.0, %v411_v61 }
 0x100   :  { %1076 = vpow2.f32 %v184_v63  ;;  %v186_v3 = vmul.f32 1.442695, %v181_v0 }
 0x101   :  { %1078 = vpow2.f32 %v418_v1  ;;  %v420_v4 = vmul.f32 1.442695, %v415_v2  ;;  %v1392_v5 = vpop.f32.mrb[4].mxu0  ;;  %v1395_v7 = vpop.f32.mrb[4].mxu1 }
 0x102   :  { %1080 = vpow2.f32 %v186_v3  ;;  %v178_v6 = vand.u32 2147483647, %v1392_v5  ;;  %v163_v8 = vpop.f32.mrb[5].mxu0  ;;  %v412_v9 = vand.u32 2147483647, %v1395_v7  ;;  %v405_v10 = vpop.f32.mrb[5].mxu1 }
 0x103   :  { %v1398_v11 = vpop.f32.mrb[6].mxu0  ;;  %1082 = vpow2.f32 %v420_v4  ;;  %v1401_v14 = vpop.f32.mrb[6].mxu1  ;;  %vm194_vm5 = vcmp.ge.f32.partialorder %v1392_v5, 0.0  ;;  %vm428_vm6 = vcmp.ge.f32.partialorder %v1395_v7, 0.0 }
 0x104   :  { %v182_v12 = vsub.f32 0.0, %v178_v6  ;;  %v179_v13 = vand.u32 2147483647, %v1398_v11  ;;  %v166_v15 = vpop.f32.mrb[7].mxu0  ;;  %v416_v16 = vsub.f32 0.0, %v412_v9  ;;  %v408_v18 = vpop.f32.mrb[7].mxu1 }
 0x105   :  { %v413_v17 = vand.u32 2147483647, %v1401_v14  ;;  %vm195_vm7 = vcmp.ge.f32.partialorder %v1398_v11, 0.0  ;;  %vm429_vm8 = vcmp.ge.f32.partialorder %v1401_v14, 0.0 }
 0x106   :  { %v188_v19 = vmul.f32 1.442695, %v182_v12  ;;  %v183_v20 = vsub.f32 0.0, %v179_v13  ;;  %v422_v21 = vmul.f32 1.442695, %v416_v16  ;;  %v1437_v16 = vpop.permute.xlu0 %242 }
 0x107   :  { %v417_v22 = vsub.f32 0.0, %v413_v17 }
 0x108   :  { %1084 = vpow2.f32 %v188_v19  ;;  %v190_v23 = vmul.f32 1.442695, %v183_v20 }
 0x109   :  { %1086 = vpow2.f32 %v422_v21  ;;  %v424_v24 = vmul.f32 1.442695, %v417_v22  ;;  %v1440_v21 = vpop.permute.xlu1 %252 }
 0x10a   :  { %v1077_v25 = vpop.eup %1076  ;;  %1088 = vpow2.f32 %v190_v23 }
 0x10b   :  { %v1079_v26 = vpop.eup %1078  ;;  %v196_v27 = vmul.f32 2.0, %v1077_v25  ;;  %v204_v28 = vadd.f32 2.0, %v1077_v25  ;;  %1090 = vpow2.f32 %v424_v24 }
 0x10c   :  { %v1081_v29 = vpop.eup %1080  ;;  %v430_v30 = vmul.f32 2.0, %v1079_v26  ;;  %v438_v31 = vadd.f32 2.0, %v1079_v26 }
 0x10d   :  { %v200_v32 = vadd.f32 1.0, %v196_v27  ;;  %v208_v33 = vmul.f32 %v1077_v25, %v204_v28  ;;  %v216_v34 = vmul.f32 %v1077_v25, %v196_v27  ;;  %v197_v35 = vmul.f32 2.0, %v1081_v29  ;;  %v1083_v36 = vpop.eup %1082 }
 0x10e   :  { %v434_v37 = vadd.f32 1.0, %v430_v30  ;;  %v442_v38 = vmul.f32 %v1079_v26, %v438_v31  ;;  %v450_v39 = vmul.f32 %v1079_v26, %v430_v30  ;;  %v205_v40 = vadd.f32 2.0, %v1081_v29 }
 0x10f   :  { %v1410_v41 = vsel %vm192_vm1, %v200_v32, %v208_v33  ;;  %v220_v42 = vsel %vm192_vm1, %v216_v34, 2.0  ;;  %v201_v43 = vadd.f32 1.0, %v197_v35  ;;  %v217_v44 = vmul.f32 %v1081_v29, %v197_v35 }
 0x110   :  { %v224_v45 = vadd.f32 %v220_v42, %v1410_v41  ;;  %v1417_v46 = vsel %vm426_vm2, %v434_v37, %v442_v38  ;;  %v454_v47 = vsel %vm426_vm2, %v450_v39, 2.0  ;;  %v209_v48 = vmul.f32 %v1081_v29, %v205_v40  ;;  %v1460_v38 = vpop.permute.xlu0 %247 }
 0x111   :  { %v458_v50 = vadd.f32 %v454_v47, %v1417_v46  ;;  %v221_v52 = vsel %vm193_vm3, %v217_v44, 2.0  ;;  %v431_v53 = vmul.f32 2.0, %v1083_v36  ;;  %v439_v54 = vadd.f32 2.0, %v1083_v36  ;;  %v1466_v47 = vpop.permute.xlu1 %257 }
 0x112   :  { %v1085_v56 = vpop.eup %1084  ;;  %1092 = vrcp.f32 %v224_v45  ;;  %v1426_v57 = vsel %vm193_vm3, %v201_v43, %v209_v48 }
 0x113   :  { %v1087_v59 = vpop.eup %1086  ;;  %1094 = vrcp.f32 %v458_v50  ;;  %v225_v60 = vadd.f32 %v221_v52, %v1426_v57  ;;  %v435_v61 = vadd.f32 1.0, %v431_v53  ;;  %v443_v62 = vmul.f32 %v1083_v36, %v439_v54 }
 0x114   :  { %v1089_v63 = vpop.eup %1088  ;;  %v451_v0 = vmul.f32 %v1083_v36, %v431_v53  ;;  %v198_v1 = vmul.f32 2.0, %v1085_v56  ;;  %v206_v2 = vadd.f32 2.0, %v1085_v56  ;;  %v432_v3 = vmul.f32 2.0, %v1087_v59 }
 0x115   :  { %1096 = vrcp.f32 %v225_v60  ;;  %v1433_v4 = vsel %vm427_vm4, %v435_v61, %v443_v62  ;;  %v440_v6 = vadd.f32 2.0, %v1087_v59  ;;  %v199_v8 = vmul.f32 2.0, %v1089_v63  ;;  %v1091_v9 = vpop.eup %1090 }
 0x116   :  { %v455_v10 = vsel %vm427_vm4, %v451_v0, 2.0  ;;  %v202_v12 = vadd.f32 1.0, %v198_v1  ;;  %v210_v13 = vmul.f32 %v1085_v56, %v206_v2  ;;  %v218_v15 = vmul.f32 %v1085_v56, %v198_v1 }
 0x117   :  { %v459_v17 = vadd.f32 %v455_v10, %v1433_v4  ;;  %v436_v18 = vadd.f32 1.0, %v432_v3  ;;  %v444_v19 = vmul.f32 %v1087_v59, %v440_v6  ;;  %v452_v20 = vmul.f32 %v1087_v59, %v432_v3 }
 0x118   :  { %v1444_v22 = vsel %vm194_vm5, %v202_v12, %v210_v13  ;;  %v222_v23 = vsel %vm194_vm5, %v218_v15, 2.0  ;;  %v203_v24 = vadd.f32 1.0, %v199_v8  ;;  %v207_v25 = vadd.f32 2.0, %v1089_v63 }
 0x119   :  { %1098 = vrcp.f32 %v459_v17  ;;  %v226_v26 = vadd.f32 %v222_v23, %v1444_v22  ;;  %v1451_v27 = vsel %vm428_vm6, %v436_v18, %v444_v19  ;;  %v456_v28 = vsel %vm428_vm6, %v452_v20, 2.0 }
 0x11a   :  { %v460_v29 = vadd.f32 %v456_v28, %v1451_v27  ;;  %v211_v30 = vmul.f32 %v1089_v63, %v207_v25  ;;  %v219_v31 = vmul.f32 %v1089_v63, %v199_v8  ;;  %v433_v32 = vmul.f32 2.0, %v1091_v9 }
 0x11b   :  { %1100 = vrcp.f32 %v226_v26  ;;  %v441_v33 = vadd.f32 2.0, %v1091_v9  ;;  %v1497_v26 = vpop.permute.xlu1 %271 }
 0x11c   :  { %v1093_v34 = vpop.eup %1092  ;;  %1102 = vrcp.f32 %v460_v29  ;;  %v1458_v35 = vsel %vm195_vm7, %v203_v24, %v211_v30  ;;  %v223_v36 = vsel %vm195_vm7, %v219_v31, 2.0  ;;  %v437_v37 = vadd.f32 1.0, %v433_v32 }
 0x11d   :  { %v1095_v39 = vpop.eup %1094  ;;  %v232_v40 = vmul.f32 %v1093_v34, %v1410_v41  ;;  %v227_v42 = vadd.f32 %v223_v36, %v1458_v35  ;;  %v445_v43 = vmul.f32 %v1091_v9, %v441_v33  ;;  %v453_v44 = vmul.f32 %v1091_v9, %v433_v32  ;;  %v1464_v45 = vpop.f32.mrb[8].mxu0 }
 0x11e   :  { %v466_v48 = vmul.f32 %v1095_v39, %v1417_v46  ;;  %v608_v50 = vand.u32 2147483647, %v1464_v45  ;;  %v1470_v52 = vpop.f32.mrb[8].mxu1  ;;  %v595_v53 = vpop.f32.mrb[9].mxu0  ;;  %vm624_vm9 = vcmp.ge.f32.partialorder %v1464_v45, 0.0 }
 0x11f   :  { %v1097_v54 = vpop.eup %1096  ;;  %v236_v56 = vmul.f32 %v232_v40, %v1380_v49  ;;  %1104 = vrcp.f32 %v227_v42  ;;  %v1475_v41 = vsel %vm429_vm8, %v437_v37, %v445_v43  ;;  %v457_v59 = vsel %vm429_vm8, %v453_v44, 2.0  ;;  %v793_v60 = vpop.f32.mrb[9].mxu1 }
 0x120   :  { %v1479_v61 = vpop.f32.mrb[10].mxu0  ;;  %v470_v46 = vmul.f32 %v466_v48, %v1383_v51  ;;  %v233_v62 = vmul.f32 %v1097_v54, %v1426_v57  ;;  %v461_v63 = vadd.f32 %v457_v59, %v1475_v41  ;;  %v612_v0 = vsub.f32 0.0, %v608_v50  ;;  %v1484_v1 = vpop.f32.mrb[10].mxu1 }
 0x121   :  { %v598_v49 = vpop.f32.mrb[11].mxu0  ;;  %v260_v2 = vmul.f32 %v1437_v16, %v236_v56  ;;  %v806_v3 = vand.u32 2147483647, %v1470_v52  ;;  %v609_v6 = vand.u32 2147483647, %v1479_v61  ;;  %v796_v8 = vpop.f32.mrb[11].mxu1 }
 0x122   :  { %v237_v9 = vmul.f32 %v233_v62, %v1386_v55  ;;  %1106 = vrcp.f32 %v461_v63  ;;  %v474_v51 = vmul.f32 %v470_v46, %v1437_v16  ;;  %v616_v10 = vmul.f32 1.442695, %v612_v0  ;;  %v1491_v57 = vpop.permute.xlu0 %266 }
 0x123   :  { %v1099_v12 = vpop.eup %1098  ;;  %v810_v13 = vsub.f32 0.0, %v806_v3  ;;  %v613_v15 = vsub.f32 0.0, %v609_v6  ;;  %v807_v17 = vand.u32 2147483647, %v1484_v1  ;;  %v284_v25 = vadd.f32 %v1491_v57, %v260_v2 }
 0x124   :  { %v467_v18 = vmul.f32 %v1099_v12, %v1433_v4  ;;  %1108 = vpow2.f32 %v616_v10  ;;  %v261_v19 = vmul.f32 %v1460_v38, %v237_v9  ;;  %v478_v4 = vadd.f32 %v474_v51, %v1491_v57 }
 0x125   :  { %v1101_v20 = vpop.eup %1100  ;;  %v814_v23 = vmul.f32 1.442695, %v810_v13  ;;  %v618_v24 = vmul.f32 1.442695, %v613_v15  ;;  %v811_v55 = vsub.f32 0.0, %v807_v17  ;;  %v1499_v28 = vpop.f32.mrb[12].mxu0 }
 0x126   :  { %v1103_v29 = vpop.eup %1102  ;;  %v471_v30 = vmul.f32 %v467_v18, %v1389_v58  ;;  %v234_v31 = vmul.f32 %v1101_v20, %v1444_v22  ;;  %v1504_v32 = vpop.f32.mrb[12].mxu1  ;;  %v610_v37 = vand.u32 2147483647, %v1499_v28  ;;  %v1511_v58 = vadd.f32 %v478_v4, %v284_v25 }
 0x127   :  { %v603_v33 = vpop.f32.mrb[13].mxu0  ;;  %v468_v34 = vmul.f32 %v1103_v29, %v1451_v27  ;;  %1110 = vpow2.f32 %v814_v23  ;;  %v816_v36 = vmul.f32 1.442695, %v811_v55  ;;  %v801_v39 = vpop.f32.mrb[13].mxu1  ;;  %v285_v22 = vadd.f32 %v1497_v26, %v261_v19 }
 0x128   :  { %v1508_v40 = vpop.f32.mrb[14].mxu0  ;;  %v475_v42 = vmul.f32 %v471_v30, %v1460_v38  ;;  %1112 = vpow2.f32 %v618_v24  ;;  %v1514_v43 = vpop.f32.mrb[14].mxu1  ;;  %v238_v27 = vmul.f32 %v234_v31, %v1392_v5  ;;  %v614_v50 = vsub.f32 0.0, %v610_v37 }
 0x129   :  { %v606_v44 = vpop.f32.mrb[15].mxu0  ;;  %v1105_v48 = vpop.eup %1104  ;;  %1114 = vpow2.f32 %v816_v36  ;;  %v472_v54 = vmul.f32 %v468_v34, %v1395_v7  ;;  %v808_v60 = vand.u32 2147483647, %v1504_v32  ;;  %v611_v62 = vand.u32 2147483647, %v1508_v40 }
 0x12a   :  { %v804_v53 = vpop.f32.mrb[15].mxu1  ;;  %v235_v56 = vmul.f32 %v1105_v48, %v1458_v35  ;;  %v479_v59 = vadd.f32 %v475_v42, %v1497_v26  ;;  %v620_v46 = vmul.f32 1.442695, %v614_v50  ;;  %v809_v2 = vand.u32 2147483647, %v1514_v43  ;;  %v1529_v3 = vpop.permute.xlu0 %276 }
 0x12b   :  { %v812_v49 = vsub.f32 0.0, %v808_v60  ;;  %vm822_vm10 = vcmp.ge.f32.partialorder %v1470_v52, 0.0  ;;  %v615_v35 = vsub.f32 0.0, %v611_v62  ;;  %v262_v6 = vmul.f32 %v1440_v21, %v238_v27 }
 0x12c   :  { %v1107_v63 = vpop.eup %1106  ;;  %v239_v0 = vmul.f32 %v235_v56, %v1398_v11  ;;  %v1524_v5 = vadd.f32 %v479_v59, %v285_v22  ;;  %1116 = vpow2.f32 %v620_v46  ;;  %vm625_vm11 = vcmp.ge.f32.partialorder %v1479_v61, 0.0  ;;  %v1555_v59 = vpop.permute.xlu1 %281 }
 0x12d   :  { %v469_v7 = vmul.f32 %v1107_v63, %v1475_v41  ;;  %v818_v9 = vmul.f32 1.442695, %v812_v49  ;;  %v813_v11 = vsub.f32 0.0, %v809_v2  ;;  %v476_v51 = vmul.f32 %v472_v54, %v1440_v21 }
 0x12e   :  { %v1109_v8 = vpop.eup %1108  ;;  %v263_v10 = vmul.f32 %v1466_v47, %v239_v0  ;;  %v622_v15 = vmul.f32 1.442695, %v615_v35  ;;  %v286_v18 = vadd.f32 %v1529_v3, %v262_v6  ;;  %vm823_vm12 = vcmp.ge.f32.partialorder %v1484_v1, 0.0 }
 0x12f   :  { %v473_v12 = vmul.f32 %v469_v7, %v1401_v14  ;;  %v628_v41 = vmul.f32 2.0, %v1109_v8  ;;  %v636_v13 = vadd.f32 2.0, %v1109_v8  ;;  %1118 = vpow2.f32 %v818_v9 }
 0x130   :  { %v820_v17 = vmul.f32 1.442695, %v813_v11  ;;  %v480_v19 = vadd.f32 %v476_v51, %v1529_v3  ;;  %1120 = vpow2.f32 %v622_v15  ;;  %vm626_vm13 = vcmp.ge.f32.partialorder %v1499_v28, 0.0 }
 0x131   :  { %v1111_v20 = vpop.eup %1110  ;;  %v632_v23 = vadd.f32 1.0, %v628_v41  ;;  %v640_v24 = vmul.f32 %v1109_v8, %v636_v13  ;;  %v648_v55 = vmul.f32 %v1109_v8, %v628_v41  ;;  %vm824_vm14 = vcmp.ge.f32.partialorder %v1504_v32, 0.0 }
 0x132   :  { %v1113_v25 = vpop.eup %1112  ;;  %v826_v29 = vmul.f32 2.0, %v1111_v20  ;;  %v834_v30 = vadd.f32 2.0, %v1111_v20  ;;  %1122 = vpow2.f32 %v820_v17  ;;  %v1539_v14 = vadd.f32 %v480_v19, %v286_v18 }
 0x133   :  { %v1115_v31 = vpop.eup %1114  ;;  %v1543_v4 = vsel %vm624_vm9, %v632_v23, %v640_v24  ;;  %v652_v33 = vsel %vm624_vm9, %v648_v55, 2.0  ;;  %v629_v34 = vmul.f32 2.0, %v1113_v25  ;;  %v637_v36 = vadd.f32 2.0, %v1113_v25 }
 0x134   :  { %v656_v37 = vadd.f32 %v652_v33, %v1543_v4  ;;  %v830_v39 = vadd.f32 1.0, %v826_v29  ;;  %v838_v42 = vmul.f32 %v1111_v20, %v834_v30  ;;  %v846_v22 = vmul.f32 %v1111_v20, %v826_v29 }
 0x135   :  { %v633_v44 = vadd.f32 1.0, %v629_v34  ;;  %v641_v48 = vmul.f32 %v1113_v25, %v637_v36  ;;  %v649_v27 = vmul.f32 %v1113_v25, %v629_v34  ;;  %v827_v50 = vmul.f32 2.0, %v1115_v31 }
 0x136   :  { %1124 = vrcp.f32 %v656_v37  ;;  %v1551_v53 = vsel %vm822_vm10, %v830_v39, %v838_v42  ;;  %v850_v54 = vsel %vm822_vm10, %v846_v22, 2.0  ;;  %v835_v56 = vadd.f32 2.0, %v1115_v31  ;;  %v1117_v60 = vpop.eup %1116 }
 0x137   :  { %v854_v46 = vadd.f32 %v850_v54, %v1551_v53  ;;  %v1560_v62 = vsel %vm625_vm11, %v633_v44, %v641_v48  ;;  %v653_v63 = vsel %vm625_vm11, %v649_v27, 2.0  ;;  %v831_v0 = vadd.f32 1.0, %v827_v50 }
 0x138   :  { %v657_v49 = vadd.f32 %v653_v63, %v1560_v62  ;;  %v839_v2 = vmul.f32 %v1115_v31, %v835_v56  ;;  %v847_v7 = vmul.f32 %v1115_v31, %v827_v50  ;;  %v630_v35 = vmul.f32 2.0, %v1117_v60 }
 0x139   :  { %vm627_vm15 = vcmp.ge.f32.partialorder %v1508_v40, 0.0  ;;  %1126 = vrcp.f32 %v854_v46  ;;  %v638_v6 = vadd.f32 2.0, %v1117_v60  ;;  %v287_v8 = vadd.f32 %v1555_v59, %v263_v10  ;;  %v1119_v11 = vpop.eup %1118 }
 0x13a   :  { %v477_v9 = vmul.f32 %v473_v12, %v1466_v47  ;;  %1128 = vrcp.f32 %v657_v49  ;;  %v843_v51 = vsel %vm823_vm12, %v831_v0, %v839_v2  ;;  %v851_v41 = vsel %vm823_vm12, %v847_v7, 2.0  ;;  %v1121_v15 = vpop.eup %1120 }
 0x13b   :  { %v634_v13 = vadd.f32 1.0, %v630_v35  ;;  %v855_v17 = vadd.f32 %v851_v41, %v843_v51  ;;  %v642_v18 = vmul.f32 %v1117_v60, %v638_v6  ;;  %v650_v19 = vmul.f32 %v1117_v60, %v630_v35 }
 0x13c   :  { %v828_v20 = vmul.f32 2.0, %v1119_v11  ;;  %v1123_v23 = vpop.eup %1122  ;;  %v836_v24 = vadd.f32 2.0, %v1119_v11  ;;  %v631_v55 = vmul.f32 2.0, %v1121_v15  ;;  %v639_v10 = vadd.f32 2.0, %v1121_v15 }
 0x13d   :  { %v481_v12 = vadd.f32 %v477_v9, %v1555_v59  ;;  %1130 = vrcp.f32 %v855_v17  ;;  %v646_v25 = vsel %vm626_vm13, %v634_v13, %v642_v18  ;;  %v654_v29 = vsel %vm626_vm13, %v650_v19, 2.0 }
 0x13e   :  { %v832_v30 = vadd.f32 1.0, %v828_v20  ;;  %v658_v31 = vadd.f32 %v654_v29, %v646_v25  ;;  %v840_v33 = vmul.f32 %v1119_v11, %v836_v24  ;;  %v848_v34 = vmul.f32 %v1119_v11, %v828_v20 }
 0x13f   :  { %v635_v36 = vadd.f32 1.0, %v631_v55  ;;  %v643_v37 = vmul.f32 %v1121_v15, %v639_v10  ;;  %v651_v39 = vmul.f32 %v1121_v15, %v631_v55  ;;  %v829_v42 = vmul.f32 2.0, %v1123_v23 }
 0x140   :  { %v837_v22 = vadd.f32 2.0, %v1123_v23  ;;  %v1125_v44 = vpop.eup %1124  ;;  %1132 = vrcp.f32 %v658_v31  ;;  %v844_v48 = vsel %vm824_vm14, %v832_v30, %v840_v33  ;;  %v852_v27 = vsel %vm824_vm14, %v848_v34, 2.0 }
 0x141   :  { %v1582_v50 = vadd.f32 %v481_v12, %v287_v8  ;;  %v664_v54 = vmul.f32 %v1125_v44, %v1543_v4  ;;  %v856_v56 = vadd.f32 %v852_v27, %v844_v48  ;;  %v647_v60 = vsel %vm627_vm15, %v635_v36, %v643_v37 }
 0x142   :  { %v655_v46 = vsel %vm627_vm15, %v651_v39, 2.0  ;;  %v833_v0 = vadd.f32 1.0, %v829_v42  ;;  %v841_v49 = vmul.f32 %v1123_v23, %v837_v22  ;;  %v849_v2 = vmul.f32 %v1123_v23, %v829_v42 }
 0x143   :  { %v659_v63 = vadd.f32 %v655_v46, %v647_v60  ;;  %v1127_v7 = vpop.eup %1126  ;;  %v668_v35 = vmul.f32 %v664_v54, %v1464_v45  ;;  %1134 = vrcp.f32 %v856_v56  ;;  %vm825_vm0 = vcmp.ge.f32.partialorder %v1514_v43, 0.0 }
 0x144   :  { %v1129_v6 = vpop.eup %1128  ;;  %v862_v4 = vmul.f32 %v1127_v7, %v1551_v53  ;;  %v845_v8 = vsel %vm825_vm0, %v833_v0, %v841_v49  ;;  %v853_v9 = vsel %vm825_vm0, %v849_v2, 2.0 }
 0x145   :  { %1136 = vrcp.f32 %v659_v63  ;;  %v672_v11 = vmul.f32 %v668_v35, %v1437_v16  ;;  %v665_v41 = vmul.f32 %v1129_v6, %v1560_v62  ;;  %v857_v13 = vadd.f32 %v853_v9, %v845_v8 }
 0x146   :  { %v866_v15 = vmul.f32 %v862_v4, %v1470_v52 }
 0x147   :  { %v1131_v17 = vpop.eup %1130  ;;  %v669_v18 = vmul.f32 %v665_v41, %v1479_v61  ;;  %v676_v45 = vadd.f32 %v672_v11, %v1491_v57  ;;  %1138 = vrcp.f32 %v857_v13 }
 0x148   :  { %v870_v19 = vmul.f32 %v866_v15, %v1437_v16  ;;  %v863_v20 = vmul.f32 %v1131_v17, %v843_v51 }
 0x149   :  { %v673_v53 = vmul.f32 %v669_v18, %v1460_v38  ;;  %v680_v23 = vadd.f32 %v676_v45, %v1511_v58 }
 0x14a   :  { %v1133_v24 = vpop.eup %1132  ;;  %v867_v55 = vmul.f32 %v863_v20, %v1484_v1  ;;  %v874_v62 = vadd.f32 %v870_v19, %v1491_v57 }
 0x14b   :  { %v677_v52 = vadd.f32 %v673_v53, %v1497_v26  ;;  %v666_v10 = vmul.f32 %v1133_v24, %v646_v25 }
 0x14c   :  { %v871_v61 = vmul.f32 %v867_v55, %v1460_v38  ;;  %v878_v12 = vadd.f32 %v874_v62, %v680_v23 }
 0x14d   :  { %v1135_v29 = vpop.eup %1134  ;;  %v681_v30 = vadd.f32 %v677_v52, %v1524_v5  ;;  %v670_v16 = vmul.f32 %v666_v10, %v1499_v28 }
 0x14e   :  { %v875_v31 = vadd.f32 %v871_v61, %v1497_v26  ;;  %v864_v58 = vmul.f32 %v1135_v29, %v844_v48  ;;  %v882_v37 = vmul.f32 0.25, %v878_v12 }
 0x14f   :  { %v1137_v51 = vpop.eup %1136  ;;  %v674_v1 = vmul.f32 %v670_v16, %v1440_v21 }
 0x150   :  { %v667_v33 = vmul.f32 %v1137_v51, %v647_v60  ;;  %v879_v34 = vadd.f32 %v875_v31, %v681_v30  ;;  %v868_v57 = vmul.f32 %v864_v58, %v1504_v32 }
 0x151   :  { %v1139_v36 = vpop.eup %1138  ;;  %v678_v38 = vadd.f32 %v674_v1, %v1529_v3 }
 0x152   :  { %v671_v25 = vmul.f32 %v667_v33, %v1508_v40  ;;  %v883_v39 = vmul.f32 0.25, %v879_v34  ;;  %v865_v5 = vmul.f32 %v1139_v36, %v845_v8  ;;  %v872_v28 = vmul.f32 %v868_v57, %v1440_v21 }
 0x153   :  { %v682_v42 = vadd.f32 %v678_v38, %v1539_v14 }
 0x154   :  { %v675_v26 = vmul.f32 %v671_v25, %v1466_v47  ;;  %v1023_v22 = vpack.c.bf16 %v883_v39, %v882_v37  ;;  %v869_v44 = vmul.f32 %v865_v5, %v1514_v43  ;;  %v876_v48 = vadd.f32 %v872_v28, %v1529_v3 }
 0x156   :  { %v679_v32 = vadd.f32 %v675_v26, %v1555_v59  ;;  %v880_v27 = vadd.f32 %v876_v48, %v682_v42  ;;  %v873_v40 = vmul.f32 %v869_v44, %v1466_v47  ;;  %1024 = vst [vmem:[%s1630_s4] sm:$0xff] %v1023_v22  }
 0x158   :  { %v683_v21 = vadd.f32 %v679_v32, %v1582_v50  ;;  %v877_v14 = vadd.f32 %v873_v40, %v1555_v59  ;;  %v884_v56 = vmul.f32 0.25, %v880_v27 }
 0x15a   :  { %v881_v54 = vadd.f32 %v877_v14, %v683_v21 }
 0x15c   :  { %v885_v60 = vmul.f32 0.25, %v881_v54 }
 0x15e   :  { %v1028_v46 = vpack.c.bf16 %v885_v60, %v884_v56 }
 0x160   :  { %1030 = vst [vmem:[%s1630_s4 + $0x8] sm:$0xff] %v1028_v46  }

// kernel: forward.20
= control target key start
LH: loop header
LB: loop body
LE: loop exit
PB: predicated region body
PF: predicated region fallthrough
CT: control target
= control target key end

     0   :  { %v579_v1 = vmov 0   ;;  %vm200_vm0 = vcmask 261120   ;;  %s729_s1 = inlined_call_operand.vmem [shape: bf16[288,128], index: 1, kind: input, shape index: {}]   ;;  %s730_s0 = inlined_call_operand.vmem [shape: bf16[32,288], index: 0, kind: input, shape index: {}]   ;;  %s731_s2 = inlined_call_operand.vmem [shape: f32[32,1], index: 2, kind: input, shape index: {}]   ;;  %s732_s3 = inlined_call_operand.vmem [shape: f32[32,1], index: 3, kind: input, shape index: {}]   ;;  %s733_s4 = inlined_call_operand.vmem [shape: bf16[32,128], index: 4, kind: output, shape index: {}]  }
   0x1   :  { %v537_v0 = vld [vmem:[%s729_s1 + $0x40] sm:$0xff]   ;;  %536 = vset.pattern.permute.xlu1 %v579_v1  ;;  %535 = vset.pattern.permute.xlu0 %v579_v1  ;;  %v539_v3 = vld [vmem:[%s729_s1 + $0x48] sm:$0xff]   ;;  %v541_v5 = vld [vmem:[%s729_s1 + $0x50] sm:$0xff]  }
   0x2   :  { %v538_v2 = vld [vmem:[%s729_s1] sm:$0xff]   ;;  %494 = vmatprep.subr.bf16.mxu0 %v537_v0  ;;  %v540_v4 = vld [vmem:[%s729_s1 + $0x8] sm:$0xff]   ;;  %v542_v6 = vld [vmem:[%s729_s1 + $0x10] sm:$0xff]  }
   0x3   :  { %495 = vmatpush3.bf16.msra.mxu0 %v538_v2  ;;  %v543_v7 = vld [vmem:[%s729_s1 + $0x58] sm:$0xff]   ;;  %v545_v9 = vld [vmem:[%s729_s1 + $0x60] sm:$0xff]   ;;  %v547_v12 = vld [vmem:[%s729_s1 + $0x68] sm:$0xff]  }
   0x4   :  { %496 = vmatprep.subr.bf16.mxu0 %v539_v3  ;;  %v544_v8 = vld [vmem:[%s729_s1 + $0x18] sm:$0xff]   ;;  %v551_v10 = vld [vmem:[%s729_s1 + $0x80] sm:$0xff]   ;;  %v548_v13 = vld [vmem:[%s729_s1 + $0x28] sm:$0xff]  }
   0x5   :  { %v546_v11 = vld [vmem:[%s729_s1 + $0x20] sm:$0xff]   ;;  %526 = vmatprep.subr.bf16.mxu1 %v551_v10  ;;  %v554_v14 = vld [vmem:[%s729_s1 + $0x88] sm:$0xff]   ;;  %v549_v15 = vld [vmem:[%s729_s1 + $0x70] sm:$0xff]  }
   0x6   :  { %527 = vmatpush3.bf16.msra.mxu1 %v551_v10  ;;  %v557_v16 = vld [vmem:[%s730_s0 + $0x4] ss:$12 sps:$4 sm:$0xff]   ;;  %v558_v17 = vld [vmem:[%s730_s0 + $0x8] ss:$12 sps:$4 sm:$0xff]   ;;  %v559_v18 = vld [vmem:[%s730_s0 + $0x20] ss:$12 sps:$4 sm:$0xff]  }
   0x7   :  { %497 = vmatpush3.bf16.msra.mxu0 %v540_v4  ;;  %528 = vmatprep.subr.bf16.mxu1 %v554_v14  ;;  %v307_v19 = vld [vmem:[%s731_s2 + $0x10] sm:$0xff]  ;;  %v305_v21 = vld [vmem:[%s731_s2] sm:$0xff]  ;;  %v552_v22 = vld [vmem:[%s729_s1 + $0x78] sm:$0xff]  }
   0x8   :  { %498 = vmatprep.subr.bf16.mxu0 %v541_v5  ;;  %239 = vmatprep.mubr.bf16.mxu0 %v557_v16  ;;  %v550_v20 = vld [vmem:[%s729_s1 + $0x30] sm:$0xff]   ;;  %v308_v23 = vld [vmem:[%s731_s2 + $0x18] sm:$0xff]  ;;  %v306_v24 = vld [vmem:[%s731_s2 + $0x8] sm:$0xff] }
   0x9   :  { %530 = vmatprep.mubr.msk.bf16.mxu1 %vm200_vm0, %v558_v17  ;;  %389 = vperm.xlu1 %536, %v307_v19   ;;  %v553_v25 = vld [vmem:[%s729_s1 + $0x38] sm:$0xff]   ;;  %v310_v26 = vld [vmem:[%s732_s3 + $0x8] sm:$0xff]  ;;  %v309_v28 = vld [vmem:[%s732_s3] sm:$0xff] }
   0xa   :  { %529 = vmatpush3.bf16.msra.mxu1 %v554_v14  ;;  %379 = vperm.xlu0 %535, %v305_v21   ;;  %v555_v27 = vld [vmem:[%s730_s0] ss:$12 sps:$4 sm:$0xff]   ;;  %v560_v29 = vld [vmem:[%s730_s0 + $0x1c] ss:$12 sps:$4 sm:$0xff]   ;;  %v311_v31 = vld [vmem:[%s732_s3 + $0x10] sm:$0xff] }
   0xb   :  { %499 = vmatpush3.bf16.msra.mxu0 %v542_v6  ;;  %v312_v30 = vld [vmem:[%s732_s3 + $0x18] sm:$0xff] }
   0xc   :  { %500 = vmatprep.subr.bf16.mxu0 %v543_v7  ;;  %v562_v32 = vld [vmem:[%s730_s0 + $0x18] ss:$12 sps:$4 sm:$0xff]  }
   0xd   :  { %531 = vmatmul.mubr.msk.bf16.vlgmr.msra.gmra.mrb[0].mxu1 %vm200_vm0, %v559_v18  ;;  %394 = vperm.xlu1 %536, %v308_v23  }
   0xe   :  { %384 = vperm.xlu0 %535, %v306_v24  }
   0xf   :  { %501 = vmatpush3.bf16.msra.mxu0 %v544_v8 }
  0x10   :  { %502 = vmatprep.subr.bf16.mxu0 %v545_v9 }
  0x11   :  { %408 = vperm.xlu1 %536, %v310_v26  }
  0x12   :  { %403 = vperm.xlu0 %535, %v309_v28  }
  0x13   :  { %503 = vmatpush3.bf16.msra.mxu0 %v546_v11 }
  0x14   :  { %504 = vmatprep.subr.bf16.mxu0 %v547_v12 }
  0x15   :  { %418 = vperm.xlu1 %536, %v312_v30  }
  0x16   :  { %413 = vperm.xlu0 %535, %v311_v31  }
  0x17   :  { %505 = vmatpush3.bf16.msra.mxu0 %v548_v13 }
  0x18   :  { %506 = vmatprep.subr.bf16.mxu0 %v549_v15 }
  0x1b   :  { %507 = vmatpush3.bf16.msra.mxu0 %v550_v20 }
  0x1c   :  { %508 = vmatprep.subr.bf16.mxu0 %v552_v22 }
  0x1f   :  { %509 = vmatpush3.bf16.msra.mxu0 %v553_v25 }
  0x22   :  { %240 = vmatmul.mubr.bf16.vlgmr.msra.gmra.mrb[0].mxu0 %v555_v27 }
  0x23   :  { %247 = vmatprep.mubr.bf16.mxu0 %v560_v29 }
  0x2a   :  { %248 = vmatmul.mubr.bf16.gmra.mrb[4].mxu0 %v562_v32 }
  0xe0   :  { %v532_v33 = vpop.f32.mrb[0].mxu1 }
  0xe1   :  { %v290_v34 = vpop.f32.mrb[1].mxu1 }
  0xe2   :  { %v533_v35 = vpop.f32.mrb[2].mxu1 }
  0xe3   :  { %v293_v36 = vpop.f32.mrb[3].mxu1 }
  0xf5   :  { %v510_v37 = vpop.f32.mrb[0].mxu0 }
  0xf6   :  { %v511_v38 = vpop.f32.mrb[1].mxu0 }
  0xf7   :  { %v512_v39 = vadd.f32 %v511_v38, %v510_v37  ;;  %v513_v40 = vpop.f32.mrb[2].mxu0 }
  0xf8   :  { %v514_v41 = vpop.f32.mrb[3].mxu0 }
  0xf9   :  { %v515_v42 = vadd.f32 %v514_v41, %v513_v40  ;;  %v703_v43 = vadd.f32 %v512_v39, %v290_v34 }
  0xfb   :  { %v313_v44 = vand.u32 2147483647, %v703_v43  ;;  %v706_v45 = vadd.f32 %v515_v42, %v293_v36  ;;  %vm329_vm1 = vcmp.ge.f32.partialorder %v703_v43, 0.0  ;;  %v380_v36 = vpop.permute.xlu0 %379 }
  0xfd   :  { %v317_v46 = vsub.f32 0.0, %v313_v44  ;;  %v314_v47 = vand.u32 2147483647, %v706_v45  ;;  %v516_v48 = vpop.f32.mrb[4].mxu0  ;;  %vm330_vm2 = vcmp.ge.f32.partialorder %v706_v45, 0.0 }
  0xfe   :  { %v517_v49 = vpop.f32.mrb[5].mxu0 }
  0xff   :  { %v321_v50 = vmul.f32 1.442695, %v317_v46  ;;  %v318_v51 = vsub.f32 0.0, %v314_v47  ;;  %v518_v52 = vadd.f32 %v517_v49, %v516_v48  ;;  %v519_v53 = vpop.f32.mrb[6].mxu0  ;;  %v385_v46 = vpop.permute.xlu0 %384 }
 0x100   :  { %v520_v54 = vpop.f32.mrb[7].mxu0 }
 0x101   :  { %563 = vpow2.f32 %v321_v50  ;;  %v323_v55 = vmul.f32 1.442695, %v318_v51  ;;  %v709_v56 = vadd.f32 %v532_v33, %v518_v52  ;;  %v521_v57 = vadd.f32 %v520_v54, %v519_v53 }
 0x103   :  { %565 = vpow2.f32 %v323_v55  ;;  %v315_v58 = vand.u32 2147483647, %v709_v56  ;;  %v712_v59 = vadd.f32 %v533_v35, %v521_v57  ;;  %vm331_vm3 = vcmp.ge.f32.partialorder %v709_v56, 0.0  ;;  %v390_v35 = vpop.permute.xlu1 %389  ;;  %v404_v54 = vpop.permute.xlu0 %403 }
 0x105   :  { %v319_v60 = vsub.f32 0.0, %v315_v58  ;;  %v316_v61 = vand.u32 2147483647, %v712_v59  ;;  %vm332_vm4 = vcmp.ge.f32.partialorder %v712_v59, 0.0 }
 0x107   :  { %v325_v62 = vmul.f32 1.442695, %v319_v60  ;;  %v320_v63 = vsub.f32 0.0, %v316_v61  ;;  %v395_v44 = vpop.permute.xlu1 %394 }
 0x109   :  { %567 = vpow2.f32 %v325_v62  ;;  %v327_v0 = vmul.f32 1.442695, %v320_v63 }
 0x10b   :  { %v564_v1 = vpop.eup %563  ;;  %569 = vpow2.f32 %v327_v0  ;;  %v409_v53 = vpop.permute.xlu1 %408 }
 0x10c   :  { %v333_v2 = vmul.f32 2.0, %v564_v1  ;;  %v341_v3 = vadd.f32 2.0, %v564_v1 }
 0x10d   :  { %v566_v4 = vpop.eup %565 }
 0x10e   :  { %v353_v5 = vmul.f32 %v564_v1, %v333_v2  ;;  %v334_v6 = vmul.f32 2.0, %v566_v4  ;;  %v337_v7 = vadd.f32 1.0, %v333_v2  ;;  %v345_v8 = vmul.f32 %v564_v1, %v341_v3  ;;  %v414_v1 = vpop.permute.xlu0 %413 }
 0x10f   :  { %v342_v9 = vadd.f32 2.0, %v566_v4  ;;  %v419_v0 = vpop.permute.xlu1 %418 }
 0x110   :  { %v357_v10 = vsel %vm329_vm1, %v353_v5, 2.0  ;;  %v354_v11 = vmul.f32 %v566_v4, %v334_v6  ;;  %v349_v12 = vsel %vm329_vm1, %v337_v7, %v345_v8  ;;  %v338_v13 = vadd.f32 1.0, %v334_v6 }
 0x111   :  { %v361_v14 = vadd.f32 %v357_v10, %v349_v12  ;;  %v346_v15 = vmul.f32 %v566_v4, %v342_v9 }
 0x112   :  { %v358_v16 = vsel %vm330_vm2, %v354_v11, 2.0 }
 0x113   :  { %v568_v17 = vpop.eup %567  ;;  %571 = vrcp.f32 %v361_v14  ;;  %v350_v18 = vsel %vm330_vm2, %v338_v13, %v346_v15 }
 0x114   :  { %v335_v19 = vmul.f32 2.0, %v568_v17  ;;  %v343_v20 = vadd.f32 2.0, %v568_v17  ;;  %v362_v21 = vadd.f32 %v358_v16, %v350_v18 }
 0x115   :  { %v570_v22 = vpop.eup %569 }
 0x116   :  { %v339_v23 = vadd.f32 1.0, %v335_v19  ;;  %v347_v24 = vmul.f32 %v568_v17, %v343_v20  ;;  %v355_v25 = vmul.f32 %v568_v17, %v335_v19  ;;  %v336_v26 = vmul.f32 2.0, %v570_v22 }
 0x117   :  { %v344_v27 = vadd.f32 2.0, %v570_v22  ;;  %573 = vrcp.f32 %v362_v21 }
 0x118   :  { %v351_v28 = vsel %vm331_vm3, %v339_v23, %v347_v24  ;;  %v359_v29 = vsel %vm331_vm3, %v355_v25, 2.0  ;;  %v340_v30 = vadd.f32 1.0, %v336_v26  ;;  %v356_v31 = vmul.f32 %v570_v22, %v336_v26 }
 0x119   :  { %v363_v32 = vadd.f32 %v359_v29, %v351_v28  ;;  %v348_v33 = vmul.f32 %v570_v22, %v344_v27 }
 0x11a   :  { %v360_v34 = vsel %vm332_vm4, %v356_v31, 2.0 }
 0x11b   :  { %575 = vrcp.f32 %v363_v32  ;;  %v352_v37 = vsel %vm332_vm4, %v340_v30, %v348_v33 }
 0x11c   :  { %v364_v38 = vadd.f32 %v360_v34, %v352_v37 }
 0x11d   :  { %v572_v39 = vpop.eup %571 }
 0x11e   :  { %v369_v40 = vmul.f32 %v572_v39, %v349_v12  ;;  %577 = vrcp.f32 %v364_v38 }
 0x120   :  { %v373_v41 = vmul.f32 %v369_v40, %v703_v43 }
 0x121   :  { %v574_v42 = vpop.eup %573 }
 0x122   :  { %v370_v47 = vmul.f32 %v574_v42, %v350_v18  ;;  %v397_v48 = vmul.f32 %v380_v36, %v373_v41 }
 0x124   :  { %v374_v49 = vmul.f32 %v370_v47, %v706_v45  ;;  %v421_v60 = vadd.f32 %v404_v54, %v397_v48 }
 0x125   :  { %v576_v50 = vpop.eup %575 }
 0x126   :  { %v371_v51 = vmul.f32 %v576_v50, %v351_v28  ;;  %v398_v52 = vmul.f32 %v385_v46, %v374_v49 }
 0x128   :  { %v578_v55 = vpop.eup %577  ;;  %v375_v57 = vmul.f32 %v371_v51, %v709_v56  ;;  %v422_v58 = vadd.f32 %v409_v53, %v398_v52 }
 0x129   :  { %v372_v61 = vmul.f32 %v578_v55, %v352_v37 }
 0x12a   :  { %v486_v62 = vpack.c.bf16 %v422_v58, %v421_v60  ;;  %v399_v43 = vmul.f32 %v390_v35, %v375_v57 }
 0x12b   :  { %v376_v63 = vmul.f32 %v372_v61, %v712_v59 }
 0x12c   :  { %487 = vst [vmem:[%s733_s4] sm:$0xff] %v486_v62   ;;  %v423_v3 = vadd.f32 %v414_v1, %v399_v43 }
 0x12d   :  { %v400_v45 = vmul.f32 %v395_v44, %v376_v63 }
 0x12f   :  { %v424_v2 = vadd.f32 %v419_v0, %v400_v45 }
 0x131   :  { %v491_v4 = vpack.c.bf16 %v424_v2, %v423_v3 }
 0x133   :  { %493 = vst [vmem:[%s733_s4 + $0x8] sm:$0xff] %v491_v4  }

// kernel: forward.21
= control target key start
LH: loop header
LB: loop body
LE: loop exit
PB: predicated region body
PF: predicated region fallthrough
CT: control target
= control target key end

     0   :  { %v603_v1 = vmov 0   ;;  %vm203_vm0 = vcmask 261120   ;;  %s764_s1 = inlined_call_operand.vmem [shape: bf16[288,128], index: 1, kind: input, shape index: {}]   ;;  %s765_s0 = inlined_call_operand.vmem [shape: bf16[32,288], index: 0, kind: input, shape index: {}]   ;;  %s766_s2 = inlined_call_operand.vmem [shape: f32[32,1], index: 2, kind: input, shape index: {}]   ;;  %s767_s3 = inlined_call_operand.vmem [shape: f32[32,1], index: 3, kind: input, shape index: {}]   ;;  %s768_s4 = inlined_call_operand.vmem [shape: bf16[32,128], index: 4, kind: input, shape index: {}]   ;;  %s769_s5 = inlined_call_operand.vmem [shape: bf16[32,128], index: 5, kind: output, shape index: {}]  }
   0x1   :  { %v561_v0 = vld [vmem:[%s764_s1 + $0x40] sm:$0xff]   ;;  %560 = vset.pattern.permute.xlu1 %v603_v1  ;;  %559 = vset.pattern.permute.xlu0 %v603_v1  ;;  %v563_v3 = vld [vmem:[%s764_s1 + $0x48] sm:$0xff]   ;;  %v565_v5 = vld [vmem:[%s764_s1 + $0x50] sm:$0xff]  }
   0x2   :  { %v562_v2 = vld [vmem:[%s764_s1] sm:$0xff]   ;;  %518 = vmatprep.subr.bf16.mxu0 %v561_v0  ;;  %v564_v4 = vld [vmem:[%s764_s1 + $0x8] sm:$0xff]   ;;  %v566_v6 = vld [vmem:[%s764_s1 + $0x10] sm:$0xff]  }
   0x3   :  { %519 = vmatpush3.bf16.msra.mxu0 %v562_v2  ;;  %v567_v7 = vld [vmem:[%s764_s1 + $0x58] sm:$0xff]   ;;  %v569_v9 = vld [vmem:[%s764_s1 + $0x60] sm:$0xff]   ;;  %v571_v12 = vld [vmem:[%s764_s1 + $0x68] sm:$0xff]  }
   0x4   :  { %520 = vmatprep.subr.bf16.mxu0 %v563_v3  ;;  %v568_v8 = vld [vmem:[%s764_s1 + $0x18] sm:$0xff]   ;;  %v575_v10 = vld [vmem:[%s764_s1 + $0x80] sm:$0xff]   ;;  %v572_v13 = vld [vmem:[%s764_s1 + $0x28] sm:$0xff]  }
   0x5   :  { %v570_v11 = vld [vmem:[%s764_s1 + $0x20] sm:$0xff]   ;;  %550 = vmatprep.subr.bf16.mxu1 %v575_v10  ;;  %v578_v14 = vld [vmem:[%s764_s1 + $0x88] sm:$0xff]   ;;  %v573_v15 = vld [vmem:[%s764_s1 + $0x70] sm:$0xff]  }
   0x6   :  { %551 = vmatpush3.bf16.msra.mxu1 %v575_v10  ;;  %v581_v16 = vld [vmem:[%s765_s0 + $0x4] ss:$12 sps:$4 sm:$0xff]   ;;  %v582_v17 = vld [vmem:[%s765_s0 + $0x8] ss:$12 sps:$4 sm:$0xff]   ;;  %v583_v18 = vld [vmem:[%s765_s0 + $0x20] ss:$12 sps:$4 sm:$0xff]  }
   0x7   :  { %521 = vmatpush3.bf16.msra.mxu0 %v564_v4  ;;  %552 = vmatprep.subr.bf16.mxu1 %v578_v14  ;;  %v310_v19 = vld [vmem:[%s766_s2 + $0x10] sm:$0xff]  ;;  %v308_v21 = vld [vmem:[%s766_s2] sm:$0xff]  ;;  %v576_v22 = vld [vmem:[%s764_s1 + $0x78] sm:$0xff]  }
   0x8   :  { %522 = vmatprep.subr.bf16.mxu0 %v565_v5  ;;  %242 = vmatprep.mubr.bf16.mxu0 %v581_v16  ;;  %v574_v20 = vld [vmem:[%s764_s1 + $0x30] sm:$0xff]   ;;  %v311_v23 = vld [vmem:[%s766_s2 + $0x18] sm:$0xff]  ;;  %v309_v24 = vld [vmem:[%s766_s2 + $0x8] sm:$0xff] }
   0x9   :  { %554 = vmatprep.mubr.msk.bf16.mxu1 %vm203_vm0, %v582_v17  ;;  %392 = vperm.xlu1 %560, %v310_v19   ;;  %v577_v25 = vld [vmem:[%s764_s1 + $0x38] sm:$0xff]   ;;  %v313_v26 = vld [vmem:[%s767_s3 + $0x8] sm:$0xff]  ;;  %v312_v28 = vld [vmem:[%s767_s3] sm:$0xff] }
   0xa   :  { %553 = vmatpush3.bf16.msra.mxu1 %v578_v14  ;;  %382 = vperm.xlu0 %559, %v308_v21   ;;  %v579_v27 = vld [vmem:[%s765_s0] ss:$12 sps:$4 sm:$0xff]   ;;  %v584_v29 = vld [vmem:[%s765_s0 + $0x1c] ss:$12 sps:$4 sm:$0xff]   ;;  %v314_v31 = vld [vmem:[%s767_s3 + $0x10] sm:$0xff] }
   0xb   :  { %523 = vmatpush3.bf16.msra.mxu0 %v566_v6  ;;  %v315_v30 = vld [vmem:[%s767_s3 + $0x18] sm:$0xff] }
   0xc   :  { %524 = vmatprep.subr.bf16.mxu0 %v567_v7  ;;  %v586_v32 = vld [vmem:[%s765_s0 + $0x18] ss:$12 sps:$4 sm:$0xff]  }
   0xd   :  { %555 = vmatmul.mubr.msk.bf16.vlgmr.msra.gmra.mrb[0].mxu1 %vm203_vm0, %v583_v18  ;;  %397 = vperm.xlu1 %560, %v311_v23  }
   0xe   :  { %387 = vperm.xlu0 %559, %v309_v24  }
   0xf   :  { %525 = vmatpush3.bf16.msra.mxu0 %v568_v8 }
  0x10   :  { %526 = vmatprep.subr.bf16.mxu0 %v569_v9 }
  0x11   :  { %411 = vperm.xlu1 %560, %v313_v26  }
  0x12   :  { %406 = vperm.xlu0 %559, %v312_v28  }
  0x13   :  { %527 = vmatpush3.bf16.msra.mxu0 %v570_v11 }
  0x14   :  { %528 = vmatprep.subr.bf16.mxu0 %v571_v12 }
  0x15   :  { %421 = vperm.xlu1 %560, %v315_v30  }
  0x16   :  { %416 = vperm.xlu0 %559, %v314_v31  }
  0x17   :  { %529 = vmatpush3.bf16.msra.mxu0 %v572_v13 }
  0x18   :  { %530 = vmatprep.subr.bf16.mxu0 %v573_v15 }
  0x1b   :  { %531 = vmatpush3.bf16.msra.mxu0 %v574_v20 }
  0x1c   :  { %532 = vmatprep.subr.bf16.mxu0 %v576_v22 }
  0x1f   :  { %533 = vmatpush3.bf16.msra.mxu0 %v577_v25 }
  0x22   :  { %243 = vmatmul.mubr.bf16.vlgmr.msra.gmra.mrb[0].mxu0 %v579_v27 }
  0x23   :  { %250 = vmatprep.mubr.bf16.mxu0 %v584_v29 }
  0x2a   :  { %251 = vmatmul.mubr.bf16.gmra.mrb[4].mxu0 %v586_v32 }
  0xe0   :  { %v556_v33 = vpop.f32.mrb[0].mxu1 }
  0xe1   :  { %v293_v34 = vpop.f32.mrb[1].mxu1 }
  0xe2   :  { %v557_v35 = vpop.f32.mrb[2].mxu1 }
  0xe3   :  { %v296_v36 = vpop.f32.mrb[3].mxu1 }
  0xf5   :  { %v534_v37 = vpop.f32.mrb[0].mxu0 }
  0xf6   :  { %v535_v38 = vpop.f32.mrb[1].mxu0 }
  0xf7   :  { %v536_v39 = vadd.f32 %v535_v38, %v534_v37  ;;  %v537_v40 = vpop.f32.mrb[2].mxu0 }
  0xf8   :  { %v538_v41 = vpop.f32.mrb[3].mxu0 }
  0xf9   :  { %v539_v42 = vadd.f32 %v538_v41, %v537_v40  ;;  %v732_v43 = vadd.f32 %v536_v39, %v293_v34 }
  0xfb   :  { %v316_v44 = vand.u32 2147483647, %v732_v43  ;;  %v735_v45 = vadd.f32 %v539_v42, %v296_v36  ;;  %vm332_vm1 = vcmp.ge.f32.partialorder %v732_v43, 0.0  ;;  %v393_v36 = vpop.permute.xlu1 %392 }
  0xfd   :  { %v320_v46 = vsub.f32 0.0, %v316_v44  ;;  %v317_v47 = vand.u32 2147483647, %v735_v45  ;;  %v540_v48 = vpop.f32.mrb[4].mxu0  ;;  %vm333_vm2 = vcmp.ge.f32.partialorder %v735_v45, 0.0 }
  0xfe   :  { %v541_v49 = vpop.f32.mrb[5].mxu0 }
  0xff   :  { %v324_v50 = vmul.f32 1.442695, %v320_v46  ;;  %v321_v51 = vsub.f32 0.0, %v317_v47  ;;  %v542_v52 = vadd.f32 %v541_v49, %v540_v48  ;;  %v543_v53 = vpop.f32.mrb[6].mxu0  ;;  %v398_v46 = vpop.permute.xlu1 %397  ;;  %v499_v49 = vld [vmem:[%s768_s4] sm:$0xff]  }
 0x100   :  { %v544_v54 = vpop.f32.mrb[7].mxu0 }
 0x101   :  { %587 = vpow2.f32 %v324_v50  ;;  %v326_v55 = vmul.f32 1.442695, %v321_v51  ;;  %v738_v56 = vadd.f32 %v556_v33, %v542_v52  ;;  %v545_v57 = vadd.f32 %v544_v54, %v543_v53  ;;  %v383_v33 = vpop.permute.xlu0 %382 }
 0x102   :  { %v500_v52 = vunpack.c.l.bf16 %v499_v49 }
 0x103   :  { %589 = vpow2.f32 %v326_v55  ;;  %v318_v58 = vand.u32 2147483647, %v738_v56  ;;  %v741_v59 = vadd.f32 %v557_v35, %v545_v57  ;;  %vm334_vm3 = vcmp.ge.f32.partialorder %v738_v56, 0.0 }
 0x104   :  { %v501_v57 = vunpack.c.h.bf16 %v499_v49 }
 0x105   :  { %v322_v60 = vsub.f32 0.0, %v318_v58  ;;  %v319_v61 = vand.u32 2147483647, %v741_v59  ;;  %vm335_vm4 = vcmp.ge.f32.partialorder %v741_v59, 0.0  ;;  %v388_v41 = vpop.permute.xlu0 %387 }
 0x107   :  { %v328_v62 = vmul.f32 1.442695, %v322_v60  ;;  %v323_v63 = vsub.f32 0.0, %v319_v61  ;;  %v412_v60 = vpop.permute.xlu1 %411 }
 0x109   :  { %591 = vpow2.f32 %v328_v62  ;;  %v330_v0 = vmul.f32 1.442695, %v323_v63  ;;  %v407_v53 = vpop.permute.xlu0 %406 }
 0x10b   :  { %v588_v1 = vpop.eup %587  ;;  %593 = vpow2.f32 %v330_v0 }
 0x10c   :  { %v336_v2 = vmul.f32 2.0, %v588_v1  ;;  %v344_v3 = vadd.f32 2.0, %v588_v1 }
 0x10d   :  { %v590_v4 = vpop.eup %589 }
 0x10e   :  { %v356_v5 = vmul.f32 %v588_v1, %v336_v2  ;;  %v337_v6 = vmul.f32 2.0, %v590_v4  ;;  %v340_v7 = vadd.f32 1.0, %v336_v2  ;;  %v348_v8 = vmul.f32 %v588_v1, %v344_v3 }
 0x10f   :  { %v345_v9 = vadd.f32 2.0, %v590_v4 }
 0x110   :  { %v360_v10 = vsel %vm332_vm1, %v356_v5, 2.0  ;;  %v357_v11 = vmul.f32 %v590_v4, %v337_v6  ;;  %v352_v12 = vsel %vm332_vm1, %v340_v7, %v348_v8  ;;  %v341_v13 = vadd.f32 1.0, %v337_v6  ;;  %v417_v5 = vpop.permute.xlu0 %416 }
 0x111   :  { %v364_v14 = vadd.f32 %v360_v10, %v352_v12  ;;  %v349_v15 = vmul.f32 %v590_v4, %v345_v9 }
 0x112   :  { %v361_v16 = vsel %vm333_vm2, %v357_v11, 2.0 }
 0x113   :  { %v592_v17 = vpop.eup %591  ;;  %595 = vrcp.f32 %v364_v14  ;;  %v353_v18 = vsel %vm333_vm2, %v341_v13, %v349_v15 }
 0x114   :  { %v338_v19 = vmul.f32 2.0, %v592_v17  ;;  %v346_v20 = vadd.f32 2.0, %v592_v17  ;;  %v365_v21 = vadd.f32 %v361_v16, %v353_v18 }
 0x115   :  { %v594_v22 = vpop.eup %593 }
 0x116   :  { %v342_v23 = vadd.f32 1.0, %v338_v19  ;;  %v350_v24 = vmul.f32 %v592_v17, %v346_v20  ;;  %v358_v25 = vmul.f32 %v592_v17, %v338_v19  ;;  %v339_v26 = vmul.f32 2.0, %v594_v22 }
 0x117   :  { %v347_v27 = vadd.f32 2.0, %v594_v22  ;;  %597 = vrcp.f32 %v365_v21 }
 0x118   :  { %v354_v28 = vsel %vm334_vm3, %v342_v23, %v350_v24  ;;  %v362_v29 = vsel %vm334_vm3, %v358_v25, 2.0  ;;  %v343_v30 = vadd.f32 1.0, %v339_v26  ;;  %v359_v31 = vmul.f32 %v594_v22, %v339_v26 }
 0x119   :  { %v366_v32 = vadd.f32 %v362_v29, %v354_v28  ;;  %v351_v34 = vmul.f32 %v594_v22, %v347_v27 }
 0x11a   :  { %v363_v35 = vsel %vm335_vm4, %v359_v31, 2.0 }
 0x11b   :  { %599 = vrcp.f32 %v366_v32  ;;  %v355_v37 = vsel %vm335_vm4, %v343_v30, %v351_v34 }
 0x11c   :  { %v367_v38 = vadd.f32 %v363_v35, %v355_v37 }
 0x11d   :  { %v596_v39 = vpop.eup %595 }
 0x11e   :  { %v372_v40 = vmul.f32 %v596_v39, %v352_v12  ;;  %601 = vrcp.f32 %v367_v38 }
 0x120   :  { %v376_v42 = vmul.f32 %v372_v40, %v732_v43 }
 0x121   :  { %v598_v44 = vpop.eup %597 }
 0x122   :  { %v400_v47 = vmul.f32 %v383_v33, %v376_v42  ;;  %v373_v48 = vmul.f32 %v598_v44, %v353_v18 }
 0x124   :  { %v377_v50 = vmul.f32 %v373_v48, %v735_v45  ;;  %v424_v58 = vadd.f32 %v407_v53, %v400_v47  ;;  %v516_v45 = vld [vmem:[%s768_s4 + $0x8] sm:$0xff]  }
 0x125   :  { %v600_v51 = vpop.eup %599  ;;  %v505_v7 = vunpack.c.h.bf16 %v516_v45  ;;  %v504_v8 = vunpack.c.l.bf16 %v516_v45 }
 0x126   :  { %v374_v54 = vmul.f32 %v600_v51, %v354_v28  ;;  %v401_v55 = vmul.f32 %v388_v41, %v377_v50  ;;  %v436_v2 = vadd.f32 %v500_v52, %v424_v58 }
 0x128   :  { %v602_v61 = vpop.eup %601  ;;  %v378_v43 = vmul.f32 %v374_v54, %v738_v56  ;;  %v425_v62 = vadd.f32 %v412_v60, %v401_v55  ;;  %v422_v56 = vpop.permute.xlu1 %421 }
 0x129   :  { %v375_v63 = vmul.f32 %v602_v61, %v355_v37 }
 0x12a   :  { %v402_v0 = vmul.f32 %v393_v36, %v378_v43  ;;  %v437_v1 = vadd.f32 %v501_v57, %v425_v62 }
 0x12b   :  { %v379_v3 = vmul.f32 %v375_v63, %v741_v59 }
 0x12c   :  { %v509_v4 = vpack.c.bf16 %v437_v1, %v436_v2  ;;  %v426_v9 = vadd.f32 %v417_v5, %v402_v0 }
 0x12d   :  { %v403_v6 = vmul.f32 %v398_v46, %v379_v3 }
 0x12e   :  { %510 = vst [vmem:[%s769_s5] sm:$0xff] %v509_v4   ;;  %v438_v12 = vadd.f32 %v504_v8, %v426_v9 }
 0x12f   :  { %v427_v10 = vadd.f32 %v422_v56, %v403_v6 }
 0x131   :  { %v439_v11 = vadd.f32 %v505_v7, %v427_v10 }
 0x133   :  { %v514_v13 = vpack.c.bf16 %v439_v11, %v438_v12 }
 0x135   :  { %517 = vst [vmem:[%s769_s5 + $0x8] sm:$0xff] %v514_v13  }

// kernel: forward.22
= control target key start
LH: loop header
LB: loop body
LE: loop exit
PB: predicated region body
PF: predicated region fallthrough
CT: control target
= control target key end

     0   :  { %v849_v39 = vmov 0.0   ;;  %vm850_vm0 = vmmov 0   ;;  %vm446_vm1 = vcmask 261120   ;;  %vm643_vm3 = vcmask 519168   ;;  %s1047_s0 = inlined_call_operand.vmem [shape: bf16[800,64], index: 0, kind: input, shape index: {}]   ;;  %s1048_s1 = inlined_call_operand.vmem [shape: bf16[8,800], index: 1, kind: input, shape index: {}]   ;;  %s1049_s2 = inlined_call_operand.vmem [shape: f32[1,64], index: 2, kind: input, shape index: {}]   ;;  %s1050_s3 = inlined_call_operand.vmem [shape: f32[1,64], index: 3, kind: input, shape index: {}]   ;;  %s1051_s4 = inlined_call_operand.vmem [shape: bf16[8,64], index: 4, kind: output, shape index: {}]  }
   0x1   :  { %v788_v0 = vld [vmem:[%s1047_s0 + $0x40] sm:$0xff]   ;;  %v792_v4 = vld [vmem:[%s1047_s0 + $0x48] sm:$0xff]   ;;  %v796_v8 = vld [vmem:[%s1047_s0 + $0x50] sm:$0xff]  }
   0x2   :  { %v789_v1 = vld [vmem:[%s1047_s0 + $0xc0] sm:$0xff]   ;;  %709 = vmatprep.subr.bf16.mxu0 %v788_v0  ;;  %v793_v5 = vld [vmem:[%s1047_s0 + $0xc8] sm:$0xff]   ;;  %v797_v9 = vld [vmem:[%s1047_s0 + $0xd0] sm:$0xff]  }
   0x3   :  { %v790_v2 = vld [vmem:[%s1047_s0] sm:$0xff]   ;;  %731 = vmatprep.subr.bf16.mxu1 %v789_v1  ;;  %v794_v6 = vld [vmem:[%s1047_s0 + $0x8] sm:$0xff]   ;;  %v798_v10 = vld [vmem:[%s1047_s0 + $0x10] sm:$0xff]  }
   0x4   :  { %v791_v3 = vld [vmem:[%s1047_s0 + $0x80] sm:$0xff]   ;;  %710 = vmatpush3.bf16.msra.mxu0 %v790_v2  ;;  %v795_v7 = vld [vmem:[%s1047_s0 + $0x88] sm:$0xff]   ;;  %v799_v11 = vld [vmem:[%s1047_s0 + $0x90] sm:$0xff]  }
   0x5   :  { %732 = vmatpush3.bf16.msra.mxu1 %v791_v3  ;;  %711 = vmatprep.subr.bf16.mxu0 %v792_v4  ;;  %v800_v12 = vld [vmem:[%s1047_s0 + $0x58] sm:$0xff]   ;;  %v804_v16 = vld [vmem:[%s1047_s0 + $0x60] sm:$0xff]   ;;  %v808_v20 = vld [vmem:[%s1047_s0 + $0x68] sm:$0xff]  }
   0x6   :  { %733 = vmatprep.subr.bf16.mxu1 %v793_v5  ;;  %v801_v13 = vld [vmem:[%s1047_s0 + $0xd8] sm:$0xff]   ;;  %v805_v17 = vld [vmem:[%s1047_s0 + $0xe0] sm:$0xff]   ;;  %v809_v21 = vld [vmem:[%s1047_s0 + $0xe8] sm:$0xff]  }
   0x7   :  { %v802_v14 = vld [vmem:[%s1047_s0 + $0x18] sm:$0xff]   ;;  %v806_v18 = vld [vmem:[%s1047_s0 + $0x20] sm:$0xff]   ;;  %v810_v22 = vld [vmem:[%s1047_s0 + $0x28] sm:$0xff]  }
   0x8   :  { %712 = vmatpush3.bf16.msra.mxu0 %v794_v6  ;;  %v803_v15 = vld [vmem:[%s1047_s0 + $0x98] sm:$0xff]   ;;  %v807_v19 = vld [vmem:[%s1047_s0 + $0xa0] sm:$0xff]   ;;  %v811_v23 = vld [vmem:[%s1047_s0 + $0xa8] sm:$0xff]  }
   0x9   :  { %734 = vmatpush3.bf16.msra.mxu1 %v795_v7  ;;  %713 = vmatprep.subr.bf16.mxu0 %v796_v8  ;;  %v812_v24 = vld [vmem:[%s1047_s0 + $0x70] sm:$0xff]   ;;  %v816_v28 = vld [vmem:[%s1047_s0 + $0x78] sm:$0xff]   ;;  %v18_v32 = vld [vmem:[%s1048_s1] sm:$0xff] }
   0xa   :  { %735 = vmatprep.subr.bf16.mxu1 %v797_v9  ;;  %v813_v25 = vld [vmem:[%s1047_s0 + $0xf0] sm:$0xff]   ;;  %v817_v29 = vld [vmem:[%s1047_s0 + $0xf8] sm:$0xff]   ;;  %v649_v33 = vcombine.low %v18_v32, %v18_v32  ;;  %v650_v34 = vcombine.high %v18_v32, %v18_v32  ;;  %v19_v35 = vld [vmem:[%s1048_s1 + $0x8] sm:$0xff] }
   0xb   :  { %v814_v26 = vld [vmem:[%s1047_s0 + $0x30] sm:$0xff]   ;;  %v818_v30 = vld [vmem:[%s1047_s0 + $0x38] sm:$0xff]   ;;  %v651_v36 = vcombine.low %v19_v35, %v19_v35  ;;  %v652_v37 = vcombine.high %v19_v35, %v19_v35  ;;  %v825_v38 = vld [vmem:[%s1047_s0 + $0x140] sm:$0xff]  }
   0xc   :  { %714 = vmatpush3.bf16.msra.mxu0 %v798_v10  ;;  %v815_v27 = vld [vmem:[%s1047_s0 + $0xb0] sm:$0xff]   ;;  %v819_v31 = vld [vmem:[%s1047_s0 + $0xb8] sm:$0xff]   ;;  %482 = vmatprep.mubr.bf16.mxu0 %v650_v34  ;;  %v826_v40 = vld [vmem:[%s1047_s0 + $0x100] sm:$0xff]  }
   0xd   :  { %736 = vmatpush3.bf16.msra.mxu1 %v799_v11  ;;  %715 = vmatprep.subr.bf16.mxu0 %v800_v12  ;;  %v827_v41 = vld [vmem:[%s1047_s0 + $0x148] sm:$0xff]   ;;  %v829_v43 = vld [vmem:[%s1047_s0 + $0x150] sm:$0xff]   ;;  %v831_v45 = vld [vmem:[%s1047_s0 + $0x158] sm:$0xff]  }
   0xe   :  { %737 = vmatprep.subr.bf16.mxu1 %v801_v13  ;;  %522 = vmatprep.mubr.bf16.mxu1 %v652_v37  ;;  %v828_v42 = vld [vmem:[%s1047_s0 + $0x108] sm:$0xff]   ;;  %v830_v44 = vld [vmem:[%s1047_s0 + $0x110] sm:$0xff]   ;;  %v832_v46 = vld [vmem:[%s1047_s0 + $0x118] sm:$0xff]  }
   0xf   :  { %v833_v47 = vld [vmem:[%s1047_s0 + $0x160] sm:$0xff]   ;;  %v20_v50 = vld [vmem:[%s1048_s1 + $0x10] sm:$0xff]  ;;  %v835_v51 = vld [vmem:[%s1047_s0 + $0x168] sm:$0xff]  }
  0x10   :  { %716 = vmatpush3.bf16.msra.mxu0 %v802_v14  ;;  %v839_v48 = vld [vmem:[%s1047_s0 + $0x180] sm:$0xff]   ;;  %v654_v52 = vcombine.high %v20_v50, %v20_v50  ;;  %v844_v53 = vld [vmem:[%s1047_s0 + $0x188] sm:$0xff]   ;;  %v822_v54 = vld [vmem:[%s1048_s1 + $0x18] ss:$0 sps:$4 sm:$0xff]   ;;  %v653_v60 = vcombine.low %v20_v50, %v20_v50 }
  0x11   :  { %738 = vmatpush3.bf16.msra.mxu1 %v803_v15  ;;  %717 = vmatprep.subr.bf16.mxu0 %v804_v16  ;;  %v834_v49 = vld [vmem:[%s1047_s0 + $0x120] sm:$0xff]   ;;  %v836_v55 = vld [vmem:[%s1047_s0 + $0x128] sm:$0xff]   ;;  %v837_v56 = vld [vmem:[%s1047_s0 + $0x170] sm:$0xff]  }
  0x12   :  { %739 = vmatprep.subr.bf16.mxu1 %v805_v17  ;;  %v838_v57 = vld [vmem:[%s1047_s0 + $0x130] sm:$0xff]   ;;  %v840_v58 = vld [vmem:[%s1047_s0 + $0x178] sm:$0xff]   ;;  %v708_v35 = vld [vmem:[%s1050_s3] ss:$0 sm:$0xff] }
  0x13   :  { %v841_v59 = vld [vmem:[%s1047_s0 + $0x138] sm:$0xff]  }
  0x14   :  { %718 = vmatpush3.bf16.msra.mxu0 %v806_v18 }
  0x15   :  { %740 = vmatpush3.bf16.msra.mxu1 %v807_v19  ;;  %719 = vmatprep.subr.bf16.mxu0 %v808_v20 }
  0x16   :  { %741 = vmatprep.subr.bf16.mxu1 %v809_v21 }
  0x18   :  { %720 = vmatpush3.bf16.msra.mxu0 %v810_v22 }
  0x19   :  { %742 = vmatpush3.bf16.msra.mxu1 %v811_v23  ;;  %721 = vmatprep.subr.bf16.mxu0 %v812_v24 }
  0x1a   :  { %743 = vmatprep.subr.bf16.mxu1 %v813_v25 }
  0x1c   :  { %722 = vmatpush3.bf16.msra.mxu0 %v814_v26 }
  0x1d   :  { %744 = vmatpush3.bf16.msra.mxu1 %v815_v27  ;;  %723 = vmatprep.subr.bf16.mxu0 %v816_v28 }
  0x1e   :  { %745 = vmatprep.subr.bf16.mxu1 %v817_v29 }
  0x20   :  { %724 = vmatpush3.bf16.msra.mxu0 %v818_v30 }
  0x21   :  { %746 = vmatpush3.bf16.msra.mxu1 %v819_v31  ;;  %753 = vmatprep.subr.bf16.mxu0 %v825_v38 }
  0x22   :  { %778 = vmatprep.subr.bf16.mxu1 %v849_v39 }
  0x23   :  { %483 = vmatmul.mubr.bf16.vlgmr.msra.gmra.mrb[0].mxu0 %v649_v33  ;;  %v707_v33 = vld [vmem:[%s1049_s2] ss:$0 sm:$0xff] }
  0x24   :  { %523 = vmatmul.mubr.bf16.vlgmr.msra.gmra.mrb[0].mxu1 %v651_v36  ;;  %754 = vmatpush3.bf16.msra.mxu0 %v826_v40 }
  0x25   :  { %782 = vmatprep.mubr.msk.bf16.mxu1 %vm850_vm0, %v849_v39  ;;  %755 = vmatprep.subr.bf16.mxu0 %v827_v41 }
  0x26   :  { %779 = vmatpush3.bf16.msra.mxu1 %v839_v48  ;;  %562 = vmatprep.mubr.bf16.mxu0 %v654_v52 }
  0x27   :  { %780 = vmatprep.subr.bf16.mxu1 %v849_v39 }
  0x28   :  { %756 = vmatpush3.bf16.msra.mxu0 %v828_v42 }
  0x29   :  { %757 = vmatprep.subr.bf16.mxu0 %v829_v43 }
  0x2a   :  { %781 = vmatpush3.bf16.msra.mxu1 %v844_v53 }
  0x2c   :  { %758 = vmatpush3.bf16.msra.mxu0 %v830_v44 }
  0x2d   :  { %759 = vmatprep.subr.bf16.mxu0 %v831_v45  ;;  %783 = vmatmul.mubr.msk.bf16.vlgmr.msra.gmra.mrb[4].mxu1 %vm446_vm1, %v822_v54 }
  0x30   :  { %760 = vmatpush3.bf16.msra.mxu0 %v832_v46 }
  0x31   :  { %761 = vmatprep.subr.bf16.mxu0 %v833_v47 }
  0x34   :  { %762 = vmatpush3.bf16.msra.mxu0 %v834_v49 }
  0x35   :  { %763 = vmatprep.subr.bf16.mxu0 %v835_v51 }
  0x38   :  { %764 = vmatpush3.bf16.msra.mxu0 %v836_v55 }
  0x39   :  { %765 = vmatprep.subr.bf16.mxu0 %v837_v56 }
  0x3c   :  { %766 = vmatpush3.bf16.msra.mxu0 %v838_v57 }
  0x3d   :  { %767 = vmatprep.subr.bf16.mxu0 %v840_v58 }
  0x40   :  { %768 = vmatpush3.bf16.msra.mxu0 %v841_v59 }
  0x43   :  { %563 = vmatmul.mubr.bf16.vlgmr.msra.gmra.mrb[4].mxu0 %v653_v60 }
  0xf6   :  { %v725_v61 = vpop.f32.mrb[0].mxu0 }
  0xf7   :  { %v747_v62 = vpop.f32.mrb[0].mxu1  ;;  %v726_v63 = vpop.f32.mrb[1].mxu0 }
  0xf8   :  { %v727_v0 = vadd.f32 %v726_v63, %v725_v61  ;;  %v748_v1 = vpop.f32.mrb[1].mxu1  ;;  %v728_v2 = vpop.f32.mrb[2].mxu0 }
  0xf9   :  { %v749_v3 = vadd.f32 %v748_v1, %v747_v62  ;;  %v729_v4 = vpop.f32.mrb[3].mxu0  ;;  %v750_v5 = vpop.f32.mrb[2].mxu1 }
  0xfa   :  { %v751_v6 = vpop.f32.mrb[3].mxu1 }
  0xfb   :  { %v525_v7 = vadd.f32 %v749_v3, %v727_v0 }
 0x100   :  { %v604_v8 = vpop.f32.mrb[4].mxu1 }
 0x101   :  { %v784_v9 = vpop.f32.mrb[5].mxu1 }
 0x102   :  { %v607_v10 = vpop.f32.mrb[6].mxu1 }
 0x103   :  { %v785_v11 = vpop.f32.mrb[7].mxu1 }
 0x116   :  { %v769_v12 = vpop.f32.mrb[4].mxu0 }
 0x117   :  { %v770_v13 = vpop.f32.mrb[5].mxu0 }
 0x118   :  { %v771_v14 = vadd.f32 %v770_v13, %v769_v12  ;;  %v772_v15 = vpop.f32.mrb[6].mxu0 }
 0x119   :  { %v773_v16 = vpop.f32.mrb[7].mxu0 }
 0x11a   :  { %v565_v17 = vadd.f32 %v771_v14, %v525_v7 }
 0x11c   :  { %v605_v18 = vadd.f32 %v604_v8, %v565_v17 }
 0x11e   :  { %v612_v19 = vand.u32 2147483647, %v605_v18  ;;  %vm616_vm2 = vcmp.ge.f32.partialorder %v605_v18, 0.0 }
 0x120   :  { %v613_v20 = vsub.f32 0.0, %v612_v19 }
 0x122   :  { %v614_v21 = vmul.f32 1.442695, %v613_v20 }
 0x124   :  { %845 = vpow2.f32 %v614_v21 }
 0x12e   :  { %v846_v22 = vpop.eup %845 }
 0x12f   :  { %v617_v23 = vmul.f32 2.0, %v846_v22  ;;  %v619_v24 = vadd.f32 2.0, %v846_v22 }
 0x131   :  { %v618_v25 = vadd.f32 1.0, %v617_v23  ;;  %v620_v26 = vmul.f32 %v846_v22, %v619_v24  ;;  %v622_v27 = vmul.f32 %v846_v22, %v617_v23 }
 0x133   :  { %v621_v28 = vsel %vm616_vm2, %v618_v25, %v620_v26  ;;  %v623_v29 = vsel %vm616_vm2, %v622_v27, 2.0 }
 0x134   :  { %v624_v30 = vadd.f32 %v623_v29, %v621_v28 }
 0x136   :  { %847 = vrcp.f32 %v624_v30 }
 0x140   :  { %v848_v31 = vpop.eup %847 }
 0x141   :  { %v626_v32 = vmul.f32 %v848_v31, %v621_v28 }
 0x143   :  { %v627_v34 = vmul.f32 %v626_v32, %v605_v18 }
 0x145   :  { %v634_v36 = vmul.f32 %v707_v33, %v627_v34 }
 0x147   :  { %v641_v37 = vadd.f32 %v708_v35, %v634_v36 }
 0x149   :  { %v642_v38 = vpack.c.bf16 %v641_v37, %v641_v37 }
 0x14b   :  { %644 = vst.msk [vmem:[%s1051_s4] sm:$0xf] %vm643_vm3, %v642_v38 }

// kernel: forward.23
= control target key start
LH: loop header
LB: loop body
LE: loop exit
PB: predicated region body
PF: predicated region fallthrough
CT: control target
= control target key end

     0   :  { %v641_v36 = vmov 0.0   ;;  %vm642_vm0 = vmmov 0   ;;  %vm326_vm1 = vcmask 523264   ;;  %vm483_vm3 = vcmask 519168   ;;  %s794_s0 = inlined_call_operand.vmem [shape: bf16[576,64], index: 0, kind: input, shape index: {}]   ;;  %s795_s1 = inlined_call_operand.vmem [shape: bf16[8,576], index: 1, kind: input, shape index: {}]   ;;  %s796_s2 = inlined_call_operand.vmem [shape: f32[1,64], index: 2, kind: input, shape index: {}]   ;;  %s797_s3 = inlined_call_operand.vmem [shape: f32[1,64], index: 3, kind: input, shape index: {}]   ;;  %s798_s4 = inlined_call_operand.vmem [shape: bf16[8,64], index: 4, kind: output, shape index: {}]  }
   0x1   :  { %v596_v0 = vld [vmem:[%s794_s0 + $0x40] sm:$0xff]   ;;  %v600_v4 = vld [vmem:[%s794_s0 + $0x48] sm:$0xff]   ;;  %v604_v8 = vld [vmem:[%s794_s0 + $0x50] sm:$0xff]  }
   0x2   :  { %v597_v1 = vld [vmem:[%s794_s0 + $0xc0] sm:$0xff]   ;;  %533 = vmatprep.subr.bf16.mxu0 %v596_v0  ;;  %v601_v5 = vld [vmem:[%s794_s0 + $0xc8] sm:$0xff]   ;;  %v605_v9 = vld [vmem:[%s794_s0 + $0xd0] sm:$0xff]  }
   0x3   :  { %v598_v2 = vld [vmem:[%s794_s0] sm:$0xff]   ;;  %555 = vmatprep.subr.bf16.mxu1 %v597_v1  ;;  %v602_v6 = vld [vmem:[%s794_s0 + $0x8] sm:$0xff]   ;;  %v606_v10 = vld [vmem:[%s794_s0 + $0x10] sm:$0xff]  }
   0x4   :  { %v599_v3 = vld [vmem:[%s794_s0 + $0x80] sm:$0xff]   ;;  %534 = vmatpush3.bf16.msra.mxu0 %v598_v2  ;;  %v603_v7 = vld [vmem:[%s794_s0 + $0x88] sm:$0xff]   ;;  %v607_v11 = vld [vmem:[%s794_s0 + $0x90] sm:$0xff]  }
   0x5   :  { %556 = vmatpush3.bf16.msra.mxu1 %v599_v3  ;;  %535 = vmatprep.subr.bf16.mxu0 %v600_v4  ;;  %v608_v12 = vld [vmem:[%s794_s0 + $0x58] sm:$0xff]   ;;  %v612_v16 = vld [vmem:[%s794_s0 + $0x60] sm:$0xff]   ;;  %v616_v20 = vld [vmem:[%s794_s0 + $0x68] sm:$0xff]  }
   0x6   :  { %557 = vmatprep.subr.bf16.mxu1 %v601_v5  ;;  %v609_v13 = vld [vmem:[%s794_s0 + $0xd8] sm:$0xff]   ;;  %v613_v17 = vld [vmem:[%s794_s0 + $0xe0] sm:$0xff]   ;;  %v617_v21 = vld [vmem:[%s794_s0 + $0xe8] sm:$0xff]  }
   0x7   :  { %v610_v14 = vld [vmem:[%s794_s0 + $0x18] sm:$0xff]   ;;  %v614_v18 = vld [vmem:[%s794_s0 + $0x20] sm:$0xff]   ;;  %v618_v22 = vld [vmem:[%s794_s0 + $0x28] sm:$0xff]  }
   0x8   :  { %536 = vmatpush3.bf16.msra.mxu0 %v602_v6  ;;  %v611_v15 = vld [vmem:[%s794_s0 + $0x98] sm:$0xff]   ;;  %v615_v19 = vld [vmem:[%s794_s0 + $0xa0] sm:$0xff]   ;;  %v619_v23 = vld [vmem:[%s794_s0 + $0xa8] sm:$0xff]  }
   0x9   :  { %558 = vmatpush3.bf16.msra.mxu1 %v603_v7  ;;  %537 = vmatprep.subr.bf16.mxu0 %v604_v8  ;;  %v620_v24 = vld [vmem:[%s794_s0 + $0x70] sm:$0xff]   ;;  %v624_v28 = vld [vmem:[%s794_s0 + $0x78] sm:$0xff]   ;;  %v18_v32 = vld [vmem:[%s795_s1] sm:$0xff] }
   0xa   :  { %559 = vmatprep.subr.bf16.mxu1 %v605_v9  ;;  %v621_v25 = vld [vmem:[%s794_s0 + $0xf0] sm:$0xff]   ;;  %v625_v29 = vld [vmem:[%s794_s0 + $0xf8] sm:$0xff]   ;;  %v489_v33 = vcombine.low %v18_v32, %v18_v32  ;;  %v490_v34 = vcombine.high %v18_v32, %v18_v32  ;;  %v19_v35 = vld [vmem:[%s795_s1 + $0x8] sm:$0xff] }
   0xb   :  { %v622_v26 = vld [vmem:[%s794_s0 + $0x30] sm:$0xff]   ;;  %v626_v30 = vld [vmem:[%s794_s0 + $0x38] sm:$0xff]   ;;  %v491_v37 = vcombine.low %v19_v35, %v19_v35  ;;  %v492_v38 = vcombine.high %v19_v35, %v19_v35  ;;  %v633_v39 = vld [vmem:[%s794_s0 + $0x100] sm:$0xff]  }
   0xc   :  { %538 = vmatpush3.bf16.msra.mxu0 %v606_v10  ;;  %v623_v27 = vld [vmem:[%s794_s0 + $0xb0] sm:$0xff]   ;;  %v627_v31 = vld [vmem:[%s794_s0 + $0xb8] sm:$0xff]   ;;  %362 = vmatprep.mubr.bf16.mxu0 %v490_v34  ;;  %v634_v40 = vld [vmem:[%s794_s0 + $0x108] sm:$0xff]  }
   0xd   :  { %560 = vmatpush3.bf16.msra.mxu1 %v607_v11  ;;  %539 = vmatprep.subr.bf16.mxu0 %v608_v12  ;;  %v635_v41 = vld [vmem:[%s794_s0 + $0x110] sm:$0xff]   ;;  %v636_v42 = vld [vmem:[%s794_s0 + $0x118] sm:$0xff]   ;;  %v531_v10 = vld [vmem:[%s796_s2] ss:$0 sm:$0xff] }
   0xe   :  { %561 = vmatprep.subr.bf16.mxu1 %v609_v13  ;;  %402 = vmatprep.mubr.bf16.mxu1 %v492_v38  ;;  %v630_v43 = vld [vmem:[%s795_s1 + $0x10] ss:$0 sps:$4 sm:$0xff]   ;;  %v532_v12 = vld [vmem:[%s797_s3] ss:$0 sm:$0xff] }
  0x10   :  { %540 = vmatpush3.bf16.msra.mxu0 %v610_v14 }
  0x11   :  { %562 = vmatpush3.bf16.msra.mxu1 %v611_v15  ;;  %541 = vmatprep.subr.bf16.mxu0 %v612_v16 }
  0x12   :  { %563 = vmatprep.subr.bf16.mxu1 %v613_v17 }
  0x14   :  { %542 = vmatpush3.bf16.msra.mxu0 %v614_v18 }
  0x15   :  { %564 = vmatpush3.bf16.msra.mxu1 %v615_v19  ;;  %543 = vmatprep.subr.bf16.mxu0 %v616_v20 }
  0x16   :  { %565 = vmatprep.subr.bf16.mxu1 %v617_v21 }
  0x18   :  { %544 = vmatpush3.bf16.msra.mxu0 %v618_v22 }
  0x19   :  { %566 = vmatpush3.bf16.msra.mxu1 %v619_v23  ;;  %545 = vmatprep.subr.bf16.mxu0 %v620_v24 }
  0x1a   :  { %567 = vmatprep.subr.bf16.mxu1 %v621_v25 }
  0x1c   :  { %546 = vmatpush3.bf16.msra.mxu0 %v622_v26 }
  0x1d   :  { %568 = vmatpush3.bf16.msra.mxu1 %v623_v27  ;;  %547 = vmatprep.subr.bf16.mxu0 %v624_v28 }
  0x1e   :  { %569 = vmatprep.subr.bf16.mxu1 %v625_v29 }
  0x20   :  { %548 = vmatpush3.bf16.msra.mxu0 %v626_v30 }
  0x21   :  { %570 = vmatpush3.bf16.msra.mxu1 %v627_v31  ;;  %582 = vmatprep.subr.bf16.mxu0 %v641_v36 }
  0x23   :  { %363 = vmatmul.mubr.bf16.vlgmr.msra.gmra.mrb[0].mxu0 %v489_v33 }
  0x24   :  { %403 = vmatmul.mubr.bf16.vlgmr.msra.gmra.mrb[0].mxu1 %v491_v37  ;;  %583 = vmatpush3.bf16.msra.mxu0 %v633_v39 }
  0x25   :  { %584 = vmatprep.subr.bf16.mxu0 %v641_v36  ;;  %590 = vmatprep.mubr.msk.bf16.mxu0 %vm642_vm0, %v641_v36 }
  0x28   :  { %585 = vmatpush3.bf16.msra.mxu0 %v634_v40 }
  0x29   :  { %586 = vmatprep.subr.bf16.mxu0 %v641_v36 }
  0x2c   :  { %587 = vmatpush3.bf16.msra.mxu0 %v635_v41 }
  0x2d   :  { %588 = vmatprep.subr.bf16.mxu0 %v641_v36 }
  0x30   :  { %589 = vmatpush3.bf16.msra.mxu0 %v636_v42 }
  0x33   :  { %591 = vmatmul.mubr.msk.bf16.vlgmr.msra.gmra.mrb[4].mxu0 %vm326_vm1, %v630_v43 }
  0xf6   :  { %v549_v44 = vpop.f32.mrb[0].mxu0 }
  0xf7   :  { %v571_v45 = vpop.f32.mrb[0].mxu1  ;;  %v550_v46 = vpop.f32.mrb[1].mxu0 }
  0xf8   :  { %v551_v47 = vadd.f32 %v550_v46, %v549_v44  ;;  %v572_v48 = vpop.f32.mrb[1].mxu1  ;;  %v552_v49 = vpop.f32.mrb[2].mxu0 }
  0xf9   :  { %v573_v50 = vadd.f32 %v572_v48, %v571_v45  ;;  %v553_v51 = vpop.f32.mrb[3].mxu0  ;;  %v574_v52 = vpop.f32.mrb[2].mxu1 }
  0xfa   :  { %v575_v53 = vpop.f32.mrb[3].mxu1 }
  0xfb   :  { %v405_v54 = vadd.f32 %v573_v50, %v551_v47 }
 0x106   :  { %v444_v55 = vpop.f32.mrb[4].mxu0 }
 0x107   :  { %v445_v56 = vadd.f32 %v444_v55, %v405_v54  ;;  %v592_v57 = vpop.f32.mrb[5].mxu0 }
 0x108   :  { %v447_v58 = vpop.f32.mrb[6].mxu0 }
 0x109   :  { %v452_v59 = vand.u32 2147483647, %v445_v56  ;;  %v593_v60 = vpop.f32.mrb[7].mxu0  ;;  %vm456_vm2 = vcmp.ge.f32.partialorder %v445_v56, 0.0 }
 0x10b   :  { %v453_v61 = vsub.f32 0.0, %v452_v59 }
 0x10d   :  { %v454_v62 = vmul.f32 1.442695, %v453_v61 }
 0x10f   :  { %637 = vpow2.f32 %v454_v62 }
 0x119   :  { %v638_v63 = vpop.eup %637 }
 0x11a   :  { %v457_v0 = vmul.f32 2.0, %v638_v63  ;;  %v459_v1 = vadd.f32 2.0, %v638_v63 }
 0x11c   :  { %v458_v2 = vadd.f32 1.0, %v457_v0  ;;  %v460_v3 = vmul.f32 %v638_v63, %v459_v1  ;;  %v462_v4 = vmul.f32 %v638_v63, %v457_v0 }
 0x11e   :  { %v461_v5 = vsel %vm456_vm2, %v458_v2, %v460_v3  ;;  %v463_v6 = vsel %vm456_vm2, %v462_v4, 2.0 }
 0x11f   :  { %v464_v7 = vadd.f32 %v463_v6, %v461_v5 }
 0x121   :  { %639 = vrcp.f32 %v464_v7 }
 0x12b   :  { %v640_v8 = vpop.eup %639 }
 0x12c   :  { %v466_v9 = vmul.f32 %v640_v8, %v461_v5 }
 0x12e   :  { %v467_v11 = vmul.f32 %v466_v9, %v445_v56 }
 0x130   :  { %v474_v13 = vmul.f32 %v531_v10, %v467_v11 }
 0x132   :  { %v481_v14 = vadd.f32 %v532_v12, %v474_v13 }
 0x134   :  { %v482_v15 = vpack.c.bf16 %v481_v14, %v481_v14 }
 0x136   :  { %484 = vst.msk [vmem:[%s798_s4] sm:$0xf] %vm483_vm3, %v482_v15 }

// kernel: forward.24
= control target key start
LH: loop header
LB: loop body
LE: loop exit
PB: predicated region body
PF: predicated region fallthrough
CT: control target
= control target key end

     0   :  { %v647_v36 = vmov 0.0   ;;  %vm648_vm0 = vmmov 0   ;;  %vm329_vm1 = vcmask 523264   ;;  %vm489_vm3 = vcmask 519168   ;;  %s808_s0 = inlined_call_operand.vmem [shape: bf16[576,64], index: 0, kind: input, shape index: {}]   ;;  %s809_s1 = inlined_call_operand.vmem [shape: bf16[8,576], index: 1, kind: input, shape index: {}]   ;;  %s810_s2 = inlined_call_operand.vmem [shape: f32[1,64], index: 2, kind: input, shape index: {}]   ;;  %s811_s4 = inlined_call_operand.vmem [shape: bf16[8,64], index: 4, kind: input, shape index: {}]   ;;  %s812_s3 = inlined_call_operand.vmem [shape: f32[1,64], index: 3, kind: input, shape index: {}]   ;;  %s813_s5 = inlined_call_operand.vmem [shape: bf16[8,64], index: 5, kind: output, shape index: {}]  }
   0x1   :  { %v602_v0 = vld [vmem:[%s808_s0 + $0x40] sm:$0xff]   ;;  %v606_v4 = vld [vmem:[%s808_s0 + $0x48] sm:$0xff]   ;;  %v610_v8 = vld [vmem:[%s808_s0 + $0x50] sm:$0xff]  }
   0x2   :  { %v603_v1 = vld [vmem:[%s808_s0 + $0xc0] sm:$0xff]   ;;  %539 = vmatprep.subr.bf16.mxu0 %v602_v0  ;;  %v607_v5 = vld [vmem:[%s808_s0 + $0xc8] sm:$0xff]   ;;  %v611_v9 = vld [vmem:[%s808_s0 + $0xd0] sm:$0xff]  }
   0x3   :  { %v604_v2 = vld [vmem:[%s808_s0] sm:$0xff]   ;;  %561 = vmatprep.subr.bf16.mxu1 %v603_v1  ;;  %v608_v6 = vld [vmem:[%s808_s0 + $0x8] sm:$0xff]   ;;  %v612_v10 = vld [vmem:[%s808_s0 + $0x10] sm:$0xff]  }
   0x4   :  { %v605_v3 = vld [vmem:[%s808_s0 + $0x80] sm:$0xff]   ;;  %540 = vmatpush3.bf16.msra.mxu0 %v604_v2  ;;  %v609_v7 = vld [vmem:[%s808_s0 + $0x88] sm:$0xff]   ;;  %v613_v11 = vld [vmem:[%s808_s0 + $0x90] sm:$0xff]  }
   0x5   :  { %562 = vmatpush3.bf16.msra.mxu1 %v605_v3  ;;  %541 = vmatprep.subr.bf16.mxu0 %v606_v4  ;;  %v614_v12 = vld [vmem:[%s808_s0 + $0x58] sm:$0xff]   ;;  %v618_v16 = vld [vmem:[%s808_s0 + $0x60] sm:$0xff]   ;;  %v622_v20 = vld [vmem:[%s808_s0 + $0x68] sm:$0xff]  }
   0x6   :  { %563 = vmatprep.subr.bf16.mxu1 %v607_v5  ;;  %v615_v13 = vld [vmem:[%s808_s0 + $0xd8] sm:$0xff]   ;;  %v619_v17 = vld [vmem:[%s808_s0 + $0xe0] sm:$0xff]   ;;  %v623_v21 = vld [vmem:[%s808_s0 + $0xe8] sm:$0xff]  }
   0x7   :  { %v616_v14 = vld [vmem:[%s808_s0 + $0x18] sm:$0xff]   ;;  %v620_v18 = vld [vmem:[%s808_s0 + $0x20] sm:$0xff]   ;;  %v624_v22 = vld [vmem:[%s808_s0 + $0x28] sm:$0xff]  }
   0x8   :  { %542 = vmatpush3.bf16.msra.mxu0 %v608_v6  ;;  %v617_v15 = vld [vmem:[%s808_s0 + $0x98] sm:$0xff]   ;;  %v621_v19 = vld [vmem:[%s808_s0 + $0xa0] sm:$0xff]   ;;  %v625_v23 = vld [vmem:[%s808_s0 + $0xa8] sm:$0xff]  }
   0x9   :  { %564 = vmatpush3.bf16.msra.mxu1 %v609_v7  ;;  %543 = vmatprep.subr.bf16.mxu0 %v610_v8  ;;  %v626_v24 = vld [vmem:[%s808_s0 + $0x70] sm:$0xff]   ;;  %v630_v28 = vld [vmem:[%s808_s0 + $0x78] sm:$0xff]   ;;  %v21_v32 = vld [vmem:[%s809_s1] sm:$0xff] }
   0xa   :  { %565 = vmatprep.subr.bf16.mxu1 %v611_v9  ;;  %v627_v25 = vld [vmem:[%s808_s0 + $0xf0] sm:$0xff]   ;;  %v631_v29 = vld [vmem:[%s808_s0 + $0xf8] sm:$0xff]   ;;  %v495_v33 = vcombine.low %v21_v32, %v21_v32  ;;  %v496_v34 = vcombine.high %v21_v32, %v21_v32  ;;  %v22_v35 = vld [vmem:[%s809_s1 + $0x8] sm:$0xff] }
   0xb   :  { %v628_v26 = vld [vmem:[%s808_s0 + $0x30] sm:$0xff]   ;;  %v632_v30 = vld [vmem:[%s808_s0 + $0x38] sm:$0xff]   ;;  %v497_v37 = vcombine.low %v22_v35, %v22_v35  ;;  %v498_v38 = vcombine.high %v22_v35, %v22_v35  ;;  %v639_v39 = vld [vmem:[%s808_s0 + $0x100] sm:$0xff]  }
   0xc   :  { %544 = vmatpush3.bf16.msra.mxu0 %v612_v10  ;;  %v629_v27 = vld [vmem:[%s808_s0 + $0xb0] sm:$0xff]   ;;  %v633_v31 = vld [vmem:[%s808_s0 + $0xb8] sm:$0xff]   ;;  %365 = vmatprep.mubr.bf16.mxu0 %v496_v34  ;;  %v640_v40 = vld [vmem:[%s808_s0 + $0x108] sm:$0xff]  }
   0xd   :  { %566 = vmatpush3.bf16.msra.mxu1 %v613_v11  ;;  %545 = vmatprep.subr.bf16.mxu0 %v614_v12  ;;  %v641_v41 = vld [vmem:[%s808_s0 + $0x110] sm:$0xff]   ;;  %v642_v42 = vld [vmem:[%s808_s0 + $0x118] sm:$0xff]   ;;  %v537_v10 = vld [vmem:[%s810_s2] ss:$0 sm:$0xff] }
   0xe   :  { %567 = vmatprep.subr.bf16.mxu1 %v615_v13  ;;  %405 = vmatprep.mubr.bf16.mxu1 %v498_v38  ;;  %v636_v43 = vld [vmem:[%s809_s1 + $0x10] ss:$0 sps:$4 sm:$0xff]   ;;  %v485_v11 = vld [vmem:[%s811_s4] sm:$0xf] }
   0xf   :  { %v538_v13 = vld [vmem:[%s812_s3] ss:$0 sm:$0xff] }
  0x10   :  { %546 = vmatpush3.bf16.msra.mxu0 %v616_v14 }
  0x11   :  { %568 = vmatpush3.bf16.msra.mxu1 %v617_v15  ;;  %547 = vmatprep.subr.bf16.mxu0 %v618_v16  ;;  %v486_v15 = vunpack.c.l.bf16 %v485_v11 }
  0x12   :  { %569 = vmatprep.subr.bf16.mxu1 %v619_v17 }
  0x14   :  { %548 = vmatpush3.bf16.msra.mxu0 %v620_v18 }
  0x15   :  { %570 = vmatpush3.bf16.msra.mxu1 %v621_v19  ;;  %549 = vmatprep.subr.bf16.mxu0 %v622_v20 }
  0x16   :  { %571 = vmatprep.subr.bf16.mxu1 %v623_v21 }
  0x18   :  { %550 = vmatpush3.bf16.msra.mxu0 %v624_v22 }
  0x19   :  { %572 = vmatpush3.bf16.msra.mxu1 %v625_v23  ;;  %551 = vmatprep.subr.bf16.mxu0 %v626_v24 }
  0x1a   :  { %573 = vmatprep.subr.bf16.mxu1 %v627_v25 }
  0x1c   :  { %552 = vmatpush3.bf16.msra.mxu0 %v628_v26 }
  0x1d   :  { %574 = vmatpush3.bf16.msra.mxu1 %v629_v27  ;;  %553 = vmatprep.subr.bf16.mxu0 %v630_v28 }
  0x1e   :  { %575 = vmatprep.subr.bf16.mxu1 %v631_v29 }
  0x20   :  { %554 = vmatpush3.bf16.msra.mxu0 %v632_v30 }
  0x21   :  { %576 = vmatpush3.bf16.msra.mxu1 %v633_v31  ;;  %588 = vmatprep.subr.bf16.mxu0 %v647_v36 }
  0x23   :  { %366 = vmatmul.mubr.bf16.vlgmr.msra.gmra.mrb[0].mxu0 %v495_v33 }
  0x24   :  { %406 = vmatmul.mubr.bf16.vlgmr.msra.gmra.mrb[0].mxu1 %v497_v37  ;;  %589 = vmatpush3.bf16.msra.mxu0 %v639_v39 }
  0x25   :  { %590 = vmatprep.subr.bf16.mxu0 %v647_v36  ;;  %596 = vmatprep.mubr.msk.bf16.mxu0 %vm648_vm0, %v647_v36 }
  0x28   :  { %591 = vmatpush3.bf16.msra.mxu0 %v640_v40 }
  0x29   :  { %592 = vmatprep.subr.bf16.mxu0 %v647_v36 }
  0x2c   :  { %593 = vmatpush3.bf16.msra.mxu0 %v641_v41 }
  0x2d   :  { %594 = vmatprep.subr.bf16.mxu0 %v647_v36 }
  0x30   :  { %595 = vmatpush3.bf16.msra.mxu0 %v642_v42 }
  0x33   :  { %597 = vmatmul.mubr.msk.bf16.vlgmr.msra.gmra.mrb[4].mxu0 %vm329_vm1, %v636_v43 }
  0xf6   :  { %v555_v44 = vpop.f32.mrb[0].mxu0 }
  0xf7   :  { %v577_v45 = vpop.f32.mrb[0].mxu1  ;;  %v556_v46 = vpop.f32.mrb[1].mxu0 }
  0xf8   :  { %v557_v47 = vadd.f32 %v556_v46, %v555_v44  ;;  %v578_v48 = vpop.f32.mrb[1].mxu1  ;;  %v558_v49 = vpop.f32.mrb[2].mxu0 }
  0xf9   :  { %v579_v50 = vadd.f32 %v578_v48, %v577_v45  ;;  %v559_v51 = vpop.f32.mrb[3].mxu0  ;;  %v580_v52 = vpop.f32.mrb[2].mxu1 }
  0xfa   :  { %v581_v53 = vpop.f32.mrb[3].mxu1 }
  0xfb   :  { %v408_v54 = vadd.f32 %v579_v50, %v557_v47 }
 0x106   :  { %v447_v55 = vpop.f32.mrb[4].mxu0 }
 0x107   :  { %v448_v56 = vadd.f32 %v447_v55, %v408_v54  ;;  %v598_v57 = vpop.f32.mrb[5].mxu0 }
 0x108   :  { %v450_v58 = vpop.f32.mrb[6].mxu0 }
 0x109   :  { %v455_v59 = vand.u32 2147483647, %v448_v56  ;;  %v599_v60 = vpop.f32.mrb[7].mxu0  ;;  %vm459_vm2 = vcmp.ge.f32.partialorder %v448_v56, 0.0 }
 0x10b   :  { %v456_v61 = vsub.f32 0.0, %v455_v59 }
 0x10d   :  { %v457_v62 = vmul.f32 1.442695, %v456_v61 }
 0x10f   :  { %643 = vpow2.f32 %v457_v62 }
 0x119   :  { %v644_v63 = vpop.eup %643 }
 0x11a   :  { %v460_v0 = vmul.f32 2.0, %v644_v63  ;;  %v462_v1 = vadd.f32 2.0, %v644_v63 }
 0x11c   :  { %v461_v2 = vadd.f32 1.0, %v460_v0  ;;  %v463_v3 = vmul.f32 %v644_v63, %v462_v1  ;;  %v465_v4 = vmul.f32 %v644_v63, %v460_v0 }
 0x11e   :  { %v464_v5 = vsel %vm459_vm2, %v461_v2, %v463_v3  ;;  %v466_v6 = vsel %vm459_vm2, %v465_v4, 2.0 }
 0x11f   :  { %v467_v7 = vadd.f32 %v466_v6, %v464_v5 }
 0x121   :  { %645 = vrcp.f32 %v467_v7 }
 0x12b   :  { %v646_v8 = vpop.eup %645 }
 0x12c   :  { %v469_v9 = vmul.f32 %v646_v8, %v464_v5 }
 0x12e   :  { %v470_v12 = vmul.f32 %v469_v9, %v448_v56 }
 0x130   :  { %v477_v14 = vmul.f32 %v537_v10, %v470_v12 }
 0x132   :  { %v484_v16 = vadd.f32 %v538_v13, %v477_v14 }
 0x134   :  { %v487_v17 = vadd.f32 %v486_v15, %v484_v16 }
 0x136   :  { %v488_v18 = vpack.c.bf16 %v487_v17, %v487_v17 }
 0x138   :  { %490 = vst.msk [vmem:[%s813_s5] sm:$0xf] %vm489_vm3, %v488_v18 }

// kernel: forward.25
= control target key start
LH: loop header
LB: loop body
LE: loop exit
PB: predicated region body
PF: predicated region fallthrough
CT: control target
= control target key end

     0   :  { %v68_v9 = vlaneseq  ;;  %v324_v13 = vmov 1966171168   ;;  %s412_s0 = inlined_call_operand.vmem [shape: bf16[2,256], index: 0, kind: input, shape index: {}]   ;;  %s413_s1 = inlined_call_operand.vmem [shape: bf16[256,64], index: 1, kind: input, shape index: {}]   ;;  %s414_s2 = inlined_call_operand.vmem [shape: f32[1,64], index: 2, kind: input, shape index: {}]   ;;  %s415_s3 = inlined_call_operand.hbm [shape: f32[2,64], index: 3, kind: output, shape index: {}]  }
   0x1   :  { %v282_v0 = vld [vmem:[%s413_s1 + $0x40] sm:$0xff]   ;;  %v284_v2 = vld [vmem:[%s413_s1 + $0x48] sm:$0xff]   ;;  %v286_v4 = vld [vmem:[%s413_s1 + $0x50] sm:$0xff]   ;;  %v66_v14 = vunpack.c.l.s4 %v324_v13 }
   0x2   :  { %v283_v1 = vld [vmem:[%s413_s1] sm:$0xff]   ;;  %258 = vmatprep.subr.bf16.mxu0 %v282_v0  ;;  %v285_v3 = vld [vmem:[%s413_s1 + $0x8] sm:$0xff]   ;;  %v287_v5 = vld [vmem:[%s413_s1 + $0x10] sm:$0xff]   ;;  %v69_v15 = vshrl.u32 %v68_v9, 7 }
   0x3   :  { %259 = vmatpush3.bf16.msra.mxu0 %v283_v1  ;;  %v288_v6 = vld [vmem:[%s413_s1 + $0x58] sm:$0xff]   ;;  %v290_v8 = vld [vmem:[%s413_s1 + $0x60] sm:$0xff]   ;;  %v292_v11 = vld [vmem:[%s413_s1 + $0x68] sm:$0xff]  }
   0x4   :  { %260 = vmatprep.subr.bf16.mxu0 %v284_v2  ;;  %v289_v7 = vld [vmem:[%s413_s1 + $0x18] sm:$0xff]   ;;  %v291_v10 = vld [vmem:[%s413_s1 + $0x20] sm:$0xff]  }
   0x5   :  { %v241_v12 = vld.sshfl [vmem:[%s412_s0] sm:$0x11 pattern:$0x75316420] }
   0x7   :  { %261 = vmatpush3.bf16.msra.mxu0 %v285_v3 }
   0x8   :  { %262 = vmatprep.subr.bf16.mxu0 %v286_v4 }
   0xb   :  { %263 = vmatpush3.bf16.msra.mxu0 %v287_v5 }
   0xc   :  { %264 = vmatprep.subr.bf16.mxu0 %v288_v6 }
   0xf   :  { %265 = vmatpush3.bf16.msra.mxu0 %v289_v7 }
  0x10   :  { %266 = vmatprep.subr.bf16.mxu0 %v290_v8 }
  0x11   :  { %8 = vsyncpa [#allocation3], 0  ;;  %v293_v16 = vld [vmem:[%s413_s1 + $0x28] sm:$0xff]   ;;  %v64_v17 = vcombine.high %v241_v12, %v241_v12  ;;  %v67_v18 = vunpack.c.0.s8 %v66_v14  ;;  %v294_v19 = vld [vmem:[%s413_s1 + $0x70] sm:$0xff]   ;;  %vm218_vm0 = vcmask 517120  }
  0x12   :  { %v295_v21 = vld [vmem:[%s413_s1 + $0x30] sm:$0xff]   ;;  %v296_v23 = vld [vmem:[%s413_s1 + $0x78] sm:$0xff]   ;;  %v240_v27 = vld [vmem:[%s414_s2] ss:$0 sm:$0xff] }
  0x13   :  { %267 = vmatpush3.bf16.msra.mxu0 %v291_v10  ;;  %v70_v20 = vsub.s32 %v67_v18, %v69_v15  ;;  %v297_v24 = vld [vmem:[%s413_s1 + $0x38] sm:$0xff]   ;;  %s325_s1 = smov [#allocation2]  }
  0x14   :  { %268 = vmatprep.subr.bf16.mxu0 %v292_v11  ;;  %s232_s20 = sshll.u32 %s325_s1, 4  ;;  %s233_s20 = int_to_ptr.vmem [resolvable:$true] %s232_s20 }
  0x15   :  { %v78_v22 = vrot.slane %v64_v17, %v70_v20  ;;  %v71_v25 = vrot.slane %v241_v12, %v70_v20  ;;  %s300_s21 = scalar_lea.vmem %s233_s20, 32  ;;  %p305_p1 = scmp.lt.s32.totalorder %s233_s20, %s233_s20 }
  0x16   :  { %p301_p0 = scmp.ne.s32.totalorder %s233_s20, %s300_s21  ;;  %p306_p2 = scmp.lt.s32.totalorder %s300_s21, %s300_s21 }
  0x17   :  { %269 = vmatpush3.bf16.msra.mxu0 %v293_v16  ;;  %209 = vmatprep.mubr.bf16.mxu0 %v78_v22 }
  0x18   :  { %270 = vmatprep.subr.bf16.mxu0 %v294_v19  ;;  %p307_p3 = por %p306_p2, %p305_p1 }
  0x1a   :  { %p308_p4 = pnand %p307_p3, %p301_p0 }
  0x1b   :  { %271 = vmatpush3.bf16.msra.mxu0 %v295_v21 }
  0x1c   :  { %272 = vmatprep.subr.bf16.mxu0 %v296_v23 }
  0x1f   :  { %273 = vmatpush3.bf16.msra.mxu0 %v297_v24 }
  0x22   :  { %210 = vmatmul.mubr.bf16.vlgmr.msra.gmra.mrb[0].mxu0 %v71_v25 }
  0xf5   :  { %v274_v26 = vpop.f32.mrb[0].mxu0 }
  0xf6   :  { %v275_v28 = vpop.f32.mrb[1].mxu0 }
  0xf7   :  { %v276_v29 = vadd.f32 %v275_v28, %v274_v26  ;;  %v277_v30 = vpop.f32.mrb[2].mxu0 }
  0xf8   :  { %v278_v31 = vpop.f32.mrb[3].mxu0 }
  0xf9   :  { %v212_v32 = vadd.f32 %v276_v29, %v240_v27 }
  0xfb   :  { %v217_v33 = vmul.f32 %v212_v32, %v212_v32 }
  0xfd   :  { %v219_v34 = vsel %vm218_vm0, %v217_v33, 0.0 }
  0xfe   :  { %220 = vadd.xlane.f32.xlu0 %v219_v34 }
 0x18b   :  { %v221_v35 = vpop.xlane.xlu0 %220 }
 0x18c   :  { %v222_v36 = vmax.f32 %v221_v35, 1e-24 }
 0x18e   :  { %298 = vrsqrt.f32 %v222_v36 }
 0x198   :  { %v299_v37 = vpop.eup %298 }
 0x199   :  { %v224_v38 = vmul.f32 %v299_v37, %v212_v32 }
 0x19b   :  { %225 = vst.msk [vmem:[#allocation2] sm:$0x3] %vm218_vm0, %v224_v38 }
 0x19c   :  { %311 = shalt.err (!%p308_p4)
}
 0x19d   :  { %s312_s23 = scalar_lea.hbm %s415_s3, 32 }
 0x19e   :  { %p313_p5 = scmp.ne.s32.totalorder %s415_s3, %s312_s23  ;;  %p316_p6 = scmp.lt.u32.totalorder %s312_s23, %s415_s3 }
 0x1a0   :  { %p318_p7 = pnand %p316_p6, %p313_p5 }
 0x1a2   :  { %321 = shalt.err (!%p318_p7)
}
 0x1a3   :  { %235 = dma.vmem_to_hbm [thread:$0]  %s233_s20, 32, %s415_s3, [#allocation3]  }
 0x1a4   :  { %322 = dma.done.wait [#allocation3], 32  }
 0x1a5   :  { %323 = vsyncadd [#allocation3], 4294967264 }
 0x1a6   :  { %239 = vsyncpa [#allocation3], 1 }

</bundles_post_ra>
